<compile_context>
chip_gen: v7x
topology: tpu7x:2x2x1
jax: 0.10.0
libtpu: 0.0.40
codegen_flags: <defaults>
</compile_context>

<pallas_src>
import numpy as np

import jax
import jax.numpy as jnp
from jax.experimental import pallas as pl
from jax.experimental.pallas import tpu as pltpu

HD_POS = 10
HD_DIR = 4
MLP_DIM = 128
EMB_POS = HD_POS * 2 * 3   # 60
EMB_DIR = HD_DIR * 2 * 3   # 24
HALF_DIM = MLP_DIM // 2    # 64
MAX_TILE = 2048            # rows per grid step (cap; safe for v7x's 64 MiB VMEM)


def _round_up(n, m):
    return (n + m - 1) // m * m


def _freq_matrix(h, omega=0.1):
    """Block-structured (3, 3*h) matrix F with F[c, c*h + k] = omega * 2**k, so
    x @ F reproduces torch's (x[..., None] * freq).view(..., -1) layout."""
    freq = omega * (2.0 ** np.arange(h, dtype=np.float32))
    f = np.zeros((3, 3 * h), dtype=np.float32)
    for c in range(3):
        f[c, c * h:(c + 1) * h] = freq
    return jnp.asarray(f)


def nerf_kernel(x_ref, fpos_ref, fdir_ref,
                w10, b10, w11, b11, w12, b12, w13, b13, w14, b14,
                w20, b20, w21, b21, w22, b22, w23, b23,
                w30, b30, w31, b31,
                out_ref):
    x = x_ref[...].astype(jnp.float32)                       # (T, 3)

    # Harmonic embeddings via one small matmul each (f32; args feed sin/cos).
    e_pos = jnp.dot(x, fpos_ref[...], preferred_element_type=jnp.float32)
    emb_pos = jnp.concatenate([jnp.sin(e_pos), jnp.cos(e_pos)], axis=-1)  # (T, 60)
    e_dir = jnp.dot(x, fdir_ref[...], preferred_element_type=jnp.float32)
    emb_dir = jnp.concatenate([jnp.sin(e_dir), jnp.cos(e_dir)], axis=-1)  # (T, 24)

    def dot(a, w_ref):
        # bf16 MXU inputs, f32 accumulation.
        return jnp.dot(a.astype(jnp.bfloat16), w_ref[...],
                       preferred_element_type=jnp.float32)

    relu = jax.nn.relu

    # mlp1: 60 -> 128, 4x (128 -> 128), all ReLU
    h = relu(dot(emb_pos, w10) + b10[...])
    h = relu(dot(h, w11) + b11[...])
    h = relu(dot(h, w12) + b12[...])
    h = relu(dot(h, w13) + b13[...])
    h = relu(dot(h, w14) + b14[...])                         # (T, 128)

    # mlp2: cat(emb_pos, h) -> 128 ReLU -> 128 ReLU -> 128 (no act) -> 129 ReLU
    cat2 = jnp.concatenate([emb_pos, h], axis=-1)            # (T, 188)
    h2 = relu(dot(cat2, w20) + b20[...])
    h2 = relu(dot(h2, w21) + b21[...])
    h2 = dot(h2, w22) + b22[...]                             # Linear, no activation
    fd = relu(dot(h2, w23) + b23[...])                       # (T, 129), ReLU on all
    feat = fd[:, :MLP_DIM]                                   # (T, 128) features
    sigma = fd[:, MLP_DIM:]                                  # (T, 1)   density

    # mlp3: cat(emb_dir, feat) -> 64 ReLU -> 3 Sigmoid
    cat3 = jnp.concatenate([emb_dir, feat], axis=-1)         # (T, 152)
    h3 = relu(dot(cat3, w30) + b30[...])                     # (T, 64)
    rgb = jax.nn.sigmoid(dot(h3, w31) + b31[...])            # (T, 3)

    # Merged output: col 0 = sigma, cols 1..3 = rgb.
    out_ref[...] = jnp.concatenate([sigma, rgb], axis=-1)    # (T, 4)


def init_params(key):
    """Deterministic init matching the PyTorch layer shapes.
    Weights are stored in bf16 (MXU path); biases / freq tables stay f32."""
    def linear(k, din, dout):
        k1, k2 = jax.random.split(k)
        bound = 1.0 / (din ** 0.5)
        w = jax.random.uniform(k1, (din, dout), jnp.float32, -bound, bound)
        b = jax.random.uniform(k2, (1, dout), jnp.float32, -bound, bound)
        return w.astype(jnp.bfloat16), b

    keys = iter(jax.random.split(key, 11))

    f_pos = _freq_matrix(HD_POS)
    f_dir = _freq_matrix(HD_DIR)

    # mlp1
    w10, b10 = linear(next(keys), EMB_POS, MLP_DIM)
    w11, b11 = linear(next(keys), MLP_DIM, MLP_DIM)
    w12, b12 = linear(next(keys), MLP_DIM, MLP_DIM)
    w13, b13 = linear(next(keys), MLP_DIM, MLP_DIM)
    w14, b14 = linear(next(keys), MLP_DIM, MLP_DIM)

    # mlp2 (first layer takes the 188-wide concat; last layer is 128 -> 129)
    w20, b20 = linear(next(keys), EMB_POS + MLP_DIM, MLP_DIM)
    w21, b21 = linear(next(keys), MLP_DIM, MLP_DIM)
    w22, b22 = linear(next(keys), MLP_DIM, MLP_DIM)
    w23, b23 = linear(next(keys), MLP_DIM, MLP_DIM + 1)

    # mlp3 (first layer takes the 152-wide concat)
    w30, b30 = linear(next(keys), EMB_DIR + MLP_DIM, HALF_DIM)
    w31, b31 = linear(next(keys), HALF_DIM, 3)

    return [f_pos, f_dir,
            w10, b10, w11, b11, w12, b12, w13, b13, w14, b14,
            w20, b20, w21, b21, w22, b22, w23, b23,
            w30, b30, w31, b31]


@jax.jit
def nerf_forward(ray_bundle, *params):
    """ray_bundle: (B, R, S, 3) -> (sigma (B, R, S), rgb (B, R, S, 3))."""
    B, R, S, C = ray_bundle.shape
    assert C == 3
    N = B * R * S
    x = ray_bundle.reshape(N, 3).astype(jnp.float32)

    # Large row tile to amortize per-step overhead; adaptive for small inputs.
    tile = min(MAX_TILE, _round_up(N, 128))
    np_rows = _round_up(N, tile)
    if np_rows != N:
        x = jnp.pad(x, ((0, np_rows - N), (0, 0)))

    in_specs = [pl.BlockSpec((tile, 3), lambda i: (i, 0))]
    for p in params:
        in_specs.append(pl.BlockSpec(p.shape, lambda i: (0, 0)))
    out_specs = pl.BlockSpec((tile, 4), lambda i: (i, 0))

    out = pl.pallas_call(
        nerf_kernel,
        grid=(np_rows // tile,),
        in_specs=in_specs,
        out_specs=out_specs,
        out_shape=jax.ShapeDtypeStruct((np_rows, 4), jnp.float32),
        compiler_params=pltpu.CompilerParams(
            dimension_semantics=("parallel",),
            vmem_limit_bytes=32 * 1024 * 1024),
    )(x, *params)

    sigma = out[:N, 0].reshape(B, R, S)
    rgb = out[:N, 1:4].reshape(B, R, S, 3)
    return sigma, rgb


if __name__ == "__main__":
    key = jax.random.PRNGKey(0)
    k_x, k_p = jax.random.split(key)

    # B x num_rays_per_img x num_samples_per_ray x 3
    B, R, S = 2, 8, 8
    ray_bundle = jax.random.normal(k_x, (B, R, S, 3), dtype=jnp.float32)

    params = init_params(k_p)

    sigma, rgb = nerf_forward(ray_bundle, *params)
    jax.block_until_ready((sigma, rgb))

    assert sigma.shape == (B, R, S)
    assert rgb.shape == (B, R, S, 3)
    assert bool(jnp.all(jnp.isfinite(sigma))) and bool(jnp.all(jnp.isfinite(rgb)))
    assert bool(jnp.all(sigma >= 0.0))                       # ReLU density
    assert bool(jnp.all((rgb >= 0.0) & (rgb <= 1.0)))        # Sigmoid colors

    print("KERNEL_OK")
</pallas_src>

<mosaic_0001>
module attributes {stable_mosaic.version = 11 : i64} {
  func.func @nerf_kernel(%arg0: i32, %arg1: memref<128x3xf32, #tpu.memory_space<vmem>>, %arg2: memref<3x30xf32, #tpu.memory_space<vmem>>, %arg3: memref<3x12xf32, #tpu.memory_space<vmem>>, %arg4: memref<60x128xbf16, #tpu.memory_space<vmem>>, %arg5: memref<1x128xf32, #tpu.memory_space<vmem>>, %arg6: memref<128x128xbf16, #tpu.memory_space<vmem>>, %arg7: memref<1x128xf32, #tpu.memory_space<vmem>>, %arg8: memref<128x128xbf16, #tpu.memory_space<vmem>>, %arg9: memref<1x128xf32, #tpu.memory_space<vmem>>, %arg10: memref<128x128xbf16, #tpu.memory_space<vmem>>, %arg11: memref<1x128xf32, #tpu.memory_space<vmem>>, %arg12: memref<128x128xbf16, #tpu.memory_space<vmem>>, %arg13: memref<1x128xf32, #tpu.memory_space<vmem>>, %arg14: memref<188x128xbf16, #tpu.memory_space<vmem>>, %arg15: memref<1x128xf32, #tpu.memory_space<vmem>>, %arg16: memref<128x128xbf16, #tpu.memory_space<vmem>>, %arg17: memref<1x128xf32, #tpu.memory_space<vmem>>, %arg18: memref<128x128xbf16, #tpu.memory_space<vmem>>, %arg19: memref<1x128xf32, #tpu.memory_space<vmem>>, %arg20: memref<128x129xbf16, #tpu.memory_space<vmem>>, %arg21: memref<1x129xf32, #tpu.memory_space<vmem>>, %arg22: memref<152x64xbf16, #tpu.memory_space<vmem>>, %arg23: memref<1x64xf32, #tpu.memory_space<vmem>>, %arg24: memref<64x3xbf16, #tpu.memory_space<vmem>>, %arg25: memref<1x3xf32, #tpu.memory_space<vmem>>, %arg26: memref<128x4xf32, #tpu.memory_space<vmem>>) attributes {dimension_semantics = [#tpu.dimension_semantics<parallel>], iteration_bounds = array<i64: 1>, scalar_prefetch = 0 : i64, scratch_operands = 0 : i64, tpu.core_type = #tpu.core_type<tc>, window_params = [{transform_indices = @transform_0, window_bounds = array<i64: 128, 3>}, {pipeline_mode = #tpu.pipeline_mode<synchronous>, transform_indices = @transform_1, window_bounds = array<i64: 3, 30>}, {pipeline_mode = #tpu.pipeline_mode<synchronous>, transform_indices = @transform_2, window_bounds = array<i64: 3, 12>}, {pipeline_mode = #tpu.pipeline_mode<synchronous>, transform_indices = @transform_3, window_bounds = array<i64: 60, 128>}, {pipeline_mode = #tpu.pipeline_mode<synchronous>, transform_indices = @transform_4, window_bounds = array<i64: 1, 128>}, {pipeline_mode = #tpu.pipeline_mode<synchronous>, transform_indices = @transform_5, window_bounds = array<i64: 128, 128>}, {pipeline_mode = #tpu.pipeline_mode<synchronous>, transform_indices = @transform_6, window_bounds = array<i64: 1, 128>}, {pipeline_mode = #tpu.pipeline_mode<synchronous>, transform_indices = @transform_7, window_bounds = array<i64: 128, 128>}, {pipeline_mode = #tpu.pipeline_mode<synchronous>, transform_indices = @transform_8, window_bounds = array<i64: 1, 128>}, {pipeline_mode = #tpu.pipeline_mode<synchronous>, transform_indices = @transform_9, window_bounds = array<i64: 128, 128>}, {pipeline_mode = #tpu.pipeline_mode<synchronous>, transform_indices = @transform_10, window_bounds = array<i64: 1, 128>}, {pipeline_mode = #tpu.pipeline_mode<synchronous>, transform_indices = @transform_11, window_bounds = array<i64: 128, 128>}, {pipeline_mode = #tpu.pipeline_mode<synchronous>, transform_indices = @transform_12, window_bounds = array<i64: 1, 128>}, {pipeline_mode = #tpu.pipeline_mode<synchronous>, transform_indices = @transform_13, window_bounds = array<i64: 188, 128>}, {pipeline_mode = #tpu.pipeline_mode<synchronous>, transform_indices = @transform_14, window_bounds = array<i64: 1, 128>}, {pipeline_mode = #tpu.pipeline_mode<synchronous>, transform_indices = @transform_15, window_bounds = array<i64: 128, 128>}, {pipeline_mode = #tpu.pipeline_mode<synchronous>, transform_indices = @transform_16, window_bounds = array<i64: 1, 128>}, {pipeline_mode = #tpu.pipeline_mode<synchronous>, transform_indices = @transform_17, window_bounds = array<i64: 128, 128>}, {pipeline_mode = #tpu.pipeline_mode<synchronous>, transform_indices = @transform_18, window_bounds = array<i64: 1, 128>}, {pipeline_mode = #tpu.pipeline_mode<synchronous>, transform_indices = @transform_19, window_bounds = array<i64: 128, 129>}, {pipeline_mode = #tpu.pipeline_mode<synchronous>, transform_indices = @transform_20, window_bounds = array<i64: 1, 129>}, {pipeline_mode = #tpu.pipeline_mode<synchronous>, transform_indices = @transform_21, window_bounds = array<i64: 152, 64>}, {pipeline_mode = #tpu.pipeline_mode<synchronous>, transform_indices = @transform_22, window_bounds = array<i64: 1, 64>}, {pipeline_mode = #tpu.pipeline_mode<synchronous>, transform_indices = @transform_23, window_bounds = array<i64: 64, 3>}, {pipeline_mode = #tpu.pipeline_mode<synchronous>, transform_indices = @transform_24, window_bounds = array<i64: 1, 3>}, {transform_indices = @transform_25, window_bounds = array<i64: 128, 4>}]} {
    %c0 = arith.constant 0 : index
    %c0_0 = arith.constant 0 : index
    %0 = vector.load %arg1[%c0, %c0_0] : memref<128x3xf32, #tpu.memory_space<vmem>>, vector<128x3xf32>
    %c0_1 = arith.constant 0 : index
    %c0_2 = arith.constant 0 : index
    %1 = vector.load %arg2[%c0_1, %c0_2] : memref<3x30xf32, #tpu.memory_space<vmem>>, vector<3x30xf32>
    %cst = arith.constant dense<0.000000e+00> : vector<128x30xf32>
    %2 = tpu.matmul %0, %1, %cst {dimension_numbers = #tpu.dot_dimension_numbers<[1], [0], [0], [1], [0, 0, 1, 1], [], []>} : vector<128x3xf32>, vector<3x30xf32>, vector<128x30xf32> -> vector<128x30xf32>
    %3 = math.sin %2 : vector<128x30xf32>
    %4 = math.cos %2 : vector<128x30xf32>
    %5 = tpu.concatenate %3, %4 in 1 : vector<128x30xf32>, vector<128x30xf32> -> vector<128x60xf32>
    %c0_3 = arith.constant 0 : index
    %c0_4 = arith.constant 0 : index
    %6 = vector.load %arg3[%c0_3, %c0_4] : memref<3x12xf32, #tpu.memory_space<vmem>>, vector<3x12xf32>
    %cst_5 = arith.constant dense<0.000000e+00> : vector<128x12xf32>
    %7 = tpu.matmul %0, %6, %cst_5 {dimension_numbers = #tpu.dot_dimension_numbers<[1], [0], [0], [1], [0, 0, 1, 1], [], []>} : vector<128x3xf32>, vector<3x12xf32>, vector<128x12xf32> -> vector<128x12xf32>
    %8 = math.sin %7 : vector<128x12xf32>
    %9 = math.cos %7 : vector<128x12xf32>
    %10 = tpu.concatenate %8, %9 in 1 : vector<128x12xf32>, vector<128x12xf32> -> vector<128x24xf32>
    %11 = arith.truncf %5 : vector<128x60xf32> to vector<128x60xbf16>
    %c0_6 = arith.constant 0 : index
    %c0_7 = arith.constant 0 : index
    %12 = vector.load %arg4[%c0_6, %c0_7] : memref<60x128xbf16, #tpu.memory_space<vmem>>, vector<60x128xbf16>
    %cst_8 = arith.constant dense<0.000000e+00> : vector<128x128xf32>
    %13 = tpu.matmul %11, %12, %cst_8 {dimension_numbers = #tpu.dot_dimension_numbers<[1], [0], [0], [1], [0, 0, 1, 1], [], []>} : vector<128x60xbf16>, vector<60x128xbf16>, vector<128x128xf32> -> vector<128x128xf32>
    %c0_9 = arith.constant 0 : index
    %c0_10 = arith.constant 0 : index
    %14 = vector.load %arg5[%c0_9, %c0_10] : memref<1x128xf32, #tpu.memory_space<vmem>>, vector<1x128xf32>
    %15 = vector.broadcast %14 : vector<1x128xf32> to vector<128x128xf32>
    %16 = arith.addf %13, %15 : vector<128x128xf32>
    %cst_11 = arith.constant 0.000000e+00 : f32
    %17 = vector.broadcast %cst_11 : f32 to vector<128x128xf32>
    %18 = arith.maximumf %16, %17 : vector<128x128xf32>
    %19 = arith.truncf %18 : vector<128x128xf32> to vector<128x128xbf16>
    %c0_12 = arith.constant 0 : index
    %c0_13 = arith.constant 0 : index
    %20 = vector.load %arg6[%c0_12, %c0_13] : memref<128x128xbf16, #tpu.memory_space<vmem>>, vector<128x128xbf16>
    %cst_14 = arith.constant dense<0.000000e+00> : vector<128x128xf32>
    %21 = tpu.matmul %19, %20, %cst_14 {dimension_numbers = #tpu.dot_dimension_numbers<[1], [0], [0], [1], [0, 0, 1, 1], [], []>} : vector<128x128xbf16>, vector<128x128xbf16>, vector<128x128xf32> -> vector<128x128xf32>
    %c0_15 = arith.constant 0 : index
    %c0_16 = arith.constant 0 : index
    %22 = vector.load %arg7[%c0_15, %c0_16] : memref<1x128xf32, #tpu.memory_space<vmem>>, vector<1x128xf32>
    %23 = vector.broadcast %22 : vector<1x128xf32> to vector<128x128xf32>
    %24 = arith.addf %21, %23 : vector<128x128xf32>
    %cst_17 = arith.constant 0.000000e+00 : f32
    %25 = vector.broadcast %cst_17 : f32 to vector<128x128xf32>
    %26 = arith.maximumf %24, %25 : vector<128x128xf32>
    %27 = arith.truncf %26 : vector<128x128xf32> to vector<128x128xbf16>
    %c0_18 = arith.constant 0 : index
    %c0_19 = arith.constant 0 : index
    %28 = vector.load %arg8[%c0_18, %c0_19] : memref<128x128xbf16, #tpu.memory_space<vmem>>, vector<128x128xbf16>
    %cst_20 = arith.constant dense<0.000000e+00> : vector<128x128xf32>
    %29 = tpu.matmul %27, %28, %cst_20 {dimension_numbers = #tpu.dot_dimension_numbers<[1], [0], [0], [1], [0, 0, 1, 1], [], []>} : vector<128x128xbf16>, vector<128x128xbf16>, vector<128x128xf32> -> vector<128x128xf32>
    %c0_21 = arith.constant 0 : index
    %c0_22 = arith.constant 0 : index
    %30 = vector.load %arg9[%c0_21, %c0_22] : memref<1x128xf32, #tpu.memory_space<vmem>>, vector<1x128xf32>
    %31 = vector.broadcast %30 : vector<1x128xf32> to vector<128x128xf32>
    %32 = arith.addf %29, %31 : vector<128x128xf32>
    %cst_23 = arith.constant 0.000000e+00 : f32
    %33 = vector.broadcast %cst_23 : f32 to vector<128x128xf32>
    %34 = arith.maximumf %32, %33 : vector<128x128xf32>
    %35 = arith.truncf %34 : vector<128x128xf32> to vector<128x128xbf16>
    %c0_24 = arith.constant 0 : index
    %c0_25 = arith.constant 0 : index
    %36 = vector.load %arg10[%c0_24, %c0_25] : memref<128x128xbf16, #tpu.memory_space<vmem>>, vector<128x128xbf16>
    %cst_26 = arith.constant dense<0.000000e+00> : vector<128x128xf32>
    %37 = tpu.matmul %35, %36, %cst_26 {dimension_numbers = #tpu.dot_dimension_numbers<[1], [0], [0], [1], [0, 0, 1, 1], [], []>} : vector<128x128xbf16>, vector<128x128xbf16>, vector<128x128xf32> -> vector<128x128xf32>
    %c0_27 = arith.constant 0 : index
    %c0_28 = arith.constant 0 : index
    %38 = vector.load %arg11[%c0_27, %c0_28] : memref<1x128xf32, #tpu.memory_space<vmem>>, vector<1x128xf32>
    %39 = vector.broadcast %38 : vector<1x128xf32> to vector<128x128xf32>
    %40 = arith.addf %37, %39 : vector<128x128xf32>
    %cst_29 = arith.constant 0.000000e+00 : f32
    %41 = vector.broadcast %cst_29 : f32 to vector<128x128xf32>
    %42 = arith.maximumf %40, %41 : vector<128x128xf32>
    %43 = arith.truncf %42 : vector<128x128xf32> to vector<128x128xbf16>
    %c0_30 = arith.constant 0 : index
    %c0_31 = arith.constant 0 : index
    %44 = vector.load %arg12[%c0_30, %c0_31] : memref<128x128xbf16, #tpu.memory_space<vmem>>, vector<128x128xbf16>
    %cst_32 = arith.constant dense<0.000000e+00> : vector<128x128xf32>
    %45 = tpu.matmul %43, %44, %cst_32 {dimension_numbers = #tpu.dot_dimension_numbers<[1], [0], [0], [1], [0, 0, 1, 1], [], []>} : vector<128x128xbf16>, vector<128x128xbf16>, vector<128x128xf32> -> vector<128x128xf32>
    %c0_33 = arith.constant 0 : index
    %c0_34 = arith.constant 0 : index
    %46 = vector.load %arg13[%c0_33, %c0_34] : memref<1x128xf32, #tpu.memory_space<vmem>>, vector<1x128xf32>
    %47 = vector.broadcast %46 : vector<1x128xf32> to vector<128x128xf32>
    %48 = arith.addf %45, %47 : vector<128x128xf32>
    %cst_35 = arith.constant 0.000000e+00 : f32
    %49 = vector.broadcast %cst_35 : f32 to vector<128x128xf32>
    %50 = arith.maximumf %48, %49 : vector<128x128xf32>
    %51 = tpu.concatenate %5, %50 in 1 : vector<128x60xf32>, vector<128x128xf32> -> vector<128x188xf32>
    %52 = arith.truncf %51 : vector<128x188xf32> to vector<128x188xbf16>
    %c0_36 = arith.constant 0 : index
    %c0_37 = arith.constant 0 : index
    %53 = vector.load %arg14[%c0_36, %c0_37] : memref<188x128xbf16, #tpu.memory_space<vmem>>, vector<188x128xbf16>
    %cst_38 = arith.constant dense<0.000000e+00> : vector<128x128xf32>
    %54 = tpu.matmul %52, %53, %cst_38 {dimension_numbers = #tpu.dot_dimension_numbers<[1], [0], [0], [1], [0, 0, 1, 1], [], []>} : vector<128x188xbf16>, vector<188x128xbf16>, vector<128x128xf32> -> vector<128x128xf32>
    %c0_39 = arith.constant 0 : index
    %c0_40 = arith.constant 0 : index
    %55 = vector.load %arg15[%c0_39, %c0_40] : memref<1x128xf32, #tpu.memory_space<vmem>>, vector<1x128xf32>
    %56 = vector.broadcast %55 : vector<1x128xf32> to vector<128x128xf32>
    %57 = arith.addf %54, %56 : vector<128x128xf32>
    %cst_41 = arith.constant 0.000000e+00 : f32
    %58 = vector.broadcast %cst_41 : f32 to vector<128x128xf32>
    %59 = arith.maximumf %57, %58 : vector<128x128xf32>
    %60 = arith.truncf %59 : vector<128x128xf32> to vector<128x128xbf16>
    %c0_42 = arith.constant 0 : index
    %c0_43 = arith.constant 0 : index
    %61 = vector.load %arg16[%c0_42, %c0_43] : memref<128x128xbf16, #tpu.memory_space<vmem>>, vector<128x128xbf16>
    %cst_44 = arith.constant dense<0.000000e+00> : vector<128x128xf32>
    %62 = tpu.matmul %60, %61, %cst_44 {dimension_numbers = #tpu.dot_dimension_numbers<[1], [0], [0], [1], [0, 0, 1, 1], [], []>} : vector<128x128xbf16>, vector<128x128xbf16>, vector<128x128xf32> -> vector<128x128xf32>
    %c0_45 = arith.constant 0 : index
    %c0_46 = arith.constant 0 : index
    %63 = vector.load %arg17[%c0_45, %c0_46] : memref<1x128xf32, #tpu.memory_space<vmem>>, vector<1x128xf32>
    %64 = vector.broadcast %63 : vector<1x128xf32> to vector<128x128xf32>
    %65 = arith.addf %62, %64 : vector<128x128xf32>
    %cst_47 = arith.constant 0.000000e+00 : f32
    %66 = vector.broadcast %cst_47 : f32 to vector<128x128xf32>
    %67 = arith.maximumf %65, %66 : vector<128x128xf32>
    %68 = arith.truncf %67 : vector<128x128xf32> to vector<128x128xbf16>
    %c0_48 = arith.constant 0 : index
    %c0_49 = arith.constant 0 : index
    %69 = vector.load %arg18[%c0_48, %c0_49] : memref<128x128xbf16, #tpu.memory_space<vmem>>, vector<128x128xbf16>
    %cst_50 = arith.constant dense<0.000000e+00> : vector<128x128xf32>
    %70 = tpu.matmul %68, %69, %cst_50 {dimension_numbers = #tpu.dot_dimension_numbers<[1], [0], [0], [1], [0, 0, 1, 1], [], []>} : vector<128x128xbf16>, vector<128x128xbf16>, vector<128x128xf32> -> vector<128x128xf32>
    %c0_51 = arith.constant 0 : index
    %c0_52 = arith.constant 0 : index
    %71 = vector.load %arg19[%c0_51, %c0_52] : memref<1x128xf32, #tpu.memory_space<vmem>>, vector<1x128xf32>
    %72 = vector.broadcast %71 : vector<1x128xf32> to vector<128x128xf32>
    %73 = arith.addf %70, %72 : vector<128x128xf32>
    %74 = arith.truncf %73 : vector<128x128xf32> to vector<128x128xbf16>
    %c0_53 = arith.constant 0 : index
    %c0_54 = arith.constant 0 : index
    %75 = vector.load %arg20[%c0_53, %c0_54] : memref<128x129xbf16, #tpu.memory_space<vmem>>, vector<128x129xbf16>
    %cst_55 = arith.constant dense<0.000000e+00> : vector<128x129xf32>
    %76 = tpu.matmul %74, %75, %cst_55 {dimension_numbers = #tpu.dot_dimension_numbers<[1], [0], [0], [1], [0, 0, 1, 1], [], []>} : vector<128x128xbf16>, vector<128x129xbf16>, vector<128x129xf32> -> vector<128x129xf32>
    %c0_56 = arith.constant 0 : index
    %c0_57 = arith.constant 0 : index
    %77 = vector.load %arg21[%c0_56, %c0_57] : memref<1x129xf32, #tpu.memory_space<vmem>>, vector<1x129xf32>
    %78 = vector.broadcast %77 : vector<1x129xf32> to vector<128x129xf32>
    %79 = arith.addf %76, %78 : vector<128x129xf32>
    %cst_58 = arith.constant 0.000000e+00 : f32
    %80 = vector.broadcast %cst_58 : f32 to vector<128x129xf32>
    %81 = arith.maximumf %79, %80 : vector<128x129xf32>
    %82 = vector.extract_strided_slice %81 {offsets = [0, 0], sizes = [128, 128], strides = [1, 1]} : vector<128x129xf32> to vector<128x128xf32>
    %83 = vector.extract_strided_slice %81 {offsets = [0, 128], sizes = [128, 1], strides = [1, 1]} : vector<128x129xf32> to vector<128x1xf32>
    %84 = tpu.concatenate %10, %82 in 1 : vector<128x24xf32>, vector<128x128xf32> -> vector<128x152xf32>
    %85 = arith.truncf %84 : vector<128x152xf32> to vector<128x152xbf16>
    %c0_59 = arith.constant 0 : index
    %c0_60 = arith.constant 0 : index
    %86 = vector.load %arg22[%c0_59, %c0_60] : memref<152x64xbf16, #tpu.memory_space<vmem>>, vector<152x64xbf16>
    %cst_61 = arith.constant dense<0.000000e+00> : vector<128x64xf32>
    %87 = tpu.matmul %85, %86, %cst_61 {dimension_numbers = #tpu.dot_dimension_numbers<[1], [0], [0], [1], [0, 0, 1, 1], [], []>} : vector<128x152xbf16>, vector<152x64xbf16>, vector<128x64xf32> -> vector<128x64xf32>
    %c0_62 = arith.constant 0 : index
    %c0_63 = arith.constant 0 : index
    %88 = vector.load %arg23[%c0_62, %c0_63] : memref<1x64xf32, #tpu.memory_space<vmem>>, vector<1x64xf32>
    %89 = vector.broadcast %88 : vector<1x64xf32> to vector<128x64xf32>
    %90 = arith.addf %87, %89 : vector<128x64xf32>
    %cst_64 = arith.constant 0.000000e+00 : f32
    %91 = vector.broadcast %cst_64 : f32 to vector<128x64xf32>
    %92 = arith.maximumf %90, %91 : vector<128x64xf32>
    %93 = arith.truncf %92 : vector<128x64xf32> to vector<128x64xbf16>
    %c0_65 = arith.constant 0 : index
    %c0_66 = arith.constant 0 : index
    %94 = vector.load %arg24[%c0_65, %c0_66] : memref<64x3xbf16, #tpu.memory_space<vmem>>, vector<64x3xbf16>
    %cst_67 = arith.constant dense<0.000000e+00> : vector<128x3xf32>
    %95 = tpu.matmul %93, %94, %cst_67 {dimension_numbers = #tpu.dot_dimension_numbers<[1], [0], [0], [1], [0, 0, 1, 1], [], []>} : vector<128x64xbf16>, vector<64x3xbf16>, vector<128x3xf32> -> vector<128x3xf32>
    %c0_68 = arith.constant 0 : index
    %c0_69 = arith.constant 0 : index
    %96 = vector.load %arg25[%c0_68, %c0_69] : memref<1x3xf32, #tpu.memory_space<vmem>>, vector<1x3xf32>
    %97 = vector.broadcast %96 : vector<1x3xf32> to vector<128x3xf32>
    %98 = arith.addf %95, %97 : vector<128x3xf32>
    %99 = arith.negf %98 : vector<128x3xf32>
    %100 = math.exp %99 : vector<128x3xf32>
    %cst_70 = arith.constant 1.000000e+00 : f32
    %101 = vector.broadcast %cst_70 : f32 to vector<128x3xf32>
    %102 = arith.addf %101, %100 : vector<128x3xf32>
    %103 = arith.divf %101, %102 : vector<128x3xf32>
    %104 = tpu.concatenate %83, %103 in 1 : vector<128x1xf32>, vector<128x3xf32> -> vector<128x4xf32>
    %c0_71 = arith.constant 0 : index
    %c0_72 = arith.constant 0 : index
    %105 = vector.load %arg26[%c0_71, %c0_72] : memref<128x4xf32, #tpu.memory_space<vmem>>, vector<128x4xf32>
    tpu.vector_store %arg26[%c0_71, %c0_72], %104 {strides = array<i32>} : memref<128x4xf32, #tpu.memory_space<vmem>>, vector<128x4xf32>,
    return
  }
  func.func @transform_0(%arg0: i32) -> (i32, i32) {
    %c0_i32 = arith.constant 0 : i32
    %c0_i32_0 = arith.constant 0 : i32
    return %arg0, %c0_i32 : i32, i32
  }
  func.func @transform_1(%arg0: i32) -> (i32, i32) {
    %c0_i32 = arith.constant 0 : i32
    %c0_i32_0 = arith.constant 0 : i32
    %c0_i32_1 = arith.constant 0 : i32
    return %c0_i32, %c0_i32_0 : i32, i32
  }
  func.func @transform_2(%arg0: i32) -> (i32, i32) {
    %c0_i32 = arith.constant 0 : i32
    %c0_i32_0 = arith.constant 0 : i32
    %c0_i32_1 = arith.constant 0 : i32
    return %c0_i32, %c0_i32_0 : i32, i32
  }
  func.func @transform_3(%arg0: i32) -> (i32, i32) {
    %c0_i32 = arith.constant 0 : i32
    %c0_i32_0 = arith.constant 0 : i32
    %c0_i32_1 = arith.constant 0 : i32
    return %c0_i32, %c0_i32_0 : i32, i32
  }
  func.func @transform_4(%arg0: i32) -> (i32, i32) {
    %c0_i32 = arith.constant 0 : i32
    %c0_i32_0 = arith.constant 0 : i32
    %c0_i32_1 = arith.constant 0 : i32
    return %c0_i32, %c0_i32_0 : i32, i32
  }
  func.func @transform_5(%arg0: i32) -> (i32, i32) {
    %c0_i32 = arith.constant 0 : i32
    %c0_i32_0 = arith.constant 0 : i32
    %c0_i32_1 = arith.constant 0 : i32
    return %c0_i32, %c0_i32_0 : i32, i32
  }
  func.func @transform_6(%arg0: i32) -> (i32, i32) {
    %c0_i32 = arith.constant 0 : i32
    %c0_i32_0 = arith.constant 0 : i32
    %c0_i32_1 = arith.constant 0 : i32
    return %c0_i32, %c0_i32_0 : i32, i32
  }
  func.func @transform_7(%arg0: i32) -> (i32, i32) {
    %c0_i32 = arith.constant 0 : i32
    %c0_i32_0 = arith.constant 0 : i32
    %c0_i32_1 = arith.constant 0 : i32
    return %c0_i32, %c0_i32_0 : i32, i32
  }
  func.func @transform_8(%arg0: i32) -> (i32, i32) {
    %c0_i32 = arith.constant 0 : i32
    %c0_i32_0 = arith.constant 0 : i32
    %c0_i32_1 = arith.constant 0 : i32
    return %c0_i32, %c0_i32_0 : i32, i32
  }
  func.func @transform_9(%arg0: i32) -> (i32, i32) {
    %c0_i32 = arith.constant 0 : i32
    %c0_i32_0 = arith.constant 0 : i32
    %c0_i32_1 = arith.constant 0 : i32
    return %c0_i32, %c0_i32_0 : i32, i32
  }
  func.func @transform_10(%arg0: i32) -> (i32, i32) {
    %c0_i32 = arith.constant 0 : i32
    %c0_i32_0 = arith.constant 0 : i32
    %c0_i32_1 = arith.constant 0 : i32
    return %c0_i32, %c0_i32_0 : i32, i32
  }
  func.func @transform_11(%arg0: i32) -> (i32, i32) {
    %c0_i32 = arith.constant 0 : i32
    %c0_i32_0 = arith.constant 0 : i32
    %c0_i32_1 = arith.constant 0 : i32
    return %c0_i32, %c0_i32_0 : i32, i32
  }
  func.func @transform_12(%arg0: i32) -> (i32, i32) {
    %c0_i32 = arith.constant 0 : i32
    %c0_i32_0 = arith.constant 0 : i32
    %c0_i32_1 = arith.constant 0 : i32
    return %c0_i32, %c0_i32_0 : i32, i32
  }
  func.func @transform_13(%arg0: i32) -> (i32, i32) {
    %c0_i32 = arith.constant 0 : i32
    %c0_i32_0 = arith.constant 0 : i32
    %c0_i32_1 = arith.constant 0 : i32
    return %c0_i32, %c0_i32_0 : i32, i32
  }
  func.func @transform_14(%arg0: i32) -> (i32, i32) {
    %c0_i32 = arith.constant 0 : i32
    %c0_i32_0 = arith.constant 0 : i32
    %c0_i32_1 = arith.constant 0 : i32
    return %c0_i32, %c0_i32_0 : i32, i32
  }
  func.func @transform_15(%arg0: i32) -> (i32, i32) {
    %c0_i32 = arith.constant 0 : i32
    %c0_i32_0 = arith.constant 0 : i32
    %c0_i32_1 = arith.constant 0 : i32
    return %c0_i32, %c0_i32_0 : i32, i32
  }
  func.func @transform_16(%arg0: i32) -> (i32, i32) {
    %c0_i32 = arith.constant 0 : i32
    %c0_i32_0 = arith.constant 0 : i32
    %c0_i32_1 = arith.constant 0 : i32
    return %c0_i32, %c0_i32_0 : i32, i32
  }
  func.func @transform_17(%arg0: i32) -> (i32, i32) {
    %c0_i32 = arith.constant 0 : i32
    %c0_i32_0 = arith.constant 0 : i32
    %c0_i32_1 = arith.constant 0 : i32
    return %c0_i32, %c0_i32_0 : i32, i32
  }
  func.func @transform_18(%arg0: i32) -> (i32, i32) {
    %c0_i32 = arith.constant 0 : i32
    %c0_i32_0 = arith.constant 0 : i32
    %c0_i32_1 = arith.constant 0 : i32
    return %c0_i32, %c0_i32_0 : i32, i32
  }
  func.func @transform_19(%arg0: i32) -> (i32, i32) {
    %c0_i32 = arith.constant 0 : i32
    %c0_i32_0 = arith.constant 0 : i32
    %c0_i32_1 = arith.constant 0 : i32
    return %c0_i32, %c0_i32_0 : i32, i32
  }
  func.func @transform_20(%arg0: i32) -> (i32, i32) {
    %c0_i32 = arith.constant 0 : i32
    %c0_i32_0 = arith.constant 0 : i32
    %c0_i32_1 = arith.constant 0 : i32
    return %c0_i32, %c0_i32_0 : i32, i32
  }
  func.func @transform_21(%arg0: i32) -> (i32, i32) {
    %c0_i32 = arith.constant 0 : i32
    %c0_i32_0 = arith.constant 0 : i32
    %c0_i32_1 = arith.constant 0 : i32
    return %c0_i32, %c0_i32_0 : i32, i32
  }
  func.func @transform_22(%arg0: i32) -> (i32, i32) {
    %c0_i32 = arith.constant 0 : i32
    %c0_i32_0 = arith.constant 0 : i32
    %c0_i32_1 = arith.constant 0 : i32
    return %c0_i32, %c0_i32_0 : i32, i32
  }
  func.func @transform_23(%arg0: i32) -> (i32, i32) {
    %c0_i32 = arith.constant 0 : i32
    %c0_i32_0 = arith.constant 0 : i32
    %c0_i32_1 = arith.constant 0 : i32
    return %c0_i32, %c0_i32_0 : i32, i32
  }
  func.func @transform_24(%arg0: i32) -> (i32, i32) {
    %c0_i32 = arith.constant 0 : i32
    %c0_i32_0 = arith.constant 0 : i32
    %c0_i32_1 = arith.constant 0 : i32
    return %c0_i32, %c0_i32_0 : i32, i32
  }
  func.func @transform_25(%arg0: i32) -> (i32, i32) {
    %c0_i32 = arith.constant 0 : i32
    %c0_i32_0 = arith.constant 0 : i32
    return %arg0, %c0_i32 : i32, i32
  }
}

</mosaic_0001>

<bundles_post_ra>
// kernel: squeeze.1
= control target key start
LH: loop header
LB: loop body
LE: loop exit
PB: predicated region body
PF: predicated region fallthrough
CT: control target
= control target key end

     0   :  { %s207_s0 = inlined_call_operand.vmem [shape: f32[128], index: 0, kind: input, shape index: {}]   ;;  %s208_s1 = inlined_call_operand.hbm [shape: f32[2,8,8], index: 1, kind: output, shape index: {}]  }
   0x1   :  { %v5_v0 = vld [vmem:[%s207_s0] sm:$0x1] }
   0x2   :  { %6 = vst [vmem:[#allocation2] sm:$0x1] %v5_v0 }
   0x3   :  { %2 = vsyncpa [#allocation1], 0  ;;  %s150_s0 = smov 120   ;;  %s151_s8 = smov 104   ;;  %vm8_vm0 = vcmask 64512  }
   0x4   :  { %s152_s9 = smov 112   ;;  %s153_s10 = smov 96  }
   0x5   :  { %s154_s11 = smov 88   ;;  %s155_s12 = smov 80  }
   0x6   :  { %s156_s13 = smov 72   ;;  %s157_s14 = smov 64  }
   0x7   :  { %s158_s15 = smov 56   ;;  %s159_s16 = smov 48  }
   0x8   :  { %s160_s17 = smov 40   ;;  %s161_s18 = smov 32  }
   0x9   :  { %v10_v1 = vld [vmem:[#allocation2] sm:$0x1]   ;;  %s162_s19 = smov 24   ;;  %s163_s20 = smov 16  }
   0xa   :  { %v22_v2 = vld [vmem:[#allocation2] sm:$0x1]   ;;  %11 = vrot.lane.b32.xlu0 %v10_v1, %s150_s0  ;;  %s164_s21 = smov 8   ;;  %s165_s22 = smov [#allocation0]  }
   0xb   :  { %23 = vrot.lane.b32.xlu1 %v22_v2, %s151_s8  ;;  %v16_v3 = vld [vmem:[#allocation2] sm:$0x1]   ;;  %s104_s23 = sshll.u32 %s165_s22, 4  ;;  %s105_s23 = int_to_ptr.vmem [resolvable:$true] %s104_s23 }
   0xc   :  { %v28_v4 = vld [vmem:[#allocation2] sm:$0x1]   ;;  %s126_s24 = scalar_lea.vmem %s105_s23, 256  ;;  %p131_p1 = scmp.lt.s32.totalorder %s105_s23, %s105_s23 }
   0xd   :  { %v34_v5 = vld [vmem:[#allocation2] sm:$0x1]   ;;  %p127_p0 = scmp.ne.s32.totalorder %s105_s23, %s126_s24  ;;  %p132_p2 = scmp.lt.s32.totalorder %s126_s24, %s126_s24 }
   0xe   :  { %17 = vrot.lane.b32.xlu0 %v16_v3, %s152_s9  ;;  %v40_v6 = vld [vmem:[#allocation2] sm:$0x1]  }
   0xf   :  { %29 = vrot.lane.b32.xlu1 %v28_v4, %s153_s10  ;;  %v46_v7 = vld [vmem:[#allocation2] sm:$0x1]   ;;  %p133_p3 = por %p132_p2, %p131_p1 }
  0x10   :  { %v52_v8 = vld [vmem:[#allocation2] sm:$0x1]  }
  0x11   :  { %v58_v9 = vld [vmem:[#allocation2] sm:$0x1]   ;;  %p134_p4 = pnand %p133_p3, %p127_p0 }
  0x12   :  { %35 = vrot.lane.b32.xlu0 %v34_v5, %s154_s11  ;;  %v64_v10 = vld [vmem:[#allocation2] sm:$0x1]  }
  0x13   :  { %41 = vrot.lane.b32.xlu1 %v40_v6, %s155_s12  ;;  %v7_v11 = vld [vmem:[#allocation2] sm:$0x1]  }
  0x14   :  { %9 = vst.msk [vmem:[#allocation0] sm:$0x1] %vm8_vm0, %v7_v11   ;;  %v70_v12 = vld [vmem:[#allocation2] sm:$0x1]  }
  0x15   :  { %v76_v13 = vld [vmem:[#allocation2] sm:$0x1]  }
  0x16   :  { %47 = vrot.lane.b32.xlu0 %v46_v7, %s156_s13  ;;  %v82_v14 = vld [vmem:[#allocation2] sm:$0x1]  }
  0x17   :  { %53 = vrot.lane.b32.xlu1 %v52_v8, %s157_s14  ;;  %v88_v15 = vld [vmem:[#allocation2] sm:$0x1]  }
  0x18   :  { %v94_v16 = vld [vmem:[#allocation2] sm:$0x1]  }
  0x1a   :  { %59 = vrot.lane.b32.xlu0 %v58_v9, %s158_s15 }
  0x1b   :  { %65 = vrot.lane.b32.xlu1 %v64_v10, %s159_s16 }
  0x1e   :  { %71 = vrot.lane.b32.xlu0 %v70_v12, %s160_s17 }
  0x1f   :  { %77 = vrot.lane.b32.xlu1 %v76_v13, %s161_s18 }
  0x22   :  { %83 = vrot.lane.b32.xlu0 %v82_v14, %s162_s19 }
  0x23   :  { %89 = vrot.lane.b32.xlu1 %v88_v15, %s163_s20 }
  0x26   :  { %95 = vrot.lane.b32.xlu0 %v94_v16, %s164_s21 }
  0x7c   :  { %v12_v17 = vpop.permute.xlu0 %11  }
  0x7d   :  { %v24_v18 = vpop.permute.xlu1 %23   ;;  %15 = vst.msk [vmem:[#allocation0 + $0x1] sm:$0x1] %vm8_vm0, %v12_v17  }
  0x7e   :  { %27 = vst.msk [vmem:[#allocation0 + $0x3] sm:$0x1] %vm8_vm0, %v24_v18  }
  0x80   :  { %v18_v19 = vpop.permute.xlu0 %17  }
  0x81   :  { %v30_v20 = vpop.permute.xlu1 %29   ;;  %21 = vst.msk [vmem:[#allocation0 + $0x2] sm:$0x1] %vm8_vm0, %v18_v19  }
  0x82   :  { %33 = vst.msk [vmem:[#allocation0 + $0x4] sm:$0x1] %vm8_vm0, %v30_v20  }
  0x84   :  { %v36_v21 = vpop.permute.xlu0 %35  }
  0x85   :  { %v42_v22 = vpop.permute.xlu1 %41   ;;  %39 = vst.msk [vmem:[#allocation0 + $0x5] sm:$0x1] %vm8_vm0, %v36_v21  }
  0x86   :  { %45 = vst.msk [vmem:[#allocation0 + $0x6] sm:$0x1] %vm8_vm0, %v42_v22  }
  0x88   :  { %v48_v23 = vpop.permute.xlu0 %47  }
  0x89   :  { %v54_v24 = vpop.permute.xlu1 %53   ;;  %51 = vst.msk [vmem:[#allocation0 + $0x7] sm:$0x1] %vm8_vm0, %v48_v23  }
  0x8a   :  { %57 = vst.msk [vmem:[#allocation0 + $0x8] sm:$0x1] %vm8_vm0, %v54_v24  }
  0x8c   :  { %v60_v25 = vpop.permute.xlu0 %59  }
  0x8d   :  { %v66_v26 = vpop.permute.xlu1 %65   ;;  %63 = vst.msk [vmem:[#allocation0 + $0x9] sm:$0x1] %vm8_vm0, %v60_v25  }
  0x8e   :  { %69 = vst.msk [vmem:[#allocation0 + $0xa] sm:$0x1] %vm8_vm0, %v66_v26  }
  0x90   :  { %v72_v27 = vpop.permute.xlu0 %71  }
  0x91   :  { %v78_v28 = vpop.permute.xlu1 %77   ;;  %75 = vst.msk [vmem:[#allocation0 + $0xb] sm:$0x1] %vm8_vm0, %v72_v27  }
  0x92   :  { %81 = vst.msk [vmem:[#allocation0 + $0xc] sm:$0x1] %vm8_vm0, %v78_v28  }
  0x94   :  { %v84_v29 = vpop.permute.xlu0 %83  }
  0x95   :  { %v90_v30 = vpop.permute.xlu1 %89   ;;  %87 = vst.msk [vmem:[#allocation0 + $0xd] sm:$0x1] %vm8_vm0, %v84_v29  }
  0x96   :  { %93 = vst.msk [vmem:[#allocation0 + $0xe] sm:$0x1] %vm8_vm0, %v90_v30  }
  0x98   :  { %v96_v31 = vpop.permute.xlu0 %95  }
  0x99   :  { %99 = vst.msk [vmem:[#allocation0 + $0xf] sm:$0x1] %vm8_vm0, %v96_v31  }
  0x9a   :  { %137 = shalt.err (!%p134_p4)
}
  0x9b   :  { %s138_s27 = scalar_lea.hbm %s208_s1, 256 }
  0x9c   :  { %p139_p5 = scmp.ne.s32.totalorder %s208_s1, %s138_s27  ;;  %p142_p6 = scmp.lt.u32.totalorder %s138_s27, %s208_s1 }
  0x9e   :  { %p144_p7 = pnand %p142_p6, %p139_p5 }
  0xa0   :  { %147 = shalt.err (!%p144_p7)
}
  0xa1   :  { %107 = dma.vmem_to_hbm [thread:$0]  %s105_s23, 256, %s208_s1, [#allocation1]  }
  0xa2   :  { %148 = dma.done.wait [#allocation1], 256  }
  0xa3   :  { %149 = vsyncadd [#allocation1], 4294967040 }
  0xa4   :  { %109 = vsyncpa [#allocation1], 1 }

// kernel: nerf_forward.1
= control target key start
LH: loop header
LB: loop body
LE: loop exit
PB: predicated region body
PF: predicated region fallthrough
CT: control target
= control target key end

     0   :  { %s16271_s0 = inlined_call_operand.vmem [shape: f32[128,3], index: 0, kind: input, shape index: {}]   ;;  %s16272_s1 = inlined_call_operand.hbm [shape: f32[3,30], index: 1, kind: input, shape index: {}]   ;;  %s16273_s2 = inlined_call_operand.vmem [shape: f32[3,12], index: 2, kind: input, shape index: {}]   ;;  %s16274_s3 = inlined_call_operand.hbm [shape: bf16[60,128], index: 3, kind: input, shape index: {}]   ;;  %s16275_s4 = inlined_call_operand.vmem [shape: f32[1,128], index: 4, kind: input, shape index: {}]   ;;  %s16276_s5 = inlined_call_operand.vmem [shape: bf16[128,128], index: 5, kind: input, shape index: {}]   ;;  %s16277_s6 = inlined_call_operand.vmem [shape: f32[1,128], index: 6, kind: input, shape index: {}]   ;;  %s16278_s7 = inlined_call_operand.vmem [shape: bf16[128,128], index: 7, kind: input, shape index: {}]   ;;  %s16279_s8 = inlined_call_operand.vmem [shape: f32[1,128], index: 8, kind: input, shape index: {}]   ;;  %s16280_s9 = inlined_call_operand.vmem [shape: bf16[128,128], index: 9, kind: input, shape index: {}]   ;;  %s16281_s10 = inlined_call_operand.vmem [shape: f32[1,128], index: 10, kind: input, shape index: {}]   ;;  %s16282_s11 = inlined_call_operand.vmem [shape: bf16[128,128], index: 11, kind: input, shape index: {}]   ;;  %s16283_s12 = inlined_call_operand.vmem [shape: f32[1,128], index: 12, kind: input, shape index: {}]   ;;  %s16284_s13 = inlined_call_operand.vmem [shape: bf16[188,128], index: 13, kind: input, shape index: {}]   ;;  %s16285_s14 = inlined_call_operand.vmem [shape: f32[1,128], index: 14, kind: input, shape index: {}]   ;;  %s16286_s15 = inlined_call_operand.vmem [shape: bf16[128,128], index: 15, kind: input, shape index: {}]   ;;  %s16287_s16 = inlined_call_operand.vmem [shape: f32[1,128], index: 16, kind: input, shape index: {}]   ;;  %s16288_s17 = inlined_call_operand.vmem [shape: bf16[128,128], index: 17, kind: input, shape index: {}]   ;;  %s16289_s18 = inlined_call_operand.vmem [shape: f32[1,128], index: 18, kind: input, shape index: {}]   ;;  %s16290_s19 = inlined_call_operand.vmem [shape: bf16[128,129], index: 19, kind: input, shape index: {}]   ;;  %s16291_s20 = inlined_call_operand.vmem [shape: f32[1,129], index: 20, kind: input, shape index: {}]   ;;  %s16292_s21 = inlined_call_operand.vmem [shape: bf16[152,64], index: 21, kind: input, shape index: {}]   ;;  %s16293_s22 = inlined_call_operand.vmem [shape: f32[1,64], index: 22, kind: input, shape index: {}]   ;;  %s16294_s23 = inlined_call_operand.vmem [shape: bf16[64,3], index: 23, kind: input, shape index: {}]   ;;  %s16295_s24 = inlined_call_operand.vmem [shape: f32[1,3], index: 24, kind: input, shape index: {}]   ;;  %s16296_s25 = inlined_call_operand.vmem [shape: f32[128,4], index: 25, kind: output, shape index: {}]  }
   0x1   :  { %16469 = sst [smem:[#allocation80_spill]] %s16271_s0 }
   0x2   :  { %16470 = sst [smem:[#allocation81_spill]] %s16272_s1 }
   0x3   :  { %16471 = sst [smem:[#allocation82_spill]] %s16273_s2 }
   0x4   :  { %16472 = sst [smem:[#allocation83_spill]] %s16274_s3 }
   0x5   :  { %16473 = sst [smem:[#allocation84_spill]] %s16275_s4 }
   0x6   :  { %16474 = sst [smem:[#allocation85_spill]] %s16276_s5 }
   0x7   :  { %16475 = sst [smem:[#allocation86_spill]] %s16277_s6 }
   0x8   :  { %16476 = sst [smem:[#allocation87_spill]] %s16278_s7 }
   0x9   :  { %16477 = sst [smem:[#allocation88_spill]] %s16279_s8 }
   0xa   :  { %16478 = sst [smem:[#allocation89_spill]] %s16280_s9 }
   0xb   :  { %30 = vsyncpa [#allocation3], 0 }
   0xc   :  { %31 = vsyncpa [#allocation5], 0  ;;  %s11420_s29 = smov [#allocation2]   ;;  %s11421_s6 = smov [#allocation4]  }
   0xd   :  { %s40_s2 = sshll.u32 %s11420_s29, 4  ;;  %s51_s30 = sshll.u32 %s11421_s6, 4  ;;  %s41_s2 = int_to_ptr.vmem [resolvable:$true] %s40_s2  ;;  %s11566_s30 = int_to_ptr.vmem [resolvable:$true] %s51_s30 }
   0xe   :  { %s16479_s26 = sld [smem:[#allocation81_spill]] }
  0x14   :  { %s11372_s1 = scalar_lea.hbm %s16479_s26, 64 }
  0x15   :  { %p11373_p0 = scmp.ne.s32.totalorder %s16479_s26, %s11372_s1  ;;  %p11376_p1 = scmp.lt.u32.totalorder %s11372_s1, %s16479_s26 }
  0x17   :  { %p11378_p2 = pnand %p11376_p1, %p11373_p0 }
  0x19   :  { %11381 = shalt.err (!%p11378_p2)
}
  0x1a   :  { %s11382_s9 = scalar_lea.vmem %s41_s2, 64  ;;  %p11387_p4 = scmp.lt.s32.totalorder %s41_s2, %s41_s2 }
  0x1b   :  { %p11383_p3 = scmp.ne.s32.totalorder %s41_s2, %s11382_s9  ;;  %p11388_p5 = scmp.lt.s32.totalorder %s11382_s9, %s11382_s9 }
  0x1d   :  { %p11389_p6 = por %p11388_p5, %p11387_p4 }
  0x1f   :  { %p11390_p7 = pnand %p11389_p6, %p11383_p3 }
  0x21   :  { %11393 = shalt.err (!%p11390_p7)
}
  0x22   :  { %43 = dma.hbm_to_vmem [thread:$0]  %s16479_s26, 64, %s41_s2, [#allocation3]  }
  0x23   :  { %s16480_s7 = sld [smem:[#allocation83_spill]] }
  0x29   :  { %s11394_s3 = scalar_lea.hbm %s16480_s7, 512 }
  0x2a   :  { %p11395_p8 = scmp.ne.s32.totalorder %s16480_s7, %s11394_s3  ;;  %p11398_p9 = scmp.lt.u32.totalorder %s11394_s3, %s16480_s7 }
  0x2c   :  { %p11400_p10 = pnand %p11398_p9, %p11395_p8 }
  0x2e   :  { %11403 = shalt.err (!%p11400_p10)
}
  0x2f   :  { %s11404_s28 = scalar_lea.vmem %s11566_s30, 512  ;;  %p11409_p12 = scmp.lt.s32.totalorder %s11566_s30, %s11566_s30 }
  0x30   :  { %p11405_p11 = scmp.ne.s32.totalorder %s11566_s30, %s11404_s28  ;;  %p11410_p13 = scmp.lt.s32.totalorder %s11404_s28, %s11404_s28 }
  0x32   :  { %p11411_p0 = por %p11410_p13, %p11409_p12 }
  0x34   :  { %p11412_p1 = pnand %p11411_p0, %p11405_p11 }
  0x36   :  { %11415 = shalt.err (!%p11412_p1)
}
  0x37   :  { %s11422_s2 = smov 64   ;;  %s11423_s26 = smov 4  }
  0x38   :  { %57 = dma.hbm_to_vmem [thread:$0]  %s16480_s7, 512, %s11566_s30, [#allocation5], %s11422_s2, %s11422_s2, %s11423_s26  }
  0x39   :  { %11416 = dma.done.wait [#allocation3], 64  }
  0x3a   :  { %11417 = vsyncadd [#allocation3], 4294967232 }
  0x3b   :  { %11418 = dma.done.wait [#allocation5], 512  }
  0x3c   :  { %11419 = vsyncadd [#allocation5], 4294966784  ;;  %vm16375_vm0 = vcmask 1042432   ;;  %vm16374_vm1 = vcmask 23552   ;;  %v123_v0 = vld [vmem:[#allocation2] sm:$0x7] }
  0x3d   :  { %s16481_s6 = sld [smem:[#allocation80_spill]]  ;;  %10466 = vmatprep.subr.msk.mxu0 %vm16375_vm0, %v123_v0  ;;  %v16316_v51 = vmov 683565275   ;;  %v16312_v56 = vmov 2475754826   ;;  %s11430_s30 = smov 30  }
  0x3e   :  { %10467 = vmatpush3.msk.msra.mxu0 %vm16375_vm0, %v123_v0  ;;  %v16305_v58 = vmov 2131351028   ;;  %v16314_v60 = vmov 2102212464   ;;  %v16309_v62 = vmov 920167782  }
  0x3f   :  { %s16628_s1 = sld [smem:[#allocation82_spill]]  ;;  %s16630_s2 = sld [smem:[#allocation85_spill]] }
  0x40   :  { %s16671_s3 = sld [smem:[#allocation84_spill]]  ;;  %s16745_s27 = sld [smem:[#allocation87_spill]] }
  0x41   :  { %s16750_s29 = sld [smem:[#allocation89_spill]]  ;;  %s16768_s4 = sld [smem:[#allocation86_spill]] }
  0x43   :  { %v107_v1 = vld [vmem:[%s16481_s6] sm:$0xff]  ;;  %v108_v2 = vld [vmem:[%s16481_s6 + $0x8] sm:$0xff]  ;;  %v109_v3 = vld [vmem:[%s16481_s6 + $0x10] sm:$0xff] }
  0x44   :  { %10468 = vmatprep.mubr.msk.f32.mxu0 %vm16374_vm1, %v107_v1  ;;  %10494 = vmatprep.mubr.msk.f32.mxu1 %vm16374_vm1, %v107_v1  ;;  %v110_v4 = vld [vmem:[%s16481_s6 + $0x18] sm:$0xff]  ;;  %v111_v5 = vld [vmem:[%s16481_s6 + $0x20] sm:$0xff]  ;;  %v112_v6 = vld [vmem:[%s16481_s6 + $0x28] sm:$0xff] }
  0x45   :  { %10469 = vmatmul.mubr.msk.f32.vlgmr.msra.gmra.mrb[0].mxu0 %vm16374_vm1, %v108_v2  ;;  %v113_v7 = vld [vmem:[%s16481_s6 + $0x30] sm:$0xff]  ;;  %v114_v8 = vld [vmem:[%s16481_s6 + $0x38] sm:$0xff]  ;;  %v115_v9 = vld [vmem:[%s16481_s6 + $0x40] sm:$0xff] }
  0x46   :  { %10471 = vmatprep.mubr.msk.f32.mxu0 %vm16374_vm1, %v109_v3  ;;  %v116_v10 = vld [vmem:[%s16481_s6 + $0x48] sm:$0xff]  ;;  %v117_v11 = vld [vmem:[%s16481_s6 + $0x50] sm:$0xff]  ;;  %v118_v12 = vld [vmem:[%s16481_s6 + $0x58] sm:$0xff] }
  0x47   :  { %v119_v13 = vld [vmem:[%s16481_s6 + $0x60] sm:$0xff]  ;;  %v120_v14 = vld [vmem:[%s16481_s6 + $0x68] sm:$0xff]  ;;  %v121_v15 = vld [vmem:[%s16481_s6 + $0x70] sm:$0xff] }
  0x48   :  { %v122_v16 = vld [vmem:[%s16481_s6 + $0x78] sm:$0xff] }
  0x49   :  { %10472 = vmatmul.mubr.msk.f32.gmra.mrb[2].mxu0 %vm16374_vm1, %v110_v4 }
  0x4a   :  { %10474 = vmatprep.mubr.msk.f32.mxu0 %vm16374_vm1, %v111_v5  ;;  %v16307_v5 = vmov 1326507024  }
  0x4d   :  { %10475 = vmatmul.mubr.msk.f32.gmra.mrb[4].mxu0 %vm16374_vm1, %v112_v6 }
  0x4e   :  { %10477 = vmatprep.mubr.msk.f32.mxu0 %vm16374_vm1, %v113_v7 }
  0x51   :  { %10478 = vmatmul.mubr.msk.f32.gmra.mrb[6].mxu0 %vm16374_vm1, %v114_v8 }
  0x52   :  { %10480 = vmatprep.mubr.msk.f32.mxu0 %vm16374_vm1, %v115_v9 }
  0x55   :  { %10481 = vmatmul.mubr.msk.f32.gmra.mrb[8].mxu0 %vm16374_vm1, %v116_v10 }
  0x56   :  { %10483 = vmatprep.mubr.msk.f32.mxu0 %vm16374_vm1, %v117_v11 }
  0x59   :  { %10484 = vmatmul.mubr.msk.f32.gmra.mrb[10].mxu0 %vm16374_vm1, %v118_v12 }
  0x5a   :  { %10486 = vmatprep.mubr.msk.f32.mxu0 %vm16374_vm1, %v119_v13 }
  0x5d   :  { %10487 = vmatmul.mubr.msk.f32.gmra.mrb[12].mxu0 %vm16374_vm1, %v120_v14 }
  0x5e   :  { %10489 = vmatprep.mubr.msk.f32.mxu0 %vm16374_vm1, %v121_v15 }
  0x61   :  { %10490 = vmatmul.mubr.msk.f32.gmra.mrb[14].mxu0 %vm16374_vm1, %v122_v16 }
 0x118   :  { %v11664_v17 = vpop.f32.mrb[0].mxu0 }
 0x119   :  { %16482 = vst [vmem:[#allocation8_spill] sm:$0xff] %v11664_v17  ;;  %v426_v18 = vand.u32 2147483647, %v11664_v17  ;;  %v429_v19 = vand.u32 2139095040, %v11664_v17  ;;  %v11668_v20 = vpop.f32.mrb[1].mxu0 }
 0x11a   :  { %16483 = vst [vmem:[#allocation9_spill] sm:$0xff] %v11668_v20  ;;  %v322_v21 = vand.u32 2147483647, %v11668_v20  ;;  %v325_v22 = vand.u32 2139095040, %v11668_v20 }
 0x11b   :  { %v430_v23 = vshrl.u32 %v429_v19, 23  ;;  %v433_v24 = vand.u32 8388607, %v426_v18 }
 0x11c   :  { %v326_v25 = vshrl.u32 %v325_v22, 23  ;;  %v329_v26 = vand.u32 8388607, %v322_v21  ;;  %v11676_v27 = vpop.f32.mrb[2].mxu0 }
 0x11d   :  { %16484 = vst [vmem:[#allocation10_spill] sm:$0xff] %v11676_v27  ;;  %v9891_v28 = vadd.s32 4294967169, %v430_v23  ;;  %v11678_v29 = vpop.f32.mrb[3].mxu0  ;;  %v637_v31 = vand.u32 2139095040, %v11676_v27  ;;  %v434_v32 = vor.u32 8388608, %v433_v24 }
 0x11e   :  { %16485 = vst [vmem:[#allocation11_spill] sm:$0xff] %v11678_v29  ;;  %v9887_v30 = vadd.s32 4294967169, %v326_v25  ;;  %v330_v34 = vor.u32 8388608, %v329_v26  ;;  %v634_v36 = vand.u32 2147483647, %v11676_v27 }
 0x11f   :  { %v436_v33 = vadd.s32 1, %v9891_v28  ;;  %v638_v37 = vshrl.u32 %v637_v31, 23  ;;  %v11686_v45 = vshll.u32 %v434_v32, 8 }
 0x120   :  { %v332_v35 = vadd.s32 1, %v9887_v30  ;;  %v11682_v38 = vpop.f32.mrb[4].mxu0  ;;  %v11690_v47 = vshll.u32 %v330_v34, 8  ;;  %v11694_v48 = vand.u32 8388607, %v634_v36 }
 0x121   :  { %16486 = vst [vmem:[#allocation12_spill] sm:$0xff] %v11682_v38  ;;  %vm437_vm2 = vcmp.gt.s32.totalorder %v436_v33, 0  ;;  %v11684_v39 = vpop.f32.mrb[5].mxu0  ;;  %v9899_v41 = vadd.s32 4294967169, %v638_v37 }
 0x122   :  { %16487 = vst [vmem:[#allocation13_spill] sm:$0xff] %v11684_v39  ;;  %v438_v40 = vsel %vm437_vm2, %v436_v33, 0  ;;  %vm333_vm3 = vcmp.gt.s32.totalorder %v332_v35, 0 }
 0x123   :  { %v439_v42 = vshrl.u32 %v438_v40, 5  ;;  %v440_v43 = vand.u32 31, %v438_v40  ;;  %v334_v44 = vsel %vm333_vm3, %v332_v35, 0  ;;  %v11699_v54 = vadd.s32 1, %v9899_v41 }
 0x124   :  { %v11688_v46 = vshrl.u32 %v334_v44, 5  ;;  %v11696_v49 = vpop.f32.mrb[6].mxu0  ;;  %v336_v53 = vand.u32 31, %v334_v44 }
 0x125   :  { %16488 = vst [vmem:[#allocation14_spill] sm:$0xff] %v11696_v49  ;;  %v441_v50 = vsub.s32 32, %v440_v43  ;;  %v443_v52 = vshll.u32 %v16316_v51, %v440_v43  ;;  %v11701_v55 = vpop.f32.mrb[7].mxu0  ;;  %v446_v57 = vshll.u32 %v16312_v56, %v440_v43  ;;  %v449_v59 = vshll.u32 %v16305_v58, %v440_v43 }
 0x126   :  { %v452_v61 = vshll.u32 %v16314_v60, %v440_v43  ;;  %v455_v63 = vshll.u32 %v16309_v62, %v440_v43  ;;  %vm458_vm4 = vcmp.lt.s32.totalorder %v439_v42, 1  ;;  %vm459_vm5 = vcmp.lt.s32.totalorder %v439_v42, 2 }
 0x127   :  { %v444_v0 = vshrl.u32 %v16312_v56, %v441_v50  ;;  %v447_v1 = vshrl.u32 %v16305_v58, %v441_v50  ;;  %v450_v2 = vshrl.u32 %v16314_v60, %v441_v50  ;;  %v442_v3 = vshrl.u32 %v16316_v51, %v441_v50 }
 0x128   :  { %v453_v4 = vshrl.u32 %v16309_v62, %v441_v50  ;;  %v456_v6 = vshrl.u32 %v16307_v5, %v441_v50  ;;  %v337_v10 = vsub.s32 32, %v336_v53  ;;  %v11713_v11 = vpop.f32.mrb[8].mxu0  ;;  %vm460_vm6 = vcmp.lt.s32.totalorder %v439_v42, 3 }
 0x129   :  { %v445_v7 = vor.u32 %v444_v0, %v443_v52  ;;  %v448_v8 = vor.u32 %v447_v1, %v446_v57  ;;  %v451_v9 = vor.u32 %v450_v2, %v449_v59  ;;  %16489 = vst [vmem:[#allocation15_spill] sm:$0xff] %v11713_v11  ;;  %vm461_vm7 = vcmp.lt.s32.totalorder %v439_v42, 4 }
 0x12a   :  { %v454_v12 = vor.u32 %v453_v4, %v452_v61  ;;  %v457_v13 = vor.u32 %v456_v6, %v455_v63  ;;  %v339_v25 = vshll.u32 %v16316_v51, %v336_v53  ;;  %v340_v30 = vshrl.u32 %v16312_v56, %v337_v10 }
 0x12b   :  { %v462_v14 = vsel %vm458_vm4, %v442_v3, %v445_v7  ;;  %v463_v15 = vsel %vm461_vm7, %v451_v9, 2102212464  ;;  %v466_v16 = vsel %vm458_vm4, %v445_v7, %v448_v8  ;;  %v470_v19 = vsel %vm458_vm4, %v448_v8, %v451_v9 }
 0x12c   :  { %v464_v22 = vsel %vm460_vm6, %v448_v8, %v463_v15  ;;  %v467_v23 = vsel %vm461_vm7, %v454_v12, 920167782  ;;  %v471_v24 = vsel %vm461_vm7, %v457_v13, 1326507024  ;;  %v342_v31 = vshll.u32 %v16312_v56, %v336_v53 }
 0x12d   :  { %v468_v26 = vsel %vm460_vm6, %v451_v9, %v467_v23  ;;  %v472_v28 = vsel %vm460_vm6, %v454_v12, %v471_v24  ;;  %v465_v32 = vsel %vm459_vm5, %v462_v14, %v464_v22  ;;  %v343_v35 = vshrl.u32 %v16305_v58, %v337_v10 }
 0x12e   :  { %v469_v33 = vsel %vm459_vm5, %v466_v16, %v468_v26  ;;  %v473_v34 = vsel %vm459_vm5, %v470_v19, %v472_v28  ;;  %v341_v44 = vor.u32 %v340_v30, %v339_v25  ;;  %v345_v52 = vshll.u32 %v16305_v58, %v336_v53 }
 0x12f   :  { %v11726_v37 = vmul.u32.u64.low %v11686_v45, %v473_v34  ;;  %v11727_v40 = vmul.u32.u64.high %v11686_v45, %v473_v34, %v11726_v37  ;;  %v11730_v41 = vmul.u32.u64.low %v11686_v45, %v469_v33  ;;  %v11731_v43 = vmul.u32.u64.high %v11686_v45, %v469_v33, %v11730_v41 }
 0x130   :  { %v344_v50 = vor.u32 %v343_v35, %v342_v31  ;;  %v346_v57 = vshrl.u32 %v16314_v60, %v337_v10  ;;  %v338_v42 = vshrl.u32 %v16316_v51, %v337_v10  ;;  %v348_v59 = vshll.u32 %v16314_v60, %v336_v53 }
 0x131   :  { %v349_v61 = vshrl.u32 %v16309_v62, %v337_v10  ;;  %v352_v63 = vshrl.u32 %v16307_v5, %v337_v10  ;;  %v481_v0 = vmul.u32 %v11686_v45, %v465_v32  ;;  %v351_v2 = vshll.u32 %v16309_v62, %v336_v53 }
 0x132   :  { %v347_v1 = vor.u32 %v346_v57, %v345_v52  ;;  %vm354_vm8 = vcmp.lt.s32.totalorder %v11688_v46, 1  ;;  %vm483_vm9 = vc.u32 %v11727_v40, %v11730_v41  ;;  %v484_v3 = vadd.s32 1, %v11731_v43 }
 0x133   :  { %v350_v4 = vor.u32 %v349_v61, %v348_v59  ;;  %vm355_vm10 = vcmp.lt.s32.totalorder %v11688_v46, 2  ;;  %v353_v6 = vor.u32 %v352_v63, %v351_v2  ;;  %vm356_vm11 = vcmp.lt.s32.totalorder %v11688_v46, 3  ;;  %v11780_v59 = vpop.f32.mrb[9].mxu0 }
 0x134   :  { %vm357_vm12 = vcmp.lt.s32.totalorder %v11688_v46, 4  ;;  %v362_v7 = vsel %vm354_vm8, %v341_v44, %v344_v50  ;;  %v485_v45 = vsel %vm483_vm9, %v484_v3, %v11731_v43  ;;  %v366_v9 = vsel %vm354_vm8, %v344_v50, %v347_v1  ;;  %16490 = vst [vmem:[#allocation16_spill] sm:$0xff] %v11780_v59 }
 0x135   :  { %v359_v8 = vsel %vm357_vm12, %v347_v1, 2102212464  ;;  %v363_v53 = vsel %vm357_vm12, %v350_v4, 920167782  ;;  %v486_v10 = vadd.s32 %v485_v45, %v481_v0  ;;  %v358_v12 = vsel %vm354_vm8, %v338_v42, %v341_v44 }
 0x136   :  { %v364_v13 = vsel %vm356_vm11, %v347_v1, %v363_v53  ;;  %v367_v14 = vsel %vm357_vm12, %v353_v6, 1326507024  ;;  %v360_v15 = vsel %vm356_vm11, %v344_v50, %v359_v8  ;;  %vm645_vm13 = vcmp.gt.s32.totalorder %v11699_v54, 0 }
 0x137   :  { %v365_v16 = vsel %vm355_vm10, %v362_v7, %v364_v13  ;;  %v368_v19 = vsel %vm356_vm11, %v350_v4, %v367_v14  ;;  %v487_v22 = vadd.s32 536870912, %v486_v10  ;;  %v646_v30 = vsel %vm645_vm13, %v11699_v54, 0 }
 0x138   :  { %v369_v23 = vsel %vm355_vm10, %v366_v9, %v368_v19  ;;  %v11756_v24 = vmul.u32.u64.low %v11690_v47, %v365_v16  ;;  %v11757_v25 = vmul.u32.u64.high %v11690_v47, %v365_v16, %v11756_v24  ;;  %v533_v31 = vand.u32 2139095040, %v11678_v29 }
 0x139   :  { %v11761_v26 = vmul.u32.u64.low %v11690_v47, %v369_v23  ;;  %v11762_v28 = vmul.u32.u64.high %v11690_v47, %v369_v23, %v11761_v26  ;;  %v11766_v32 = vshrl.u32 %v487_v22, 30  ;;  %v361_v33 = vsel %vm355_vm10, %v358_v12, %v360_v15 }
 0x13a   :  { %v648_v34 = vand.u32 31, %v646_v30  ;;  %v380_v37 = vadd.s32 1, %v11757_v25  ;;  %v377_v44 = vmul.u32 %v11690_v47, %v361_v33  ;;  %v642_v54 = vor.u32 8388608, %v11694_v48 }
 0x13b   :  { %v489_v35 = vshll.u32 %v11766_v32, 30  ;;  %vm379_vm14 = vc.u32 %v11762_v28, %v11756_v24  ;;  %v534_v50 = vshrl.u32 %v533_v31, 23  ;;  %v647_v46 = vshrl.u32 %v646_v30, 5 }
 0x13c   :  { %v649_v43 = vsub.s32 32, %v648_v34  ;;  %v381_v57 = vsel %vm379_vm14, %v380_v37, %v11757_v25  ;;  %v651_v42 = vshll.u32 %v16316_v51, %v648_v34  ;;  %v654_v47 = vshll.u32 %v16312_v56, %v648_v34 }
 0x13d   :  { %v11776_v52 = vsub.s32 %v486_v10, %v489_v35  ;;  %v382_v61 = vadd.s32 %v381_v57, %v377_v44  ;;  %v660_v2 = vshll.u32 %v16314_v60, %v648_v34  ;;  %v657_v45 = vshll.u32 %v16305_v58, %v648_v34 }
 0x13e   :  { %v652_v63 = vshrl.u32 %v16312_v56, %v649_v43  ;;  %v655_v0 = vshrl.u32 %v16305_v58, %v649_v43  ;;  %v658_v48 = vshrl.u32 %v16314_v60, %v649_v43  ;;  %v661_v3 = vshrl.u32 %v16309_v62, %v649_v43 }
 0x13f   :  { %v492_v1 = vsub.s32 0, %v11776_v52  ;;  %v383_v4 = vadd.s32 536870912, %v382_v61  ;;  %v663_v9 = vshll.u32 %v16309_v62, %v648_v34  ;;  %v664_v10 = vshrl.u32 %v16307_v5, %v649_v43 }
 0x140   :  { %v653_v6 = vor.u32 %v652_v63, %v651_v42  ;;  %v656_v7 = vor.u32 %v655_v0, %v654_v47  ;;  %v662_v53 = vor.u32 %v661_v3, %v660_v2  ;;  %v659_v13 = vor.u32 %v658_v48, %v657_v45 }
 0x141   :  { %v9892_v8 = vmin.u32 %v492_v1, %v11776_v52  ;;  %v11793_v12 = vshrl.u32 %v383_v4, 30  ;;  %v665_v15 = vor.u32 %v664_v10, %v663_v9  ;;  %vm666_vm15 = vcmp.lt.s32.totalorder %v647_v46, 1 }
 0x142   :  { %v682_v16 = vshll.u32 %v642_v54, 8  ;;  %vm669_vm2 = vcmp.lt.s32.totalorder %v647_v46, 4  ;;  %v674_v22 = vsel %vm666_vm15, %v653_v6, %v656_v7  ;;  %v9895_v23 = vadd.s32 4294967169, %v534_v50 }
 0x143   :  { %v494_v14 = vclz %v9892_v8  ;;  %v385_v19 = vshll.u32 %v11793_v12, 30  ;;  %vm667_vm3 = vcmp.lt.s32.totalorder %v647_v46, 2  ;;  %vm668_vm4 = vcmp.lt.s32.totalorder %v647_v46, 3 }
 0x144   :  { %v675_v26 = vsel %vm669_vm2, %v662_v53, 920167782  ;;  %v671_v31 = vsel %vm669_vm2, %v659_v13, 2102212464  ;;  %v678_v34 = vsel %vm666_vm15, %v656_v7, %v659_v13  ;;  %v650_v35 = vshrl.u32 %v16316_v51, %v649_v43 }
 0x145   :  { %v9893_v25 = vadd.s32 4294967294, %v494_v14  ;;  %v11797_v30 = vsub.s32 %v382_v61, %v385_v19  ;;  %v676_v33 = vsel %vm668_vm4, %v659_v13, %v675_v26  ;;  %v679_v44 = vsel %vm669_vm2, %v665_v15, 1326507024 }
 0x146   :  { %v677_v37 = vsel %vm667_vm3, %v674_v22, %v676_v33  ;;  %v680_v50 = vsel %vm668_vm4, %v662_v53, %v679_v44  ;;  %v540_v42 = vadd.s32 1, %v9895_v23  ;;  %v670_v63 = vsel %vm666_vm15, %v650_v35, %v653_v6 }
 0x147   :  { %vm9894_vm5 = vcmp.lt.s32.totalorder %v9893_v25, 0  ;;  %v388_v57 = vsub.s32 0, %v11797_v30  ;;  %v672_v47 = vsel %vm668_vm4, %v656_v7, %v671_v31  ;;  %v681_v61 = vsel %vm667_vm3, %v678_v34, %v680_v50  ;;  %v11826_v34 = vpop.f32.mrb[10].mxu0 }
 0x148   :  { %v497_v54 = vsel %vm9894_vm5, 0, %v9893_v25  ;;  %v11806_v1 = vmul.u32.u64.low %v682_v16, %v681_v61  ;;  %v11807_v48 = vmul.u32.u64.high %v682_v16, %v681_v61, %v11806_v1  ;;  %vm541_vm6 = vcmp.gt.s32.totalorder %v540_v42, 0  ;;  %16491 = vst [vmem:[#allocation17_spill] sm:$0xff] %v11826_v34 }
 0x149   :  { %v9888_v0 = vmin.u32 %v388_v57, %v11797_v30  ;;  %v502_v43 = vsub.s32 4294967266, %v497_v54  ;;  %v11809_v2 = vmul.u32.u64.low %v682_v16, %v677_v37  ;;  %v11810_v3 = vmul.u32.u64.high %v682_v16, %v677_v37, %v11809_v2 }
 0x14a   :  { %v530_v45 = vand.u32 2147483647, %v11678_v29  ;;  %v542_v8 = vsel %vm541_vm6, %v540_v42, 0  ;;  %v498_v53 = vsub.s32 32, %v497_v54  ;;  %v673_v6 = vsel %vm667_vm3, %v670_v63, %v672_v47 }
 0x14b   :  { %v390_v4 = vclz %v9888_v0  ;;  %v544_v7 = vand.u32 31, %v542_v8  ;;  %vm691_vm7 = vc.u32 %v11807_v48, %v11809_v2  ;;  %v482_v10 = vadd.s32 %v11730_v41, %v11727_v40 }
 0x14c   :  { %v503_v13 = vadd.s32 127, %v502_v43  ;;  %v692_v14 = vadd.s32 1, %v11810_v3  ;;  %v689_v15 = vmul.u32 %v682_v16, %v673_v6  ;;  %v537_v19 = vand.u32 8388607, %v530_v45 }
 0x14d   :  { %v9889_v9 = vadd.s32 4294967294, %v390_v4  ;;  %v500_v22 = vshrl.u32 %v482_v10, %v498_v53  ;;  %v545_v23 = vsub.s32 32, %v544_v7  ;;  %v499_v31 = vshll.u32 %v11776_v52, %v497_v54 }
 0x14e   :  { %v693_v46 = vsel %vm691_vm7, %v692_v14, %v11810_v3  ;;  %v504_v33 = vshll.u32 %v503_v13, 23  ;;  %v538_v41 = vor.u32 8388608, %v537_v19  ;;  %v845_v35 = vand.u32 2139095040, %v11682_v38 }
 0x14f   :  { %vm9890_vm8 = vcmp.lt.s32.totalorder %v9889_v9, 0  ;;  %v694_v26 = vadd.s32 %v693_v46, %v689_v15  ;;  %v501_v16 = vor.u32 %v500_v22, %v499_v31  ;;  %v548_v44 = vshrl.u32 %v16312_v56, %v545_v23 }
 0x150   :  { %v11823_v25 = vsel %vm9890_vm8, 0, %v9889_v9  ;;  %v551_v57 = vshrl.u32 %v16305_v58, %v545_v23  ;;  %v543_v42 = vshrl.u32 %v542_v8, 5  ;;  %v554_v63 = vshrl.u32 %v16314_v60, %v545_v23 }
 0x151   :  { %v695_v40 = vadd.s32 536870912, %v694_v26  ;;  %v398_v37 = vsub.s32 4294967266, %v11823_v25  ;;  %v557_v52 = vshrl.u32 %v16309_v62, %v545_v23  ;;  %v505_v54 = vor.u32 4788187, %v504_v33 }
 0x152   :  { %v547_v47 = vshll.u32 %v16316_v51, %v544_v7  ;;  %v550_v61 = vshll.u32 %v16312_v56, %v544_v7  ;;  %v560_v0 = vshrl.u32 %v16307_v5, %v545_v23  ;;  %v394_v1 = vsub.s32 32, %v11823_v25 }
 0x153   :  { %v11832_v50 = vshrl.u32 %v695_v40, 30  ;;  %v553_v3 = vshll.u32 %v16305_v58, %v544_v7  ;;  %v556_v4 = vshll.u32 %v16314_v60, %v544_v7  ;;  %v399_v8 = vadd.s32 127, %v398_v37 }
 0x154   :  { %v549_v53 = vor.u32 %v548_v44, %v547_v47  ;;  %v552_v6 = vor.u32 %v551_v57, %v550_v61  ;;  %v559_v9 = vshll.u32 %v16309_v62, %v544_v7  ;;  %v378_v10 = vadd.s32 %v11756_v24, %v11762_v28 }
 0x155   :  { %v697_v43 = vshll.u32 %v11832_v50, 30  ;;  %v555_v14 = vor.u32 %v554_v63, %v553_v3  ;;  %v558_v15 = vor.u32 %v557_v52, %v556_v4  ;;  %v508_v19 = vcvt.s32.f32 %v501_v16 }
 0x156   :  { %v561_v22 = vor.u32 %v560_v0, %v559_v9  ;;  %v578_v46 = vshll.u32 %v538_v41, 8  ;;  %v846_v31 = vshrl.u32 %v845_v35, 23  ;;  %v506_v33 = vand.u32 2147483647, %v505_v54 }
 0x157   :  { %v11846_v13 = vsub.s32 %v694_v26, %v697_v43  ;;  %v546_v37 = vshrl.u32 %v16316_v51, %v545_v23  ;;  %vm562_vm9 = vcmp.lt.s32.totalorder %v543_v42, 1  ;;  %v396_v44 = vshrl.u32 %v378_v10, %v394_v1 }
 0x158   :  { %v400_v57 = vshll.u32 %v399_v8, 23  ;;  %vm565_vm10 = vcmp.lt.s32.totalorder %v543_v42, 4  ;;  %v570_v7 = vsel %vm562_vm9, %v549_v53, %v552_v6  ;;  %vm564_vm11 = vcmp.lt.s32.totalorder %v543_v42, 3 }
 0x159   :  { %v700_v40 = vsub.s32 0, %v11846_v13  ;;  %v567_v28 = vsel %vm565_vm10, %v555_v14, 2102212464  ;;  %v571_v26 = vsel %vm565_vm10, %v558_v15, 920167782  ;;  %vm563_vm12 = vcmp.lt.s32.totalorder %v543_v42, 2 }
 0x15a   :  { %v572_v16 = vsel %vm564_vm11, %v555_v14, %v571_v26  ;;  %v574_v63 = vsel %vm562_vm9, %v552_v6, %v555_v14  ;;  %v575_v41 = vsel %vm565_vm10, %v561_v22, 1326507024  ;;  %v566_v52 = vsel %vm562_vm9, %v546_v37, %v549_v53 }
 0x15b   :  { %v9900_v24 = vmin.u32 %v700_v40, %v11846_v13  ;;  %v573_v54 = vsel %vm563_vm12, %v570_v7, %v572_v16  ;;  %v576_v47 = vsel %vm564_vm11, %v558_v15, %v575_v41  ;;  %vm428_vm13 = vcmp.lt.s32.totalorder %v11664_v17, 0 }
 0x15c   :  { %v568_v23 = vsel %vm564_vm11, %v552_v6, %v567_v28  ;;  %v577_v61 = vsel %vm563_vm12, %v574_v63, %v576_v47  ;;  %v11854_v0 = vmul.u32.u64.low %v578_v46, %v573_v54  ;;  %v11855_v1 = vmul.u32.u64.high %v578_v46, %v573_v54, %v11854_v0 }
 0x15d   :  { %v702_v35 = vclz %v9900_v24  ;;  %v509_v43 = vmul.f32 %v508_v19, %v506_v33  ;;  %v11858_v4 = vmul.u32.u64.low %v578_v46, %v577_v61  ;;  %v11859_v8 = vmul.u32.u64.high %v578_v46, %v577_v61, %v11858_v4 }
 0x15e   :  { %vm324_vm14 = vcmp.lt.s32.totalorder %v11668_v20, 0  ;;  %v395_v53 = vshll.u32 %v11797_v30, %v11823_v25  ;;  %v401_v9 = vor.u32 4788187, %v400_v57  ;;  %v9907_v10 = vadd.s32 4294967169, %v846_v31 }
 0x15f   :  { %v9901_v3 = vadd.s32 4294967294, %v702_v35  ;;  %vm636_vm15 = vcmp.lt.s32.totalorder %v11676_v27, 0  ;;  %v720_v6 = vsub.s32 4, %v11832_v50  ;;  %v569_v14 = vsel %vm563_vm12, %v566_v52, %v568_v23 }
 0x160   :  { %v397_v15 = vor.u32 %v396_v44, %v395_v53  ;;  %v588_v22 = vadd.s32 1, %v11855_v1  ;;  %v852_v33 = vadd.s32 1, %v9907_v10  ;;  %vm11872_vm3 = vcmp.le.f32.partialorder %v426_v18, 0.7853982 }
 0x161   :  { %vm9902_vm2 = vcmp.lt.s32.totalorder %v9901_v3, 0  ;;  %v510_v30 = vxor.u32 2147483648, %v509_v43  ;;  %v512_v25 = vsub.s32 4, %v11766_v32  ;;  %v408_v31 = vsub.s32 4, %v11793_v12 }
 0x162   :  { %v11867_v19 = vsel %vm9902_vm2, 0, %v9901_v3  ;;  %v16304_v42 = vand.u32 2147483647, %v11682_v38  ;;  %v402_v37 = vand.u32 2147483647, %v401_v9  ;;  %v585_v44 = vmul.u32 %v578_v46, %v569_v14 }
 0x163   :  { %vm587_vm4 = vc.u32 %v11859_v8, %v11854_v0  ;;  %vm853_vm5 = vcmp.gt.s32.totalorder %v852_v33, 0  ;;  %v710_v57 = vsub.s32 4294967266, %v11867_v19  ;;  %v721_v18 = vsel %vm636_vm15, %v720_v6, %v11832_v50 }
 0x164   :  { %v589_v7 = vsel %vm587_vm4, %v588_v22, %v11855_v1  ;;  %v854_v24 = vsel %vm853_vm5, %v852_v33, 0  ;;  %v404_v28 = vcvt.s32.f32 %v397_v15  ;;  %vm11888_vm6 = vcmp.le.f32.partialorder %v634_v36, 0.7853982  ;;  %v11916_v1 = vpop.f32.mrb[11].mxu0 }
 0x165   :  { %v590_v46 = vadd.s32 %v589_v7, %v585_v44  ;;  %v856_v16 = vand.u32 31, %v854_v24  ;;  %v511_v63 = vsel %vm428_vm13, %v510_v30, %v509_v43  ;;  %v11897_v41 = vsel %vm428_vm13, %v512_v25, %v11766_v32 }
 0x166   :  { %v11902_v50 = vsel %vm324_vm14, %v408_v31, %v11793_v12  ;;  %v690_v36 = vadd.s32 %v11809_v2, %v11807_v48  ;;  %v11906_v35 = vmul.f32 %v404_v28, %v402_v37  ;;  %v11910_v52 = vsel %vm11888_vm6, 0, %v721_v18 }
 0x167   :  { %v591_v54 = vadd.s32 536870912, %v590_v46  ;;  %v857_v47 = vsub.s32 32, %v856_v16  ;;  %v711_v23 = vadd.s32 127, %v710_v57  ;;  %v849_v32 = vand.u32 8388607, %v16304_v42 }
 0x168   :  { %v859_v61 = vshll.u32 %v16316_v51, %v856_v16  ;;  %v862_v12 = vshll.u32 %v16312_v56, %v856_v16  ;;  %v865_v3 = vshll.u32 %v16305_v58, %v856_v16  ;;  %v855_v4 = vshrl.u32 %v854_v24, 5 }
 0x169   :  { %v11918_v43 = vshrl.u32 %v591_v54, 30  ;;  %v860_v48 = vshrl.u32 %v16312_v56, %v857_v47  ;;  %v863_v2 = vshrl.u32 %v16305_v58, %v857_v47  ;;  %v866_v53 = vshrl.u32 %v16314_v60, %v857_v47 }
 0x16a   :  { %v868_v9 = vshll.u32 %v16314_v60, %v856_v16  ;;  %v869_v10 = vshrl.u32 %v16309_v62, %v857_v47  ;;  %v514_v6 = vsel %vm11872_vm3, %v11664_v17, %v511_v63  ;;  %v727_v14 = vadd.s32 3, %v11910_v52 }
 0x16b   :  { %v593_v15 = vshll.u32 %v11918_v43, 30  ;;  %v871_v22 = vshll.u32 %v16309_v62, %v856_v16  ;;  %v406_v33 = vxor.u32 2147483648, %v11906_v35  ;;  %v850_v30 = vor.u32 8388608, %v849_v32 }
 0x16c   :  { %v872_v25 = vshrl.u32 %v16307_v5, %v857_v47  ;;  %v741_v31 = vand.u32 2139095040, %v11684_v39  ;;  %v861_v44 = vor.u32 %v860_v48, %v859_v61  ;;  %v864_v57 = vor.u32 %v863_v2, %v862_v12 }
 0x16d   :  { %v11935_v37 = vsub.s32 %v590_v46, %v593_v15  ;;  %v867_v18 = vor.u32 %v866_v53, %v865_v3  ;;  %v706_v7 = vsub.s32 32, %v11867_v19  ;;  %v712_v24 = vshll.u32 %v711_v23, 23 }
 0x16e   :  { %v870_v28 = vor.u32 %v869_v10, %v868_v9  ;;  %vm874_vm7 = vcmp.lt.s32.totalorder %v855_v4, 1  ;;  %v858_v16 = vshrl.u32 %v16316_v51, %v857_v47  ;;  %v873_v54 = vor.u32 %v872_v25, %v871_v22 }
 0x16f   :  { %v596_v63 = vsub.s32 0, %v11935_v37  ;;  %vm877_vm8 = vcmp.lt.s32.totalorder %v855_v4, 4  ;;  %v707_v32 = vshll.u32 %v11846_v13, %v11867_v19  ;;  %vm876_vm9 = vcmp.lt.s32.totalorder %v855_v4, 3 }
 0x170   :  { %v890_v46 = vshll.u32 %v850_v30, 8  ;;  %v742_v15 = vshrl.u32 %v741_v31, 23  ;;  %vm875_vm10 = vcmp.lt.s32.totalorder %v855_v4, 2  ;;  %v879_v12 = vsel %vm877_vm8, %v867_v18, 2102212464 }
 0x171   :  { %v9896_v61 = vmin.u32 %v596_v63, %v11935_v37  ;;  %v882_v23 = vsel %vm874_vm7, %v861_v44, %v864_v57  ;;  %vm11947_vm11 = vcmp.le.f32.partialorder %v322_v21, 0.7853982  ;;  %v708_v47 = vshrl.u32 %v690_v36, %v706_v7 }
 0x172   :  { %v713_v2 = vor.u32 4788187, %v712_v24  ;;  %v883_v13 = vsel %vm877_vm8, %v870_v28, 920167782  ;;  %v886_v19 = vsel %vm874_vm7, %v864_v57, %v867_v18  ;;  %v878_v53 = vsel %vm874_vm7, %v858_v16, %v861_v44 }
 0x173   :  { %v598_v3 = vclz %v9896_v61  ;;  %v884_v9 = vsel %vm876_vm9, %v867_v18, %v883_v13  ;;  %v887_v10 = vsel %vm877_vm8, %v873_v54, 1326507024  ;;  %vm532_vm12 = vcmp.lt.s32.totalorder %v11678_v29, 0 }
 0x174   :  { %v880_v21 = vsel %vm876_vm9, %v864_v57, %v879_v12  ;;  %v885_v22 = vsel %vm875_vm10, %v882_v23, %v884_v9  ;;  %v888_v36 = vsel %vm876_vm9, %v870_v28, %v887_v10  ;;  %v9903_v30 = vadd.s32 4294967169, %v742_v15 }
 0x175   :  { %v9897_v25 = vadd.s32 4294967294, %v598_v3  ;;  %v889_v31 = vsel %vm875_vm10, %v886_v19, %v888_v36  ;;  %v11961_v7 = vmul.u32.u64.low %v890_v46, %v885_v22  ;;  %v11962_v24 = vmul.u32.u64.high %v890_v46, %v885_v22, %v11961_v7  ;;  %v11995_v3 = vpop.f32.mrb[12].mxu0 }
 0x176   :  { %11165 = vcosq.f32 %v514_v6  ;;  %v11965_v44 = vmul.u32.u64.low %v890_v46, %v889_v31  ;;  %v11966_v18 = vmul.u32.u64.high %v890_v46, %v889_v31, %v11965_v44  ;;  %v748_v63 = vadd.s32 1, %v9903_v30 }
 0x177   :  { %v709_v16 = vor.u32 %v708_v47, %v707_v32  ;;  %vm9898_vm13 = vcmp.lt.s32.totalorder %v9897_v25, 0  ;;  %v881_v57 = vsel %vm875_vm10, %v878_v53, %v880_v21  ;;  %v16303_v54 = vand.u32 2147483647, %v11684_v39 }
 0x178   :  { %11167 = vsinq.f32 %v514_v6  ;;  %v407_v28 = vsel %vm324_vm14, %v406_v33, %v11906_v35  ;;  %v11974_v15 = vand.u32 3, %v11910_v52  ;;  %vm749_vm2 = vcmp.gt.s32.totalorder %v748_v63, 0 }
 0x179   :  { %v714_v61 = vand.u32 2147483647, %v713_v2  ;;  %v11976_v12 = vand.u32 3, %v727_v14  ;;  %v616_v23 = vsub.s32 4, %v11918_v43  ;;  %v900_v32 = vadd.s32 1, %v11962_v24 }
 0x17a   :  { %16498 = vst [vmem:[#allocation18_spill] sm:$0xff] %v11974_v15  ;;  %v11980_v4 = vsel %vm9898_vm13, 0, %v9897_v25  ;;  %v897_v47 = vmul.u32 %v890_v46, %v881_v57  ;;  %vm899_vm4 = vc.u32 %v11966_v18, %v11961_v7  ;;  %v750_v6 = vsel %vm749_vm2, %v748_v63, 0 }
 0x17b   :  { %16499 = vst [vmem:[#allocation19_spill] sm:$0xff] %v11976_v12  ;;  %v11987_v35 = vsel %vm11947_vm11, %v11668_v20, %v407_v28  ;;  %v716_v52 = vcvt.s32.f32 %v709_v16  ;;  %v901_v14 = vsel %vm899_vm4, %v900_v32, %v11962_v24  ;;  %v745_v33 = vand.u32 8388607, %v16303_v54 }
 0x17c   :  { %v586_v2 = vadd.s32 %v11854_v0, %v11859_v8  ;;  %v902_v13 = vadd.s32 %v901_v14, %v897_v47  ;;  %v752_v46 = vand.u32 31, %v750_v6  ;;  %v16311_v19 = vand.u32 2147483647, %v11696_v49 }
 0x17d   :  { %v11997_v53 = vmul.f32 %v716_v52, %v714_v61  ;;  %v606_v9 = vsub.s32 4294967266, %v11980_v4  ;;  %v12003_v10 = vsel %vm532_vm12, %v616_v23, %v11918_v43  ;;  %v1053_v21 = vand.u32 2139095040, %v11696_v49 }
 0x17e   :  { %v903_v22 = vadd.s32 536870912, %v902_v13  ;;  %v753_v36 = vsub.s32 32, %v752_v46  ;;  %v755_v0 = vshll.u32 %v16316_v51, %v752_v46  ;;  %v758_v8 = vshll.u32 %v16312_v56, %v752_v46 }
 0x17f   :  { %v746_v30 = vor.u32 8388608, %v745_v33  ;;  %v751_v25 = vshrl.u32 %v750_v6, 5  ;;  %v761_v31 = vshll.u32 %v16305_v58, %v752_v46  ;;  %v764_v24 = vshll.u32 %v16314_v60, %v752_v46 }
 0x180   :  { %v12010_v44 = vpop.eup %11165  ;;  %v602_v63 = vsub.s32 32, %v11980_v4  ;;  %v12013_v43 = vshrl.u32 %v903_v22, 30  ;;  %v756_v16 = vshrl.u32 %v16312_v56, %v753_v36  ;;  %v759_v57 = vshrl.u32 %v16305_v58, %v753_v36 }
 0x181   :  { %v607_v28 = vadd.s32 127, %v606_v9  ;;  %v762_v61 = vshrl.u32 %v16314_v60, %v753_v36  ;;  %v765_v23 = vshrl.u32 %v16309_v62, %v753_v36  ;;  %v767_v32 = vshll.u32 %v16309_v62, %v752_v46 }
 0x182   :  { %v12020_v47 = vpop.eup %11167  ;;  %v905_v6 = vshll.u32 %v12013_v43, 30  ;;  %v757_v52 = vor.u32 %v756_v16, %v755_v0  ;;  %v760_v14 = vor.u32 %v759_v57, %v758_v8  ;;  %v1054_v33 = vshrl.u32 %v1053_v21, 23 }
 0x183   :  { %v763_v22 = vor.u32 %v762_v61, %v761_v31  ;;  %v766_v54 = vor.u32 %v765_v23, %v764_v24  ;;  %v768_v42 = vshrl.u32 %v16307_v5, %v753_v36  ;;  %vm770_vm14 = vcmp.lt.s32.totalorder %v751_v25, 1 }
 0x184   :  { %v12024_v58 = vsub.s32 %v902_v13, %v905_v6  ;;  %v754_v9 = vshrl.u32 %v16316_v51, %v753_v36  ;;  %vm772_vm5 = vcmp.lt.s32.totalorder %v751_v25, 3  ;;  %vm773_vm7 = vcmp.lt.s32.totalorder %v751_v25, 4 }
 0x185   :  { %vm12029_vm8 = vcmp.le.f32.partialorder %v530_v45, 0.7853982  ;;  %v608_v0 = vshll.u32 %v607_v28, 23  ;;  %v769_v8 = vor.u32 %v768_v42, %v767_v32  ;;  %vm771_vm9 = vcmp.lt.s32.totalorder %v751_v25, 2 }
 0x186   :  { %v786_v21 = vshll.u32 %v746_v30, 8  ;;  %v908_v31 = vsub.s32 0, %v12024_v58  ;;  %v775_v24 = vsel %vm773_vm7, %v763_v22, 2102212464  ;;  %v778_v13 = vsel %vm770_vm14, %v757_v52, %v760_v14 }
 0x187   :  { %v779_v36 = vsel %vm773_vm7, %v766_v54, 920167782  ;;  %v604_v16 = vshrl.u32 %v586_v2, %v602_v63  ;;  %v782_v45 = vsel %vm770_vm14, %v760_v14, %v763_v22  ;;  %v9915_v61 = vadd.s32 4294967169, %v1054_v33 }
 0x188   :  { %v780_v57 = vsel %vm772_vm5, %v763_v22, %v779_v36  ;;  %v9908_v23 = vmin.u32 %v908_v31, %v12024_v58  ;;  %v774_v42 = vsel %vm770_vm14, %v754_v9, %v757_v52  ;;  %v783_v28 = vsel %vm773_vm7, %v769_v8, 1326507024 }
 0x189   :  { %v781_v30 = vsel %vm771_vm9, %v778_v13, %v780_v57  ;;  %v776_v32 = vsel %vm772_vm5, %v760_v14, %v775_v24  ;;  %v784_v6 = vsel %vm772_vm5, %v766_v54, %v783_v28  ;;  %v603_v2 = vshll.u32 %v11935_v37, %v11980_v4 }
 0x18a   :  { %v12045_v5 = vmul.u32.u64.low %v786_v21, %v781_v30  ;;  %v12046_v62 = vmul.u32.u64.high %v786_v21, %v781_v30, %v12045_v5  ;;  %v609_v63 = vor.u32 4788187, %v608_v0  ;;  %v910_v33 = vclz %v9908_v23 }
 0x18b   :  { %v785_v22 = vsel %vm771_vm9, %v782_v45, %v784_v6  ;;  %v1057_v8 = vand.u32 8388607, %v16311_v19  ;;  %v1060_v14 = vadd.s32 1, %v9915_v61  ;;  %11169 = vcosq.f32 %v11987_v35 }
 0x18c   :  { %v12052_v52 = vmul.u32.u64.low %v786_v21, %v785_v22  ;;  %v12053_v9 = vmul.u32.u64.high %v786_v21, %v785_v22, %v12052_v52  ;;  %v605_v54 = vor.u32 %v604_v16, %v603_v2  ;;  %v9909_v31 = vadd.s32 4294967294, %v910_v33 }
 0x18d   :  { %v777_v24 = vsel %vm771_vm9, %v774_v42, %v776_v32  ;;  %11171 = vsinq.f32 %v11987_v35  ;;  %v718_v37 = vxor.u32 2147483648, %v11997_v53  ;;  %v796_v4 = vadd.s32 1, %v12046_v62 }
 0x18e   :  { %vm1061_vm10 = vcmp.gt.s32.totalorder %v1060_v14, 0  ;;  %v610_v0 = vand.u32 2147483647, %v609_v63  ;;  %v12065_v13 = vsel %vm12029_vm8, 0, %v12003_v10  ;;  %vm9910_vm13 = vcmp.lt.s32.totalorder %v9909_v31, 0 }
 0x18f   :  { %v1062_v36 = vsel %vm1061_vm10, %v1060_v14, 0  ;;  %v913_v57 = vsel %vm9910_vm13, 0, %v9909_v31  ;;  %v793_v16 = vmul.u32 %v786_v21, %v777_v24  ;;  %vm795_vm2 = vc.u32 %v12053_v9, %v12045_v5  ;;  %v12078_v21 = vpop.f32.mrb[13].mxu0 }
 0x190   :  { %v1058_v25 = vor.u32 8388608, %v1057_v8  ;;  %v612_v35 = vcvt.s32.f32 %v605_v54  ;;  %v918_v45 = vsub.s32 4294967266, %v913_v57  ;;  %v797_v61 = vsel %vm795_vm2, %v796_v4, %v12046_v62 }
 0x191   :  { %v949_v23 = vand.u32 2139095040, %v11701_v55  ;;  %v12074_v42 = vsel %vm636_vm15, %v718_v37, %v11997_v53  ;;  %v798_v10 = vadd.s32 %v797_v61, %v793_v16  ;;  %v12076_v30 = vshrl.u32 %v1062_v36, 5 }
 0x192   :  { %v1064_v28 = vand.u32 31, %v1062_v36  ;;  %v12080_v32 = vmul.f32 %v612_v35, %v610_v0  ;;  %v898_v6 = vadd.s32 %v11961_v7, %v11966_v18  ;;  %v914_v2 = vsub.s32 32, %v913_v57 }
 0x193   :  { %v919_v62 = vadd.s32 127, %v918_v45  ;;  %v799_v63 = vadd.s32 536870912, %v798_v10  ;;  %v16502_v52 = vmov 2131351028   ;;  %v12088_v54 = vshll.u32 %v1058_v25, 8 }
 0x194   :  { %v1065_v33 = vsub.s32 32, %v1064_v28  ;;  %v1067_v22 = vshll.u32 %v16316_v51, %v1064_v28  ;;  %v1070_v53 = vshll.u32 %v16312_v56, %v1064_v28  ;;  %v1073_v8 = vshll.u32 %v16502_v52, %v1064_v28 }
 0x195   :  { %v1076_v14 = vshll.u32 %v16314_v60, %v1064_v28  ;;  %v950_v31 = vshrl.u32 %v949_v23, 23  ;;  %v12090_v24 = vshrl.u32 %v799_v63, 30  ;;  %vm1082_vm15 = vcmp.lt.s32.totalorder %v12076_v30, 1  ;;  %v12095_v18 = vpop.eup %11169 }
 0x196   :  { %v1068_v37 = vshrl.u32 %v16312_v56, %v1065_v33  ;;  %v1071_v7 = vshrl.u32 %v16502_v52, %v1065_v33  ;;  %v916_v4 = vshrl.u32 %v898_v6, %v914_v2  ;;  %v920_v0 = vshll.u32 %v919_v62, 23 }
 0x197   :  { %v1074_v36 = vshrl.u32 %v16314_v60, %v1065_v33  ;;  %v16503_v16 = vmov 920167782   ;;  %v12099_v45 = vpop.eup %11171  ;;  %v801_v25 = vshll.u32 %v12090_v24, 30  ;;  %vm1085_vm4 = vcmp.lt.s32.totalorder %v12076_v30, 4 }
 0x198   :  { %v1077_v35 = vshrl.u32 %v16503_v16, %v1065_v33  ;;  %v1069_v61 = vor.u32 %v1068_v37, %v1067_v22  ;;  %v1072_v23 = vor.u32 %v1071_v7, %v1070_v53  ;;  %v1079_v56 = vshll.u32 %v16503_v16, %v1064_v28 }
 0x199   :  { %v1075_v63 = vor.u32 %v1074_v36, %v1073_v8  ;;  %vm1084_vm14 = vcmp.lt.s32.totalorder %v12076_v30, 3  ;;  %v915_v6 = vshll.u32 %v12024_v58, %v913_v57  ;;  %v12106_v2 = vsub.s32 %v798_v10, %v801_v25 }
 0x19a   :  { %v1078_v19 = vor.u32 %v1077_v35, %v1076_v14  ;;  %v16504_v62 = vmov 1326507024   ;;  %vm1083_vm5 = vcmp.lt.s32.totalorder %v12076_v30, 2  ;;  %v921_v51 = vor.u32 4788187, %v920_v0 }
 0x19b   :  { %v1080_v60 = vshrl.u32 %v16504_v62, %v1065_v33  ;;  %v16505_v15 = vmov 683565275   ;;  %v1090_v53 = vsel %vm1082_vm15, %v1069_v61, %v1072_v23  ;;  %v804_v28 = vsub.s32 0, %v12106_v2 }
 0x19c   :  { %v1066_v22 = vshrl.u32 %v16505_v15, %v1065_v33  ;;  %v1091_v8 = vsel %vm1085_vm4, %v1078_v19, 920167782  ;;  %v1087_v58 = vsel %vm1085_vm4, %v1075_v63, 2102212464  ;;  %v614_v10 = vxor.u32 2147483648, %v12080_v32 }
 0x19d   :  { %v1081_v14 = vor.u32 %v1080_v60, %v1079_v56  ;;  %v1092_v57 = vsel %vm1084_vm14, %v1075_v63, %v1091_v8  ;;  %v917_v37 = vor.u32 %v916_v4, %v915_v6  ;;  %v1094_v7 = vsel %vm1082_vm15, %v1072_v23, %v1075_v63 }
 0x19e   :  { %v1093_v33 = vsel %vm1083_vm5, %v1090_v53, %v1092_v57  ;;  %v9904_v0 = vmin.u32 %v804_v28, %v12106_v2  ;;  %v1086_v35 = vsel %vm1082_vm15, %v1066_v22, %v1069_v61  ;;  %v1088_v4 = vsel %vm1084_vm14, %v1072_v23, %v1087_v58 }
 0x19f   :  { %v1095_v56 = vsel %vm1085_vm4, %v1081_v14, 1326507024  ;;  %v12129_v60 = vmul.u32.u64.low %v12088_v54, %v1093_v33  ;;  %v12130_v36 = vmul.u32.u64.high %v12088_v54, %v1093_v33, %v12129_v60  ;;  %v9911_v63 = vadd.s32 4294967169, %v950_v31 }
 0x1a0   :  { %v1096_v25 = vsel %vm1084_vm14, %v1078_v19, %v1095_v56  ;;  %v922_v6 = vand.u32 2147483647, %v921_v51  ;;  %v806_v53 = vclz %v9904_v0  ;;  %v16319_v28 = vand.u32 2147483647, %v11701_v55 }
 0x1a1   :  { %v1097_v8 = vsel %vm1083_vm5, %v1094_v7, %v1096_v25  ;;  %v722_v14 = vsel %vm11888_vm6, %v11676_v27, %v12074_v42  ;;  %v956_v23 = vadd.s32 1, %v9911_v63  ;;  %v924_v58 = vcvt.s32.f32 %v917_v37 }
 0x1a2   :  { %v12147_v61 = vmul.u32.u64.low %v12088_v54, %v1097_v8  ;;  %v12148_v22 = vmul.u32.u64.high %v12088_v54, %v1097_v8, %v12147_v61  ;;  %v9905_v19 = vadd.s32 4294967294, %v806_v53  ;;  %v1089_v51 = vsel %vm1083_vm5, %v1086_v35, %v1088_v4 }
 0x1a3   :  { %v1108_v31 = vadd.s32 1, %v12130_v36  ;;  %v615_v57 = vsel %vm532_vm12, %v614_v10, %v12080_v32  ;;  %v12157_v33 = vadd.s32 3, %v12065_v13  ;;  %v12160_v26 = vand.u32 3, %v12065_v13 }
 0x1a4   :  { %vm957_vm6 = vcmp.gt.s32.totalorder %v956_v23, 0  ;;  %v12162_v42 = vmul.f32 %v924_v58, %v922_v6  ;;  %vm9906_vm7 = vcmp.lt.s32.totalorder %v9905_v19, 0  ;;  %v12166_v30 = vand.u32 8388607, %v16319_v28 }
 0x1a5   :  { %16506 = vst [vmem:[#allocation20_spill] sm:$0xff] %v12160_v26  ;;  %v958_v37 = vsel %vm957_vm6, %v956_v23, 0  ;;  %11173 = vcosq.f32 %v722_v14  ;;  %v809_v7 = vsel %vm9906_vm7, 0, %v9905_v19  ;;  %v1105_v0 = vmul.u32 %v12088_v54, %v1089_v51 }
 0x1a6   :  { %vm1107_vm12 = vc.u32 %v12148_v22, %v12129_v60  ;;  %11175 = vsinq.f32 %v722_v14  ;;  %v810_v32 = vsub.s32 32, %v809_v7  ;;  %v814_v13 = vsub.s32 4294967266, %v809_v7 }
 0x1a7   :  { %v1109_v10 = vsel %vm1107_vm12, %v1108_v31, %v12130_v36  ;;  %v12175_v56 = vsel %vm12029_vm8, %v11678_v29, %v615_v57  ;;  %v960_v25 = vand.u32 31, %v958_v37  ;;  %v926_v63 = vxor.u32 2147483648, %v12162_v42 }
 0x1a8   :  { %v1110_v4 = vadd.s32 %v1109_v10, %v1105_v0  ;;  %v794_v54 = vadd.s32 %v12045_v5, %v12053_v9  ;;  %v815_v6 = vadd.s32 127, %v814_v13  ;;  %v954_v53 = vor.u32 8388608, %v12166_v30  ;;  %v12192_v0 = vpop.f32.mrb[14].mxu0 }
 0x1a9   :  { %vm844_vm9 = vcmp.lt.s32.totalorder %v11682_v38, 0  ;;  %v961_v8 = vsub.s32 32, %v960_v25  ;;  %v963_v46 = vshll.u32 %v16505_v15, %v960_v25  ;;  %v16507_v14 = vmov 2475754826  }
 0x1aa   :  { %v1111_v36 = vadd.s32 536870912, %v1110_v4  ;;  %v966_v61 = vshll.u32 %v16507_v14, %v960_v25  ;;  %v812_v23 = vshrl.u32 %v794_v54, %v810_v32  ;;  %v816_v58 = vshll.u32 %v815_v6, 23 }
 0x1ab   :  { %v12185_v19 = vshrl.u32 %v958_v37, 5  ;;  %v16508_v51 = vmov 2102212464   ;;  %vm1052_vm8 = vcmp.lt.s32.totalorder %v11696_v49, 0  ;;  %v964_v9 = vshrl.u32 %v16507_v14, %v961_v8 }
 0x1ac   :  { %v972_v31 = vshll.u32 %v16508_v51, %v960_v25  ;;  %v1112_v5 = vshrl.u32 %v1111_v36, 30  ;;  %v967_v57 = vshrl.u32 %v16502_v52, %v961_v8  ;;  %v969_v30 = vshll.u32 %v16502_v52, %v960_v25 }
 0x1ad   :  { %v811_v13 = vshll.u32 %v12106_v2, %v809_v7  ;;  %v970_v32 = vshrl.u32 %v16508_v51, %v961_v8  ;;  %v973_v37 = vshrl.u32 %v16503_v16, %v961_v8  ;;  %v1261_v10 = vand.u32 2139095040, %v11713_v11 }
 0x1ae   :  { %v817_v54 = vor.u32 4788187, %v816_v58  ;;  %v1113_v6 = vshll.u32 %v1112_v5, 30  ;;  %v965_v28 = vor.u32 %v964_v9, %v963_v46  ;;  %v968_v36 = vor.u32 %v967_v57, %v966_v61 }
 0x1af   :  { %v813_v35 = vor.u32 %v812_v23, %v811_v13  ;;  %v974_v26 = vor.u32 %v973_v37, %v972_v31  ;;  %v975_v12 = vshll.u32 %v16503_v16, %v960_v25  ;;  %vm978_vm10 = vcmp.lt.s32.totalorder %v12185_v19, 1  ;;  %v12200_v27 = vpop.eup %11173 }
 0x1b0   :  { %16509 = vst [vmem:[#allocation21_spill] sm:$0xff] %v12200_v27  ;;  %v16510_v2 = vand.u32 2147483647, %v11696_v49  ;;  %v12208_v29 = vsub.s32 %v1110_v4, %v1113_v6  ;;  %v971_v58 = vor.u32 %v970_v32, %v969_v30  ;;  %v976_v46 = vshrl.u32 %v16504_v62, %v961_v8  ;;  %v12212_v61 = vpop.eup %11175 }
 0x1b1   :  { %vm981_vm2 = vcmp.lt.s32.totalorder %v12185_v19, 4  ;;  %16513 = vst [vmem:[#allocation22_spill] sm:$0xff] %v12212_v61  ;;  %v16514_v25 = vand.u32 2147483647, %v11682_v38  ;;  %v16515_v23 = vmov 0  ;;  %v1136_v31 = vsub.s32 4, %v1112_v5 }
 0x1b2   :  { %vm12204_vm13 = vcmp.le.f32.partialorder %v16510_v2, 0.7853982  ;;  %v962_v9 = vshrl.u32 %v16505_v15, %v961_v8  ;;  %vm979_vm4 = vcmp.lt.s32.totalorder %v12185_v19, 2  ;;  %vm980_vm14 = vcmp.lt.s32.totalorder %v12185_v19, 3 }
 0x1b3   :  { %vm12216_vm15 = vcmp.le.f32.partialorder %v16514_v25, 0.7853982  ;;  %v818_v4 = vand.u32 2147483647, %v817_v54  ;;  %v1116_v57 = vsub.s32 0, %v12208_v29  ;;  %v977_v30 = vor.u32 %v976_v46, %v975_v12 }
 0x1b4   :  { %v16516_v23 = vsel %vm12216_vm15, 4294967295, %v16515_v23  ;;  %v986_v13 = vsel %vm978_vm10, %v965_v28, %v968_v36  ;;  %v927_v32 = vsel %vm844_vm9, %v926_v63, %v12162_v42  ;;  %vm740_vm5 = vcmp.lt.s32.totalorder %v11684_v39, 0 }
 0x1b5   :  { %16517 = vst [vmem:[#allocation23_spill] sm:$0xff] %v16516_v23  ;;  %v820_v37 = vcvt.s32.f32 %v813_v35  ;;  %v987_v8 = vsel %vm981_vm2, %v974_v26, 920167782  ;;  %v994_v6 = vshll.u32 %v954_v53, 8  ;;  %v9916_v2 = vmin.u32 %v1116_v57, %v12208_v29 }
 0x1b6   :  { %v983_v54 = vsel %vm981_vm2, %v971_v58, 2102212464  ;;  %v988_v12 = vsel %vm980_vm14, %v971_v58, %v987_v8  ;;  %v990_v46 = vsel %vm978_vm10, %v968_v36, %v971_v58  ;;  %v1137_v42 = vsel %vm1052_vm8, %v1136_v31, %v1112_v5 }
 0x1b7   :  { %v982_v35 = vsel %vm978_vm10, %v962_v9, %v965_v28  ;;  %v989_v63 = vsel %vm979_vm4, %v986_v13, %v988_v12  ;;  %v991_v53 = vsel %vm981_vm2, %v977_v30, 1326507024  ;;  %v821_v25 = vmul.f32 %v820_v37, %v818_v4 }
 0x1b8   :  { %v1118_v57 = vclz %v9916_v2  ;;  %v992_v8 = vsel %vm980_vm14, %v974_v26, %v991_v53  ;;  %v1262_v27 = vshrl.u32 %v1261_v10, 23  ;;  %v984_v58 = vsel %vm980_vm14, %v968_v36, %v983_v54 }
 0x1b9   :  { %v993_v5 = vsel %vm979_vm4, %v990_v46, %v992_v8  ;;  %v12253_v31 = vmul.u32.u64.low %v994_v6, %v989_v63  ;;  %v12254_v28 = vmul.u32.u64.high %v994_v6, %v989_v63, %v12253_v31  ;;  %v16518_v9 = vand.u32 2147483647, %v11684_v39 }
 0x1ba   :  { %v16519_v30 = vmov 0  ;;  %v824_v4 = vsub.s32 4, %v12090_v24  ;;  %v9917_v26 = vadd.s32 4294967294, %v1118_v57  ;;  %11177 = vcosq.f32 %v12175_v56 }
 0x1bb   :  { %vm12259_vm6 = vcmp.le.f32.partialorder %v16518_v9, 0.7853982  ;;  %v12264_v10 = vmul.u32.u64.low %v994_v6, %v993_v5  ;;  %v12265_v13 = vmul.u32.u64.high %v994_v6, %v993_v5, %v12264_v10  ;;  %v12269_v36 = vand.u32 3, %v12157_v33  ;;  %v12301_v5 = vpop.f32.mrb[15].mxu0 }
 0x1bc   :  { %v16520_v30 = vsel %vm12259_vm6, 4294967295, %v16519_v30  ;;  %v1139_v37 = vsel %vm12204_vm13, 0, %v1137_v42  ;;  %v9923_v2 = vadd.s32 4294967169, %v1262_v27  ;;  %v930_v54 = vsel %vm12216_vm15, %v11682_v38, %v927_v32 }
 0x1bd   :  { %16521 = vst [vmem:[#allocation24_spill] sm:$0xff] %v16520_v30  ;;  %16522 = vst [vmem:[#allocation25_spill] sm:$0xff] %v12269_v36  ;;  %v822_v12 = vxor.u32 2147483648, %v821_v25  ;;  %vm9918_vm7 = vcmp.lt.s32.totalorder %v9917_v26, 0  ;;  %v985_v46 = vsel %vm979_vm4, %v982_v35, %v984_v58  ;;  %v1004_v53 = vadd.s32 1, %v12254_v28 }
 0x1be   :  { %v12278_v63 = vsel %vm9918_vm7, 0, %v9917_v26  ;;  %v16327_v33 = vand.u32 2147483647, %v11713_v11  ;;  %v1268_v57 = vadd.s32 1, %v9923_v2  ;;  %11179 = vsinq.f32 %v12175_v56 }
 0x1bf   :  { %v16523_v27 = vsub.s32 4, %v12013_v43  ;;  %v12293_v19 = vsel %vm740_vm5, %v824_v4, %v12090_v24  ;;  %v1143_v42 = vadd.s32 3, %v1139_v37  ;;  %11181 = vcosq.f32 %v930_v54 }
 0x1c0   :  { %16525 = vst [vmem:[#allocation27_spill] sm:$0xff] %v12293_v19  ;;  %v1001_v35 = vmul.u32 %v994_v6, %v985_v46  ;;  %vm1003_vm12 = vc.u32 %v12265_v13, %v12253_v31  ;;  %vm1269_vm10 = vcmp.gt.s32.totalorder %v1268_v57, 0  ;;  %v823_v56 = vsel %vm740_vm5, %v822_v12, %v821_v25 }
 0x1c1   :  { %v12288_v32 = vsel %vm844_vm9, %v16523_v27, %v12013_v43  ;;  %v1126_v8 = vsub.s32 4294967266, %v12278_v63  ;;  %v1005_v43 = vsel %vm1003_vm12, %v1004_v53, %v12254_v28  ;;  %v1270_v58 = vsel %vm1269_vm10, %v1268_v57, 0 }
 0x1c2   :  { %16524 = vst [vmem:[#allocation26_spill] sm:$0xff] %v12288_v32  ;;  %11183 = vsinq.f32 %v930_v54  ;;  %v1006_v24 = vadd.s32 %v1005_v43, %v1001_v35  ;;  %v1265_v9 = vand.u32 8388607, %v16327_v33  ;;  %v1272_v6 = vand.u32 31, %v1270_v58 }
 0x1c3   :  { %v1106_v4 = vadd.s32 %v12129_v60, %v12148_v22  ;;  %v12307_v26 = vand.u32 3, %v1143_v42  ;;  %v12309_v10 = vand.u32 3, %v1139_v37  ;;  %v12315_v28 = vsel %vm12259_vm6, %v11684_v39, %v823_v56 }
 0x1c4   :  { %v1007_v2 = vadd.s32 536870912, %v1006_v24  ;;  %v1273_v54 = vsub.s32 32, %v1272_v6  ;;  %v1157_v12 = vand.u32 2139095040, %v11780_v59  ;;  %v1122_v46 = vsub.s32 32, %v12278_v63  ;;  %v12322_v22 = vpop.eup %11177 }
 0x1c5   :  { %16526 = vst [vmem:[#allocation28_spill] sm:$0xff] %v12307_v26  ;;  %16527 = vst [vmem:[#allocation29_spill] sm:$0xff] %v12309_v10  ;;  %v1127_v53 = vadd.s32 127, %v1126_v8  ;;  %v12319_v57 = vshrl.u32 %v1270_v58, 5  ;;  %v1275_v60 = vshll.u32 %v16505_v15, %v1272_v6  ;;  %v1278_v42 = vshll.u32 %v16507_v14, %v1272_v6 }
 0x1c6   :  { %16528 = vst [vmem:[#allocation30_spill] sm:$0xff] %v12322_v22  ;;  %v12324_v37 = vshrl.u32 %v1007_v2, 30  ;;  %v1276_v27 = vshrl.u32 %v16507_v14, %v1273_v54  ;;  %v1279_v35 = vshrl.u32 %v16502_v52, %v1273_v54  ;;  %v1281_v56 = vshll.u32 %v16502_v52, %v1272_v6 }
 0x1c7   :  { %v1282_v43 = vshrl.u32 %v16508_v51, %v1273_v54  ;;  %v1284_v8 = vshll.u32 %v16508_v51, %v1272_v6  ;;  %v1285_v58 = vshrl.u32 %v16503_v16, %v1273_v54  ;;  %11185 = vcosq.f32 %v12315_v28 }
 0x1c8   :  { %v1009_v33 = vshll.u32 %v12324_v37, 30  ;;  %v1266_v2 = vor.u32 8388608, %v1265_v9  ;;  %v1287_v25 = vshll.u32 %v16503_v16, %v1272_v6  ;;  %v12336_v10 = vpop.eup %11179  ;;  %v1288_v26 = vshrl.u32 %v16504_v62, %v1273_v54 }
 0x1c9   :  { %16529 = vst [vmem:[#allocation31_spill] sm:$0xff] %v12336_v10  ;;  %v1158_v38 = vshrl.u32 %v1157_v12, 23  ;;  %v16530_v23 = vand.u32 2147483647, %v11780_v59  ;;  %v16345_v39 = vand.u32 2147483647, %v11826_v34  ;;  %v12344_v30 = vpop.eup %11181  ;;  %v1124_v19 = vshrl.u32 %v1106_v4, %v1122_v46 }
 0x1ca   :  { %v12346_v61 = vsub.s32 %v1006_v24, %v1009_v33  ;;  %v1277_v22 = vor.u32 %v1276_v27, %v1275_v60  ;;  %v1280_v9 = vor.u32 %v1279_v35, %v1278_v42  ;;  %v1128_v36 = vshll.u32 %v1127_v53, 23 }
 0x1cb   :  { %v12341_v32 = vand.u32 8388607, %v16530_v23  ;;  %v1283_v6 = vor.u32 %v1282_v43, %v1281_v56  ;;  %v1286_v20 = vor.u32 %v1285_v58, %v1284_v8  ;;  %vm1290_vm9 = vcmp.lt.s32.totalorder %v12319_v57, 1 }
 0x1cc   :  { %v12349_v10 = vpop.eup %11183  ;;  %v1012_v12 = vsub.s32 0, %v12346_v61  ;;  %v1274_v23 = vshrl.u32 %v16505_v15, %v1273_v54  ;;  %v1289_v17 = vor.u32 %v1288_v26, %v1287_v25  ;;  %vm1293_vm2 = vcmp.lt.s32.totalorder %v12319_v57, 4 }
 0x1cd   :  { %v1123_v33 = vshll.u32 %v12208_v29, %v12278_v63  ;;  %vm1292_vm4 = vcmp.lt.s32.totalorder %v12319_v57, 3  ;;  %v1306_v24 = vshll.u32 %v1266_v2, 8  ;;  %v9919_v4 = vadd.s32 4294967169, %v1158_v38 }
 0x1ce   :  { %v9912_v46 = vmin.u32 %v1012_v12, %v12346_v61  ;;  %vm1291_vm14 = vcmp.lt.s32.totalorder %v12319_v57, 2  ;;  %v1295_v53 = vsel %vm1293_vm2, %v1283_v6, 2102212464  ;;  %v1298_v54 = vsel %vm1290_vm9, %v1277_v22, %v1280_v9 }
 0x1cf   :  { %v1125_v26 = vor.u32 %v1124_v19, %v1123_v33  ;;  %v1129_v25 = vor.u32 4788187, %v1128_v36  ;;  %v1299_v60 = vsel %vm1293_vm2, %v1286_v20, 920167782  ;;  %v1302_v29 = vsel %vm1290_vm9, %v1280_v9, %v1283_v6 }
 0x1d0   :  { %v1014_v63 = vclz %v9912_v46  ;;  %v1294_v38 = vsel %vm1290_vm9, %v1274_v23, %v1277_v22  ;;  %v1300_v27 = vsel %vm1292_vm4, %v1283_v6, %v1299_v60  ;;  %v1303_v42 = vsel %vm1293_vm2, %v1289_v17, 1326507024 }
 0x1d1   :  { %v1296_v19 = vsel %vm1292_vm4, %v1280_v9, %v1295_v53  ;;  %v1301_v36 = vsel %vm1291_vm14, %v1298_v54, %v1300_v27  ;;  %v1304_v35 = vsel %vm1292_vm4, %v1286_v20, %v1303_v42  ;;  %v1164_v56 = vadd.s32 1, %v9919_v4  ;;  %v12379_v43 = vpop.eup %11185 }
 0x1d2   :  { %vm948_vm5 = vcmp.lt.s32.totalorder %v11701_v55, 0  ;;  %v9913_v22 = vadd.s32 4294967294, %v1014_v63  ;;  %v1305_v8 = vsel %vm1291_vm14, %v1302_v29, %v1304_v35  ;;  %v1130_v2 = vand.u32 2147483647, %v1129_v25 }
 0x1d3   :  { %v12384_v58 = vmul.u32.u64.low %v1306_v24, %v1301_v36  ;;  %v12385_v17 = vmul.u32.u64.high %v1306_v24, %v1301_v36, %v12384_v58  ;;  %v12388_v9 = vmul.u32.u64.low %v1306_v24, %v1305_v8  ;;  %v12389_v6 = vmul.u32.u64.high %v1306_v24, %v1305_v8, %v12388_v9 }
 0x1d4   :  { %vm1165_vm7 = vcmp.gt.s32.totalorder %v1164_v56, 0  ;;  %v1002_v20 = vadd.s32 %v12253_v31, %v12265_v13  ;;  %vm9914_vm12 = vcmp.lt.s32.totalorder %v9913_v22, 0  ;;  %v1297_v12 = vsel %vm1291_vm14, %v1294_v38, %v1296_v19 }
 0x1d5   :  { %v1166_v23 = vsel %vm1165_vm7, %v1164_v56, 0  ;;  %v1132_v33 = vcvt.s32.f32 %v1125_v26  ;;  %v1017_v4 = vsel %vm9914_vm12, 0, %v9913_v22  ;;  %v1162_v46 = vor.u32 8388608, %v12341_v32 }
 0x1d6   :  { %v1168_v53 = vand.u32 31, %v1166_v23  ;;  %v16531_v54 = vand.u32 2147483647, %v11701_v55  ;;  %v1018_v60 = vsub.s32 32, %v1017_v4  ;;  %v1022_v29 = vsub.s32 4294967266, %v1017_v4 }
 0x1d7   :  { %v1032_v31 = vsub.s32 4, %v12324_v37  ;;  %v1316_v13 = vadd.s32 1, %v12385_v17  ;;  %v1133_v57 = vmul.f32 %v1132_v33, %v1130_v2  ;;  %v1313_v63 = vmul.u32 %v1306_v24, %v1297_v12 }
 0x1d8   :  { %vm12398_vm10 = vcmp.le.f32.partialorder %v16531_v54, 0.7853982  ;;  %vm1315_vm9 = vc.u32 %v12389_v6, %v12384_v58  ;;  %v1169_v26 = vsub.s32 32, %v1168_v53  ;;  %v1023_v32 = vadd.s32 127, %v1022_v29 }
 0x1d9   :  { %v1317_v38 = vsel %vm1315_vm9, %v1316_v13, %v12385_v17  ;;  %v1171_v27 = vshll.u32 %v16505_v15, %v1168_v53  ;;  %v1174_v42 = vshll.u32 %v16507_v14, %v1168_v53  ;;  %v12409_v36 = vshrl.u32 %v1166_v23, 5 }
 0x1da   :  { %v1318_v19 = vadd.s32 %v1317_v38, %v1313_v63  ;;  %v1172_v35 = vshrl.u32 %v16507_v14, %v1169_v26  ;;  %v1175_v56 = vshrl.u32 %v16502_v52, %v1169_v26  ;;  %v1020_v22 = vshrl.u32 %v1002_v20, %v1018_v60 }
 0x1db   :  { %v1024_v24 = vshll.u32 %v1023_v32, 23  ;;  %v1177_v8 = vshll.u32 %v16502_v52, %v1168_v53  ;;  %v1178_v2 = vshrl.u32 %v16508_v51, %v1169_v26  ;;  %v1019_v9 = vshll.u32 %v12346_v61, %v1017_v4 }
 0x1dc   :  { %v1033_v17 = vsel %vm948_vm5, %v1032_v31, %v12324_v37  ;;  %v1319_v12 = vadd.s32 536870912, %v1318_v19  ;;  %v1180_v23 = vshll.u32 %v16508_v51, %v1168_v53  ;;  %v1173_v54 = vor.u32 %v1172_v35, %v1171_v27 }
 0x1dd   :  { %v1025_v33 = vor.u32 4788187, %v1024_v24  ;;  %v1176_v29 = vor.u32 %v1175_v56, %v1174_v42  ;;  %v1181_v13 = vshrl.u32 %v16503_v16, %v1169_v26  ;;  %v1183_v60 = vshll.u32 %v16503_v16, %v1168_v53 }
 0x1de   :  { %v1320_v20 = vshrl.u32 %v1319_v12, 30  ;;  %v1184_v63 = vshrl.u32 %v16504_v62, %v1169_v26  ;;  %vm1186_vm2 = vcmp.lt.s32.totalorder %v12409_v36, 1  ;;  %v1134_v61 = vxor.u32 2147483648, %v1133_v57 }
 0x1df   :  { %v1021_v4 = vor.u32 %v1020_v22, %v1019_v9  ;;  %vm1260_vm4 = vcmp.lt.s32.totalorder %v11713_v11, 0  ;;  %v1179_v37 = vor.u32 %v1178_v2, %v1177_v8  ;;  %v1182_v31 = vor.u32 %v1181_v13, %v1180_v23 }
 0x1e0   :  { %v1035_v32 = vsel %vm12398_vm10, 0, %v1033_v17  ;;  %v1321_v38 = vshll.u32 %v1320_v20, 30  ;;  %vm1188_vm14 = vcmp.lt.s32.totalorder %v12409_v36, 3  ;;  %vm1189_vm7 = vcmp.lt.s32.totalorder %v12409_v36, 4 }
 0x1e1   :  { %v1026_v27 = vand.u32 2147483647, %v1025_v33  ;;  %v1185_v53 = vor.u32 %v1184_v63, %v1183_v60  ;;  %vm1187_vm12 = vcmp.lt.s32.totalorder %v12409_v36, 2  ;;  %v1194_v42 = vsel %vm1186_vm2, %v1173_v54, %v1176_v29 }
 0x1e2   :  { %v16534_v35 = vand.u32 2147483647, %v11713_v11  ;;  %v12438_v22 = vsub.s32 %v1318_v19, %v1321_v38  ;;  %v1170_v24 = vshrl.u32 %v16505_v15, %v1169_v26  ;;  %v1195_v8 = vsel %vm1189_vm7, %v1182_v31, 920167782 }
 0x1e3   :  { %v1202_v2 = vshll.u32 %v1162_v46, 8  ;;  %v1028_v9 = vcvt.s32.f32 %v1021_v4  ;;  %v1039_v17 = vadd.s32 3, %v1035_v32  ;;  %v1191_v12 = vsel %vm1189_vm7, %v1179_v37, 2102212464 }
 0x1e4   :  { %vm12434_vm9 = vcmp.le.f32.partialorder %v16534_v35, 0.7853982  ;;  %v1196_v23 = vsel %vm1188_vm14, %v1179_v37, %v1195_v8  ;;  %v1135_v33 = vsel %vm1052_vm8, %v1134_v61, %v1133_v57  ;;  %v1324_v19 = vsub.s32 0, %v12438_v22 }
 0x1e5   :  { %v1344_v13 = vsub.s32 4, %v1320_v20  ;;  %v1197_v26 = vsel %vm1187_vm12, %v1194_v42, %v1196_v23  ;;  %v1029_v60 = vmul.f32 %v1028_v9, %v1026_v27  ;;  %v1198_v46 = vsel %vm1186_vm2, %v1176_v29, %v1179_v37 }
 0x1e6   :  { %v1199_v63 = vsel %vm1189_vm7, %v1185_v53, 1326507024  ;;  %v1469_v4 = vand.u32 2139095040, %v11826_v34  ;;  %v9924_v38 = vmin.u32 %v1324_v19, %v12438_v22  ;;  %v1190_v57 = vsel %vm1186_vm2, %v1170_v24, %v1173_v54 }
 0x1e7   :  { %v1192_v61 = vsel %vm1188_vm14, %v1176_v29, %v1191_v12  ;;  %v1200_v42 = vsel %vm1188_vm14, %v1182_v31, %v1199_v63  ;;  %11187 = vsinq.f32 %v12315_v28  ;;  %v1345_v8 = vsel %vm1260_vm4, %v1344_v13, %v1320_v20 }
 0x1e8   :  { %v1201_v37 = vsel %vm1187_vm12, %v1198_v46, %v1200_v42  ;;  %v12467_v27 = vmul.u32.u64.low %v1202_v2, %v1197_v26  ;;  %v12468_v53 = vmul.u32.u64.high %v1202_v2, %v1197_v26, %v12467_v27  ;;  %v1326_v35 = vclz %v9924_v38 }
 0x1e9   :  { %v12472_v9 = vmul.u32.u64.low %v1202_v2, %v1201_v37  ;;  %v12473_v54 = vmul.u32.u64.high %v1202_v2, %v1201_v37, %v12472_v9  ;;  %v1138_v29 = vsel %vm12204_vm13, %v11696_v49, %v1135_v33  ;;  %v12478_v31 = vand.u32 3, %v1035_v32 }
 0x1ea   :  { %v1193_v28 = vsel %vm1187_vm12, %v1190_v57, %v1192_v61  ;;  %v1470_v24 = vshrl.u32 %v1469_v4, 23  ;;  %v1030_v12 = vxor.u32 2147483648, %v1029_v60  ;;  %v12482_v23 = vand.u32 3, %v1039_v17 }
 0x1eb   :  { %16537 = vst [vmem:[#allocation32_spill] sm:$0xff] %v12478_v31  ;;  %v9925_v19 = vadd.s32 4294967294, %v1326_v35  ;;  %v1473_v20 = vand.u32 8388607, %v16345_v39  ;;  %v1347_v13 = vsel %vm12434_vm9, 0, %v1345_v8  ;;  %v1212_v26 = vadd.s32 1, %v12468_v53 }
 0x1ec   :  { %16538 = vst [vmem:[#allocation33_spill] sm:$0xff] %v12482_v23  ;;  %v9931_v7 = vadd.s32 4294967169, %v1470_v24  ;;  %v1365_v32 = vand.u32 2139095040, %v11916_v1  ;;  %11189 = vcosq.f32 %v1138_v29  ;;  %v1209_v36 = vmul.u32 %v1202_v2, %v1193_v28 }
 0x1ed   :  { %vm9926_vm8 = vcmp.lt.s32.totalorder %v9925_v19, 0  ;;  %vm1211_vm13 = vc.u32 %v12473_v54, %v12467_v27  ;;  %v16344_v63 = vand.u32 2147483647, %v11916_v1  ;;  %v1031_v4 = vsel %vm948_vm5, %v1030_v12, %v1029_v60 }
 0x1ee   :  { %v1329_v33 = vsel %vm9926_vm8, 0, %v9925_v19  ;;  %v1213_v17 = vsel %vm1211_vm13, %v1212_v26, %v12468_v53  ;;  %v1476_v46 = vadd.s32 1, %v9931_v7  ;;  %v1351_v57 = vadd.s32 3, %v1347_v13 }
 0x1ef   :  { %v1334_v38 = vsub.s32 4294967266, %v1329_v33  ;;  %v1214_v61 = vadd.s32 %v1213_v17, %v1209_v36  ;;  %v1330_v42 = vsub.s32 32, %v1329_v33  ;;  %v1474_v37 = vor.u32 8388608, %v1473_v20 }
 0x1f0   :  { %vm1477_vm2 = vcmp.gt.s32.totalorder %v1476_v46, 0  ;;  %v1366_v35 = vshrl.u32 %v1365_v32, 23  ;;  %11191 = vsinq.f32 %v1138_v29  ;;  %v12500_v53 = vsel %vm12398_vm10, %v11701_v55, %v1031_v4 }
 0x1f1   :  { %v1335_v2 = vadd.s32 127, %v1334_v38  ;;  %v1215_v8 = vadd.s32 536870912, %v1214_v61  ;;  %v1478_v9 = vsel %vm1477_vm2, %v1476_v46, 0  ;;  %v12495_v28 = vpop.eup %11187  ;;  %v1314_v60 = vadd.s32 %v12384_v58, %v12389_v6 }
 0x1f2   :  { %v12504_v24 = vand.u32 3, %v1347_v13  ;;  %v1480_v12 = vand.u32 31, %v1478_v9  ;;  %v12506_v19 = vand.u32 3, %v1351_v57  ;;  %v12510_v29 = vand.u32 8388607, %v16344_v63 }
 0x1f3   :  { %v1216_v20 = vshrl.u32 %v1215_v8, 30  ;;  %v1332_v7 = vshrl.u32 %v1314_v60, %v1330_v42  ;;  %v12513_v25 = vshll.u32 %v1474_v37, 8  ;;  %v9927_v36 = vadd.s32 4294967169, %v1366_v35 }
 0x1f4   :  { %16539 = vst [vmem:[#allocation34_spill] sm:$0xff] %v12504_v24  ;;  %16540 = vst [vmem:[#allocation35_spill] sm:$0xff] %v12506_v19  ;;  %v1481_v32 = vsub.s32 32, %v1480_v12  ;;  %v1336_v17 = vshll.u32 %v1335_v2, 23  ;;  %v12516_v58 = vadd.s32 %v12467_v27, %v12473_v54  ;;  %v1483_v13 = vshll.u32 %v16505_v15, %v1480_v12 }
 0x1f5   :  { %v1217_v6 = vshll.u32 %v1216_v20, 30  ;;  %v1331_v46 = vshll.u32 %v12438_v22, %v1329_v33  ;;  %vm1156_vm5 = vcmp.lt.s32.totalorder %v11780_v59, 0  ;;  %v1486_v38 = vshll.u32 %v16507_v14, %v1480_v12 }
 0x1f6   :  { %v1484_v4 = vshrl.u32 %v16507_v14, %v1481_v32  ;;  %v1487_v57 = vshrl.u32 %v16502_v52, %v1481_v32  ;;  %v12524_v42 = vpop.eup %11189  ;;  %v1479_v35 = vshrl.u32 %v1478_v9, 5  ;;  %v1489_v27 = vshll.u32 %v16502_v52, %v1480_v12 }
 0x1f7   :  { %16541 = vst [vmem:[#allocation36_spill] sm:$0xff] %v12524_v42  ;;  %v12526_v37 = vsub.s32 %v1214_v61, %v1217_v6  ;;  %v1490_v54 = vshrl.u32 %v16508_v51, %v1481_v32  ;;  %v1333_v2 = vor.u32 %v1332_v7, %v1331_v46  ;;  %v1492_v22 = vshll.u32 %v16508_v51, %v1480_v12 }
 0x1f8   :  { %v1372_v8 = vadd.s32 1, %v9927_v36  ;;  %v1337_v60 = vor.u32 4788187, %v1336_v17  ;;  %v1240_v26 = vsub.s32 4, %v1216_v20  ;;  %v1485_v39 = vor.u32 %v1484_v4, %v1483_v13 }
 0x1f9   :  { %v1220_v63 = vsub.s32 0, %v12526_v37  ;;  %v1488_v24 = vor.u32 %v1487_v57, %v1486_v38  ;;  %v1493_v61 = vshrl.u32 %v16503_v16, %v1481_v32  ;;  %v1495_v9 = vshll.u32 %v16503_v16, %v1480_v12 }
 0x1fa   :  { %v1496_v6 = vshrl.u32 %v16504_v62, %v1481_v32  ;;  %v12536_v19 = vpop.eup %11191  ;;  %v16543_v7 = vand.u32 2147483647, %v11780_v59  ;;  %v1482_v17 = vshrl.u32 %v16505_v15, %v1481_v32  ;;  %v1491_v13 = vor.u32 %v1490_v54, %v1489_v27 }
 0x1fb   :  { %16542 = vst [vmem:[#allocation37_spill] sm:$0xff] %v12536_v19  ;;  %v9920_v36 = vmin.u32 %v1220_v63, %v12526_v37  ;;  %vm1498_vm14 = vcmp.lt.s32.totalorder %v1479_v35, 1  ;;  %v1494_v4 = vor.u32 %v1493_v61, %v1492_v22  ;;  %vm1500_vm7 = vcmp.lt.s32.totalorder %v1479_v35, 3 }
 0x1fc   :  { %vm12540_vm10 = vcmp.le.f32.partialorder %v16543_v7, 0.7853982  ;;  %v1497_v38 = vor.u32 %v1496_v6, %v1495_v9  ;;  %vm1501_vm12 = vcmp.lt.s32.totalorder %v1479_v35, 4  ;;  %vm1499_vm8 = vcmp.lt.s32.totalorder %v1479_v35, 2 }
 0x1fd   :  { %v1222_v12 = vclz %v9920_v36  ;;  %v1503_v57 = vsel %vm1501_vm12, %v1491_v13, 2102212464  ;;  %v1338_v7 = vand.u32 2147483647, %v1337_v60  ;;  %v1340_v31 = vcvt.s32.f32 %v1333_v2 }
 0x1fe   :  { %v1506_v42 = vsel %vm1498_vm14, %v1485_v39, %v1488_v24  ;;  %v1507_v63 = vsel %vm1501_vm12, %v1494_v4, 920167782  ;;  %v1241_v32 = vsel %vm1156_vm5, %v1240_v26, %v1216_v20  ;;  %v1502_v27 = vsel %vm1498_vm14, %v1482_v17, %v1485_v39 }
 0x1ff   :  { %v9921_v19 = vadd.s32 4294967294, %v1222_v12  ;;  %v1508_v54 = vsel %vm1500_vm7, %v1491_v13, %v1507_v63  ;;  %v1504_v22 = vsel %vm1500_vm7, %v1488_v24, %v1503_v57  ;;  %v1510_v9 = vsel %vm1498_vm14, %v1488_v24, %v1491_v13 }
 0x200   :  { %v1509_v61 = vsel %vm1499_vm8, %v1506_v42, %v1508_v54  ;;  %v1511_v2 = vsel %vm1501_vm12, %v1497_v38, 1326507024  ;;  %v1341_v20 = vmul.f32 %v1340_v31, %v1338_v7  ;;  %vm1373_vm2 = vcmp.gt.s32.totalorder %v1372_v8, 0 }
 0x201   :  { %vm9922_vm13 = vcmp.lt.s32.totalorder %v9921_v19, 0  ;;  %v1512_v60 = vsel %vm1500_vm7, %v1494_v4, %v1511_v2  ;;  %v12560_v6 = vmul.u32.u64.low %v12513_v25, %v1509_v61  ;;  %v12561_v36 = vmul.u32.u64.high %v12513_v25, %v1509_v61, %v12560_v6 }
 0x202   :  { %v1225_v39 = vsel %vm9922_vm13, 0, %v9921_v19  ;;  %v1513_v26 = vsel %vm1499_vm8, %v1510_v9, %v1512_v60  ;;  %v1505_v42 = vsel %vm1499_vm8, %v1502_v27, %v1504_v22  ;;  %v1374_v24 = vsel %vm1373_vm2, %v1372_v8, 0 }
 0x203   :  { %v1226_v17 = vsub.s32 32, %v1225_v39  ;;  %v1230_v12 = vsub.s32 4294967266, %v1225_v39  ;;  %v12568_v13 = vsel %vm12540_vm10, 0, %v1241_v32  ;;  %v1376_v57 = vand.u32 31, %v1374_v24 }
 0x204   :  { %v12571_v4 = vmul.u32.u64.low %v12513_v25, %v1513_v26  ;;  %v12572_v38 = vmul.u32.u64.high %v12513_v25, %v1513_v26, %v12571_v4  ;;  %v1227_v31 = vshll.u32 %v12526_v37, %v1225_v39  ;;  %v1524_v63 = vadd.s32 1, %v12561_v36 }
 0x205   :  { %v1228_v19 = vshrl.u32 %v12516_v58, %v1226_v17  ;;  %v1231_v7 = vadd.s32 127, %v1230_v12  ;;  %v1342_v54 = vxor.u32 2147483648, %v1341_v20  ;;  %v1521_v35 = vmul.u32 %v12513_v25, %v1505_v42 }
 0x206   :  { %v12578_v8 = vshrl.u32 %v1374_v24, 5  ;;  %v1377_v27 = vsub.s32 32, %v1376_v57  ;;  %v1379_v61 = vshll.u32 %v16505_v15, %v1376_v57  ;;  %v1382_v9 = vshll.u32 %v16507_v14, %v1376_v57 }
 0x207   :  { %v1229_v32 = vor.u32 %v1228_v19, %v1227_v31  ;;  %v1232_v22 = vshll.u32 %v1231_v7, 23  ;;  %vm1523_vm14 = vc.u32 %v12572_v38, %v12560_v6  ;;  %v1385_v37 = vshll.u32 %v16502_v52, %v1376_v57 }
 0x208   :  { %v1380_v58 = vshrl.u32 %v16507_v14, %v1377_v27  ;;  %v1388_v2 = vshll.u32 %v16508_v51, %v1376_v57  ;;  %v1525_v25 = vsel %vm1523_vm14, %v1524_v63, %v12561_v36  ;;  %v1383_v39 = vshrl.u32 %v16502_v52, %v1377_v27 }
 0x209   :  { %v1233_v60 = vor.u32 4788187, %v1232_v22  ;;  %v1391_v26 = vshll.u32 %v16503_v16, %v1376_v57  ;;  %v1236_v17 = vcvt.s32.f32 %v1229_v32  ;;  %v1526_v12 = vadd.s32 %v1525_v25, %v1521_v35 }
 0x20a   :  { %v1386_v42 = vshrl.u32 %v16508_v51, %v1377_v27  ;;  %v1389_v24 = vshrl.u32 %v16503_v16, %v1377_v27  ;;  %vm1468_vm7 = vcmp.lt.s32.totalorder %v11826_v34, 0  ;;  %v1381_v31 = vor.u32 %v1380_v58, %v1379_v61 }
 0x20b   :  { %v1234_v4 = vand.u32 2147483647, %v1233_v60  ;;  %v1384_v19 = vor.u32 %v1383_v39, %v1382_v9  ;;  %v1392_v7 = vshrl.u32 %v16504_v62, %v1377_v27  ;;  %v1527_v22 = vadd.s32 536870912, %v1526_v12 }
 0x20c   :  { %v1387_v33 = vor.u32 %v1386_v42, %v1385_v37  ;;  %v1390_v36 = vor.u32 %v1389_v24, %v1388_v2  ;;  %vm1394_vm12 = vcmp.lt.s32.totalorder %v12578_v8, 1  ;;  %vm1396_vm8 = vcmp.lt.s32.totalorder %v12578_v8, 3 }
 0x20d   :  { %v1237_v63 = vmul.f32 %v1236_v17, %v1234_v4  ;;  %v1393_v57 = vor.u32 %v1392_v7, %v1391_v26  ;;  %vm1397_vm13 = vcmp.lt.s32.totalorder %v12578_v8, 4  ;;  %v1343_v35 = vsel %vm1260_vm4, %v1342_v54, %v1341_v20 }
 0x20e   :  { %v1528_v32 = vshrl.u32 %v1527_v22, 30  ;;  %v1378_v61 = vshrl.u32 %v16505_v15, %v1377_v27  ;;  %v16546_v9 = vand.u32 2139095040, %v11995_v3  ;;  %v16547_v37 = vand.u32 2147483647, %v11826_v34 }
 0x20f   :  { %v1238_v60 = vxor.u32 2147483648, %v1237_v63  ;;  %vm1395_vm14 = vcmp.lt.s32.totalorder %v12578_v8, 2  ;;  %v1402_v25 = vsel %vm1394_vm12, %v1381_v31, %v1384_v19  ;;  %v1403_v20 = vsel %vm1397_vm13, %v1390_v36, 920167782 }
 0x210   :  { %v1678_v58 = vshrl.u32 %v16546_v9, 23  ;;  %vm12604_vm2 = vcmp.le.f32.partialorder %v16547_v37, 0.7853982  ;;  %v1529_v54 = vshll.u32 %v1528_v32, 30  ;;  %v1552_v27 = vsub.s32 4, %v1528_v32 }
 0x211   :  { %v1404_v39 = vsel %vm1396_vm8, %v1387_v33, %v1403_v20  ;;  %v1406_v26 = vsel %vm1394_vm12, %v1384_v19, %v1387_v33  ;;  %11193 = vcosq.f32 %v12500_v53  ;;  %v1399_v17 = vsel %vm1397_vm13, %v1387_v33, 2102212464 }
 0x212   :  { %v1407_v42 = vsel %vm1397_vm13, %v1393_v57, 1326507024  ;;  %v16550_v24 = vor.u32 8388608, %v12510_v29  ;;  %v1247_v7 = vadd.s32 3, %v12568_v13  ;;  %v12625_v22 = vsub.s32 %v1526_v12, %v1529_v54 }
 0x213   :  { %v1405_v9 = vsel %vm1395_vm14, %v1402_v25, %v1404_v39  ;;  %v1408_v37 = vsel %vm1396_vm8, %v1390_v36, %v1407_v42  ;;  %v1346_v33 = vsel %vm12434_vm9, %v11713_v11, %v1343_v35  ;;  %v1398_v57 = vsel %vm1394_vm12, %v1378_v61, %v1381_v31 }
 0x214   :  { %v1410_v4 = vshll.u32 %v16550_v24, 8  ;;  %v1409_v29 = vsel %vm1395_vm14, %v1406_v26, %v1408_v37  ;;  %v9939_v20 = vadd.s32 4294967169, %v1678_v58  ;;  %v1239_v12 = vsel %vm1156_vm5, %v1238_v60, %v1237_v63 }
 0x215   :  { %v1532_v54 = vsub.s32 0, %v12625_v22  ;;  %v1553_v25 = vsel %vm1468_vm7, %v1552_v27, %v1528_v32  ;;  %v1400_v36 = vsel %vm1396_vm8, %v1384_v19, %v1399_v17  ;;  %11195 = vsinq.f32 %v12500_v53 }
 0x216   :  { %v12645_v56 = vmul.u32.u64.low %v1410_v4, %v1409_v29  ;;  %v12646_v35 = vmul.u32.u64.high %v1410_v4, %v1409_v29, %v12645_v56  ;;  %v12648_v39 = vmul.u32.u64.low %v1410_v4, %v1405_v9  ;;  %v12649_v31 = vmul.u32.u64.high %v1410_v4, %v1405_v9, %v12648_v39 }
 0x217   :  { %v9932_v61 = vmin.u32 %v1532_v54, %v12625_v22  ;;  %v16551_v63 = vand.u32 2147483647, %v11995_v3  ;;  %v1684_v60 = vadd.s32 1, %v9939_v20  ;;  %11197 = vcosq.f32 %v1346_v33 }
 0x218   :  { %v12656_v32 = vand.u32 3, %v1247_v7  ;;  %v12659_v19 = vand.u32 3, %v12568_v13  ;;  %v1401_v27 = vsel %vm1395_vm14, %v1398_v57, %v1400_v36  ;;  %v12666_v26 = vsel %vm12540_vm10, %v11780_v59, %v1239_v12 }
 0x219   :  { %v1681_v58 = vand.u32 8388607, %v16551_v63  ;;  %v1534_v53 = vclz %v9932_v61  ;;  %v12670_v17 = vsel %vm12604_vm2, 0, %v1553_v25  ;;  %vm1685_vm4 = vcmp.gt.s32.totalorder %v1684_v60, 0 }
 0x21a   :  { %16552 = vst [vmem:[#allocation38_spill] sm:$0xff] %v12656_v32  ;;  %16553 = vst [vmem:[#allocation39_spill] sm:$0xff] %v12659_v19  ;;  %11199 = vsinq.f32 %v1346_v33  ;;  %vm1419_vm9 = vc.u32 %v12646_v35, %v12648_v39  ;;  %v1420_v13 = vadd.s32 1, %v12649_v31  ;;  %v1686_v42 = vsel %vm1685_vm4, %v1684_v60, 0 }
 0x21b   :  { %v1522_v8 = vadd.s32 %v12560_v6, %v12572_v38  ;;  %v9933_v24 = vadd.s32 4294967294, %v1534_v53  ;;  %v1417_v46 = vmul.u32 %v1410_v4, %v1401_v27  ;;  %v1688_v7 = vand.u32 31, %v1686_v42  ;;  %v12677_v9 = vpop.eup %11193 }
 0x21c   :  { %16554 = vst [vmem:[#allocation40_spill] sm:$0xff] %v12677_v9  ;;  %11201 = vcosq.f32 %v12666_v26  ;;  %v12681_v37 = vadd.s32 3, %v12670_v17  ;;  %v1421_v33 = vsel %vm1419_vm9, %v1420_v13, %v12649_v31  ;;  %v1682_v57 = vor.u32 8388608, %v1681_v58 }
 0x21d   :  { %vm9934_vm5 = vcmp.lt.s32.totalorder %v9933_v24, 0  ;;  %v1422_v29 = vadd.s32 %v1421_v33, %v1417_v46  ;;  %v1689_v20 = vsub.s32 32, %v1688_v7  ;;  %v12685_v6 = vshrl.u32 %v1686_v42, 5 }
 0x21e   :  { %v1537_v54 = vsel %vm9934_vm5, 0, %v9933_v24  ;;  %v1691_v38 = vshll.u32 %v16505_v15, %v1688_v7  ;;  %v1573_v4 = vand.u32 2139095040, %v12078_v21  ;;  %v1694_v61 = vshll.u32 %v16507_v14, %v1688_v7 }
 0x21f   :  { %v1538_v25 = vsub.s32 32, %v1537_v54  ;;  %v1542_v36 = vsub.s32 4294967266, %v1537_v54  ;;  %v1423_v56 = vadd.s32 536870912, %v1422_v29  ;;  %v1539_v31 = vshll.u32 %v12625_v22, %v1537_v54  ;;  %v12695_v27 = vpop.eup %11195 }
 0x220   :  { %vm1364_vm10 = vcmp.lt.s32.totalorder %v11916_v1, 0  ;;  %v1692_v63 = vshrl.u32 %v16507_v14, %v1689_v20  ;;  %v1695_v58 = vshrl.u32 %v16502_v52, %v1689_v20  ;;  %v1700_v60 = vshll.u32 %v16508_v51, %v1688_v7  ;;  %16555 = vst [vmem:[#allocation41_spill] sm:$0xff] %v12695_v27 }
 0x221   :  { %v1540_v53 = vshrl.u32 %v1522_v8, %v1538_v25  ;;  %v1543_v13 = vadd.s32 127, %v1542_v36  ;;  %v1424_v42 = vshrl.u32 %v1423_v56, 30  ;;  %v1701_v24 = vshrl.u32 %v16503_v16, %v1689_v20  ;;  %v12698_v46 = vpop.eup %11197 }
 0x222   :  { %16556 = vst [vmem:[#allocation42_spill] sm:$0xff] %v12698_v46  ;;  %v1697_v33 = vshll.u32 %v16502_v52, %v1688_v7  ;;  %v1698_v22 = vshrl.u32 %v16508_v51, %v1689_v20  ;;  %v1703_v54 = vshll.u32 %v16503_v16, %v1688_v7  ;;  %v12703_v12 = vshll.u32 %v1682_v57, 8 }
 0x223   :  { %v1541_v19 = vor.u32 %v1540_v53, %v1539_v31  ;;  %v1544_v11 = vshll.u32 %v1543_v13, 23  ;;  %v16557_v32 = vand.u32 2147483647, %v11916_v1  ;;  %v1425_v25 = vshll.u32 %v1424_v42, 30 }
 0x224   :  { %v1690_v36 = vshrl.u32 %v16505_v15, %v1689_v20  ;;  %v12712_v56 = vpop.eup %11199  ;;  %v1693_v46 = vor.u32 %v1692_v63, %v1691_v38  ;;  %v1696_v59 = vor.u32 %v1695_v58, %v1694_v61  ;;  %v1702_v49 = vor.u32 %v1701_v24, %v1700_v60 }
 0x225   :  { %vm12707_vm12 = vcmp.le.f32.partialorder %v16557_v32, 0.7853982  ;;  %16560 = vst [vmem:[#allocation43_spill] sm:$0xff] %v12712_v56  ;;  %v1704_v7 = vshrl.u32 %v16504_v62, %v1689_v20  ;;  %v1545_v57 = vor.u32 4788187, %v1544_v11  ;;  %v12715_v9 = vsub.s32 %v1422_v29, %v1425_v25 }
 0x226   :  { %v1448_v31 = vsub.s32 4, %v1424_v42  ;;  %vm1706_vm8 = vcmp.lt.s32.totalorder %v12685_v6, 1  ;;  %v12718_v32 = vpop.eup %11201  ;;  %v1699_v53 = vor.u32 %v1698_v22, %v1697_v33  ;;  %vm1709_vm13 = vcmp.lt.s32.totalorder %v12685_v6, 4 }
 0x227   :  { %v1705_v13 = vor.u32 %v1704_v7, %v1703_v54  ;;  %v1574_v27 = vshrl.u32 %v1573_v4, 23  ;;  %v1546_v23 = vand.u32 2147483647, %v1545_v57  ;;  %v1548_v56 = vcvt.s32.f32 %v1541_v19 }
 0x228   :  { %v1428_v38 = vsub.s32 0, %v12715_v9  ;;  %vm1708_vm14 = vcmp.lt.s32.totalorder %v12685_v6, 3  ;;  %vm1707_vm4 = vcmp.lt.s32.totalorder %v12685_v6, 2  ;;  %v1711_v11 = vsel %vm1709_vm13, %v1699_v53, 2102212464 }
 0x229   :  { %v1714_v29 = vsel %vm1706_vm8, %v1693_v46, %v1696_v59  ;;  %v1715_v20 = vsel %vm1709_vm13, %v1702_v49, 920167782  ;;  %v1549_v61 = vmul.f32 %v1548_v56, %v1546_v23  ;;  %v1449_v19 = vsel %vm1364_vm10, %v1448_v31, %v1424_v42 }
 0x22a   :  { %v9928_v4 = vmin.u32 %v1428_v38, %v12715_v9  ;;  %v1710_v63 = vsel %vm1706_vm8, %v1690_v36, %v1693_v46  ;;  %v1712_v58 = vsel %vm1708_vm14, %v1696_v59, %v1711_v11  ;;  %v1716_v60 = vsel %vm1708_vm14, %v1699_v53, %v1715_v20 }
 0x22b   :  { %v1718_v24 = vsel %vm1706_vm8, %v1696_v59, %v1699_v53  ;;  %v1719_v23 = vsel %vm1709_vm13, %v1705_v13, 1326507024  ;;  %v1550_v33 = vxor.u32 2147483648, %v1549_v61  ;;  %v1717_v42 = vsel %vm1707_vm4, %v1714_v29, %v1716_v60 }
 0x22c   :  { %v1430_v22 = vclz %v9928_v4  ;;  %v1720_v46 = vsel %vm1708_vm14, %v1702_v49, %v1719_v23  ;;  %v1451_v54 = vsel %vm12707_vm12, 0, %v1449_v19  ;;  %v1713_v7 = vsel %vm1707_vm4, %v1710_v63, %v1712_v58 }
 0x22d   :  { %v1721_v25 = vsel %vm1707_vm4, %v1718_v24, %v1720_v46  ;;  %v12752_v36 = vmul.u32.u64.low %v12703_v12, %v1717_v42  ;;  %v12753_v59 = vmul.u32.u64.high %v12703_v12, %v1717_v42, %v12752_v36  ;;  %11203 = vsinq.f32 %v12666_v26 }
 0x22e   :  { %v9929_v56 = vadd.s32 4294967294, %v1430_v22  ;;  %v12759_v57 = vmul.u32.u64.low %v12703_v12, %v1721_v25  ;;  %v12760_v31 = vmul.u32.u64.high %v12703_v12, %v1721_v25, %v12759_v57  ;;  %v12764_v49 = vand.u32 3, %v12681_v37 }
 0x22f   :  { %v12767_v53 = vand.u32 3, %v12670_v17  ;;  %v9935_v13 = vadd.s32 4294967169, %v1574_v27  ;;  %v1551_v38 = vsel %vm1468_vm7, %v1550_v33, %v1549_v61  ;;  %v1455_v11 = vadd.s32 3, %v1451_v54 }
 0x230   :  { %16561 = vst [vmem:[#allocation44_spill] sm:$0xff] %v12764_v49  ;;  %vm9930_vm9 = vcmp.lt.s32.totalorder %v9929_v56, 0  ;;  %v16563_v6 = vand.u32 2147483647, %v12078_v21  ;;  %v1729_v4 = vmul.u32 %v12703_v12, %v1713_v7  ;;  %v1732_v26 = vadd.s32 1, %v12753_v59 }
 0x231   :  { %16562 = vst [vmem:[#allocation45_spill] sm:$0xff] %v12767_v53  ;;  %v1433_v20 = vsel %vm9930_vm9, 0, %v9929_v56  ;;  %v1580_v19 = vadd.s32 1, %v9935_v13  ;;  %v1418_v37 = vadd.s32 %v12648_v39, %v12646_v35  ;;  %v16364_v27 = vand.u32 2147483647, %v12192_v0 }
 0x232   :  { %v1577_v29 = vand.u32 8388607, %v16563_v6  ;;  %v1434_v17 = vsub.s32 32, %v1433_v20  ;;  %v1438_v63 = vsub.s32 4294967266, %v1433_v20  ;;  %v12781_v61 = vsel %vm12604_vm2, %v11826_v34, %v1551_v38 }
 0x233   :  { %v12783_v58 = vand.u32 3, %v1451_v54  ;;  %vm1731_vm7 = vc.u32 %v12760_v31, %v12752_v36  ;;  %vm1581_vm5 = vcmp.gt.s32.totalorder %v1580_v19, 0  ;;  %v12788_v39 = vand.u32 3, %v1455_v11 }
 0x234   :  { %v1436_v12 = vshrl.u32 %v1418_v37, %v1434_v17  ;;  %v1439_v60 = vadd.s32 127, %v1438_v63  ;;  %v1733_v24 = vsel %vm1731_vm7, %v1732_v26, %v12753_v59  ;;  %v1582_v35 = vsel %vm1581_vm5, %v1580_v19, 0 }
 0x235   :  { %16564 = vst [vmem:[#allocation46_spill] sm:$0xff] %v12783_v58  ;;  %16565 = vst [vmem:[#allocation47_spill] sm:$0xff] %v12788_v39  ;;  %v1734_v23 = vadd.s32 %v1733_v24, %v1729_v4  ;;  %v1578_v33 = vor.u32 8388608, %v1577_v29  ;;  %v1584_v22 = vand.u32 31, %v1582_v35  ;;  %11205 = vcosq.f32 %v12781_v61 }
 0x236   :  { %v1435_v2 = vshll.u32 %v12715_v9, %v1433_v20  ;;  %v1440_v42 = vshll.u32 %v1439_v60, 23  ;;  %v1885_v46 = vand.u32 2139095040, %v12192_v0  ;;  %vm1676_vm2 = vcmp.lt.s32.totalorder %v11995_v3, 0 }
 0x237   :  { %v1735_v54 = vadd.s32 536870912, %v1734_v23  ;;  %v1583_v25 = vshrl.u32 %v1582_v35, 5  ;;  %v1585_v56 = vsub.s32 32, %v1584_v22  ;;  %v12796_v59 = vand.u32 8388607, %v16364_v27  ;;  %v12800_v11 = vpop.eup %11203 }
 0x238   :  { %v1437_v7 = vor.u32 %v1436_v12, %v1435_v2  ;;  %v1441_v57 = vor.u32 4788187, %v1440_v42  ;;  %v1587_v13 = vshll.u32 %v16505_v15, %v1584_v22  ;;  %v1590_v38 = vshll.u32 %v16507_v14, %v1584_v22 }
 0x239   :  { %v1736_v9 = vshrl.u32 %v1735_v54, 30  ;;  %v1588_v6 = vshrl.u32 %v16507_v14, %v1585_v56  ;;  %v1591_v29 = vshrl.u32 %v16502_v52, %v1585_v56  ;;  %v1593_v20 = vshll.u32 %v16502_v52, %v1584_v22 }
 0x23a   :  { %v1442_v4 = vand.u32 2147483647, %v1441_v57  ;;  %v16566_v26 = vand.u32 2147483647, %v11995_v3  ;;  %v1594_v37 = vshrl.u32 %v16508_v51, %v1585_v56  ;;  %v1596_v17 = vshll.u32 %v16508_v51, %v1584_v22 }
 0x23b   :  { %v1597_v63 = vshrl.u32 %v16503_v16, %v1585_v56  ;;  %v1737_v12 = vshll.u32 %v1736_v9, 30  ;;  %v1599_v60 = vshll.u32 %v16503_v16, %v1584_v22  ;;  %v1886_v24 = vshrl.u32 %v1885_v46, 23 }
 0x23c   :  { %vm12807_vm8 = vcmp.le.f32.partialorder %v16566_v26, 0.7853982  ;;  %v1444_v2 = vcvt.s32.f32 %v1437_v7  ;;  %v1760_v42 = vsub.s32 4, %v1736_v9  ;;  %v1600_v54 = vshrl.u32 %v16504_v62, %v1585_v56 }
 0x23d   :  { %v12817_v57 = vshll.u32 %v1578_v33, 8  ;;  %v12819_v26 = vsub.s32 %v1734_v23, %v1737_v12  ;;  %v1586_v27 = vshrl.u32 %v16505_v15, %v1585_v56  ;;  %v1589_v53 = vor.u32 %v1588_v6, %v1587_v13 }
 0x23e   :  { %v1592_v58 = vor.u32 %v1591_v29, %v1590_v38  ;;  %v1445_v49 = vmul.f32 %v1444_v2, %v1442_v4  ;;  %v1595_v34 = vor.u32 %v1594_v37, %v1593_v20  ;;  %v1598_v39 = vor.u32 %v1597_v63, %v1596_v17 }
 0x23f   :  { %vm1602_vm13 = vcmp.lt.s32.totalorder %v1583_v25, 1  ;;  %v1740_v22 = vsub.s32 0, %v12819_v26  ;;  %v1601_v46 = vor.u32 %v1600_v54, %v1599_v60  ;;  %vm1605_vm14 = vcmp.lt.s32.totalorder %v1583_v25, 4  ;;  %v12823_v35 = vpop.eup %11205 }
 0x240   :  { %v9947_v7 = vadd.s32 4294967169, %v1886_v24  ;;  %v1761_v33 = vsel %vm1676_vm2, %v1760_v42, %v1736_v9  ;;  %vm1603_vm4 = vcmp.lt.s32.totalorder %v1583_v25, 2  ;;  %vm1604_vm9 = vcmp.lt.s32.totalorder %v1583_v25, 3 }
 0x241   :  { %v1607_v23 = vsel %vm1605_vm14, %v1595_v34, 2102212464  ;;  %v9940_v56 = vmin.u32 %v1740_v22, %v12819_v26  ;;  %v1606_v13 = vsel %vm1602_vm13, %v1586_v27, %v1589_v53  ;;  %v1610_v6 = vsel %vm1602_vm13, %v1589_v53, %v1592_v58 }
 0x242   :  { %v1608_v38 = vsel %vm1604_vm9, %v1592_v58, %v1607_v23  ;;  %11207 = vsinq.f32 %v12781_v61  ;;  %v1446_v29 = vxor.u32 2147483648, %v1445_v49  ;;  %v1611_v20 = vsel %vm1605_vm14, %v1598_v39, 920167782 }
 0x243   :  { %v1614_v4 = vsel %vm1602_vm13, %v1592_v58, %v1595_v34  ;;  %v1742_v9 = vclz %v9940_v56  ;;  %v12837_v37 = vsel %vm12807_vm8, 0, %v1761_v33  ;;  %v1612_v17 = vsel %vm1604_vm9, %v1595_v34, %v1611_v20 }
 0x244   :  { %v1615_v27 = vsel %vm1605_vm14, %v1601_v46, 1326507024  ;;  %v1609_v63 = vsel %vm1603_vm4, %v1606_v13, %v1608_v38  ;;  %v1613_v53 = vsel %vm1603_vm4, %v1610_v6, %v1612_v17  ;;  %v1892_v12 = vadd.s32 1, %v9947_v7 }
 0x245   :  { %v1616_v61 = vsel %vm1604_vm9, %v1598_v39, %v1615_v27  ;;  %v9941_v60 = vadd.s32 4294967294, %v1742_v9  ;;  %v12846_v58 = vmul.u32.u64.low %v12817_v57, %v1613_v53  ;;  %v12847_v2 = vmul.u32.u64.high %v12817_v57, %v1613_v53, %v12846_v58 }
 0x246   :  { %v1617_v24 = vsel %vm1603_vm4, %v1614_v4, %v1616_v61  ;;  %v1447_v34 = vsel %vm1364_vm10, %v1446_v29, %v1445_v49  ;;  %vm1893_vm7 = vcmp.gt.s32.totalorder %v1892_v12, 0  ;;  %v1730_v39 = vadd.s32 %v12752_v36, %v12760_v31  ;;  %v11063_v29 = vld [vmem:[#allocation4] sm:$0xff]  }
 0x247   :  { %v12853_v42 = vmul.u32.u64.low %v12817_v57, %v1617_v24  ;;  %v12854_v54 = vmul.u32.u64.high %v12817_v57, %v1617_v24, %v12853_v42  ;;  %vm9942_vm5 = vcmp.lt.s32.totalorder %v9941_v60, 0  ;;  %v1894_v22 = vsel %vm1893_vm7, %v1892_v12, 0  ;;  %10518 = vmatprep.subr.bf16.mxu0 %v11063_v29 }
 0x248   :  { %v1745_v46 = vsel %vm9942_vm5, 0, %v9941_v60  ;;  %v12860_v7 = vadd.s32 3, %v12837_v37  ;;  %v1625_v33 = vmul.u32 %v12817_v57, %v1609_v63  ;;  %v1896_v23 = vand.u32 31, %v1894_v22  ;;  %v11064_v57 = vld [vmem:[#allocation4 + $0x8] sm:$0xff]   ;;  %10519 = vmatpush3.bf16.msra.mxu0 %v11063_v29 }
 0x249   :  { %v12866_v49 = vsel %vm12707_vm12, %v11916_v1, %v1447_v34  ;;  %v1746_v56 = vsub.s32 32, %v1745_v46  ;;  %v1750_v13 = vsub.s32 4294967266, %v1745_v46  ;;  %v1628_v36 = vadd.s32 1, %v12847_v2  ;;  %10520 = vmatprep.subr.bf16.mxu0 %v11064_v57 }
 0x24a   :  { %v1747_v31 = vshll.u32 %v12819_v26, %v1745_v46  ;;  %vm1627_vm10 = vc.u32 %v12854_v54, %v12846_v58  ;;  %v1897_v38 = vsub.s32 32, %v1896_v23  ;;  %v1899_v6 = vshll.u32 %v16505_v15, %v1896_v23 }
 0x24b   :  { %v1748_v20 = vshrl.u32 %v1730_v39, %v1746_v56  ;;  %v1751_v4 = vadd.s32 127, %v1750_v13  ;;  %vm1572_vm13 = vcmp.lt.s32.totalorder %v12078_v21, 0  ;;  %v1629_v8 = vsel %vm1627_vm10, %v1628_v36, %v12847_v2 }
 0x24c   :  { %v1902_v9 = vshll.u32 %v16507_v14, %v1896_v23  ;;  %v12876_v17 = vpop.eup %11207  ;;  %v1630_v27 = vadd.s32 %v1629_v8, %v1625_v33  ;;  %v1895_v26 = vshrl.u32 %v1894_v22, 5  ;;  %v1900_v63 = vshrl.u32 %v16507_v14, %v1897_v38  ;;  %v11065_v33 = vld [vmem:[#allocation4 + $0x10] sm:$0xff]   ;;  %10521 = vmatpush3.bf16.msra.mxu0 %v11064_v57 }
 0x24d   :  { %v1903_v53 = vshrl.u32 %v16502_v52, %v1897_v38  ;;  %v1749_v61 = vor.u32 %v1748_v20, %v1747_v31  ;;  %v1752_v12 = vshll.u32 %v1751_v4, 23  ;;  %v16569_v60 = vand.u32 2147483647, %v12078_v21  ;;  %10522 = vmatprep.subr.bf16.mxu0 %v11065_v33 }
 0x24e   :  { %v1905_v2 = vshll.u32 %v16502_v52, %v1896_v23  ;;  %v1906_v34 = vshrl.u32 %v16508_v51, %v1897_v38  ;;  %v1631_v42 = vadd.s32 536870912, %v1630_v27  ;;  %v1898_v39 = vshrl.u32 %v16505_v15, %v1897_v38 }
 0x24f   :  { %vm12882_vm12 = vcmp.le.f32.partialorder %v16569_v60, 0.7853982  ;;  %v1901_v22 = vor.u32 %v1900_v63, %v1899_v6  ;;  %v1908_v46 = vshll.u32 %v16508_v51, %v1896_v23  ;;  %v1753_v56 = vor.u32 4788187, %v1752_v12 }
 0x250   :  { %v1756_v13 = vcvt.s32.f32 %v1749_v61  ;;  %v1904_v36 = vor.u32 %v1903_v53, %v1902_v9  ;;  %v1909_v31 = vshrl.u32 %v16503_v16, %v1897_v38  ;;  %v1632_v20 = vshrl.u32 %v1631_v42, 30  ;;  %10523 = vmatpush3.bf16.msra.mxu0 %v11065_v33 }
 0x251   :  { %v1911_v4 = vshll.u32 %v16503_v16, %v1896_v23  ;;  %v1912_v8 = vshrl.u32 %v16504_v62, %v1897_v38  ;;  %vm1914_vm14 = vcmp.lt.s32.totalorder %v1895_v26, 1  ;;  %v1754_v29 = vand.u32 2147483647, %v1753_v56 }
 0x252   :  { %v1907_v60 = vor.u32 %v1906_v34, %v1905_v2  ;;  %v1910_v25 = vor.u32 %v1909_v31, %v1908_v46  ;;  %vm1915_vm4 = vcmp.lt.s32.totalorder %v1895_v26, 2  ;;  %v1633_v6 = vshll.u32 %v1632_v20, 30 }
 0x253   :  { %v1656_v63 = vsub.s32 4, %v1632_v20  ;;  %vm1916_vm9 = vcmp.lt.s32.totalorder %v1895_v26, 3  ;;  %vm1917_vm7 = vcmp.lt.s32.totalorder %v1895_v26, 4  ;;  %v1757_v61 = vmul.f32 %v1756_v13, %v1754_v29 }
 0x254   :  { %v1913_v9 = vor.u32 %v1912_v8, %v1911_v4  ;;  %v1919_v53 = vsel %vm1917_vm7, %v1907_v60, 2102212464  ;;  %v1922_v12 = vsel %vm1914_vm14, %v1901_v22, %v1904_v36  ;;  %v12895_v23 = vsub.s32 %v1630_v27, %v1633_v6 }
 0x255   :  { %v1657_v38 = vsel %vm1572_vm13, %v1656_v63, %v1632_v20  ;;  %v1923_v2 = vsel %vm1917_vm7, %v1910_v25, 920167782  ;;  %v16572_v57 = vor.u32 8388608, %v12796_v59  ;;  %v1758_v42 = vxor.u32 2147483648, %v1757_v61 }
 0x256   :  { %v1918_v46 = vsel %vm1914_vm14, %v1898_v39, %v1901_v22  ;;  %v1920_v56 = vsel %vm1916_vm9, %v1904_v36, %v1919_v53  ;;  %v1924_v13 = vsel %vm1916_vm9, %v1907_v60, %v1923_v2  ;;  %v12906_v31 = vand.u32 3, %v12837_v37 }
 0x257   :  { %v1930_v34 = vshll.u32 %v16572_v57, 8  ;;  %v1636_v27 = vsub.s32 0, %v12895_v23  ;;  %v1659_v20 = vsel %vm12882_vm12, 0, %v1657_v38  ;;  %v1925_v4 = vsel %vm1915_vm4, %v1922_v12, %v1924_v13 }
 0x258   :  { %v1759_v59 = vsel %vm1676_vm2, %v1758_v42, %v1757_v61  ;;  %v1926_v39 = vsel %vm1914_vm14, %v1904_v36, %v1907_v60  ;;  %v1927_v22 = vsel %vm1917_vm7, %v1913_v9, 1326507024  ;;  %v1781_v8 = vand.u32 2139095040, %v12301_v5 }
 0x259   :  { %11209 = vcosq.f32 %v12866_v49  ;;  %v9936_v37 = vmin.u32 %v1636_v27, %v12895_v23  ;;  %v1921_v33 = vsel %vm1915_vm4, %v1918_v46, %v1920_v56  ;;  %v1928_v29 = vsel %vm1916_vm9, %v1910_v25, %v1927_v22 }
 0x25a   :  { %v1663_v6 = vadd.s32 3, %v1659_v20  ;;  %v1929_v63 = vsel %vm1915_vm4, %v1926_v39, %v1928_v29  ;;  %v12922_v53 = vmul.u32.u64.low %v1930_v34, %v1925_v4  ;;  %v12923_v12 = vmul.u32.u64.high %v1930_v34, %v1925_v4, %v12922_v53 }
 0x25b   :  { %v1762_v36 = vsel %vm12807_vm8, %v11995_v3, %v1759_v59  ;;  %v1638_v60 = vclz %v9936_v37  ;;  %v12928_v61 = vmul.u32.u64.low %v1930_v34, %v1929_v63  ;;  %v12929_v9 = vmul.u32.u64.high %v1930_v34, %v1929_v63, %v12928_v61 }
 0x25c   :  { %11211 = vsinq.f32 %v12866_v49  ;;  %v12933_v38 = vand.u32 3, %v12860_v7  ;;  %v1782_v25 = vshrl.u32 %v1781_v8, 23  ;;  %v16573_v26 = vand.u32 2147483647, %v12301_v5 }
 0x25d   :  { %v1626_v57 = vadd.s32 %v12846_v58, %v12854_v54  ;;  %v9937_v42 = vadd.s32 4294967294, %v1638_v60  ;;  %v12939_v46 = vand.u32 3, %v1659_v20  ;;  %v1937_v19 = vmul.u32 %v1930_v34, %v1921_v33 }
 0x25e   :  { %v1785_v2 = vand.u32 8388607, %v16573_v26  ;;  %11213 = vcosq.f32 %v1762_v36  ;;  %v1940_v56 = vadd.s32 1, %v12923_v12  ;;  %v9943_v13 = vadd.s32 4294967169, %v1782_v25 }
 0x25f   :  { %v12945_v7 = vsel %vm11947_vm11, 0, %v11902_v50  ;;  %11215 = vsinq.f32 %v1762_v36  ;;  %vm9938_vm2 = vcmp.lt.s32.totalorder %v9937_v42, 0  ;;  %v12947_v49 = vand.u32 3, %v1663_v6  ;;  %v16596_v50 = vld [vmem:[#allocation22_spill] sm:$0xff] }
 0x260   :  { %vm1939_vm8 = vc.u32 %v12929_v9, %v12922_v53  ;;  %v1641_v58 = vsel %vm9938_vm2, 0, %v9937_v42  ;;  %vm1884_vm5 = vcmp.lt.s32.totalorder %v12192_v0, 0  ;;  %v1786_v34 = vor.u32 8388608, %v1785_v2 }
 0x261   :  { %v1941_v54 = vsel %vm1939_vm8, %v1940_v56, %v12923_v12  ;;  %v1788_v27 = vadd.s32 1, %v9943_v13  ;;  %v1642_v20 = vsub.s32 32, %v1641_v58  ;;  %v1646_v4 = vsub.s32 4294967266, %v1641_v58 }
 0x262   :  { %v16574_v59 = vand.u32 2147483647, %v12192_v0  ;;  %v1942_v48 = vadd.s32 %v1941_v54, %v1937_v19  ;;  %v415_v39 = vadd.s32 3, %v12945_v7  ;;  %v12964_v37 = vsel %vm11872_vm3, 0, %v11897_v41 }
 0x263   :  { %vm1789_vm11 = vcmp.gt.s32.totalorder %v1788_v27, 0  ;;  %v12966_v33 = vpop.eup %11209  ;;  %v1644_v29 = vshrl.u32 %v1626_v57, %v1642_v20  ;;  %v1647_v6 = vadd.s32 127, %v1646_v4  ;;  %v1643_v36 = vshll.u32 %v12895_v23, %v1641_v58 }
 0x264   :  { %vm12954_vm10 = vcmp.le.f32.partialorder %v16574_v59, 0.7853982  ;;  %v1943_v63 = vadd.s32 536870912, %v1942_v48  ;;  %v1790_v12 = vsel %vm1789_vm11, %v1788_v27, 0  ;;  %v12970_v60 = vadd.s32 %v12922_v53, %v12929_v9 }
 0x265   :  { %v1792_v61 = vand.u32 31, %v1790_v12  ;;  %v12972_v25 = vshll.u32 %v1786_v34, 8  ;;  %v1648_v26 = vshll.u32 %v1647_v6, 23  ;;  %v12974_v42 = vshrl.u32 %v1790_v12, 5 }
 0x266   :  { %v1944_v2 = vshrl.u32 %v1943_v63, 30  ;;  %v12976_v40 = vand.u32 3, %v415_v39  ;;  %v12978_v41 = vpop.eup %11211  ;;  %v1645_v57 = vor.u32 %v1644_v29, %v1643_v36  ;;  %v519_v23 = vadd.s32 3, %v12964_v37 }
 0x267   :  { %v1793_v19 = vsub.s32 32, %v1792_v61  ;;  %v1795_v56 = vshll.u32 %v16505_v15, %v1792_v61  ;;  %v1649_v13 = vor.u32 4788187, %v1648_v26  ;;  %v1798_v58 = vshll.u32 %v16507_v14, %v1792_v61 }
 0x268   :  { %v1945_v53 = vshll.u32 %v1944_v2, 30  ;;  %v1968_v9 = vsub.s32 4, %v1944_v2  ;;  %v12983_v54 = vpop.eup %11213  ;;  %v1801_v20 = vshll.u32 %v16502_v52, %v1792_v61  ;;  %v1652_v12 = vcvt.s32.f32 %v1645_v57 }
 0x269   :  { %v1796_v34 = vshrl.u32 %v16507_v14, %v1793_v19  ;;  %v1799_v27 = vshrl.u32 %v16502_v52, %v1793_v19  ;;  %v12989_v59 = vpop.eup %11215  ;;  %v1650_v39 = vand.u32 2147483647, %v1649_v13  ;;  %v1802_v63 = vshrl.u32 %v16508_v51, %v1793_v19 }
 0x26a   :  { %v12991_v29 = vsub.s32 %v1942_v48, %v1945_v53  ;;  %v1969_v6 = vsel %vm1884_vm5, %v1968_v9, %v1944_v2  ;;  %v1804_v26 = vshll.u32 %v16508_v51, %v1792_v61  ;;  %v1794_v4 = vshrl.u32 %v16505_v15, %v1793_v19 }
 0x26b   :  { %v1971_v36 = vsel %vm12954_vm10, 0, %v1969_v6  ;;  %v1797_v13 = vor.u32 %v1796_v34, %v1795_v56  ;;  %v1800_v48 = vor.u32 %v1799_v27, %v1798_v58  ;;  %v1653_v53 = vmul.f32 %v1652_v12, %v1650_v39 }
 0x26c   :  { %v1948_v22 = vsub.s32 0, %v12991_v29  ;;  %v1805_v52 = vshrl.u32 %v16503_v16, %v1793_v19  ;;  %v1807_v2 = vshll.u32 %v16503_v16, %v1792_v61  ;;  %v1808_v57 = vshrl.u32 %v16504_v62, %v1793_v19 }
 0x26d   :  { %v1975_v6 = vadd.s32 3, %v1971_v36  ;;  %v1803_v14 = vor.u32 %v1802_v63, %v1801_v20  ;;  %vm1810_vm3 = vcmp.lt.s32.totalorder %v12974_v42, 1  ;;  %vm1812_vm14 = vcmp.lt.s32.totalorder %v12974_v42, 3 }
 0x26e   :  { %v9948_v9 = vmin.u32 %v1948_v22, %v12991_v29  ;;  %v1806_v8 = vor.u32 %v1805_v52, %v1804_v26  ;;  %v1809_v51 = vor.u32 %v1808_v57, %v1807_v2  ;;  %vm1813_vm4 = vcmp.lt.s32.totalorder %v12974_v42, 4  ;;  %v16577_v2 = vld [vmem:[#allocation8_spill] sm:$0xff] }
 0x26f   :  { %vm1811_vm9 = vcmp.lt.s32.totalorder %v12974_v42, 2  ;;  %v1814_v61 = vsel %vm1810_vm3, %v1794_v4, %v1797_v13  ;;  %v1815_v19 = vsel %vm1813_vm4, %v1803_v14, 2102212464  ;;  %v1654_v22 = vxor.u32 2147483648, %v1653_v53 }
 0x270   :  { %v1950_v56 = vclz %v9948_v9  ;;  %v1816_v58 = vsel %vm1812_vm14, %v1800_v48, %v1815_v19  ;;  %v1818_v52 = vsel %vm1810_vm3, %v1797_v13, %v1800_v48  ;;  %v1819_v34 = vsel %vm1813_vm4, %v1806_v8, 920167782 }
 0x271   :  { %v13020_v20 = vand.u32 3, %v1975_v6  ;;  %v13022_v39 = vand.u32 3, %v1971_v36  ;;  %v1820_v4 = vsel %vm1812_vm14, %v1803_v14, %v1819_v34  ;;  %v1817_v63 = vsel %vm1811_vm9, %v1814_v61, %v1816_v58 }
 0x272   :  { %v9949_v27 = vadd.s32 4294967294, %v1950_v56  ;;  %v1821_v12 = vsel %vm1811_vm9, %v1818_v52, %v1820_v4  ;;  %v1822_v26 = vsel %vm1810_vm3, %v1800_v48, %v1803_v14  ;;  %v1823_v13 = vsel %vm1813_vm4, %v1809_v51, 1326507024  ;;  %v16578_v51 = vld [vmem:[#allocation9_spill] sm:$0xff] }
 0x273   :  { %vm518_vm7 = vweird.f32 %v16577_v2  ;;  %v1824_v36 = vsel %vm1812_vm14, %v1806_v8, %v1823_v13  ;;  %v13038_v57 = vmul.u32.u64.low %v12972_v25, %v1821_v12  ;;  %v13039_v9 = vmul.u32.u64.high %v12972_v25, %v1821_v12, %v13038_v57 }
 0x274   :  { %vm9950_vm2 = vcmp.lt.s32.totalorder %v9949_v27, 0  ;;  %vm418_vm8 = vcmp.eq.s32.totalorder %v12976_v40, 0  ;;  %v1655_v6 = vsel %vm1572_vm13, %v1654_v22, %v1653_v53  ;;  %v1825_v14 = vsel %vm1811_vm9, %v1822_v26, %v1824_v36 }
 0x275   :  { %v1953_v56 = vsel %vm9950_vm2, 0, %v9949_v27  ;;  %vm414_vm11 = vweird.f32 %v16578_v51  ;;  %vm421_vm3 = vcmp.eq.s32.totalorder %v12976_v40, 2  ;;  %v520_v48 = vand.u32 3, %v519_v23 }
 0x276   :  { %v1954_v61 = vsub.s32 32, %v1953_v56  ;;  %v1958_v8 = vsub.s32 4294967266, %v1953_v56  ;;  %v1833_v19 = vmul.u32 %v12972_v25, %v1817_v63  ;;  %v2079_v58 = vand.u32 3, %v12945_v7 }
 0x277   :  { %v1955_v52 = vshll.u32 %v12991_v29, %v1953_v56  ;;  %v13052_v34 = vmul.u32.u64.low %v12972_v25, %v1825_v14  ;;  %v13053_v53 = vmul.u32.u64.high %v12972_v25, %v1825_v14, %v13052_v34  ;;  %vm417_vm13 = vcmp.lt.s32.totalorder %v12976_v40, 2  ;;  %v16590_v40 = vld [vmem:[#allocation11_spill] sm:$0xff] }
 0x278   :  { %vm522_vm14 = vcmp.eq.s32.totalorder %v520_v48, 0  ;;  %v1956_v42 = vshrl.u32 %v12970_v60, %v1954_v61  ;;  %v1959_v22 = vadd.s32 127, %v1958_v8  ;;  %v1836_v23 = vadd.s32 1, %v13039_v9 }
 0x279   :  { %v16579_v27 = vxor.u32 2147483648, %v12020_v47  ;;  %vm521_vm4 = vcmp.lt.s32.totalorder %v520_v48, 2  ;;  %vm525_vm9 = vcmp.eq.s32.totalorder %v520_v48, 2  ;;  %vm2081_vm2 = vcmp.eq.s32.totalorder %v2079_v58, 0 }
 0x27a   :  { %vm2084_vm1 = vcmp.eq.s32.totalorder %v2079_v58, 2  ;;  %v1957_v7 = vor.u32 %v1956_v42, %v1955_v52  ;;  %v1960_v29 = vshll.u32 %v1959_v22, 23  ;;  %v16580_v25 = vxor.u32 2147483648, %v12010_v44 }
 0x27b   :  { %v524_v4 = vsel %vm522_vm14, %v12010_v44, %v16579_v27  ;;  %v16581_v12 = vxor.u32 2147483648, %v12099_v45  ;;  %v1658_v26 = vsel %vm12882_vm12, %v12078_v21, %v1655_v6  ;;  %vm1835_vm14 = vc.u32 %v13053_v53, %v13038_v57 }
 0x27c   :  { %v527_v63 = vsel %vm525_vm9, %v16580_v25, %v12020_v47  ;;  %v16582_v36 = vxor.u32 2147483648, %v12095_v18  ;;  %v1961_v14 = vor.u32 4788187, %v1960_v29  ;;  %vm1780_vm0 = vcmp.lt.s32.totalorder %v12301_v5, 0 }
 0x27d   :  { %v2083_v60 = vsel %vm2081_vm2, %v12095_v18, %v16581_v12  ;;  %v528_v13 = vsel %vm521_vm4, %v524_v4, %v527_v63  ;;  %v1837_v48 = vsel %vm1835_vm14, %v1836_v23, %v13039_v9  ;;  %vm2080_vm9 = vcmp.lt.s32.totalorder %v2079_v58, 2 }
 0x27e   :  { %v2086_v56 = vsel %vm2084_vm1, %v16582_v36, %v12099_v45  ;;  %v13078_v61 = vsel %vm518_vm7, nan, %v528_v13  ;;  %v16583_v24 = vand.u32 2147483647, %v12301_v5  ;;  %v1838_v8 = vadd.s32 %v1837_v48, %v1833_v19  ;;  %v16591_v48 = vld [vmem:[#allocation25_spill] sm:$0xff] }
 0x27f   :  { %v2087_v52 = vsel %vm2080_vm9, %v2083_v60, %v2086_v56  ;;  %v2182_v34 = vand.u32 3, %v12964_v37  ;;  %v16586_v42 = vmov %v16581_v12  ;;  %v1962_v22 = vand.u32 2147483647, %v1961_v14 }
 0x280   :  { %vm13082_vm12 = vcmp.le.f32.partialorder %v16583_v24, 0.7853982  ;;  %v420_v9 = vsel %vm418_vm8, %v12095_v18, %v16586_v42  ;;  %v1964_v23 = vcvt.s32.f32 %v1957_v7  ;;  %v2088_v58 = vsel %vm414_vm11, nan, %v2087_v52  ;;  %v16592_v24 = vld [vmem:[#allocation31_spill] sm:$0xff]  ;;  %v16594_v42 = vld [vmem:[#allocation10_spill] sm:$0xff] }
 0x281   :  { %v16587_v27 = vmov %v16582_v36  ;;  %v1839_v4 = vadd.s32 536870912, %v1838_v8  ;;  %vm2183_vm1 = vcmp.lt.s32.totalorder %v2182_v34, 2  ;;  %vm2184_vm4 = vcmp.eq.s32.totalorder %v2182_v34, 0 }
 0x282   :  { %v423_v19 = vsel %vm421_vm3, %v16587_v27, %v12099_v45  ;;  %vm2187_vm2 = vcmp.eq.s32.totalorder %v2182_v34, 2  ;;  %v1965_v37 = vmul.f32 %v1964_v23, %v1962_v22  ;;  %v16588_v29 = vxor.u32 2147483648, %v12020_v47  ;;  %v16595_v22 = vld [vmem:[#allocation19_spill] sm:$0xff]  ;;  %v16597_v27 = vld [vmem:[#allocation21_spill] sm:$0xff] }
 0x283   :  { %v16589_v7 = vxor.u32 2147483648, %v12010_v44  ;;  %v424_v12 = vsel %vm417_vm13, %v420_v9, %v423_v19  ;;  %11217 = vcosq.f32 %v1658_v26  ;;  %v1840_v18 = vshrl.u32 %v1839_v4, 30 }
 0x284   :  { %v2186_v25 = vsel %vm2184_vm4, %v12010_v44, %v16588_v29  ;;  %v13109_v45 = vsel %vm414_vm11, nan, %v424_v12  ;;  %11219 = vsinq.f32 %v1658_v26  ;;  %v1966_v13 = vxor.u32 2147483648, %v1965_v37  ;;  %v16593_v26 = vld [vmem:[#allocation30_spill] sm:$0xff] }
 0x285   :  { %v2189_v63 = vsel %vm2187_vm2, %v16589_v7, %v12020_v47  ;;  %v13112_v36 = vadd.s32 %v13038_v57, %v13053_v53  ;;  %v1841_v44 = vshll.u32 %v1840_v18, 30  ;;  %v1864_v47 = vsub.s32 4, %v1840_v18  ;;  %v16599_v12 = vld [vmem:[#allocation18_spill] sm:$0xff] }
 0x286   :  { %v2190_v60 = vsel %vm2183_vm1, %v2186_v25, %v2189_v63  ;;  %vm622_vm8 = vweird.f32 %v16590_v40  ;;  %vm626_vm3 = vcmp.eq.s32.totalorder %v16591_v48, 0  ;;  %v1967_v51 = vsel %vm1884_vm5, %v1966_v13, %v1965_v37  ;;  %v16598_v37 = vld [vmem:[#allocation20_spill] sm:$0xff]  ;;  %v16603_v40 = vld [vmem:[#allocation26_spill] sm:$0xff] }
 0x287   :  { %v2191_v56 = vsel %vm518_vm7, nan, %v2190_v60  ;;  %v627_v52 = vxor.u32 2147483648, %v16592_v24  ;;  %vm629_vm11 = vcmp.eq.s32.totalorder %v16591_v48, 2  ;;  %v630_v57 = vxor.u32 2147483648, %v16593_v26 }
 0x288   :  { %v10903_v14 = vpack.i.bf16 %v2191_v56, %v2088_v58  ;;  %v1970_v2 = vsel %vm12954_vm10, %v12192_v0, %v1967_v51  ;;  %v13126_v53 = vsub.s32 %v1838_v8, %v1841_v44  ;;  %v1865_v34 = vsel %vm1780_vm0, %v1864_v47, %v1840_v18 }
 0x289   :  { %vm625_vm5 = vcmp.lt.s32.totalorder %v16591_v48, 2  ;;  %vm726_vm7 = vweird.f32 %v16594_v42  ;;  %11221 = vcosq.f32 %v1970_v2  ;;  %v1867_v9 = vsel %vm13082_vm12, 0, %v1865_v34 }
 0x28a   :  { %10904 = vrot.lane.b32.xlu0 %v10903_v14, %s11430_s30  ;;  %vm729_vm13 = vcmp.lt.s32.totalorder %v16595_v22, 2  ;;  %v731_v23 = vxor.u32 2147483648, %v16596_v50  ;;  %11223 = vsinq.f32 %v1970_v2  ;;  %v1844_v8 = vsub.s32 0, %v13126_v53 }
 0x28b   :  { %vm730_vm10 = vcmp.eq.s32.totalorder %v16595_v22, 0  ;;  %vm733_vm14 = vcmp.eq.s32.totalorder %v16595_v22, 2  ;;  %v13140_v58 = vadd.s32 3, %v1867_v9  ;;  %v734_v4 = vxor.u32 2147483648, %v16597_v27 }
 0x28c   :  { %v732_v19 = vsel %vm730_vm10, %v16597_v27, %v731_v23  ;;  %vm2287_vm9 = vcmp.eq.s32.totalorder %v16598_v37, 0  ;;  %v9944_v29 = vmin.u32 %v1844_v8, %v13126_v53  ;;  %vm2286_vm1 = vcmp.lt.s32.totalorder %v16598_v37, 2  ;;  %v16600_v8 = vld [vmem:[#allocation27_spill] sm:$0xff] }
 0x28d   :  { %v2289_v25 = vsel %vm2287_vm9, %v16593_v26, %v627_v52  ;;  %vm2290_vm4 = vcmp.eq.s32.totalorder %v16598_v37, 2  ;;  %v735_v7 = vsel %vm733_vm14, %v734_v4, %v16596_v50  ;;  %vm2389_vm2 = vcmp.lt.s32.totalorder %v16599_v12, 2  ;;  %v13153_v18 = vpop.eup %11217 }
 0x28e   :  { %v2292_v63 = vsel %vm2290_vm4, %v630_v57, %v16592_v24  ;;  %vm2390_vm10 = vcmp.eq.s32.totalorder %v16599_v12, 0  ;;  %v1846_v60 = vclz %v9944_v29  ;;  %v736_v13 = vsel %vm729_vm13, %v732_v19, %v735_v7  ;;  %v13158_v47 = vpop.eup %11219 }
 0x28f   :  { %v2293_v56 = vsel %vm2286_vm1, %v2289_v25, %v2292_v63  ;;  %v2392_v44 = vsel %vm2390_vm10, %v16597_v27, %v731_v23  ;;  %v13162_v14 = vsel %vm726_vm7, nan, %v736_v13  ;;  %vm2393_vm14 = vcmp.eq.s32.totalorder %v16599_v12, 2  ;;  %v16602_v13 = vld [vmem:[#allocation13_spill] sm:$0xff] }
 0x290   :  { %v2294_v51 = vsel %vm622_vm8, nan, %v2293_v56  ;;  %v628_v2 = vsel %vm626_vm3, %v16593_v26, %v627_v52  ;;  %v9945_v34 = vadd.s32 4294967294, %v1846_v60  ;;  %v2395_v22 = vsel %vm2393_vm14, %v734_v4, %v16596_v50 }
 0x291   :  { %v631_v23 = vsel %vm629_vm11, %v630_v57, %v16592_v24  ;;  %v827_v19 = vsel %vm12259_vm6, 0, %v16600_v8  ;;  %v13177_v37 = vand.u32 3, %v1867_v9  ;;  %v2396_v29 = vsel %vm2389_vm2, %v2392_v44, %v2395_v22 }
 0x292   :  { %v632_v25 = vsel %vm625_vm5, %v628_v2, %v631_v23  ;;  %v831_v52 = vadd.s32 3, %v827_v19  ;;  %vm9946_vm3 = vcmp.lt.s32.totalorder %v9945_v34, 0  ;;  %v2397_v26 = vsel %vm726_vm7, nan, %v2396_v29 }
 0x293   :  { %v13187_v24 = vsel %vm622_vm8, nan, %v632_v25  ;;  %v835_v57 = vxor.u32 2147483648, %v12495_v28  ;;  %v13190_v50 = vpop.eup %11221  ;;  %v1849_v9 = vsel %vm9946_vm3, 0, %v9945_v34  ;;  %v10908_v4 = vpack.i.bf16 %v2397_v26, %v2294_v51  ;;  %v16605_v51 = vld [vmem:[#allocation12_spill] sm:$0xff] }
 0x294   :  { %v832_v7 = vand.u32 3, %v831_v52  ;;  %v838_v63 = vxor.u32 2147483648, %v12379_v43  ;;  %v13193_v48 = vpop.eup %11223  ;;  %v1850_v12 = vsub.s32 32, %v1849_v9  ;;  %v1851_v60 = vshll.u32 %v13126_v53, %v1849_v9 }
 0x295   :  { %v1854_v42 = vsub.s32 4294967266, %v1849_v9  ;;  %vm830_vm6 = vweird.f32 %v16602_v13  ;;  %v931_v44 = vsel %vm12216_vm15, 0, %v16603_v40  ;;  %10909 = vrot.lane.b32.xlu0 %v10908_v4, %s11430_s30  ;;  %vm934_vm7 = vweird.f32 %v16605_v51  ;;  %v16611_v51 = vld [vmem:[#allocation37_spill] sm:$0xff] }
 0x296   :  { %vm833_vm8 = vcmp.lt.s32.totalorder %v832_v7, 2  ;;  %vm834_vm11 = vcmp.eq.s32.totalorder %v832_v7, 0  ;;  %vm837_vm5 = vcmp.eq.s32.totalorder %v832_v7, 2  ;;  %v1852_v2 = vshrl.u32 %v13112_v36, %v1850_v12  ;;  %v16607_v7 = vld [vmem:[#allocation41_spill] sm:$0xff] }
 0x297   :  { %v1855_v34 = vadd.s32 127, %v1854_v42  ;;  %v935_v22 = vadd.s32 3, %v931_v44  ;;  %v939_v53 = vxor.u32 2147483648, %v12349_v10  ;;  %v942_v23 = vxor.u32 2147483648, %v12344_v30 }
 0x298   :  { %v2491_v8 = vand.u32 3, %v827_v19  ;;  %v2594_v27 = vand.u32 3, %v931_v44  ;;  %v836_v29 = vsel %vm834_vm11, %v12379_v43, %v835_v57  ;;  %v1853_v25 = vor.u32 %v1852_v2, %v1851_v60 }
 0x299   :  { %v1856_v52 = vshll.u32 %v1855_v34, 23  ;;  %v936_v26 = vand.u32 3, %v935_v22  ;;  %v839_v9 = vsel %vm837_vm5, %v838_v63, %v12495_v28  ;;  %vm1038_vm11 = vweird.f32 %v11701_v55  ;;  %v16620_v55 = vld [vmem:[#allocation42_spill] sm:$0xff] }
 0x29a   :  { %vm2492_vm15 = vcmp.lt.s32.totalorder %v2491_v8, 2  ;;  %vm2493_vm13 = vcmp.eq.s32.totalorder %v2491_v8, 0  ;;  %vm2496_vm9 = vcmp.eq.s32.totalorder %v2491_v8, 2  ;;  %vm2595_vm1 = vcmp.lt.s32.totalorder %v2594_v27, 2 }
 0x29b   :  { %v1857_v36 = vor.u32 4788187, %v1856_v52  ;;  %v1860_v4 = vcvt.s32.f32 %v1853_v25  ;;  %vm937_vm4 = vcmp.lt.s32.totalorder %v936_v26, 2  ;;  %vm938_vm2 = vcmp.eq.s32.totalorder %v936_v26, 0  ;;  %v16606_v52 = vld [vmem:[#allocation33_spill] sm:$0xff] }
 0x29c   :  { %v940_v12 = vsel %vm938_vm2, %v12344_v30, %v939_v53  ;;  %vm941_vm10 = vcmp.eq.s32.totalorder %v936_v26, 2  ;;  %v2495_v19 = vsel %vm2493_vm13, %v12379_v43, %v835_v57  ;;  %v2498_v42 = vsel %vm2496_vm9, %v838_v63, %v12495_v28  ;;  %v16610_v26 = vld [vmem:[#allocation28_spill] sm:$0xff] }
 0x29d   :  { %v1858_v60 = vand.u32 2147483647, %v1857_v36  ;;  %v943_v40 = vsel %vm941_vm10, %v942_v23, %v12349_v10  ;;  %v2499_v56 = vsel %vm2492_vm15, %v2495_v19, %v2498_v42  ;;  %vm2596_vm14 = vcmp.eq.s32.totalorder %v2594_v27, 0  ;;  %v16613_v42 = vld [vmem:[#allocation32_spill] sm:$0xff] }
 0x29e   :  { %v944_v44 = vsel %vm937_vm4, %v940_v12, %v943_v40  ;;  %v2500_v2 = vsel %vm830_vm6, nan, %v2499_v56  ;;  %v2598_v34 = vsel %vm2596_vm14, %v12344_v30, %v939_v53  ;;  %vm2599_vm3 = vcmp.eq.s32.totalorder %v2594_v27, 2 }
 0x29f   :  { %v1861_v22 = vmul.f32 %v1860_v4, %v1858_v60  ;;  %v13216_v8 = vsel %vm934_vm7, nan, %v944_v44  ;;  %v2601_v43 = vsel %vm2599_vm3, %v942_v23, %v12349_v10  ;;  %v840_v28 = vsel %vm833_vm8, %v836_v29, %v839_v9  ;;  %v16608_v23 = vld [vmem:[#allocation40_spill] sm:$0xff]  ;;  %v16609_v29 = vld [vmem:[#allocation14_spill] sm:$0xff] }
 0x2a0   :  { %v13221_v57 = vand.u32 3, %v13140_v58  ;;  %v2602_v63 = vsel %vm2595_vm1, %v2598_v34, %v2601_v43  ;;  %v13226_v25 = vsel %vm830_vm6, nan, %v840_v28  ;;  %vm1041_vm5 = vcmp.lt.s32.totalorder %v16606_v52, 2  ;;  %v16612_v4 = vld [vmem:[#allocation36_spill] sm:$0xff] }
 0x2a1   :  { %v1862_v30 = vxor.u32 2147483648, %v1861_v22  ;;  %v2603_v53 = vsel %vm934_vm7, nan, %v2602_v63  ;;  %vm1042_vm15 = vcmp.eq.s32.totalorder %v16606_v52, 0  ;;  %v1043_v58 = vxor.u32 2147483648, %v16607_v7 }
 0x2a2   :  { %v10913_v10 = vpack.i.bf16 %v2603_v53, %v2500_v2  ;;  %vm1045_vm8 = vcmp.eq.s32.totalorder %v16606_v52, 2  ;;  %v1046_v27 = vxor.u32 2147483648, %v16608_v23  ;;  %vm1142_vm6 = vweird.f32 %v16609_v29  ;;  %v16614_v2 = vld [vmem:[#allocation29_spill] sm:$0xff]  ;;  %v16617_v52 = vld [vmem:[#allocation15_spill] sm:$0xff] }
 0x2a3   :  { %v1863_v13 = vsel %vm1780_vm0, %v1862_v30, %v1861_v22  ;;  %vm1145_vm13 = vcmp.lt.s32.totalorder %v16610_v26, 2  ;;  %v1147_v9 = vxor.u32 2147483648, %v16611_v51  ;;  %vm1146_vm7 = vcmp.eq.s32.totalorder %v16610_v26, 0 }
 0x2a4   :  { %v1866_v36 = vsel %vm13082_vm12, %v12301_v5, %v1863_v13  ;;  %10914 = vrot.lane.b32.xlu1 %v10913_v10, %s11430_s30  ;;  %vm1149_vm9 = vcmp.eq.s32.totalorder %v16610_v26, 2  ;;  %v1150_v12 = vxor.u32 2147483648, %v16612_v4  ;;  %vm2698_vm0 = vcmp.lt.s32.totalorder %v16613_v42, 2  ;;  %v16615_v13 = vld [vmem:[#allocation16_spill] sm:$0xff]  ;;  %v16616_v26 = vld [vmem:[#allocation38_spill] sm:$0xff] }
 0x2a5   :  { %v1148_v19 = vsel %vm1146_vm7, %v16612_v4, %v1147_v9  ;;  %vm2699_vm1 = vcmp.eq.s32.totalorder %v16613_v42, 0  ;;  %vm2702_vm4 = vcmp.eq.s32.totalorder %v16613_v42, 2  ;;  %11225 = vcosq.f32 %v1866_v36 }
 0x2a6   :  { %v1151_v6 = vsel %vm1149_vm9, %v1150_v12, %v16611_v51  ;;  %v2701_v60 = vsel %vm2699_vm1, %v16608_v23, %v1043_v58  ;;  %v2704_v40 = vsel %vm2702_vm4, %v1046_v27, %v16607_v7  ;;  %11227 = vsinq.f32 %v1866_v36  ;;  %v16619_v36 = vld [vmem:[#allocation43_spill] sm:$0xff] }
 0x2a7   :  { %v1152_v56 = vsel %vm1145_vm13, %v1148_v19, %v1151_v6  ;;  %v2705_v44 = vsel %vm2698_vm0, %v2701_v60, %v2704_v40  ;;  %vm2802_vm12 = vcmp.eq.s32.totalorder %v16614_v2, 0  ;;  %vm2801_vm2 = vcmp.lt.s32.totalorder %v16614_v2, 2  ;;  %v16622_v19 = vld [vmem:[#allocation34_spill] sm:$0xff] }
 0x2a8   :  { %v13260_v34 = vsel %vm1142_vm6, nan, %v1152_v56  ;;  %v2804_v22 = vsel %vm2802_vm12, %v16612_v4, %v1147_v9  ;;  %vm2805_vm10 = vcmp.eq.s32.totalorder %v16614_v2, 2  ;;  %v2706_v43 = vsel %vm1038_vm11, nan, %v2705_v44 }
 0x2a9   :  { %v2807_v28 = vsel %vm2805_vm10, %v1150_v12, %v16611_v51  ;;  %v1044_v63 = vsel %vm1042_vm15, %v16608_v23, %v1043_v58  ;;  %v1047_v30 = vsel %vm1045_vm8, %v1046_v27, %v16607_v7  ;;  %vm1246_vm14 = vweird.f32 %v16615_v13  ;;  %v16618_v27 = vld [vmem:[#allocation35_spill] sm:$0xff] }
 0x2aa   :  { %v2808_v53 = vsel %vm2801_vm2, %v2804_v22, %v2807_v28  ;;  %v1048_v10 = vsel %vm1041_vm5, %v1044_v63, %v1047_v30  ;;  %vm1250_vm3 = vcmp.eq.s32.totalorder %v16616_v26, 0  ;;  %v1251_v58 = vxor.u32 2147483648, %v12800_v11  ;;  %v16621_v12 = vld [vmem:[#allocation39_spill] sm:$0xff] }
 0x2ab   :  { %v2809_v9 = vsel %vm1142_vm6, nan, %v2808_v53  ;;  %v13282_v51 = vsel %vm1038_vm11, nan, %v1048_v10  ;;  %vm1253_vm15 = vcmp.eq.s32.totalorder %v16616_v26, 2  ;;  %v1254_v23 = vxor.u32 2147483648, %v12718_v32 }
 0x2ac   :  { %v10918_v7 = vpack.i.bf16 %v2809_v9, %v2706_v43  ;;  %vm1350_vm5 = vweird.f32 %v16617_v52  ;;  %vm1353_vm8 = vcmp.lt.s32.totalorder %v16618_v27, 2  ;;  %vm1354_vm13 = vcmp.eq.s32.totalorder %v16618_v27, 0  ;;  %v16627_v52 = vld [vmem:[#allocation45_spill] sm:$0xff] }
 0x2ad   :  { %v1355_v29 = vxor.u32 2147483648, %v16619_v36  ;;  %vm1357_vm6 = vcmp.eq.s32.totalorder %v16618_v27, 2  ;;  %v1358_v4 = vxor.u32 2147483648, %v16620_v55  ;;  %vm2904_vm11 = vcmp.lt.s32.totalorder %v16621_v12, 2 }
 0x2ae   :  { %10919 = vrot.lane.b32.xlu1 %v10918_v7, %s11430_s30  ;;  %vm2905_vm7 = vcmp.eq.s32.totalorder %v16621_v12, 0  ;;  %vm2908_vm9 = vcmp.eq.s32.totalorder %v16621_v12, 2  ;;  %vm3007_vm0 = vcmp.lt.s32.totalorder %v16622_v19, 2  ;;  %vm3008_vm1 = vcmp.eq.s32.totalorder %v16622_v19, 0 }
 0x2af   :  { %v1356_v42 = vsel %vm1354_vm13, %v16620_v55, %v1355_v29  ;;  %v1359_v6 = vsel %vm1357_vm6, %v1358_v4, %v16619_v36  ;;  %v2907_v60 = vsel %vm2905_vm7, %v12718_v32, %v1251_v58  ;;  %v2910_v40 = vsel %vm2908_vm9, %v1254_v23, %v12800_v11  ;;  %v13302_v56 = vpop.eup %11225 }
 0x2b0   :  { %v1360_v44 = vsel %vm1353_vm8, %v1356_v42, %v1359_v6  ;;  %v2911_v2 = vsel %vm2904_vm11, %v2907_v60, %v2910_v40  ;;  %vm3011_vm4 = vcmp.eq.s32.totalorder %v16622_v19, 2  ;;  %v13306_v22 = vpop.eup %11227  ;;  %v3010_v63 = vsel %vm3008_vm1, %v16620_v55, %v1355_v29 }
 0x2b1   :  { %v13310_v43 = vsel %vm1350_vm5, nan, %v1360_v44  ;;  %v2912_v28 = vsel %vm1246_vm14, nan, %v2911_v2  ;;  %v3013_v30 = vsel %vm3011_vm4, %v1358_v4, %v16619_v36  ;;  %vm1249_vm12 = vcmp.lt.s32.totalorder %v16616_v26, 2  ;;  %v16623_v36 = vld [vmem:[#allocation47_spill] sm:$0xff]  ;;  %v16625_v26 = vld [vmem:[#allocation44_spill] sm:$0xff] }
 0x2b2   :  { %v3014_v53 = vsel %vm3007_vm0, %v3010_v63, %v3013_v30  ;;  %v1252_v10 = vsel %vm1250_vm3, %v12718_v32, %v1251_v58  ;;  %v1255_v9 = vsel %vm1253_vm15, %v1254_v23, %v12800_v11  ;;  %vm1454_vm2 = vweird.f32 %v11916_v1  ;;  %v16624_v11 = vld [vmem:[#allocation17_spill] sm:$0xff]  ;;  %v16626_v23 = vld [vmem:[#allocation46_spill] sm:$0xff] }
 0x2b3   :  { %v3015_v7 = vsel %vm1350_vm5, nan, %v3014_v53  ;;  %v1256_v27 = vsel %vm1249_vm12, %v1252_v10, %v1255_v9  ;;  %vm1458_vm10 = vcmp.eq.s32.totalorder %v16623_v36, 0  ;;  %v1459_v4 = vxor.u32 2147483648, %v12978_v41 }
 0x2b4   :  { %v10923_v29 = vpack.i.bf16 %v3015_v7, %v2912_v28  ;;  %v13331_v55 = vsel %vm1246_vm14, nan, %v1256_v27  ;;  %vm1461_vm3 = vcmp.eq.s32.totalorder %v16623_v36, 2  ;;  %v1462_v32 = vxor.u32 2147483648, %v12966_v33 }
 0x2b5   :  { %vm1558_vm15 = vweird.f32 %v16624_v11  ;;  %vm1561_vm5 = vcmp.lt.s32.totalorder %v16625_v26, 2  ;;  %vm1562_vm8 = vcmp.eq.s32.totalorder %v16625_v26, 0  ;;  %v1563_v58 = vxor.u32 2147483648, %v12876_v17 }
 0x2b6   :  { %10924 = vrot.lane.b32.xlu0 %v10923_v29, %s11430_s30  ;;  %vm1565_vm13 = vcmp.eq.s32.totalorder %v16625_v26, 2  ;;  %v1566_v13 = vxor.u32 2147483648, %v12823_v35  ;;  %vm3110_vm14 = vcmp.lt.s32.totalorder %v16626_v23, 2  ;;  %vm3111_vm6 = vcmp.eq.s32.totalorder %v16626_v23, 0 }
 0x2b7   :  { %vm3114_vm11 = vcmp.eq.s32.totalorder %v16626_v23, 2  ;;  %vm3213_vm7 = vcmp.lt.s32.totalorder %v16627_v52, 2  ;;  %vm3214_vm9 = vcmp.eq.s32.totalorder %v16627_v52, 0  ;;  %v1564_v12 = vsel %vm1562_vm8, %v12823_v35, %v1563_v58 }
 0x2b8   :  { %v1567_v19 = vsel %vm1565_vm13, %v1566_v13, %v12876_v17  ;;  %v3113_v42 = vsel %vm3111_vm6, %v12966_v33, %v1459_v4  ;;  %v3116_v6 = vsel %vm3114_vm11, %v1462_v32, %v12978_v41  ;;  %v3216_v44 = vsel %vm3214_vm9, %v12823_v35, %v1563_v58 }
 0x2b9   :  { %v1568_v60 = vsel %vm1561_vm5, %v1564_v12, %v1567_v19  ;;  %v3117_v40 = vsel %vm3110_vm14, %v3113_v42, %v3116_v6  ;;  %vm3217_vm0 = vcmp.eq.s32.totalorder %v16627_v52, 2  ;;  %v1460_v30 = vsel %vm1458_vm10, %v12966_v33, %v1459_v4 }
 0x2ba   :  { %v13356_v2 = vsel %vm1558_vm15, nan, %v1568_v60  ;;  %v3118_v28 = vsel %vm1454_vm2, nan, %v3117_v40  ;;  %v3219_v63 = vsel %vm3217_vm0, %v1566_v13, %v12876_v17  ;;  %vm1457_vm1 = vcmp.lt.s32.totalorder %v16623_v36, 2  ;;  %v11067_v40 = vld [vmem:[%s16630_s2] sm:$0xff]  }
 0x2bb   :  { %v3220_v53 = vsel %vm3213_vm7, %v3216_v44, %v3219_v63  ;;  %v1463_v35 = vsel %vm1461_vm3, %v1462_v32, %v12978_v41  ;;  %vm1662_vm4 = vweird.f32 %v12078_v21  ;;  %vm1665_vm12 = vcmp.lt.s32.totalorder %v12947_v49, 2  ;;  %v11066_v63 = vld [vmem:[#allocation4 + $0x18] sm:$0x3f]  }
 0x2bc   :  { %v3221_v10 = vsel %vm1558_vm15, nan, %v3220_v53  ;;  %v1464_v9 = vsel %vm1457_vm1, %v1460_v30, %v1463_v35  ;;  %vm1666_vm5 = vcmp.eq.s32.totalorder %v12947_v49, 0  ;;  %v1667_v17 = vxor.u32 2147483648, %v13158_v47 }
 0x2bd   :  { %v10928_v33 = vpack.i.bf16 %v3221_v10, %v3118_v28  ;;  %v13376_v7 = vsel %vm1454_vm2, nan, %v1464_v9  ;;  %vm1669_vm10 = vcmp.eq.s32.totalorder %v12947_v49, 2  ;;  %v1670_v41 = vxor.u32 2147483648, %v13153_v18  ;;  %v11357_v9 = vld [vmem:[%s16481_s6 + $0x8] sm:$0xff] }
 0x2be   :  { %vm1766_vm3 = vweird.f32 %v11995_v3  ;;  %vm1769_vm15 = vcmp.lt.s32.totalorder %v12933_v38, 2  ;;  %vm1770_vm8 = vcmp.eq.s32.totalorder %v12933_v38, 0  ;;  %v1771_v27 = vxor.u32 2147483648, %v12989_v59 }
 0x2bf   :  { %10929 = vrot.lane.b32.xlu1 %v10928_v33, %s11430_s30  ;;  %vm1773_vm13 = vcmp.eq.s32.totalorder %v12933_v38, 2  ;;  %v1774_v1 = vxor.u32 2147483648, %v12983_v54  ;;  %vm3316_vm2 = vcmp.lt.s32.totalorder %v12939_v46, 2  ;;  %vm3317_vm14 = vcmp.eq.s32.totalorder %v12939_v46, 0  ;;  %v11358_v33 = vld [vmem:[%s16481_s6 + $0x10] sm:$0xff] }
 0x2c0   :  { %v1772_v36 = vsel %vm1770_vm8, %v12983_v54, %v1771_v27  ;;  %v3319_v29 = vsel %vm3317_vm14, %v13153_v18, %v1667_v17  ;;  %vm3320_vm6 = vcmp.eq.s32.totalorder %v12939_v46, 2  ;;  %vm3419_vm11 = vcmp.lt.s32.totalorder %v12906_v31, 2 }
 0x2c1   :  { %v1775_v4 = vsel %vm1773_vm13, %v1774_v1, %v12989_v59  ;;  %v3322_v32 = vsel %vm3320_vm6, %v1670_v41, %v13158_v47  ;;  %vm3420_vm7 = vcmp.eq.s32.totalorder %v12906_v31, 0  ;;  %vm3423_vm9 = vcmp.eq.s32.totalorder %v12906_v31, 2 }
 0x2c2   :  { %v1776_v11 = vsel %vm1769_vm15, %v1772_v36, %v1775_v4  ;;  %v3323_v26 = vsel %vm3316_vm2, %v3319_v29, %v3322_v32  ;;  %v3422_v58 = vsel %vm3420_vm7, %v12983_v54, %v1771_v27  ;;  %v3425_v13 = vsel %vm3423_vm9, %v1774_v1, %v12989_v59  ;;  %v11069_v1 = vld [vmem:[%s16630_s2 + $0x10] sm:$0xff]   ;;  %v11361_v36 = vld [vmem:[%s16481_s6 + $0x28] sm:$0xff]  ;;  %v11071_v4 = vld [vmem:[%s16630_s2 + $0x20] sm:$0xff]  }
 0x2c3   :  { %v13403_v46 = vsel %vm1766_vm3, nan, %v1776_v11  ;;  %v3324_v23 = vsel %vm1662_vm4, nan, %v3323_v26  ;;  %v3426_v52 = vsel %vm3419_vm11, %v3422_v58, %v3425_v13  ;;  %v1668_v31 = vsel %vm1666_vm5, %v13153_v18, %v1667_v17  ;;  %v11362_v29 = vld [vmem:[%s16481_s6 + $0x30] sm:$0xff]  ;;  %v11363_v32 = vld [vmem:[%s16481_s6 + $0x38] sm:$0xff]  ;;  %v11364_v11 = vld [vmem:[%s16481_s6 + $0x40] sm:$0xff] }
 0x2c4   :  { %v3427_v38 = vsel %vm1766_vm3, nan, %v3426_v52  ;;  %v1671_v54 = vsel %vm1669_vm10, %v1670_v41, %v13158_v47  ;;  %vm1870_vm0 = vweird.f32 %v12301_v5  ;;  %vm1873_vm1 = vcmp.lt.s32.totalorder %v13221_v57, 2  ;;  %v3715_v47 = vld [vmem:[%s16628_s1] sm:$0x7]  ;;  %v11072_v26 = vld [vmem:[%s16630_s2 + $0x28] sm:$0xff]   ;;  %v11366_v13 = vld [vmem:[%s16481_s6 + $0x50] sm:$0xff] }
 0x2c5   :  { %v10933_v59 = vpack.i.bf16 %v3427_v38, %v3324_v23  ;;  %v1672_v12 = vsel %vm1665_vm12, %v1668_v31, %v1671_v54  ;;  %vm1874_vm15 = vcmp.eq.s32.totalorder %v13221_v57, 0  ;;  %v1875_v19 = vxor.u32 2147483648, %v13306_v22  ;;  %v11360_v5 = vld [vmem:[%s16481_s6 + $0x20] sm:$0xff]  ;;  %v11365_v58 = vld [vmem:[%s16481_s6 + $0x48] sm:$0xff]  ;;  %v11367_v23 = vld [vmem:[%s16481_s6 + $0x58] sm:$0xff] }
 0x2c6   :  { %v13423_v3 = vsel %vm1662_vm4, nan, %v1672_v12  ;;  %vm1877_vm5 = vcmp.eq.s32.totalorder %v13221_v57, 2  ;;  %v1878_v18 = vxor.u32 2147483648, %v13302_v56  ;;  %vm1974_vm10 = vweird.f32 %v12192_v0  ;;  %v11359_v0 = vld [vmem:[%s16481_s6 + $0x18] sm:$0xff]  ;;  %v11368_v52 = vld [vmem:[%s16481_s6 + $0x60] sm:$0xff]  ;;  %v11369_v31 = vld [vmem:[%s16481_s6 + $0x68] sm:$0xff] }
 0x2c7   :  { %10934 = vrot.lane.b32.xlu0 %v10933_v59, %s11430_s30  ;;  %vm1977_vm3 = vcmp.lt.s32.totalorder %v13020_v20, 2  ;;  %vm1978_vm12 = vcmp.eq.s32.totalorder %v13020_v20, 0  ;;  %v1979_v49 = vxor.u32 2147483648, %v13193_v48  ;;  %vm1981_vm8 = vcmp.eq.s32.totalorder %v13020_v20, 2  ;;  %v11070_v57 = vld [vmem:[%s16630_s2 + $0x18] sm:$0xff]   ;;  %v11370_v38 = vld [vmem:[%s16481_s6 + $0x70] sm:$0xff] }
 0x2c8   :  { %v1982_v21 = vxor.u32 2147483648, %v13190_v50  ;;  %vm3522_vm4 = vcmp.lt.s32.totalorder %v13177_v37, 2  ;;  %vm3523_vm13 = vcmp.eq.s32.totalorder %v13177_v37, 0  ;;  %vm3526_vm2 = vcmp.eq.s32.totalorder %v13177_v37, 2  ;;  %v11068_v37 = vld [vmem:[%s16630_s2 + $0x8] sm:$0xff]   ;;  %v11371_v54 = vld [vmem:[%s16481_s6 + $0x78] sm:$0xff] }
 0x2c9   :  { %v1980_v42 = vsel %vm1978_vm12, %v13190_v50, %v1979_v49  ;;  %v3525_v6 = vsel %vm3523_vm13, %v13302_v56, %v1875_v19  ;;  %v3528_v60 = vsel %vm3526_vm2, %v1878_v18, %v13306_v22  ;;  %vm3625_vm14 = vcmp.lt.s32.totalorder %v13022_v39, 2  ;;  %s16840_s6 = sld [smem:[#allocation88_spill]] }
 0x2ca   :  { %vm16629_vm6 = vcmask 1042432   ;;  %v1983_v44 = vsel %vm1981_vm8, %v1982_v21, %v13193_v48  ;;  %v3529_v28 = vsel %vm3522_vm4, %v3525_v6, %v3528_v60  ;;  %vm3626_vm11 = vcmp.eq.s32.totalorder %v13022_v39, 0 }
 0x2cb   :  { %10492 = vmatprep.subr.msk.mxu1 %vm16629_vm6, %v3715_v47  ;;  %vm3629_vm7 = vcmp.eq.s32.totalorder %v13022_v39, 2  ;;  %vm16631_vm9 = vmmov %vm16629_vm6  ;;  %v1984_v30 = vsel %vm1977_vm3, %v1980_v42, %v1983_v44  ;;  %v3530_v53 = vsel %vm1870_vm0, nan, %v3529_v28  ;;  %v3628_v35 = vsel %vm3626_vm11, %v13190_v50, %v1979_v49 }
 0x2cc   :  { %10493 = vmatpush3.msk.msra.mxu1 %vm16631_vm9, %v3715_v47  ;;  %v3631_v10 = vsel %vm3629_vm7, %v1982_v21, %v13193_v48  ;;  %vm16632_vm12 = vcmask 23552   ;;  %v13467_v17 = vsel %vm1974_vm10, nan, %v1984_v30  ;;  %v1876_v50 = vsel %vm1874_vm15, %v13302_v56, %v1875_v19 }
 0x2cd   :  { %10495 = vmatmul.mubr.msk.f32.vlgmr.msra.gmra.mrb[0].mxu1 %vm16632_vm12, %v11357_v9  ;;  %10542 = vmatprep.subr.bf16.mxu1 %v11067_v40  ;;  %v3632_v20 = vsel %vm3625_vm14, %v3628_v35, %v3631_v10  ;;  %v1879_v48 = vsel %vm1877_vm5, %v1878_v18, %v13306_v22  ;;  %vm16633_vm3 = vmmov %vm16632_vm12  ;;  %vm7328_vm8 = vcmask 1045504   ;;  %vm3698_vm12 = vcmask 244736  }
 0x2ce   :  { %10497 = vmatprep.mubr.msk.f32.mxu1 %vm16633_vm3, %v11358_v33  ;;  %10543 = vmatpush3.bf16.msra.mxu1 %v11067_v40  ;;  %v3633_v41 = vsel %vm1974_vm10, nan, %v3632_v20  ;;  %v1880_v39 = vsel %vm1873_vm1, %v1876_v50, %v1879_v48  ;;  %v7330_v22 = vsel %vm7328_vm8, %v11066_v63, 0  ;;  %vm16634_vm1 = vmmov %vm16633_vm3  ;;  %vm16468_vm3 = vcmask 490496  }
 0x2cf   :  { %10544 = vmatprep.subr.bf16.mxu1 %v11068_v37  ;;  %v10938_v56 = vpack.i.bf16 %v3633_v41, %v3530_v53  ;;  %v13487_v27 = vsel %vm1870_vm0, nan, %v1880_v39  ;;  %10758 = vmatprep.subr.msk.bf16.mxu0 %vm7328_vm8, %v11066_v63  ;;  %vm16635_vm0 = vmmov %vm16634_vm1 }
 0x2d0   :  { %10525 = vmatpush3.bf16.msra.mxu0 %v7330_v22  ;;  %vm16636_vm15 = vmmov %vm16635_vm0 }
 0x2d1   :  { %10498 = vmatmul.mubr.msk.f32.gmra.mrb[2].mxu1 %vm16634_vm1, %v11359_v0  ;;  %10939 = vrot.lane.b32.xlu1 %v10938_v56, %s11430_s30  ;;  %vm16637_vm5 = vmmov %vm16635_vm0 }
 0x2d2   :  { %10500 = vmatprep.mubr.msk.f32.mxu1 %vm16635_vm0, %v11360_v5  ;;  %10545 = vmatpush3.bf16.msra.mxu1 %v11068_v37  ;;  %vm16638_vm10 = vmmov %vm16635_vm0 }
 0x2d3   :  { %10546 = vmatprep.subr.bf16.mxu1 %v11069_v1  ;;  %vm16639_vm4 = vmmov %vm16635_vm0 }
 0x2d4   :  { %vm16640_vm13 = vmmov %vm16635_vm0 }
 0x2d5   :  { %10501 = vmatmul.mubr.msk.f32.gmra.mrb[4].mxu1 %vm16636_vm15, %v11361_v36  ;;  %vm16641_vm2 = vmmov %vm16635_vm0 }
 0x2d6   :  { %10503 = vmatprep.mubr.msk.f32.mxu1 %vm16637_vm5, %v11362_v29  ;;  %10547 = vmatpush3.bf16.msra.mxu1 %v11069_v1  ;;  %vm16642_vm14 = vmmov %vm16635_vm0 }
 0x2d7   :  { %10548 = vmatprep.subr.bf16.mxu1 %v11070_v57  ;;  %vm16643_vm6 = vmmov %vm16635_vm0 }
 0x2d8   :  { %vm16644_vm11 = vmmov %vm16635_vm0 }
 0x2d9   :  { %10504 = vmatmul.mubr.msk.f32.gmra.mrb[6].mxu1 %vm16638_vm10, %v11363_v32  ;;  %vm16645_vm7 = vmmov %vm16635_vm0  ;;  %v11074_v32 = vld [vmem:[%s16630_s2 + $0x38] sm:$0xff]  }
 0x2da   :  { %10506 = vmatprep.mubr.msk.f32.mxu1 %vm16639_vm4, %v11364_v11  ;;  %10549 = vmatpush3.bf16.msra.mxu1 %v11070_v57  ;;  %vm16646_vm9 = vmmov %vm16635_vm0 }
 0x2db   :  { %10550 = vmatprep.subr.bf16.mxu1 %v11071_v4 }
 0x2dd   :  { %10507 = vmatmul.mubr.msk.f32.gmra.mrb[8].mxu1 %vm16640_vm13, %v11365_v58 }
 0x2de   :  { %10509 = vmatprep.mubr.msk.f32.mxu1 %vm16641_vm2, %v11366_v13  ;;  %10551 = vmatpush3.bf16.msra.mxu1 %v11071_v4  ;;  %v11073_v4 = vld [vmem:[%s16630_s2 + $0x30] sm:$0xff]  }
 0x2df   :  { %10552 = vmatprep.subr.bf16.mxu1 %v11072_v26 }
 0x2e1   :  { %10510 = vmatmul.mubr.msk.f32.gmra.mrb[10].mxu1 %vm16642_vm14, %v11367_v23 }
 0x2e2   :  { %10512 = vmatprep.mubr.msk.f32.mxu1 %vm16643_vm6, %v11368_v52  ;;  %10553 = vmatpush3.bf16.msra.mxu1 %v11072_v26 }
 0x2e3   :  { %10554 = vmatprep.subr.bf16.mxu1 %v11073_v4 }
 0x2e5   :  { %10513 = vmatmul.mubr.msk.f32.gmra.mrb[12].mxu1 %vm16644_vm11, %v11369_v31 }
 0x2e6   :  { %10515 = vmatprep.mubr.msk.f32.mxu1 %vm16645_vm7, %v11370_v38  ;;  %10555 = vmatpush3.bf16.msra.mxu1 %v11073_v4 }
 0x2e7   :  { %10556 = vmatprep.subr.bf16.mxu1 %v11074_v32 }
 0x2e9   :  { %10516 = vmatmul.mubr.msk.f32.gmra.mrb[14].mxu1 %vm16646_vm9, %v11371_v54 }
 0x2ea   :  { %10557 = vmatpush3.bf16.msra.mxu1 %v11074_v32 }
 0x2fc   :  { %v10905_v59 = vpop.permute.xlu0 %10904 }
 0x2fd   :  { %v10907_v12 = vunpack.i.h.bf16 %v10905_v59  ;;  %v10906_v19 = vunpack.i.l.bf16 %v10905_v59 }
 0x2ff   :  { %v13558_v18 = vsel %vm3698_vm12, %v13078_v61, %v10907_v12  ;;  %v13562_v49 = vsel %vm3698_vm12, %v13109_v45, %v10906_v19 }
 0x300   :  { %16647 = vst [vmem:[#allocation8_spill] sm:$0xff] %v13558_v18  ;;  %16648 = vst [vmem:[#allocation9_spill] sm:$0xff] %v13562_v49  ;;  %v7257_v21 = vpack.c.bf16 %v13558_v18, %v13562_v49 }
 0x302   :  { %10526 = vmatprep.mubr.msk.bf16.mxu0 %vm16468_vm3, %v7257_v21 }
 0x307   :  { %v10910_v47 = vpop.permute.xlu0 %10909 }
 0x308   :  { %v10912_v42 = vunpack.i.h.bf16 %v10910_v47  ;;  %v10911_v6 = vunpack.i.l.bf16 %v10910_v47 }
 0x30a   :  { %v13569_v60 = vsel %vm3698_vm12, %v13162_v14, %v10912_v42  ;;  %v13573_v61 = vsel %vm3698_vm12, %v13187_v24, %v10911_v6 }
 0x30b   :  { %16649 = vst [vmem:[#allocation11_spill] sm:$0xff] %v13569_v60  ;;  %16650 = vst [vmem:[#allocation25_spill] sm:$0xff] %v13573_v61  ;;  %v7258_v45 = vpack.c.bf16 %v13569_v60, %v13573_v61 }
 0x30d   :  { %10527 = vmatmul.mubr.msk.bf16.vlgmr.msra.gmra.mrb[16].mxu0 %vm16468_vm3, %v7258_v45 }
 0x316   :  { %v10915_v40 = vpop.permute.xlu1 %10914 }
 0x317   :  { %v10917_v37 = vunpack.i.h.bf16 %v10915_v40  ;;  %v10916_v44 = vunpack.i.l.bf16 %v10915_v40 }
 0x319   :  { %v13580_v28 = vsel %vm3698_vm12, %v13216_v8, %v10917_v37  ;;  %v13584_v14 = vsel %vm3698_vm12, %v13226_v25, %v10916_v44 }
 0x31a   :  { %16651 = vst [vmem:[#allocation31_spill] sm:$0xff] %v13580_v28  ;;  %16652 = vst [vmem:[#allocation30_spill] sm:$0xff] %v13584_v14  ;;  %v7259_v24 = vpack.c.bf16 %v13580_v28, %v13584_v14 }
 0x31c   :  { %10530 = vmatprep.mubr.msk.bf16.mxu0 %vm16468_vm3, %v7259_v24 }
 0x320   :  { %v10920_v63 = vpop.permute.xlu1 %10919 }
 0x321   :  { %v10922_v30 = vunpack.i.h.bf16 %v10920_v63  ;;  %v10921_v53 = vunpack.i.l.bf16 %v10920_v63 }
 0x323   :  { %v13591_v35 = vsel %vm3698_vm12, %v13260_v34, %v10922_v30  ;;  %v13595_v8 = vsel %vm3698_vm12, %v13282_v51, %v10921_v53 }
 0x324   :  { %16653 = vst [vmem:[#allocation10_spill] sm:$0xff] %v13591_v35  ;;  %16654 = vst [vmem:[#allocation19_spill] sm:$0xff] %v13595_v8  ;;  %v7260_v25 = vpack.c.bf16 %v13591_v35, %v13595_v8 }
 0x326   :  { %10531 = vmatmul.mubr.msk.bf16.gmra.mrb[20].mxu0 %vm16468_vm3, %v7260_v25 }
 0x328   :  { %v10925_v10 = vpop.permute.xlu0 %10924 }
 0x329   :  { %v10927_v9 = vunpack.i.h.bf16 %v10925_v10  ;;  %v10926_v20 = vunpack.i.l.bf16 %v10925_v10 }
 0x32b   :  { %v13602_v50 = vsel %vm3698_vm12, %v13310_v43, %v10927_v9  ;;  %v13606_v34 = vsel %vm3698_vm12, %v13331_v55, %v10926_v20 }
 0x32c   :  { %16655 = vst [vmem:[#allocation22_spill] sm:$0xff] %v13602_v50  ;;  %16656 = vst [vmem:[#allocation21_spill] sm:$0xff] %v13606_v34  ;;  %v7261_v51 = vpack.c.bf16 %v13602_v50, %v13606_v34 }
 0x32e   :  { %10534 = vmatprep.mubr.msk.bf16.mxu0 %vm16468_vm3, %v7261_v51 }
 0x331   :  { %v10930_v48 = vpop.permute.xlu1 %10929 }
 0x332   :  { %v10932_v33 = vunpack.i.h.bf16 %v10930_v48  ;;  %v10931_v41 = vunpack.i.l.bf16 %v10930_v48 }
 0x334   :  { %v13613_v39 = vsel %vm3698_vm12, %v13356_v2, %v10932_v33  ;;  %v13617_v43 = vsel %vm3698_vm12, %v13376_v7, %v10931_v41  ;;  %v16666_v41 = vmov 2475754826  }
 0x335   :  { %16657 = vst [vmem:[#allocation20_spill] sm:$0xff] %v13613_v39  ;;  %16658 = vst [vmem:[#allocation18_spill] sm:$0xff] %v13617_v43  ;;  %v7262_v55 = vpack.c.bf16 %v13613_v39, %v13617_v43 }
 0x337   :  { %10535 = vmatmul.mubr.msk.bf16.gmra.mrb[24].mxu0 %vm16468_vm3, %v7262_v55 }
 0x339   :  { %v10935_v56 = vpop.permute.xlu0 %10934 }
 0x33a   :  { %v10937_v22 = vunpack.i.h.bf16 %v10935_v56  ;;  %v10936_v1 = vunpack.i.l.bf16 %v10935_v56  ;;  %v16667_v56 = vmov 2131351028  }
 0x33c   :  { %v13624_v0 = vsel %vm3698_vm12, %v13403_v46, %v10937_v22  ;;  %v13628_v2 = vsel %vm3698_vm12, %v13423_v3, %v10936_v1  ;;  %v16668_v1 = vmov 2102212464  }
 0x33d   :  { %16659 = vst [vmem:[#allocation27_spill] sm:$0xff] %v13624_v0  ;;  %16660 = vst [vmem:[#allocation24_spill] sm:$0xff] %v13628_v2  ;;  %v7263_v7 = vpack.c.bf16 %v13624_v0, %v13628_v2 }
 0x33f   :  { %10538 = vmatprep.mubr.msk.bf16.mxu0 %vm16468_vm3, %v7263_v7 }
 0x343   :  { %v10940_v5 = vpop.permute.xlu1 %10939 }
 0x344   :  { %v10942_v57 = vunpack.i.h.bf16 %v10940_v5  ;;  %v10941_v36 = vunpack.i.l.bf16 %v10940_v5 }
 0x346   :  { %v13635_v29 = vsel %vm3698_vm12, %v13467_v17, %v10942_v57  ;;  %v13639_v46 = vsel %vm3698_vm12, %v13487_v27, %v10941_v36 }
 0x347   :  { %16661 = vst [vmem:[#allocation13_spill] sm:$0xff] %v13635_v29  ;;  %16662 = vst [vmem:[#allocation26_spill] sm:$0xff] %v13639_v46  ;;  %v7264_v3 = vpack.c.bf16 %v13635_v29, %v13639_v46 }
 0x349   :  { %10539 = vmatmul.mubr.msk.bf16.gmra.mrb[28].mxu0 %vm16468_vm3, %v7264_v3 }
 0x3a0   :  { %v13650_v17 = vpop.f32.mrb[0].mxu1 }
 0x3a1   :  { %v3968_v27 = vand.u32 2147483647, %v13650_v17  ;;  %v3971_v11 = vand.u32 2139095040, %v13650_v17  ;;  %v13654_v26 = vpop.f32.mrb[1].mxu1 }
 0x3a2   :  { %v3864_v58 = vand.u32 2147483647, %v13654_v26  ;;  %v3867_v13 = vand.u32 2139095040, %v13654_v26 }
 0x3a3   :  { %v3972_v52 = vshrl.u32 %v3971_v11, 23  ;;  %v3975_v31 = vand.u32 8388607, %v3968_v27 }
 0x3a4   :  { %v13658_v23 = vpop.f32.mrb[2].mxu1  ;;  %v3868_v38 = vshrl.u32 %v3867_v13, 23  ;;  %v3871_v54 = vand.u32 8388607, %v3864_v58 }
 0x3a5   :  { %16663 = vst [vmem:[#allocation23_spill] sm:$0xff] %v13658_v23  ;;  %v4179_v59 = vand.u32 2139095040, %v13658_v23  ;;  %v10036_v12 = vadd.s32 4294967169, %v3972_v52  ;;  %v13665_v19 = vpop.f32.mrb[3].mxu1  ;;  %v3976_v45 = vor.u32 8388608, %v3975_v31 }
 0x3a6   :  { %16664 = vst [vmem:[#allocation12_spill] sm:$0xff] %v13665_v19  ;;  %v10032_v21 = vadd.s32 4294967169, %v3868_v38  ;;  %v3872_v40 = vor.u32 8388608, %v3871_v54  ;;  %v16376_v25 = vand.u32 2147483647, %v13658_v23 }
 0x3a7   :  { %v4180_v47 = vshrl.u32 %v4179_v59, 23  ;;  %v3978_v6 = vadd.s32 1, %v10036_v12  ;;  %v13670_v10 = vshll.u32 %v3976_v45, 8 }
 0x3a8   :  { %v13667_v42 = vpop.f32.mrb[4].mxu1  ;;  %v3874_v37 = vadd.s32 1, %v10032_v21  ;;  %v13672_v20 = vshll.u32 %v3872_v40, 8 }
 0x3a9   :  { %16665 = vst [vmem:[#allocation33_spill] sm:$0xff] %v13667_v42  ;;  %v10044_v44 = vadd.s32 4294967169, %v4180_v47  ;;  %vm3979_vm1 = vcmp.gt.s32.totalorder %v3978_v6, 0 }
 0x3aa   :  { %v3980_v24 = vsel %vm3979_vm1, %v3978_v6, 0  ;;  %vm3875_vm0 = vcmp.gt.s32.totalorder %v3874_v37, 0 }
 0x3ab   :  { %v3981_v63 = vshrl.u32 %v3980_v24, 5  ;;  %v3982_v30 = vand.u32 31, %v3980_v24  ;;  %v3876_v53 = vsel %vm3875_vm0, %v3874_v37, 0  ;;  %v13674_v51 = vadd.s32 1, %v10044_v44 }
 0x3ac   :  { %v3878_v9 = vand.u32 31, %v3876_v53  ;;  %v13681_v57 = vshrl.u32 %v3876_v53, 5 }
 0x3ad   :  { %v3983_v48 = vsub.s32 32, %v3982_v30  ;;  %v3985_v33 = vshll.u32 %v16505_v15, %v3982_v30  ;;  %v3988_v55 = vshll.u32 %v16666_v41, %v3982_v30  ;;  %v3991_v22 = vshll.u32 %v16667_v56, %v3982_v30 }
 0x3ae   :  { %v3994_v7 = vshll.u32 %v16668_v1, %v3982_v30  ;;  %v3997_v5 = vshll.u32 %v16503_v16, %v3982_v30  ;;  %vm4000_vm15 = vcmp.lt.s32.totalorder %v3981_v63, 1  ;;  %vm4001_vm5 = vcmp.lt.s32.totalorder %v3981_v63, 2 }
 0x3af   :  { %v3984_v36 = vshrl.u32 %v16505_v15, %v3983_v48  ;;  %v3986_v3 = vshrl.u32 %v16666_v41, %v3983_v48  ;;  %v3989_v4 = vshrl.u32 %v16667_v56, %v3983_v48  ;;  %v3992_v32 = vshrl.u32 %v16668_v1, %v3983_v48 }
 0x3b0   :  { %v3995_v11 = vshrl.u32 %v16503_v16, %v3983_v48  ;;  %v3998_v13 = vshrl.u32 %v16504_v62, %v3983_v48  ;;  %vm4003_vm10 = vcmp.lt.s32.totalorder %v3981_v63, 4  ;;  %v3879_v54 = vsub.s32 32, %v3878_v9 }
 0x3b1   :  { %v3987_v52 = vor.u32 %v3986_v3, %v3985_v33  ;;  %v3990_v31 = vor.u32 %v3989_v4, %v3988_v55  ;;  %v3993_v38 = vor.u32 %v3992_v32, %v3991_v22  ;;  %vm4002_vm4 = vcmp.lt.s32.totalorder %v3981_v63, 3 }
 0x3b2   :  { %v3996_v59 = vor.u32 %v3995_v11, %v3994_v7  ;;  %v3999_v12 = vor.u32 %v3998_v13, %v3997_v5  ;;  %v3881_v21 = vshll.u32 %v16505_v15, %v3878_v9  ;;  %v3884_v30 = vshll.u32 %v16666_v41, %v3878_v9 }
 0x3b3   :  { %v4004_v47 = vsel %vm4000_vm15, %v3984_v36, %v3987_v52  ;;  %v4005_v6 = vsel %vm4003_vm10, %v3993_v38, 2102212464  ;;  %v4008_v45 = vsel %vm4000_vm15, %v3987_v52, %v3990_v31  ;;  %v4012_v40 = vsel %vm4000_vm15, %v3990_v31, %v3993_v38 }
 0x3b4   :  { %v4006_v37 = vsel %vm4002_vm4, %v3990_v31, %v4005_v6  ;;  %v4009_v44 = vsel %vm4003_vm10, %v3996_v59, 920167782  ;;  %v4013_v24 = vsel %vm4003_vm10, %v3999_v12, 1326507024  ;;  %vm4187_vm13 = vcmp.gt.s32.totalorder %v13674_v51, 0  ;;  %v13716_v6 = vpop.f32.mrb[5].mxu1 }
 0x3b5   :  { %v4010_v53 = vsel %vm4002_vm4, %v3993_v38, %v4009_v44  ;;  %v4014_v48 = vsel %vm4002_vm4, %v3996_v59, %v4013_v24  ;;  %v3880_v33 = vshrl.u32 %v16505_v15, %v3879_v54  ;;  %v3882_v55 = vshrl.u32 %v16666_v41, %v3879_v54  ;;  %16669 = vst [vmem:[#allocation41_spill] sm:$0xff] %v13716_v6 }
 0x3b6   :  { %v4007_v22 = vsel %vm4001_vm5, %v4004_v47, %v4006_v37  ;;  %v4011_v7 = vsel %vm4001_vm5, %v4008_v45, %v4010_v53  ;;  %v4015_v5 = vsel %vm4001_vm5, %v4012_v40, %v4014_v48  ;;  %v3885_v36 = vshrl.u32 %v16667_v56, %v3879_v54 }
 0x3b7   :  { %v13702_v3 = vmul.u32.u64.low %v13670_v10, %v4015_v5  ;;  %v13703_v4 = vmul.u32.u64.high %v13670_v10, %v4015_v5, %v13702_v3  ;;  %v13706_v32 = vmul.u32.u64.low %v13670_v10, %v4011_v7  ;;  %v13707_v11 = vmul.u32.u64.high %v13670_v10, %v4011_v7, %v13706_v32 }
 0x3b8   :  { %v3883_v13 = vor.u32 %v3882_v55, %v3881_v21  ;;  %v3886_v52 = vor.u32 %v3885_v36, %v3884_v30  ;;  %v3887_v31 = vshll.u32 %v16667_v56, %v3878_v9  ;;  %v3888_v38 = vshrl.u32 %v16668_v1, %v3879_v54 }
 0x3b9   :  { %v3890_v63 = vshll.u32 %v16668_v1, %v3878_v9  ;;  %v3891_v59 = vshrl.u32 %v16503_v16, %v3879_v54  ;;  %v3893_v12 = vshll.u32 %v16503_v16, %v3878_v9  ;;  %v3894_v47 = vshrl.u32 %v16504_v62, %v3879_v54 }
 0x3ba   :  { %v4023_v45 = vmul.u32 %v13670_v10, %v4007_v22  ;;  %v3889_v40 = vor.u32 %v3888_v38, %v3887_v31  ;;  %vm3896_vm2 = vcmp.lt.s32.totalorder %v13681_v57, 1  ;;  %vm3897_vm14 = vcmp.lt.s32.totalorder %v13681_v57, 2 }
 0x3bb   :  { %vm4025_vm6 = vc.u32 %v13703_v4, %v13706_v32  ;;  %v4026_v21 = vadd.s32 1, %v13707_v11  ;;  %v3892_v37 = vor.u32 %v3891_v59, %v3890_v63  ;;  %vm3898_vm11 = vcmp.lt.s32.totalorder %v13681_v57, 3 }
 0x3bc   :  { %v3895_v9 = vor.u32 %v3894_v47, %v3893_v12  ;;  %vm3899_vm7 = vcmp.lt.s32.totalorder %v13681_v57, 4  ;;  %v3900_v54 = vsel %vm3896_vm2, %v3880_v33, %v3883_v13  ;;  %v3904_v44 = vsel %vm3896_vm2, %v3883_v13, %v3886_v52 }
 0x3bd   :  { %v4027_v10 = vsel %vm4025_vm6, %v4026_v21, %v13707_v11  ;;  %v3901_v24 = vsel %vm3899_vm7, %v3889_v40, 2102212464  ;;  %v3905_v30 = vsel %vm3899_vm7, %v3892_v37, 920167782  ;;  %v3908_v53 = vsel %vm3896_vm2, %v3886_v52, %v3889_v40 }
 0x3be   :  { %v4028_v48 = vadd.s32 %v4027_v10, %v4023_v45  ;;  %v3902_v55 = vsel %vm3898_vm11, %v3886_v52, %v3901_v24  ;;  %v3906_v22 = vsel %vm3898_vm11, %v3889_v40, %v3905_v30  ;;  %v3909_v7 = vsel %vm3899_vm7, %v3895_v9, 1326507024 }
 0x3bf   :  { %v3903_v5 = vsel %vm3897_vm14, %v3900_v54, %v3902_v55  ;;  %v3907_v36 = vsel %vm3897_vm14, %v3904_v44, %v3906_v22  ;;  %v3910_v3 = vsel %vm3898_vm11, %v3892_v37, %v3909_v7  ;;  %v4188_v33 = vsel %vm4187_vm13, %v13674_v51, 0 }
 0x3c0   :  { %v4029_v13 = vadd.s32 536870912, %v4028_v48  ;;  %v3911_v11 = vsel %vm3897_vm14, %v3908_v53, %v3910_v3  ;;  %v13737_v31 = vmul.u32.u64.low %v13672_v20, %v3907_v36  ;;  %v13738_v52 = vmul.u32.u64.high %v13672_v20, %v3907_v36, %v13737_v31 }
 0x3c1   :  { %v13742_v38 = vmul.u32.u64.low %v13672_v20, %v3911_v11  ;;  %v13743_v63 = vmul.u32.u64.high %v13672_v20, %v3911_v11, %v13742_v38  ;;  %v4190_v12 = vand.u32 31, %v4188_v33  ;;  %v3919_v47 = vmul.u32 %v13672_v20, %v3903_v5 }
 0x3c2   :  { %v13745_v59 = vshrl.u32 %v4029_v13, 30  ;;  %v4183_v51 = vand.u32 8388607, %v16376_v25  ;;  %v3922_v45 = vadd.s32 1, %v13738_v52  ;;  %v4189_v40 = vshrl.u32 %v4188_v33, 5 }
 0x3c3   :  { %v4191_v21 = vsub.s32 32, %v4190_v12  ;;  %vm3921_vm9 = vc.u32 %v13743_v63, %v13737_v31  ;;  %v4193_v37 = vshll.u32 %v16505_v15, %v4190_v12  ;;  %v4196_v20 = vshll.u32 %v16666_v41, %v4190_v12 }
 0x3c4   :  { %v4031_v57 = vshll.u32 %v13745_v59, 30  ;;  %v3923_v54 = vsel %vm3921_vm9, %v3922_v45, %v13738_v52  ;;  %v4184_v10 = vor.u32 8388608, %v4183_v51  ;;  %v4199_v55 = vshll.u32 %v16667_v56, %v4190_v12 }
 0x3c5   :  { %v3924_v44 = vadd.s32 %v3923_v54, %v3919_v47  ;;  %v4194_v24 = vshrl.u32 %v16666_v41, %v4191_v21  ;;  %v4197_v30 = vshrl.u32 %v16667_v56, %v4191_v21  ;;  %vm4211_vm12 = vcmp.lt.s32.totalorder %v4189_v40, 4 }
 0x3c6   :  { %v13755_v9 = vsub.s32 %v4028_v48, %v4031_v57  ;;  %v4075_v22 = vand.u32 2139095040, %v13665_v19  ;;  %v4192_v48 = vshrl.u32 %v16505_v15, %v4191_v21  ;;  %v4200_v36 = vshrl.u32 %v16668_v1, %v4191_v21 }
 0x3c7   :  { %v3925_v7 = vadd.s32 536870912, %v3924_v44  ;;  %v4195_v5 = vor.u32 %v4194_v24, %v4193_v37  ;;  %v4198_v33 = vor.u32 %v4197_v30, %v4196_v20  ;;  %v4202_v13 = vshll.u32 %v16668_v1, %v4190_v12 }
 0x3c8   :  { %v4034_v53 = vsub.s32 0, %v13755_v9  ;;  %v4203_v11 = vshrl.u32 %v16503_v16, %v4191_v21  ;;  %v4201_v38 = vor.u32 %v4200_v36, %v4199_v55  ;;  %v4205_v47 = vshll.u32 %v16503_v16, %v4190_v12 }
 0x3c9   :  { %v13769_v52 = vshrl.u32 %v3925_v7, 30  ;;  %v4206_v51 = vshrl.u32 %v16504_v62, %v4191_v21  ;;  %vm4208_vm1 = vcmp.lt.s32.totalorder %v4189_v40, 1  ;;  %vm4210_vm0 = vcmp.lt.s32.totalorder %v4189_v40, 3 }
 0x3ca   :  { %v10037_v3 = vmin.u32 %v4034_v53, %v13755_v9  ;;  %v4204_v45 = vor.u32 %v4203_v11, %v4202_v13  ;;  %v4213_v20 = vsel %vm4211_vm12, %v4201_v38, 2102212464  ;;  %v4076_v24 = vshrl.u32 %v4075_v22, 23 }
 0x3cb   :  { %v3927_v37 = vshll.u32 %v13769_v52, 30  ;;  %v4207_v54 = vor.u32 %v4206_v51, %v4205_v47  ;;  %vm4209_vm15 = vcmp.lt.s32.totalorder %v4189_v40, 2  ;;  %v4224_v7 = vshll.u32 %v4184_v10, 8  ;;  %v13785_v10 = vpop.f32.mrb[6].mxu1 }
 0x3cc   :  { %v4036_v57 = vclz %v10037_v3  ;;  %v4217_v53 = vsel %vm4211_vm12, %v4204_v45, 920167782  ;;  %v4212_v12 = vsel %vm4208_vm1, %v4192_v48, %v4195_v5  ;;  %v4216_v21 = vsel %vm4208_vm1, %v4195_v5, %v4198_v33  ;;  %16670 = vst [vmem:[#allocation40_spill] sm:$0xff] %v13785_v10 }
 0x3cd   :  { %v13776_v55 = vsub.s32 %v3924_v44, %v3927_v37  ;;  %v4218_v36 = vsel %vm4210_vm0, %v4201_v38, %v4217_v53  ;;  %v4214_v3 = vsel %vm4210_vm0, %v4198_v33, %v4213_v20  ;;  %v4220_v13 = vsel %vm4208_vm1, %v4198_v33, %v4201_v38 }
 0x3ce   :  { %v10038_v30 = vadd.s32 4294967294, %v4036_v57  ;;  %v4221_v22 = vsel %vm4211_vm12, %v4207_v54, 1326507024  ;;  %v10040_v51 = vadd.s32 4294967169, %v4076_v24  ;;  %v4219_v48 = vsel %vm4209_vm15, %v4216_v21, %v4218_v36 }
 0x3cf   :  { %v3930_v47 = vsub.s32 0, %v13776_v55  ;;  %v4222_v5 = vsel %vm4210_vm0, %v4204_v45, %v4221_v22  ;;  %v16377_v57 = vand.u32 2147483647, %v13665_v19  ;;  %v4024_v37 = vadd.s32 %v13706_v32, %v13703_v4 }
 0x3d0   :  { %vm10039_vm5 = vcmp.lt.s32.totalorder %v10038_v30, 0  ;;  %v4215_v38 = vsel %vm4209_vm15, %v4212_v12, %v4214_v3  ;;  %v4223_v54 = vsel %vm4209_vm15, %v4220_v13, %v4222_v5  ;;  %v4082_v45 = vadd.s32 1, %v10040_v51  ;;  %v13811_v13 = vld [vmem:[%s16671_s3] ss:$0 sm:$0xff] }
 0x3d1   :  { %v4039_v11 = vsel %vm10039_vm5, 0, %v10038_v30  ;;  %v10033_v33 = vmin.u32 %v3930_v47, %v13776_v55  ;;  %v13795_v30 = vmul.u32.u64.low %v4224_v7, %v4223_v54  ;;  %v13796_v53 = vmul.u32.u64.high %v4224_v7, %v4223_v54, %v13795_v30 }
 0x3d2   :  { %v4044_v44 = vsub.s32 4294967266, %v4039_v11  ;;  %v4040_v20 = vsub.s32 32, %v4039_v11  ;;  %v13798_v21 = vmul.u32.u64.low %v4224_v7, %v4219_v48  ;;  %v13799_v36 = vmul.u32.u64.high %v4224_v7, %v4219_v48, %v13798_v21 }
 0x3d3   :  { %v3932_v25 = vclz %v10033_v33  ;;  %v4054_v22 = vsub.s32 4, %v13745_v59  ;;  %v4079_v32 = vand.u32 8388607, %v16377_v57  ;;  %vm4083_vm10 = vcmp.gt.s32.totalorder %v4082_v45, 0 }
 0x3d4   :  { %v4045_v24 = vadd.s32 127, %v4044_v44  ;;  %v4041_v40 = vshll.u32 %v13755_v9, %v4039_v11  ;;  %v4042_v12 = vshrl.u32 %v4024_v37, %v4040_v20  ;;  %v4231_v3 = vmul.u32 %v4224_v7, %v4215_v38 }
 0x3d5   :  { %v10034_v4 = vadd.s32 4294967294, %v3932_v25  ;;  %vm4233_vm4 = vc.u32 %v13796_v53, %v13798_v21  ;;  %v4234_v25 = vadd.s32 1, %v13799_v36  ;;  %v4084_v51 = vsel %vm4083_vm10, %v4082_v45, 0 }
 0x3d6   :  { %v4046_v47 = vshll.u32 %v4045_v24, 23  ;;  %vm13816_vm2 = vcmp.le.f32.partialorder %v3968_v27, 0.7853982  ;;  %vm3970_vm14 = vcmp.lt.s32.totalorder %v13650_v17, 0  ;;  %vm13823_vm6 = vcmp.le.f32.partialorder %v3864_v58, 0.7853982 }
 0x3d7   :  { %vm10035_vm13 = vcmp.lt.s32.totalorder %v10034_v4, 0  ;;  %vm3866_vm11 = vcmp.lt.s32.totalorder %v13654_v26, 0  ;;  %v3950_v48 = vsub.s32 4, %v13769_v52  ;;  %v4235_v5 = vsel %vm4233_vm4, %v4234_v25, %v13799_v36 }
 0x3d8   :  { %v3935_v11 = vsel %vm10035_vm13, 0, %v10034_v4  ;;  %v4086_v27 = vand.u32 31, %v4084_v51  ;;  %v4043_v38 = vor.u32 %v4042_v12, %v4041_v40  ;;  %v4055_v58 = vsel %vm3970_vm14, %v4054_v22, %v13745_v59 }
 0x3d9   :  { %v4236_v54 = vadd.s32 %v4235_v5, %v4231_v3  ;;  %v4047_v30 = vor.u32 4788187, %v4046_v47  ;;  %v3920_v45 = vadd.s32 %v13737_v31, %v13743_v63  ;;  %v4080_v4 = vor.u32 8388608, %v4079_v32 }
 0x3da   :  { %v3936_v57 = vsub.s32 32, %v3935_v11  ;;  %v13841_v59 = vsel %vm13816_vm2, 0, %v4055_v58  ;;  %v3951_v22 = vsel %vm3866_vm11, %v3950_v48, %v13769_v52  ;;  %v4087_v12 = vsub.s32 32, %v4086_v27 }
 0x3db   :  { %v4237_v29 = vadd.s32 536870912, %v4236_v54  ;;  %v4050_v63 = vcvt.s32.f32 %v4043_v38  ;;  %v13852_v52 = vsel %vm13823_vm6, 0, %v3951_v22  ;;  %v4089_v48 = vshll.u32 %v16505_v15, %v4086_v27  ;;  %v13868_v22 = vpop.f32.mrb[7].mxu1 }
 0x3dc   :  { %v3938_v46 = vshrl.u32 %v3920_v45, %v3936_v57  ;;  %v4092_v38 = vshll.u32 %v16666_v41, %v4086_v27  ;;  %v4387_v45 = vand.u32 2139095040, %v13667_v42  ;;  %16676 = vst [vmem:[#allocation14_spill] sm:$0xff] %v13868_v22  ;;  %vm4178_vm15 = vcmp.lt.s32.totalorder %v13658_v23, 0 }
 0x3dd   :  { %v13846_v32 = vshrl.u32 %v4237_v29, 30  ;;  %v4090_v29 = vshrl.u32 %v16666_v41, %v4087_v12 }
 0x3df   :  { %v4239_v58 = vshll.u32 %v13846_v32, 30 }
 0x3e0   :  { %v10528_v7 = vpop.f32.mrb[16].mxu0 }
 0x3e1   :  { %v7375_v37 = vadd.f32 %v10528_v7, %v13811_v13  ;;  %v7366_v33 = vpop.f32.mrb[17].mxu0  ;;  %v3940_v7 = vsub.s32 4294967266, %v3935_v11 }
 0x3e2   :  { %v7367_v20 = vadd.f32 %v13811_v13, %v7366_v33  ;;  %v10529_v24 = vpop.f32.mrb[18].mxu0  ;;  %v4048_v33 = vand.u32 2147483647, %v4047_v30  ;;  %v4095_v30 = vshll.u32 %v16667_v56, %v4086_v27 }
 0x3e3   :  { %v7378_v36 = vadd.f32 %v10529_v24, %v13811_v13  ;;  %v7369_v25 = vpop.f32.mrb[19].mxu0  ;;  %v7431_v3 = vmax.f32 %v7375_v37, 0.0  ;;  %v3937_v24 = vshll.u32 %v13776_v55, %v3935_v11  ;;  %v3941_v0 = vadd.s32 127, %v3940_v7 }
 0x3e4   :  { %v7370_v40 = vadd.f32 %v13811_v13, %v7369_v25  ;;  %v7429_v47 = vmax.f32 %v7367_v20, 0.0  ;;  %v13856_v37 = vsub.s32 %v4236_v54, %v4239_v58  ;;  %v4093_v55 = vshrl.u32 %v16667_v56, %v4087_v12 }
 0x3e5   :  { %v7432_v31 = vmax.f32 %v7378_v36, 0.0  ;;  %v13860_v11 = vshll.u32 %v4080_v4, 8  ;;  %v13862_v57 = vmul.f32 %v4050_v63, %v4048_v33  ;;  %v4085_v20 = vshrl.u32 %v4084_v51, 5 }
 0x3e6   :  { %v7430_v5 = vmax.f32 %v7370_v40, 0.0  ;;  %v3939_v36 = vor.u32 %v3938_v46, %v3937_v24  ;;  %v3942_v7 = vshll.u32 %v3941_v0, 23  ;;  %v4242_v54 = vsub.s32 0, %v13856_v37 }
 0x3e7   :  { %v7446_v25 = vpack.c.bf16 %v7432_v31, %v7431_v3  ;;  %v4088_v40 = vshrl.u32 %v16505_v15, %v4087_v12  ;;  %v4091_v3 = vor.u32 %v4090_v29, %v4089_v48  ;;  %v4096_v4 = vshrl.u32 %v16668_v1, %v4087_v12 }
 0x3e8   :  { %v7445_v2 = vpack.c.bf16 %v7430_v5, %v7429_v47  ;;  %v4099_v51 = vshrl.u32 %v16503_v16, %v4087_v12  ;;  %v10045_v31 = vmin.u32 %v4242_v54, %v13856_v37  ;;  %v4094_v63 = vor.u32 %v4093_v55, %v4092_v38 }
 0x3e9   :  { %v4101_v47 = vshll.u32 %v16503_v16, %v4086_v27  ;;  %v4102_v0 = vshrl.u32 %v16504_v62, %v4087_v12  ;;  %v4232_v46 = vadd.s32 %v13798_v21, %v13796_v53  ;;  %v4097_v5 = vor.u32 %v4096_v4, %v4095_v30 }
 0x3ea   :  { %10558 = vmatprep.mubr.bf16.mxu1 %v7445_v2  ;;  %v4098_v2 = vshll.u32 %v16668_v1, %v4086_v27  ;;  %vm4104_vm7 = vcmp.lt.s32.totalorder %v4085_v20, 1  ;;  %v4052_v24 = vxor.u32 2147483648, %v13862_v57  ;;  %v4244_v58 = vclz %v10045_v31 }
 0x3eb   :  { %10559 = vmatmul.mubr.bf16.vlgmr.msra.gmra.mrb[16].mxu1 %v7446_v25  ;;  %v3943_v25 = vor.u32 4788187, %v3942_v7  ;;  %v4103_v48 = vor.u32 %v4102_v0, %v4101_v47  ;;  %v3946_v29 = vcvt.s32.f32 %v3939_v36  ;;  %vm4105_vm9 = vcmp.lt.s32.totalorder %v4085_v20, 2 }
 0x3ec   :  { %v4100_v33 = vor.u32 %v4099_v51, %v4098_v2  ;;  %vm4106_vm12 = vcmp.lt.s32.totalorder %v4085_v20, 3  ;;  %vm4107_vm1 = vcmp.lt.s32.totalorder %v4085_v20, 4  ;;  %v10046_v38 = vadd.s32 4294967294, %v4244_v58 }
 0x3ed   :  { %v4108_v55 = vsel %vm4104_vm7, %v4088_v40, %v4091_v3  ;;  %v4109_v27 = vsel %vm4107_vm1, %v4097_v5, 2102212464  ;;  %v4112_v54 = vsel %vm4104_vm7, %v4091_v3, %v4094_v63  ;;  %v4116_v43 = vsel %vm4104_vm7, %v4094_v63, %v4097_v5 }
 0x3ee   :  { %v4110_v12 = vsel %vm4106_vm12, %v4094_v63, %v4109_v27  ;;  %v4113_v39 = vsel %vm4107_vm1, %v4100_v33, 920167782  ;;  %v4117_v53 = vsel %vm4107_vm1, %v4103_v48, 1326507024  ;;  %v3944_v21 = vand.u32 2147483647, %v3943_v25 }
 0x3ef   :  { %vm10047_vm0 = vcmp.lt.s32.totalorder %v10046_v38, 0  ;;  %v4114_v30 = vsel %vm4106_vm12, %v4097_v5, %v4113_v39  ;;  %v4118_v4 = vsel %vm4106_vm12, %v4100_v33, %v4117_v53  ;;  %v4111_v7 = vsel %vm4105_vm9, %v4108_v55, %v4110_v12 }
 0x3f0   :  { %v4247_v2 = vsel %vm10047_vm0, 0, %v10046_v38  ;;  %v4115_v36 = vsel %vm4105_vm9, %v4112_v54, %v4114_v30  ;;  %v4119_v51 = vsel %vm4105_vm9, %v4116_v43, %v4118_v4  ;;  %v4388_v3 = vshrl.u32 %v4387_v45, 23 }
 0x3f1   :  { %v4248_v31 = vsub.s32 32, %v4247_v2  ;;  %v4249_v40 = vshll.u32 %v13856_v37, %v4247_v2  ;;  %v4252_v47 = vsub.s32 4294967266, %v4247_v2  ;;  %v4061_v5 = vadd.s32 3, %v13841_v59 }
 0x3f2   :  { %v13884_v0 = vmul.u32.u64.low %v13860_v11, %v4119_v51  ;;  %v13885_v63 = vmul.u32.u64.high %v13860_v11, %v4119_v51, %v13884_v0  ;;  %v13888_v25 = vmul.u32.u64.low %v13860_v11, %v4115_v36  ;;  %v13889_v39 = vmul.u32.u64.high %v13860_v11, %v4115_v36, %v13888_v25 }
 0x3f3   :  { %v3947_v33 = vmul.f32 %v3946_v29, %v3944_v21  ;;  %v4250_v43 = vshrl.u32 %v4232_v46, %v4248_v31  ;;  %v4253_v20 = vadd.s32 127, %v4252_v47  ;;  %v13895_v37 = vand.u32 3, %v13841_v59 }
 0x3f4   :  { %v3957_v45 = vadd.s32 3, %v13852_v52  ;;  %v16386_v48 = vand.u32 2147483647, %v13667_v42  ;;  %v10052_v38 = vadd.s32 4294967169, %v4388_v3  ;;  %v4053_v29 = vsel %vm3970_vm14, %v4052_v24, %v13862_v57 }
 0x3f5   :  { %16677 = vst [vmem:[#allocation28_spill] sm:$0xff] %v13895_v37  ;;  %v4254_v54 = vshll.u32 %v4253_v20, 23  ;;  %v4127_v46 = vmul.u32 %v13860_v11, %v4111_v7  ;;  %v16678_v59 = vand.u32 2147483647, %v13658_v23  ;;  %v4251_v30 = vor.u32 %v4250_v43, %v4249_v40 }
 0x3f6   :  { %vm4129_vm10 = vc.u32 %v13885_v63, %v13888_v25  ;;  %v4130_v4 = vadd.s32 1, %v13889_v39  ;;  %v3948_v2 = vxor.u32 2147483648, %v3947_v33  ;;  %v4262_v7 = vsub.s32 4, %v13846_v32 }
 0x3f7   :  { %vm13907_vm5 = vcmp.le.f32.partialorder %v16678_v59, 0.7853982  ;;  %v4255_v11 = vor.u32 4788187, %v4254_v54  ;;  %v4391_v31 = vand.u32 8388607, %v16386_v48 }
 0x3f8   :  { %v4131_v51 = vsel %vm4129_vm10, %v4130_v4, %v13889_v39  ;;  %v4394_v40 = vadd.s32 1, %v10052_v38  ;;  %v4283_v43 = vand.u32 2139095040, %v13716_v6  ;;  %v13921_v34 = vand.u32 3, %v4061_v5 }
 0x3f9   :  { %v10532_v58 = vpop.f32.mrb[20].mxu0  ;;  %v4132_v0 = vadd.s32 %v4131_v51, %v4127_v46  ;;  %v4263_v39 = vsel %vm4178_vm15, %v4262_v7, %v13846_v32  ;;  %v13928_v46 = vand.u32 3, %v3957_v45  ;;  %v13938_v5 = vsel %vm13816_vm2, %v13650_v17, %v4053_v29 }
 0x3fa   :  { %v7391_v55 = vadd.f32 %v10532_v58, %v13811_v13  ;;  %v7382_v27 = vpop.f32.mrb[21].mxu0  ;;  %vm4395_vm4 = vcmp.gt.s32.totalorder %v4394_v40, 0  ;;  %v4392_v4 = vor.u32 8388608, %v4391_v31  ;;  %v4284_v32 = vshrl.u32 %v4283_v43, 23 }
 0x3fb   :  { %v7383_v12 = vadd.f32 %v13811_v13, %v7382_v27  ;;  %v10533_v53 = vpop.f32.mrb[22].mxu0  ;;  %v4258_v27 = vcvt.s32.f32 %v4251_v30  ;;  %v4133_v59 = vadd.s32 536870912, %v4132_v0  ;;  %v4396_v50 = vsel %vm4395_vm4, %v4394_v40, 0 }
 0x3fc   :  { %v7394_v57 = vadd.f32 %v10533_v53, %v13811_v13  ;;  %v7385_v24 = vpop.f32.mrb[23].mxu0  ;;  %v7435_v47 = vmax.f32 %v7391_v55, 0.0  ;;  %v4256_v53 = vand.u32 2147483647, %v4255_v11  ;;  %v4398_v38 = vand.u32 31, %v4396_v50 }
 0x3fd   :  { %v7386_v36 = vadd.f32 %v13811_v13, %v7385_v24  ;;  %v7433_v20 = vmax.f32 %v7383_v12, 0.0  ;;  %v3949_v55 = vsel %vm3866_vm11, %v3948_v2, %v3947_v33  ;;  %v13931_v12 = vand.u32 3, %v13852_v52 }
 0x3fe   :  { %v7436_v3 = vmax.f32 %v7394_v57, 0.0  ;;  %v13933_v30 = vshrl.u32 %v4133_v59, 30  ;;  %v4399_v57 = vsub.s32 32, %v4398_v38  ;;  %v13940_v11 = vmul.f32 %v4258_v27, %v4256_v53 }
 0x3ff   :  { %v7434_v58 = vmax.f32 %v7386_v36, 0.0  ;;  %16681 = vst [vmem:[#allocation37_spill] sm:$0xff] %v13931_v12  ;;  %v13944_v33 = vsel %vm13907_vm5, 0, %v4263_v39  ;;  %v4401_v45 = vshll.u32 %v16505_v15, %v4398_v38  ;;  %v13951_v44 = vsel %vm13823_vm6, %v13654_v26, %v3949_v55  ;;  %v13956_v36 = vpop.f32.mrb[8].mxu1 }
 0x400   :  { %v7448_v54 = vpack.c.bf16 %v7436_v3, %v7435_v47  ;;  %v4135_v52 = vshll.u32 %v13933_v30, 30  ;;  %v4402_v29 = vshrl.u32 %v16666_v41, %v4399_v57  ;;  %v4404_v2 = vshll.u32 %v16666_v41, %v4398_v38  ;;  %16682 = vst [vmem:[#allocation36_spill] sm:$0xff] %v13956_v36 }
 0x401   :  { %v7447_v24 = vpack.c.bf16 %v7434_v58, %v7433_v20  ;;  %v4405_v7 = vshrl.u32 %v16667_v56, %v4399_v57  ;;  %v4397_v31 = vshrl.u32 %v4396_v50, 5  ;;  %v4407_v40 = vshll.u32 %v16667_v56, %v4398_v38 }
 0x402   :  { %v13958_v51 = vsub.s32 %v4132_v0, %v4135_v52  ;;  %v4408_v47 = vshrl.u32 %v16668_v1, %v4399_v57  ;;  %v4410_v3 = vshll.u32 %v16668_v1, %v4398_v38  ;;  %v13963_v9 = vshll.u32 %v4392_v4, 8 }
 0x403   :  { %10562 = vmatprep.mubr.bf16.mxu1 %v7447_v24  ;;  %v13966_v20 = vadd.s32 4294967169, %v4284_v32  ;;  %v4260_v58 = vxor.u32 2147483648, %v13940_v11  ;;  %v4400_v0 = vshrl.u32 %v16505_v15, %v4399_v57  ;;  %v4406_v50 = vor.u32 %v4405_v7, %v4404_v2 }
 0x404   :  { %10563 = vmatmul.mubr.bf16.gmra.mrb[20].mxu1 %v7448_v54  ;;  %v4138_v27 = vsub.s32 0, %v13958_v51  ;;  %v4403_v54 = vor.u32 %v4402_v29, %v4401_v45  ;;  %v4411_v53 = vshrl.u32 %v16503_v16, %v4399_v57  ;;  %v4413_v59 = vshll.u32 %v16503_v16, %v4398_v38 }
 0x405   :  { %v4414_v24 = vshrl.u32 %v16504_v62, %v4399_v57  ;;  %v4409_v4 = vor.u32 %v4408_v47, %v4407_v40  ;;  %vm4416_vm13 = vcmp.lt.s32.totalorder %v4397_v31, 1  ;;  %vm4417_vm2 = vcmp.lt.s32.totalorder %v4397_v31, 2 }
 0x406   :  { %v10041_v55 = vmin.u32 %v4138_v27, %v13958_v51  ;;  %v4412_v48 = vor.u32 %v4411_v53, %v4410_v3  ;;  %vm4419_vm14 = vcmp.lt.s32.totalorder %v4397_v31, 4  ;;  %vm4418_vm6 = vcmp.lt.s32.totalorder %v4397_v31, 3 }
 0x407   :  { %v4415_v43 = vor.u32 %v4414_v24, %v4413_v59  ;;  %v4421_v38 = vsel %vm4419_vm14, %v4409_v4, 2102212464  ;;  %v4420_v40 = vsel %vm4416_vm13, %v4400_v0, %v4403_v54  ;;  %vm4074_vm11 = vcmp.lt.s32.totalorder %v13665_v19, 0 }
 0x408   :  { %v4140_v2 = vclz %v10041_v55  ;;  %v4422_v47 = vsel %vm4418_vm6, %v4406_v50, %v4421_v38  ;;  %v4424_v59 = vsel %vm4416_vm13, %v4403_v54, %v4406_v50  ;;  %v4425_v55 = vsel %vm4419_vm14, %v4412_v48, 920167782 }
 0x409   :  { %v4426_v0 = vsel %vm4418_vm6, %v4409_v4, %v4425_v55  ;;  %11229 = vcosq.f32 %v13938_v5  ;;  %v4269_v31 = vadd.s32 3, %v13944_v33 }
 0x40a   :  { %v10536_v39 = vpop.f32.mrb[24].mxu0  ;;  %v10042_v53 = vadd.s32 4294967294, %v4140_v2  ;;  %v4427_v35 = vsel %vm4417_vm2, %v4424_v59, %v4426_v0  ;;  %11231 = vsinq.f32 %v13938_v5 }
 0x40b   :  { %v7407_v32 = vadd.f32 %v10536_v39, %v13811_v13  ;;  %v7398_v52 = vpop.f32.mrb[25].mxu0  ;;  %11233 = vcosq.f32 %v13951_v44 }
 0x40c   :  { %v7399_v45 = vadd.f32 %v13811_v13, %v7398_v52  ;;  %v10537_v29 = vpop.f32.mrb[26].mxu0  ;;  %v4429_v52 = vsel %vm4419_vm14, %v4415_v43, 1326507024  ;;  %vm10043_vm7 = vcmp.lt.s32.totalorder %v10042_v53, 0  ;;  %11235 = vsinq.f32 %v13951_v44 }
 0x40d   :  { %v7439_v57 = vmax.f32 %v7407_v32, 0.0  ;;  %v7410_v7 = vadd.f32 %v10537_v29, %v13811_v13  ;;  %v7401_v27 = vpop.f32.mrb[27].mxu0  ;;  %v4428_v32 = vsel %vm4416_vm13, %v4406_v50, %v4409_v4  ;;  %v16683_v50 = vand.u32 2147483647, %v13665_v19 }
 0x40e   :  { %v7437_v39 = vmax.f32 %v7399_v45, 0.0  ;;  %v7402_v3 = vadd.f32 %v13811_v13, %v7401_v27  ;;  %v4430_v45 = vsel %vm4418_vm6, %v4412_v48, %v4429_v52  ;;  %v4143_v27 = vsel %vm10043_vm7, 0, %v10042_v53 }
 0x40f   :  { %v7440_v24 = vmax.f32 %v7410_v7, 0.0  ;;  %v4431_v2 = vsel %vm4417_vm2, %v4428_v32, %v4430_v45  ;;  %v4261_v7 = vsel %vm4178_vm15, %v4260_v58, %v13940_v11  ;;  %vm13996_vm9 = vcmp.le.f32.partialorder %v16683_v50, 0.7853982 }
 0x410   :  { %v7438_v29 = vmax.f32 %v7402_v3, 0.0  ;;  %v4158_v4 = vsub.s32 4, %v13933_v30  ;;  %v4423_v48 = vsel %vm4417_vm2, %v4420_v40, %v4422_v47  ;;  %v4128_v11 = vadd.s32 %v13888_v25, %v13885_v63 }
 0x411   :  { %v7450_v38 = vpack.c.bf16 %v7440_v24, %v7439_v57  ;;  %v14003_v57 = vmul.u32.u64.low %v13963_v9, %v4431_v2  ;;  %v14004_v3 = vmul.u32.u64.high %v13963_v9, %v4431_v2, %v14003_v57  ;;  %v4144_v58 = vsub.s32 32, %v4143_v27 }
 0x412   :  { %v7449_v54 = vpack.c.bf16 %v7438_v29, %v7437_v39  ;;  %v14007_v39 = vmul.u32.u64.low %v13963_v9, %v4427_v35  ;;  %v14008_v53 = vmul.u32.u64.high %v13963_v9, %v4427_v35, %v14007_v39  ;;  %v4148_v59 = vsub.s32 4294967266, %v4143_v27  ;;  %v14034_v29 = vpop.f32.mrb[9].mxu1 }
 0x413   :  { %v16686_v40 = vand.u32 2147483647, %v13716_v6  ;;  %v4290_v35 = vadd.s32 1, %v13966_v20  ;;  %v14023_v24 = vsel %vm13907_vm5, %v13658_v23, %v4261_v7  ;;  %v4439_v63 = vmul.u32 %v13963_v9, %v4423_v48  ;;  %16687 = vst [vmem:[#allocation32_spill] sm:$0xff] %v14034_v29 }
 0x414   :  { %10566 = vmatprep.mubr.bf16.mxu1 %v7449_v54  ;;  %v16388_v25 = vand.u32 2147483647, %v13785_v10  ;;  %v4159_v5 = vsel %vm4074_vm11, %v4158_v4, %v13933_v30  ;;  %vm4441_vm12 = vc.u32 %v14004_v3, %v14007_v39  ;;  %v4442_v20 = vadd.s32 1, %v14008_v53 }
 0x415   :  { %10567 = vmatmul.mubr.bf16.gmra.mrb[24].mxu1 %v7450_v38  ;;  %v4287_v47 = vand.u32 8388607, %v16686_v40  ;;  %vm4291_vm1 = vcmp.gt.s32.totalorder %v4290_v35, 0  ;;  %v4145_v55 = vshll.u32 %v13958_v51, %v4143_v27  ;;  %v4146_v32 = vshrl.u32 %v4128_v11, %v4144_v58  ;;  %v14061_v40 = vpop.eup %11229 }
 0x416   :  { %v4149_v21 = vadd.s32 127, %v4148_v59  ;;  %v4292_v52 = vsel %vm4291_vm1, %v4290_v35, 0  ;;  %v4443_v9 = vsel %vm4441_vm12, %v4442_v20, %v14008_v53  ;;  %v4595_v38 = vand.u32 2139095040, %v13785_v10 }
 0x417   :  { %v4288_v0 = vor.u32 8388608, %v4287_v47  ;;  %v4294_v45 = vand.u32 31, %v4292_v52  ;;  %v14039_v30 = vand.u32 3, %v4269_v31  ;;  %v14042_v2 = vand.u32 3, %v13944_v33 }
 0x418   :  { %v4444_v54 = vadd.s32 %v4443_v9, %v4439_v63  ;;  %11237 = vcosq.f32 %v14023_v24  ;;  %v14047_v27 = vsel %vm13996_vm9, 0, %v4159_v5  ;;  %v14051_v50 = vand.u32 8388607, %v16388_v25 }
 0x419   :  { %16688 = vst [vmem:[#allocation29_spill] sm:$0xff] %v14039_v30  ;;  %16689 = vst [vmem:[#allocation16_spill] sm:$0xff] %v14042_v2  ;;  %v4295_v7 = vsub.s32 32, %v4294_v45  ;;  %v14054_v48 = vor.u32 %v4146_v32, %v4145_v55  ;;  %v4150_v33 = vshll.u32 %v4149_v21, 23  ;;  %v14057_v58 = vshrl.u32 %v4292_v52, 5  ;;  %v14068_v55 = vpop.eup %11231 }
 0x41a   :  { %v4445_v57 = vadd.s32 536870912, %v4444_v54  ;;  %v14059_v59 = vshll.u32 %v4288_v0, 8  ;;  %v4596_v31 = vshrl.u32 %v4595_v38, 23  ;;  %v4297_v5 = vshll.u32 %v16505_v15, %v4294_v45  ;;  %v14074_v0 = vpop.eup %11233 }
 0x41b   :  { %v4300_v20 = vshll.u32 %v16666_v41, %v4294_v45  ;;  %v4298_v21 = vshrl.u32 %v16666_v41, %v4295_v7  ;;  %v4301_v52 = vshrl.u32 %v16667_v56, %v4295_v7  ;;  %v4303_v9 = vshll.u32 %v16667_v56, %v4294_v45  ;;  %v14085_v18 = vpop.eup %11235 }
 0x41c   :  { %v10540_v51 = vpop.f32.mrb[28].mxu0  ;;  %v14064_v63 = vshrl.u32 %v4445_v57, 30  ;;  %v4306_v57 = vshll.u32 %v16668_v1, %v4294_v45  ;;  %v4304_v8 = vshrl.u32 %v16668_v1, %v4295_v7  ;;  %v4151_v28 = vor.u32 4788187, %v4150_v33 }
 0x41d   :  { %v7423_v44 = vadd.f32 %v10540_v51, %v13811_v13  ;;  %v7414_v4 = vpop.f32.mrb[29].mxu0  ;;  %v4440_v14 = vadd.s32 %v14007_v39, %v14004_v3  ;;  %v4302_v49 = vor.u32 %v4301_v52, %v4300_v20  ;;  %v4309_v3 = vshll.u32 %v16503_v16, %v4294_v45 }
 0x41e   :  { %v7415_v53 = vadd.f32 %v13811_v13, %v7414_v4  ;;  %v10541_v11 = vpop.f32.mrb[30].mxu0  ;;  %v4447_v4 = vshll.u32 %v14064_v63, 30  ;;  %v4305_v2 = vor.u32 %v4304_v8, %v4303_v9  ;;  %v4310_v39 = vshrl.u32 %v16504_v62, %v4295_v7 }
 0x41f   :  { %v7426_v47 = vadd.f32 %v10541_v11, %v13811_v13  ;;  %v7417_v35 = vpop.f32.mrb[31].mxu0  ;;  %v7443_v38 = vmax.f32 %v7423_v44, 0.0  ;;  %v4296_v44 = vshrl.u32 %v16505_v15, %v4295_v7  ;;  %vm4312_vm0 = vcmp.lt.s32.totalorder %v14057_v58, 1 }
 0x420   :  { %v7418_v32 = vadd.f32 %v13811_v13, %v7417_v35  ;;  %v7441_v11 = vmax.f32 %v7415_v53, 0.0  ;;  %v4307_v13 = vshrl.u32 %v16503_v16, %v4295_v7  ;;  %v14082_v60 = vsub.s32 %v4444_v54, %v4447_v4 }
 0x421   :  { %v7444_v51 = vmax.f32 %v7426_v47, 0.0  ;;  %v4299_v47 = vor.u32 %v4298_v21, %v4297_v5  ;;  %v4154_v53 = vcvt.s32.f32 %v14054_v48  ;;  %vm4313_vm15 = vcmp.lt.s32.totalorder %v14057_v58, 2 }
 0x422   :  { %v7442_v25 = vmax.f32 %v7418_v32, 0.0  ;;  %v4450_v32 = vsub.s32 0, %v14082_v60  ;;  %v4308_v30 = vor.u32 %v4307_v13, %v4306_v57  ;;  %vm4314_vm5 = vcmp.lt.s32.totalorder %v14057_v58, 3 }
 0x423   :  { %v7452_v35 = vpack.c.bf16 %v7444_v51, %v7443_v38  ;;  %v14089_v38 = vpop.eup %11237  ;;  %vm4315_vm10 = vcmp.lt.s32.totalorder %v14057_v58, 4  ;;  %v4311_v8 = vor.u32 %v4310_v39, %v4309_v3  ;;  %v4316_v48 = vsel %vm4312_vm0, %v4296_v44, %v4299_v47 }
 0x424   :  { %v7451_v61 = vpack.c.bf16 %v7442_v25, %v7441_v11  ;;  %16690 = vst [vmem:[#allocation38_spill] sm:$0xff] %v14089_v38  ;;  %v10060_v25 = vadd.s32 4294967169, %v4596_v31  ;;  %v10053_v54 = vmin.u32 %v4450_v32, %v14082_v60  ;;  %v4317_v33 = vsel %vm4315_vm10, %v4305_v2, 2102212464 }
 0x425   :  { %v4318_v45 = vsel %vm4314_vm5, %v4302_v49, %v4317_v33  ;;  %v4321_v7 = vsel %vm4315_vm10, %v4308_v30, 920167782  ;;  %v4324_v20 = vsel %vm4312_vm0, %v4302_v49, %v4305_v2  ;;  %v4152_v31 = vand.u32 2147483647, %v4151_v28 }
 0x426   :  { %10570 = vmatprep.mubr.bf16.mxu1 %v7451_v61  ;;  %v4320_v61 = vsel %vm4312_vm0, %v4299_v47, %v4302_v49  ;;  %v4452_v5 = vclz %v10053_v54  ;;  %v4322_v21 = vsel %vm4314_vm5, %v4305_v2, %v4321_v7  ;;  %v4325_v52 = vsel %vm4315_vm10, %v4311_v8, 1326507024 }
 0x427   :  { %10571 = vmatmul.mubr.bf16.gmra.mrb[28].mxu1 %v7452_v35  ;;  %v4602_v9 = vadd.s32 1, %v10060_v25  ;;  %v4319_v4 = vsel %vm4313_vm15, %v4316_v48, %v4318_v45  ;;  %v4323_v57 = vsel %vm4313_vm15, %v4320_v61, %v4322_v21  ;;  %v4326_v11 = vsel %vm4314_vm5, %v4308_v30, %v4325_v52  ;;  %v14127_v61 = vpop.f32.mrb[10].mxu1 }
 0x428   :  { %v10054_v51 = vadd.s32 4294967294, %v4452_v5  ;;  %v4327_v13 = vsel %vm4313_vm15, %v4324_v20, %v4326_v11  ;;  %v14111_v49 = vmul.u32.u64.low %v14059_v59, %v4323_v57  ;;  %v14112_v28 = vmul.u32.u64.high %v14059_v59, %v4323_v57, %v14111_v49  ;;  %16691 = vst [vmem:[#allocation15_spill] sm:$0xff] %v14127_v61 }
 0x429   :  { %vm4603_vm4 = vcmp.gt.s32.totalorder %v4602_v9, 0  ;;  %v14116_v2 = vmul.u32.u64.low %v14059_v59, %v4327_v13  ;;  %v14117_v35 = vmul.u32.u64.high %v14059_v59, %v4327_v13, %v14116_v2  ;;  %11239 = vsinq.f32 %v14023_v24 }
 0x42a   :  { %vm10055_vm13 = vcmp.lt.s32.totalorder %v10054_v51, 0  ;;  %v4604_v44 = vsel %vm4603_vm4, %v4602_v9, 0  ;;  %v4155_v47 = vmul.f32 %v4154_v53, %v4152_v31  ;;  %v4335_v25 = vmul.u32 %v14059_v59, %v4319_v4 }
 0x42b   :  { %v4455_v32 = vsel %vm10055_vm13, 0, %v10054_v51  ;;  %v4606_v30 = vand.u32 31, %v4604_v44  ;;  %v14123_v54 = vadd.s32 3, %v14047_v27  ;;  %v4338_v8 = vadd.s32 1, %v14112_v28 }
 0x42c   :  { %v4456_v3 = vsub.s32 32, %v4455_v32  ;;  %v4457_v58 = vshll.u32 %v14082_v60, %v4455_v32  ;;  %v4460_v39 = vsub.s32 4294967266, %v4455_v32  ;;  %v4600_v48 = vor.u32 8388608, %v14051_v50 }
 0x42d   :  { %v4607_v33 = vsub.s32 32, %v4606_v30  ;;  %vm4386_vm2 = vcmp.lt.s32.totalorder %v13667_v42, 0  ;;  %vm4337_vm14 = vc.u32 %v14117_v35, %v14111_v49  ;;  %v4609_v60 = vshll.u32 %v16505_v15, %v4606_v30 }
 0x42e   :  { %v4458_v24 = vshrl.u32 %v4440_v14, %v4456_v3  ;;  %v4461_v53 = vadd.s32 127, %v4460_v39  ;;  %v4339_v59 = vsel %vm4337_vm14, %v4338_v8, %v14112_v28  ;;  %v4612_v45 = vshll.u32 %v16666_v41, %v4606_v30 }
 0x42f   :  { %v4610_v5 = vshrl.u32 %v16666_v41, %v4607_v33  ;;  %v4613_v50 = vshrl.u32 %v16667_v56, %v4607_v33  ;;  %v4156_v7 = vxor.u32 2147483648, %v4155_v47  ;;  %v4340_v21 = vadd.s32 %v4339_v59, %v4335_v25 }
 0x430   :  { %v4459_v20 = vor.u32 %v4458_v24, %v4457_v58  ;;  %v4462_v31 = vshll.u32 %v4461_v53, 23  ;;  %v4605_v52 = vshrl.u32 %v4604_v44, 5  ;;  %v4615_v14 = vshll.u32 %v16667_v56, %v4606_v30 }
 0x431   :  { %v4616_v9 = vshrl.u32 %v16668_v1, %v4607_v33  ;;  %v4618_v51 = vshll.u32 %v16668_v1, %v4606_v30  ;;  %v4470_v57 = vsub.s32 4, %v14064_v63  ;;  %v4341_v11 = vadd.s32 536870912, %v4340_v21 }
 0x432   :  { %v4463_v4 = vor.u32 4788187, %v4462_v31  ;;  %v4619_v13 = vshrl.u32 %v16503_v16, %v4607_v33  ;;  %v16692_v28 = vand.u32 2147483647, %v13667_v42  ;;  %v4611_v32 = vor.u32 %v4610_v5, %v4609_v60 }
 0x433   :  { %v4614_v44 = vor.u32 %v4613_v50, %v4612_v45  ;;  %v4621_v3 = vshll.u32 %v16503_v16, %v4606_v30  ;;  %v4622_v58 = vshrl.u32 %v16504_v62, %v4607_v33  ;;  %v4466_v25 = vcvt.s32.f32 %v4459_v20  ;;  %v14151_v53 = vpop.eup %11239  ;;  %v14156_v45 = vpop.f32.mrb[11].mxu1 }
 0x434   :  { %vm14144_vm6 = vcmp.le.f32.partialorder %v16692_v28, 0.7853982  ;;  %v4464_v39 = vand.u32 2147483647, %v4463_v4  ;;  %vm4282_vm7 = vcmp.lt.s32.totalorder %v13716_v6, 0  ;;  %v4342_v8 = vshrl.u32 %v4341_v11, 30 }
 0x435   :  { %v4620_v24 = vor.u32 %v4619_v13, %v4618_v51  ;;  %16695 = vst [vmem:[#allocation35_spill] sm:$0xff] %v14151_v53  ;;  %v4617_v59 = vor.u32 %v4616_v9, %v4615_v14  ;;  %v4623_v31 = vor.u32 %v4622_v58, %v4621_v3  ;;  %vm4624_vm12 = vcmp.lt.s32.totalorder %v4605_v52, 1  ;;  %16696 = vst [vmem:[#allocation43_spill] sm:$0xff] %v14156_v45  ;;  %v14175_v28 = vpop.f32.mrb[12].mxu1 }
 0x436   :  { %vm4627_vm1 = vcmp.lt.s32.totalorder %v4605_v52, 4  ;;  %v4157_v60 = vsel %vm4074_vm11, %v4156_v7, %v4155_v47  ;;  %v4343_v5 = vshll.u32 %v4342_v8, 30  ;;  %v4608_v30 = vshrl.u32 %v16505_v15, %v4607_v33  ;;  %16700 = vst [vmem:[#allocation42_spill] sm:$0xff] %v14175_v28 }
 0x437   :  { %vm4626_vm0 = vcmp.lt.s32.totalorder %v4605_v52, 3  ;;  %v4471_v50 = vsel %vm4386_vm2, %v4470_v57, %v14064_v63  ;;  %v16697_v20 = vand.u32 2147483647, %v13716_v6  ;;  %vm4625_vm5 = vcmp.lt.s32.totalorder %v4605_v52, 2 }
 0x438   :  { %v4633_v9 = vsel %vm4627_vm1, %v4620_v24, 920167782  ;;  %v4640_v47 = vshll.u32 %v4600_v48, 8  ;;  %v4467_v7 = vmul.f32 %v4466_v25, %v4464_v39  ;;  %v14168_v51 = vsub.s32 %v4340_v21, %v4343_v5  ;;  %v14185_v39 = vpop.f32.mrb[13].mxu1 }
 0x439   :  { %vm14163_vm15 = vcmp.le.f32.partialorder %v16697_v20, 0.7853982  ;;  %v4629_v33 = vsel %vm4627_vm1, %v4617_v59, 2102212464  ;;  %v4632_v4 = vsel %vm4624_vm12, %v4611_v32, %v4614_v44  ;;  %v4366_v11 = vsub.s32 4, %v4342_v8 }
 0x43a   :  { %v4634_v63 = vsel %vm4626_vm0, %v4617_v59, %v4633_v9  ;;  %v4636_v57 = vsel %vm4624_vm12, %v4614_v44, %v4617_v59  ;;  %v4637_v13 = vsel %vm4627_vm1, %v4623_v31, 1326507024  ;;  %v4160_v48 = vsel %vm13996_vm9, %v13665_v19, %v4157_v60 }
 0x43b   :  { %v14181_v21 = vand.u32 3, %v14047_v27  ;;  %v4346_v3 = vsub.s32 0, %v14168_v51  ;;  %v4628_v58 = vsel %vm4624_vm12, %v4608_v30, %v4611_v32  ;;  %v4630_v25 = vsel %vm4626_vm0, %v4614_v44, %v4629_v33 }
 0x43c   :  { %v4635_v59 = vsel %vm4625_vm5, %v4632_v4, %v4634_v63  ;;  %v4638_v31 = vsel %vm4626_vm0, %v4620_v24, %v4637_v13  ;;  %v4491_v5 = vand.u32 2139095040, %v13868_v22  ;;  %v4468_v20 = vxor.u32 2147483648, %v4467_v7 }
 0x43d   :  { %16701 = vst [vmem:[#allocation39_spill] sm:$0xff] %v14181_v21  ;;  %v4473_v43 = vsel %vm14144_vm6, 0, %v4471_v50  ;;  %v10049_v27 = vmin.u32 %v4346_v3, %v14168_v51  ;;  %v4639_v60 = vsel %vm4625_vm5, %v4636_v57, %v4638_v31  ;;  %v4367_v32 = vsel %vm4282_vm7, %v4366_v11, %v4342_v8 }
 0x43e   :  { %v14197_v30 = vmul.u32.u64.low %v4640_v47, %v4639_v60  ;;  %v14198_v9 = vmul.u32.u64.high %v4640_v47, %v4639_v60, %v14197_v30  ;;  %v4492_v44 = vshrl.u32 %v4491_v5, 23  ;;  %v4631_v24 = vsel %vm4625_vm5, %v4628_v58, %v4630_v25 }
 0x43f   :  { %v4348_v33 = vclz %v10049_v27  ;;  %v14201_v4 = vmul.u32.u64.low %v4640_v47, %v4635_v59  ;;  %v14202_v63 = vmul.u32.u64.high %v4640_v47, %v4635_v59, %v14201_v4  ;;  %11241 = vcosq.f32 %v4160_v48 }
 0x440   :  { %v14205_v50 = vand.u32 3, %v14123_v54  ;;  %v16398_v13 = vand.u32 2147483647, %v13868_v22  ;;  %v10056_v57 = vadd.s32 4294967169, %v4492_v44  ;;  %11243 = vsinq.f32 %v4160_v48 }
 0x441   :  { %v4469_v8 = vsel %vm4386_vm2, %v4468_v20, %v4467_v7  ;;  %v10050_v11 = vadd.s32 4294967294, %v4348_v33  ;;  %v4369_v3 = vsel %vm14163_vm15, 0, %v4367_v32  ;;  %v4477_v52 = vadd.s32 3, %v4473_v43 }
 0x442   :  { %16702 = vst [vmem:[#allocation34_spill] sm:$0xff] %v14205_v50  ;;  %v4647_v58 = vmul.u32 %v4640_v47, %v4631_v24  ;;  %vm4649_vm11 = vc.u32 %v14198_v9, %v14201_v4  ;;  %v4498_v25 = vadd.s32 1, %v10056_v57  ;;  %v14213_v59 = vand.u32 3, %v4473_v43 }
 0x443   :  { %v4336_v54 = vadd.s32 %v14111_v49, %v14117_v35  ;;  %vm10051_vm9 = vcmp.lt.s32.totalorder %v10050_v11, 0  ;;  %v4650_v48 = vadd.s32 1, %v14202_v63  ;;  %v14221_v7 = vsel %vm14144_vm6, %v13667_v42, %v4469_v8 }
 0x444   :  { %16703 = vst [vmem:[#allocation47_spill] sm:$0xff] %v14213_v59  ;;  %v4351_v31 = vsel %vm10051_vm9, 0, %v10050_v11  ;;  %v4373_v5 = vadd.s32 3, %v4369_v3  ;;  %vm4499_vm10 = vcmp.gt.s32.totalorder %v4498_v25, 0  ;;  %v4495_v43 = vand.u32 8388607, %v16398_v13 }
 0x445   :  { %v4352_v47 = vsub.s32 32, %v4351_v31  ;;  %v4356_v20 = vsub.s32 4294967266, %v4351_v31  ;;  %v4651_v27 = vsel %vm4649_vm11, %v4650_v48, %v14202_v63  ;;  %v4353_v49 = vshll.u32 %v14168_v51, %v4351_v31 }
 0x446   :  { %v4652_v35 = vadd.s32 %v4651_v27, %v4647_v58  ;;  %v4500_v60 = vsel %vm4499_vm10, %v4498_v25, 0  ;;  %v4803_v32 = vand.u32 2139095040, %v13956_v36  ;;  %v14228_v30 = vand.u32 3, %v4477_v52 }
 0x447   :  { %v4354_v2 = vshrl.u32 %v4336_v54, %v4352_v47  ;;  %v4357_v44 = vadd.s32 127, %v4356_v20  ;;  %v4502_v33 = vand.u32 31, %v4500_v60  ;;  %11245 = vcosq.f32 %v14221_v7  ;;  %v14238_v47 = vpop.f32.mrb[14].mxu1 }
 0x448   :  { %16704 = vst [vmem:[#allocation17_spill] sm:$0xff] %v14228_v30  ;;  %v14231_v24 = vand.u32 3, %v4373_v5  ;;  %v14233_v57 = vand.u32 3, %v4369_v3  ;;  %v4653_v63 = vadd.s32 536870912, %v4652_v35  ;;  %v4496_v11 = vor.u32 8388608, %v4495_v43 }
 0x449   :  { %v4358_v8 = vshll.u32 %v4357_v44, 23  ;;  %v4503_v48 = vsub.s32 32, %v4502_v33  ;;  %v14236_v58 = vpop.eup %11241  ;;  %v4355_v25 = vor.u32 %v4354_v2, %v4353_v49  ;;  %v4501_v31 = vshrl.u32 %v4500_v60, 5 }
 0x44a   :  { %16705 = vst [vmem:[#allocation44_spill] sm:$0xff] %v14231_v24  ;;  %16706 = vst [vmem:[#allocation46_spill] sm:$0xff] %v14233_v57  ;;  %v4654_v52 = vshrl.u32 %v4653_v63, 30  ;;  %v4804_v54 = vshrl.u32 %v4803_v32, 23  ;;  %v14240_v20 = vpop.eup %11243  ;;  %v4505_v5 = vshll.u32 %v16505_v15, %v4502_v33  ;;  %v4508_v27 = vshll.u32 %v16666_v41, %v4502_v33 }
 0x44b   :  { %16707 = vst [vmem:[#allocation45_spill] sm:$0xff] %v14236_v58  ;;  %16708 = vst [vmem:[#allocation48_spill] sm:$0xff] %v14240_v20  ;;  %v4506_v3 = vshrl.u32 %v16666_v41, %v4503_v48  ;;  %v4514_v43 = vshll.u32 %v16668_v1, %v4502_v33  ;;  %v4509_v13 = vshrl.u32 %v16667_v56, %v4503_v48  ;;  %v4359_v32 = vor.u32 4788187, %v4358_v8 }
 0x44c   :  { %v4655_v44 = vshll.u32 %v4654_v52, 30  ;;  %v4511_v49 = vshll.u32 %v16667_v56, %v4502_v33  ;;  %v4512_v60 = vshrl.u32 %v16668_v1, %v4503_v48  ;;  %vm4594_vm4 = vcmp.lt.s32.totalorder %v13785_v10, 0 }
 0x44d   :  { %v4648_v2 = vadd.s32 %v14201_v4, %v14198_v9  ;;  %v4515_v63 = vshrl.u32 %v16503_v16, %v4503_v48  ;;  %v14252_v51 = vshll.u32 %v4496_v11, 8  ;;  %v4517_v57 = vshll.u32 %v16503_v16, %v4502_v33 }
 0x44e   :  { %v14254_v59 = vsub.s32 %v4652_v35, %v4655_v44  ;;  %v10068_v30 = vadd.s32 4294967169, %v4804_v54  ;;  %v16709_v42 = vand.u32 2147483647, %v13956_v36  ;;  %v4507_v21 = vor.u32 %v4506_v3, %v4505_v5 }
 0x44f   :  { %v4510_v38 = vor.u32 %v4509_v13, %v4508_v27  ;;  %v4516_v8 = vor.u32 %v4515_v63, %v4514_v43  ;;  %v4518_v53 = vshrl.u32 %v16504_v62, %v4503_v48  ;;  %v4362_v23 = vcvt.s32.f32 %v4355_v25 }
 0x450   :  { %v14259_v24 = vand.u32 8388607, %v16709_v42  ;;  %v4658_v9 = vsub.s32 0, %v14254_v59  ;;  %v4513_v4 = vor.u32 %v4512_v60, %v4511_v49  ;;  %vm4520_vm13 = vcmp.lt.s32.totalorder %v4501_v31, 1 }
 0x451   :  { %v4360_v11 = vand.u32 2147483647, %v4359_v32  ;;  %v4678_v35 = vsub.s32 4, %v4654_v52  ;;  %v4504_v44 = vshrl.u32 %v16505_v15, %v4503_v48  ;;  %vm4522_vm2 = vcmp.lt.s32.totalorder %v4501_v31, 3  ;;  %v14264_v33 = vpop.eup %11245 }
 0x452   :  { %16710 = vst [vmem:[#allocation49_spill] sm:$0xff] %v14264_v33  ;;  %v10061_v42 = vmin.u32 %v4658_v9, %v14254_v59  ;;  %v4519_v54 = vor.u32 %v4518_v53, %v4517_v57  ;;  %vm4521_vm14 = vcmp.lt.s32.totalorder %v4501_v31, 2  ;;  %vm4523_vm6 = vcmp.lt.s32.totalorder %v4501_v31, 4 }
 0x453   :  { %v4525_v13 = vsel %vm4523_vm6, %v4513_v4, 2102212464  ;;  %v4528_v25 = vsel %vm4520_vm13, %v4507_v21, %v4510_v38  ;;  %v4529_v5 = vsel %vm4523_vm6, %v4516_v8, 920167782  ;;  %v4810_v3 = vadd.s32 1, %v10068_v30 }
 0x454   :  { %v4660_v27 = vclz %v10061_v42  ;;  %v4530_v43 = vsel %vm4522_vm2, %v4513_v4, %v4529_v5  ;;  %v4699_v49 = vand.u32 2139095040, %v14034_v29  ;;  %v4524_v60 = vsel %vm4520_vm13, %v4504_v44, %v4507_v21 }
 0x455   :  { %v4526_v53 = vsel %vm4522_vm2, %v4510_v38, %v4525_v13  ;;  %v4531_v57 = vsel %vm4521_vm14, %v4528_v25, %v4530_v43  ;;  %v4532_v32 = vsel %vm4520_vm13, %v4510_v38, %v4513_v4  ;;  %v14277_v63 = vmul.f32 %v4362_v23, %v4360_v11 }
 0x456   :  { %v10062_v9 = vadd.s32 4294967294, %v4660_v27  ;;  %v14281_v30 = vsel %vm4594_vm4, %v4678_v35, %v4654_v52  ;;  %v4533_v42 = vsel %vm4523_vm6, %v4519_v54, 1326507024  ;;  %vm4811_vm12 = vcmp.gt.s32.totalorder %v4810_v3, 0 }
 0x457   :  { %v4534_v5 = vsel %vm4522_vm2, %v4516_v8, %v4533_v42  ;;  %v14286_v48 = vmul.u32.u64.low %v14252_v51, %v4531_v57  ;;  %v14287_v21 = vmul.u32.u64.high %v14252_v51, %v4531_v57, %v14286_v48  ;;  %v4527_v38 = vsel %vm4521_vm14, %v4524_v60, %v4526_v53 }
 0x458   :  { %vm10063_vm1 = vcmp.lt.s32.totalorder %v10062_v9, 0  ;;  %v4535_v23 = vsel %vm4521_vm14, %v4532_v32, %v4534_v5  ;;  %v4812_v4 = vsel %vm4811_vm12, %v4810_v3, 0  ;;  %v4364_v27 = vxor.u32 2147483648, %v14277_v63 }
 0x459   :  { %v4663_v11 = vsel %vm10063_vm1, 0, %v10062_v9  ;;  %v14293_v52 = vmul.u32.u64.low %v14252_v51, %v4535_v23  ;;  %v14294_v35 = vmul.u32.u64.high %v14252_v51, %v4535_v23, %v14293_v52  ;;  %v14296_v44 = vshrl.u32 %v4812_v4, 5 }
 0x45a   :  { %v4664_v8 = vsub.s32 32, %v4663_v11  ;;  %v4665_v54 = vshll.u32 %v14254_v59, %v4663_v11  ;;  %v4668_v13 = vsub.s32 4294967266, %v4663_v11  ;;  %v4814_v25 = vand.u32 31, %v4812_v4 }
 0x45b   :  { %v4543_v43 = vmul.u32 %v14252_v51, %v4527_v38  ;;  %v4546_v31 = vadd.s32 1, %v14287_v21  ;;  %v4700_v60 = vshrl.u32 %v4699_v49, 23  ;;  %vm4832_vm0 = vcmp.lt.s32.totalorder %v14296_v44, 1  ;;  %v14316_v38 = vpop.f32.mrb[15].mxu1 }
 0x45c   :  { %v4666_v3 = vshrl.u32 %v4648_v2, %v4664_v8  ;;  %v4669_v53 = vadd.s32 127, %v4668_v13  ;;  %v4815_v57 = vsub.s32 32, %v4814_v25  ;;  %v16711_v32 = vand.u32 2147483647, %v13785_v10 }
 0x45d   :  { %vm4545_vm11 = vc.u32 %v14294_v35, %v14286_v48  ;;  %v4817_v59 = vshll.u32 %v16505_v15, %v4814_v25  ;;  %v4820_v51 = vshll.u32 %v16666_v41, %v4814_v25  ;;  %v4823_v49 = vshll.u32 %v16667_v56, %v4814_v25 }
 0x45e   :  { %vm14305_vm5 = vcmp.le.f32.partialorder %v16711_v32, 0.7853982  ;;  %v4667_v2 = vor.u32 %v4666_v3, %v4665_v54  ;;  %v4670_v42 = vshll.u32 %v4669_v53, 23  ;;  %v4547_v5 = vsel %vm4545_vm11, %v4546_v31, %v14287_v21 }
 0x45f   :  { %vm4834_vm9 = vcmp.lt.s32.totalorder %v14296_v44, 3  ;;  %v4548_v23 = vadd.s32 %v4547_v5, %v4543_v43  ;;  %v4818_v4 = vshrl.u32 %v16666_v41, %v4815_v57  ;;  %v4821_v11 = vshrl.u32 %v16667_v56, %v4815_v57 }
 0x460   :  { %v4824_v52 = vshrl.u32 %v16668_v1, %v4815_v57  ;;  %v4671_v8 = vor.u32 4788187, %v4670_v42  ;;  %v4674_v13 = vcvt.s32.f32 %v4667_v2  ;;  %vm4490_vm10 = vcmp.lt.s32.totalorder %v13868_v22, 0 }
 0x461   :  { %v4826_v54 = vshll.u32 %v16668_v1, %v4814_v25  ;;  %v4827_v3 = vshrl.u32 %v16503_v16, %v4815_v57  ;;  %v4549_v21 = vadd.s32 536870912, %v4548_v23  ;;  %v4819_v31 = vor.u32 %v4818_v4, %v4817_v59 }
 0x462   :  { %v4822_v53 = vor.u32 %v4821_v11, %v4820_v51  ;;  %v4825_v32 = vor.u32 %v4824_v52, %v4823_v49  ;;  %v4672_v33 = vand.u32 2147483647, %v4671_v8  ;;  %v4829_v5 = vshll.u32 %v16503_v16, %v4814_v25 }
 0x463   :  { %v4828_v43 = vor.u32 %v4827_v3, %v4826_v54  ;;  %v4830_v58 = vshrl.u32 %v16504_v62, %v4815_v57  ;;  %v4550_v20 = vshrl.u32 %v4549_v21, 30  ;;  %v4816_v42 = vshrl.u32 %v16505_v15, %v4815_v57 }
 0x464   :  { %vm4833_vm13 = vcmp.lt.s32.totalorder %v14296_v44, 2  ;;  %vm4835_vm2 = vcmp.lt.s32.totalorder %v14296_v44, 4  ;;  %v4675_v2 = vmul.f32 %v4674_v13, %v4672_v33  ;;  %v16714_v50 = vand.u32 2147483647, %v13868_v22 }
 0x465   :  { %v4831_v51 = vor.u32 %v4830_v58, %v4829_v5  ;;  %v4840_v25 = vsel %vm4832_vm0, %v4819_v31, %v4822_v53  ;;  %v4841_v49 = vsel %vm4835_vm2, %v4828_v43, 920167782  ;;  %v4551_v4 = vshll.u32 %v4550_v20, 30 }
 0x466   :  { %vm14331_vm14 = vcmp.le.f32.partialorder %v16714_v50, 0.7853982  ;;  %v4574_v57 = vsub.s32 4, %v4550_v20  ;;  %v4837_v11 = vsel %vm4835_vm2, %v4825_v32, 2102212464  ;;  %v4842_v33 = vsel %vm4834_vm9, %v4825_v32, %v4841_v49 }
 0x467   :  { %v4365_v50 = vsel %vm4282_vm7, %v4364_v27, %v14277_v63  ;;  %v4676_v52 = vxor.u32 2147483648, %v4675_v2  ;;  %v4681_v58 = vsel %vm14305_vm5, 0, %v14281_v30  ;;  %v16717_v8 = vor.u32 8388608, %v14259_v24 }
 0x468   :  { %v14351_v54 = vsub.s32 %v4548_v23, %v4551_v4  ;;  %v4843_v3 = vsel %vm4833_vm13, %v4840_v25, %v4842_v33  ;;  %v4844_v21 = vsel %vm4832_vm0, %v4822_v53, %v4825_v32  ;;  %v4845_v5 = vsel %vm4835_vm2, %v4831_v51, 1326507024 }
 0x469   :  { %v4848_v13 = vshll.u32 %v16717_v8, 8  ;;  %v4836_v63 = vsel %vm4832_vm0, %v4816_v42, %v4819_v31  ;;  %v4838_v30 = vsel %vm4834_vm9, %v4822_v53, %v4837_v11  ;;  %v4846_v24 = vsel %vm4834_vm9, %v4828_v43, %v4845_v5 }
 0x46a   :  { %v10064_v27 = vadd.s32 4294967169, %v4700_v60  ;;  %11247 = vsinq.f32 %v14221_v7  ;;  %v4685_v23 = vadd.s32 3, %v4681_v58  ;;  %v4554_v25 = vsub.s32 0, %v14351_v54 }
 0x46b   :  { %v4575_v32 = vsel %vm4490_vm10, %v4574_v57, %v4550_v20  ;;  %v4677_v51 = vsel %vm4594_vm4, %v4676_v52, %v4675_v2  ;;  %v4847_v31 = vsel %vm4833_vm13, %v4844_v21, %v4846_v24  ;;  %v4368_v7 = vsel %vm14163_vm15, %v13716_v6, %v4365_v50 }
 0x46c   :  { %v14373_v42 = vmul.u32.u64.low %v4848_v13, %v4843_v3  ;;  %v14374_v53 = vmul.u32.u64.high %v4848_v13, %v4843_v3, %v14373_v42  ;;  %v10057_v60 = vmin.u32 %v4554_v25, %v14351_v54  ;;  %v4839_v43 = vsel %vm4833_vm13, %v4836_v63, %v4838_v30 }
 0x46d   :  { %v16414_v20 = vand.u32 2147483647, %v14034_v29  ;;  %v14384_v49 = vand.u32 3, %v4681_v58  ;;  %v14386_v2 = vmul.u32.u64.low %v4848_v13, %v4847_v31  ;;  %v14387_v4 = vmul.u32.u64.high %v4848_v13, %v4847_v31, %v14386_v2 }
 0x46e   :  { %v4706_v57 = vadd.s32 1, %v10064_v27  ;;  %v4680_v11 = vsel %vm14305_vm5, %v13785_v10, %v4677_v51  ;;  %v14392_v33 = vand.u32 3, %v4685_v23  ;;  %v4556_v14 = vclz %v10057_v60 }
 0x46f   :  { %16718 = vst [vmem:[#allocation50_spill] sm:$0xff] %v14384_v49  ;;  %v4577_v50 = vsel %vm14331_vm14, 0, %v4575_v32  ;;  %11249 = vcosq.f32 %v4368_v7  ;;  %v4855_v44 = vmul.u32 %v4848_v13, %v4839_v43  ;;  %v4858_v52 = vadd.s32 1, %v14374_v53 }
 0x470   :  { %16719 = vst [vmem:[#allocation51_spill] sm:$0xff] %v14392_v33  ;;  %vm4707_vm7 = vcmp.gt.s32.totalorder %v4706_v57, 0  ;;  %11251 = vsinq.f32 %v4368_v7  ;;  %v4544_v58 = vadd.s32 %v14286_v48, %v14294_v35  ;;  %v10058_v8 = vadd.s32 4294967294, %v4556_v14 }
 0x471   :  { %v4708_v3 = vsel %vm4707_vm7, %v4706_v57, 0  ;;  %11253 = vcosq.f32 %v4680_v11  ;;  %v14399_v9 = vadd.s32 3, %v4577_v50  ;;  %vm4857_vm15 = vc.u32 %v14387_v4, %v14373_v42 }
 0x472   :  { %v4710_v21 = vand.u32 31, %v4708_v3  ;;  %11255 = vsinq.f32 %v4680_v11  ;;  %vm10059_vm4 = vcmp.lt.s32.totalorder %v10058_v8, 0  ;;  %v14403_v5 = vand.u32 3, %v4577_v50 }
 0x473   :  { %v4859_v13 = vsel %vm4857_vm15, %v4858_v52, %v14374_v53  ;;  %v4559_v63 = vsel %vm10059_vm4, 0, %v10058_v8  ;;  %v4703_v48 = vand.u32 8388607, %v16414_v20  ;;  %v14410_v25 = vshrl.u32 %v4708_v3, 5 }
 0x474   :  { %16720 = vst [vmem:[#allocation52_spill] sm:$0xff] %v14403_v5  ;;  %v4860_v30 = vadd.s32 %v4859_v13, %v4855_v44  ;;  %v4711_v35 = vsub.s32 32, %v4710_v21  ;;  %v14408_v24 = vpop.eup %11247  ;;  %v4560_v27 = vsub.s32 32, %v4559_v63  ;;  %v4564_v23 = vsub.s32 4294967266, %v4559_v63 }
 0x475   :  { %16721 = vst [vmem:[#allocation53_spill] sm:$0xff] %v14408_v24  ;;  %v5011_v32 = vand.u32 2139095040, %v14127_v61  ;;  %v4561_v51 = vshll.u32 %v14351_v54, %v4559_v63  ;;  %v4713_v7 = vshll.u32 %v16505_v15, %v4710_v21  ;;  %v4716_v53 = vshll.u32 %v16666_v41, %v4710_v21 }
 0x476   :  { %v4861_v31 = vadd.s32 536870912, %v4860_v30  ;;  %v4562_v60 = vshrl.u32 %v4544_v58, %v4560_v27  ;;  %v4565_v43 = vadd.s32 127, %v4564_v23  ;;  %v4714_v2 = vshrl.u32 %v16666_v41, %v4711_v35 }
 0x477   :  { %v4717_v57 = vshrl.u32 %v16667_v56, %v4711_v35  ;;  %v4719_v14 = vshll.u32 %v16667_v56, %v4710_v21  ;;  %v4720_v50 = vshrl.u32 %v16668_v1, %v4711_v35  ;;  %v4722_v44 = vshll.u32 %v16668_v1, %v4710_v21 }
 0x478   :  { %v4862_v11 = vshrl.u32 %v4861_v31, 30  ;;  %v4566_v52 = vshll.u32 %v4565_v43, 23  ;;  %v4704_v54 = vor.u32 8388608, %v4703_v48  ;;  %v4723_v8 = vshrl.u32 %v16503_v16, %v4711_v35 }
 0x479   :  { %v14423_v13 = vpop.eup %11249  ;;  %v4725_v63 = vshll.u32 %v16503_v16, %v4710_v21  ;;  %v4726_v27 = vshrl.u32 %v16504_v62, %v4711_v35  ;;  %v5012_v23 = vshrl.u32 %v5011_v32, 23  ;;  %v4563_v20 = vor.u32 %v4562_v60, %v4561_v51 }
 0x47a   :  { %16722 = vst [vmem:[#allocation54_spill] sm:$0xff] %v14423_v13  ;;  %v4863_v58 = vshll.u32 %v4862_v11, 30  ;;  %v14427_v31 = vpop.eup %11251  ;;  %vm4802_vm6 = vcmp.lt.s32.totalorder %v13956_v36, 0  ;;  %v4715_v49 = vor.u32 %v4714_v2, %v4713_v7  ;;  %v4718_v43 = vor.u32 %v4717_v57, %v4716_v53 }
 0x47b   :  { %16723 = vst [vmem:[#allocation55_spill] sm:$0xff] %v14427_v31  ;;  %v4724_v48 = vor.u32 %v4723_v8, %v4722_v44  ;;  %v14430_v5 = vpop.eup %11253  ;;  %v4567_v33 = vor.u32 4788187, %v4566_v52  ;;  %v4721_v10 = vor.u32 %v4720_v50, %v4719_v14  ;;  %vm4728_vm12 = vcmp.lt.s32.totalorder %v14410_v25, 1 }
 0x47c   :  { %16724 = vst [vmem:[#allocation56_spill] sm:$0xff] %v14430_v5  ;;  %v14432_v3 = vsub.s32 %v4860_v30, %v4863_v58  ;;  %v14435_v21 = vpop.eup %11255  ;;  %v4712_v32 = vshrl.u32 %v16505_v15, %v4711_v35  ;;  %vm4730_vm1 = vcmp.lt.s32.totalorder %v14410_v25, 3  ;;  %vm4731_vm0 = vcmp.lt.s32.totalorder %v14410_v25, 4 }
 0x47d   :  { %16725 = vst [vmem:[#allocation57_spill] sm:$0xff] %v14435_v21  ;;  %v4744_v51 = vshll.u32 %v4704_v54, 8  ;;  %v4727_v53 = vor.u32 %v4726_v27, %v4725_v63  ;;  %vm4729_vm5 = vcmp.lt.s32.totalorder %v14410_v25, 2  ;;  %v10076_v60 = vadd.s32 4294967169, %v5012_v23 }
 0x47e   :  { %v4866_v7 = vsub.s32 0, %v14432_v3  ;;  %v16726_v30 = vand.u32 2147483647, %v13956_v36  ;;  %v4886_v57 = vsub.s32 4, %v4862_v11  ;;  %v4733_v35 = vsel %vm4731_vm0, %v4721_v10, 2102212464 }
 0x47f   :  { %v4736_v14 = vsel %vm4728_vm12, %v4715_v49, %v4718_v43  ;;  %v4737_v50 = vsel %vm4731_vm0, %v4724_v48, 920167782  ;;  %v4568_v44 = vand.u32 2147483647, %v4567_v33  ;;  %v4570_v52 = vcvt.s32.f32 %v4563_v20 }
 0x480   :  { %vm14444_vm11 = vcmp.le.f32.partialorder %v16726_v30, 0.7853982  ;;  %v10069_v54 = vmin.u32 %v4866_v7, %v14432_v3  ;;  %v4738_v8 = vsel %vm4730_vm1, %v4721_v10, %v4737_v50  ;;  %v4732_v58 = vsel %vm4728_vm12, %v4712_v32, %v4715_v49 }
 0x481   :  { %v4734_v63 = vsel %vm4730_vm1, %v4718_v43, %v4733_v35  ;;  %v4739_v27 = vsel %vm4729_vm5, %v4736_v14, %v4738_v8  ;;  %v4740_v23 = vsel %vm4728_vm12, %v4718_v43, %v4721_v10  ;;  %v4741_v20 = vsel %vm4731_vm0, %v4727_v53, 1326507024 }
 0x482   :  { %v4868_v30 = vclz %v10069_v54  ;;  %v14467_v33 = vmul.u32.u64.low %v4744_v51, %v4739_v27  ;;  %v14468_v7 = vmul.u32.u64.high %v4744_v51, %v4739_v27, %v14467_v33  ;;  %v14472_v50 = vand.u32 3, %v14399_v9 }
 0x483   :  { %v4742_v49 = vsel %vm4730_vm1, %v4724_v48, %v4741_v20  ;;  %v16730_v32 = vand.u32 2147483647, %v14127_v61  ;;  %v5018_v14 = vadd.s32 1, %v10076_v60  ;;  %v4887_v43 = vsel %vm4802_vm6, %v4886_v57, %v4862_v11 }
 0x484   :  { %16729 = vst [vmem:[#allocation58_spill] sm:$0xff] %v14472_v50  ;;  %v10070_v10 = vadd.s32 4294967294, %v4868_v30  ;;  %v4735_v53 = vsel %vm4729_vm5, %v4732_v58, %v4734_v63  ;;  %v4743_v54 = vsel %vm4729_vm5, %v4740_v23, %v4742_v49  ;;  %v4571_v9 = vmul.f32 %v4570_v52, %v4568_v44 }
 0x485   :  { %v14478_v35 = vand.u32 8388607, %v16730_v32  ;;  %v14486_v8 = vmul.u32.u64.low %v4744_v51, %v4743_v54  ;;  %v14487_v27 = vmul.u32.u64.high %v4744_v51, %v4743_v54, %v14486_v8  ;;  %vm5019_vm9 = vcmp.gt.s32.totalorder %v5018_v14, 0 }
 0x486   :  { %v4856_v48 = vadd.s32 %v14373_v42, %v14387_v4  ;;  %vm10071_vm13 = vcmp.lt.s32.totalorder %v10070_v10, 0  ;;  %v4754_v60 = vadd.s32 1, %v14468_v7  ;;  %v5020_v30 = vsel %vm5019_vm9, %v5018_v14, 0 }
 0x487   :  { %v4871_v20 = vsel %vm10071_vm13, 0, %v10070_v10  ;;  %v4751_v11 = vmul.u32 %v4744_v51, %v4735_v53  ;;  %v5016_v57 = vor.u32 8388608, %v14478_v35  ;;  %v5022_v58 = vand.u32 31, %v5020_v30 }
 0x488   :  { %v4872_v63 = vsub.s32 32, %v4871_v20  ;;  %v4873_v25 = vshll.u32 %v14432_v3, %v4871_v20  ;;  %v4876_v44 = vsub.s32 4294967266, %v4871_v20  ;;  %v4889_v52 = vsel %vm14444_vm11, 0, %v4887_v43 }
 0x489   :  { %v4572_v23 = vxor.u32 2147483648, %v4571_v9  ;;  %vm4753_vm2 = vc.u32 %v14487_v27, %v14467_v33  ;;  %v5023_v42 = vsub.s32 32, %v5022_v58  ;;  %v5025_v4 = vshll.u32 %v16505_v15, %v5022_v58 }
 0x48a   :  { %v4874_v49 = vshrl.u32 %v4856_v48, %v4872_v63  ;;  %v4877_v32 = vadd.s32 127, %v4876_v44  ;;  %v4755_v51 = vsel %vm4753_vm2, %v4754_v60, %v14468_v7  ;;  %v5028_v35 = vshll.u32 %v16666_v41, %v5022_v58 }
 0x48b   :  { %vm4698_vm7 = vcmp.lt.s32.totalorder %v14034_v29, 0  ;;  %v4756_v3 = vadd.s32 %v4755_v51, %v4751_v11  ;;  %v5021_v14 = vshrl.u32 %v5020_v30, 5  ;;  %v5026_v10 = vshrl.u32 %v16666_v41, %v5023_v42 }
 0x48c   :  { %v5029_v43 = vshrl.u32 %v16667_v56, %v5023_v42  ;;  %v4875_v53 = vor.u32 %v4874_v49, %v4873_v25  ;;  %v4878_v54 = vshll.u32 %v4877_v32, 23  ;;  %v5031_v8 = vshll.u32 %v16667_v56, %v5022_v58 }
 0x48d   :  { %v5032_v20 = vshrl.u32 %v16668_v1, %v5023_v42  ;;  %v4757_v48 = vadd.s32 536870912, %v4756_v3  ;;  %v5024_v63 = vshrl.u32 %v16505_v15, %v5023_v42  ;;  %v5027_v7 = vor.u32 %v5026_v10, %v5025_v4 }
 0x48e   :  { %v5034_v60 = vshll.u32 %v16668_v1, %v5022_v58  ;;  %v4879_v44 = vor.u32 4788187, %v4878_v54  ;;  %v4882_v5 = vcvt.s32.f32 %v4875_v53  ;;  %v16731_v30 = vand.u32 2147483647, %v14034_v29 }
 0x48f   :  { %v5030_v25 = vor.u32 %v5029_v43, %v5028_v35  ;;  %v5035_v49 = vshrl.u32 %v16503_v16, %v5023_v42  ;;  %v4758_v32 = vshrl.u32 %v4757_v48, 30  ;;  %v5037_v51 = vshll.u32 %v16503_v16, %v5022_v58 }
 0x490   :  { %vm14510_vm15 = vcmp.le.f32.partialorder %v16731_v30, 0.7853982  ;;  %v5038_v21 = vshrl.u32 %v16504_v62, %v5023_v42  ;;  %vm5040_vm4 = vcmp.lt.s32.totalorder %v5021_v14, 1  ;;  %v4880_v4 = vand.u32 2147483647, %v4879_v44 }
 0x491   :  { %v5033_v10 = vor.u32 %v5032_v20, %v5031_v8  ;;  %v5036_v50 = vor.u32 %v5035_v49, %v5034_v60  ;;  %vm5041_vm12 = vcmp.lt.s32.totalorder %v5021_v14, 2  ;;  %v4759_v53 = vshll.u32 %v4758_v32, 30 }
 0x492   :  { %v4782_v54 = vsub.s32 4, %v4758_v32  ;;  %vm5042_vm1 = vcmp.lt.s32.totalorder %v5021_v14, 3  ;;  %vm5043_vm0 = vcmp.lt.s32.totalorder %v5021_v14, 4  ;;  %v4883_v30 = vmul.f32 %v4882_v5, %v4880_v4 }
 0x493   :  { %v5039_v24 = vor.u32 %v5038_v21, %v5037_v51  ;;  %v5045_v35 = vsel %vm5043_vm0, %v5033_v10, 2102212464  ;;  %v5048_v43 = vsel %vm5040_vm4, %v5027_v7, %v5030_v25  ;;  %v4573_v58 = vsel %vm4490_vm10, %v4572_v23, %v4571_v9 }
 0x494   :  { %v4893_v48 = vadd.s32 3, %v4889_v52  ;;  %v14521_v42 = vsub.s32 %v4756_v3, %v4759_v53  ;;  %v5049_v8 = vsel %vm5043_vm0, %v5036_v50, 920167782  ;;  %v14524_v20 = vand.u32 3, %v4889_v52 }
 0x495   :  { %v4783_v60 = vsel %vm4698_vm7, %v4782_v54, %v4758_v32  ;;  %v5050_v5 = vsel %vm5042_vm1, %v5033_v10, %v5049_v8  ;;  %v5056_v21 = vshll.u32 %v5016_v57, 8  ;;  %v5044_v49 = vsel %vm5040_vm4, %v5024_v63, %v5027_v7 }
 0x496   :  { %16734 = vst [vmem:[#allocation59_spill] sm:$0xff] %v14524_v20  ;;  %v4762_v44 = vsub.s32 0, %v14521_v42  ;;  %v5046_v51 = vsel %vm5042_vm1, %v5030_v25, %v5045_v35  ;;  %v5051_v9 = vsel %vm5041_vm12, %v5048_v43, %v5050_v5  ;;  %v4576_v23 = vsel %vm14331_vm14, %v13868_v22, %v4573_v58 }
 0x497   :  { %v4884_v52 = vxor.u32 2147483648, %v4883_v30  ;;  %v5052_v3 = vsel %vm5040_vm4, %v5030_v25, %v5033_v10  ;;  %v5053_v32 = vsel %vm5043_vm0, %v5039_v24, 1326507024  ;;  %v4785_v57 = vsel %vm14510_vm15, 0, %v4783_v60 }
 0x498   :  { %v10065_v4 = vmin.u32 %v4762_v44, %v14521_v42  ;;  %v5054_v63 = vsel %vm5042_vm1, %v5036_v50, %v5053_v32  ;;  %v16425_v7 = vand.u32 2147483647, %v14156_v45  ;;  %v5047_v53 = vsel %vm5041_vm12, %v5044_v49, %v5046_v51 }
 0x499   :  { %v5055_v54 = vsel %vm5041_vm12, %v5052_v3, %v5054_v63  ;;  %v14545_v59 = vmul.u32.u64.low %v5056_v21, %v5051_v9  ;;  %v14546_v35 = vmul.u32.u64.high %v5056_v21, %v5051_v9, %v14545_v59  ;;  %11257 = vcosq.f32 %v4576_v23 }
 0x49a   :  { %v4764_v25 = vclz %v10065_v4  ;;  %v14548_v10 = vmul.u32.u64.low %v5056_v21, %v5055_v54  ;;  %v14549_v24 = vmul.u32.u64.high %v5056_v21, %v5055_v54, %v14548_v10  ;;  %11259 = vsinq.f32 %v4576_v23 }
 0x49b   :  { %v4885_v43 = vsel %vm4802_vm6, %v4884_v52, %v4883_v30  ;;  %v14553_v58 = vand.u32 3, %v4893_v48  ;;  %v4907_v50 = vand.u32 2139095040, %v14156_v45  ;;  %v4752_v14 = vadd.s32 %v14467_v33, %v14487_v27 }
 0x49c   :  { %v10066_v8 = vadd.s32 4294967294, %v4764_v25  ;;  %v4789_v60 = vadd.s32 3, %v4785_v57  ;;  %v5063_v5 = vmul.u32 %v5056_v21, %v5047_v53  ;;  %v14558_v44 = vand.u32 3, %v4785_v57 }
 0x49d   :  { %16735 = vst [vmem:[#allocation60_spill] sm:$0xff] %v14553_v58  ;;  %v5066_v49 = vadd.s32 1, %v14546_v35  ;;  %v4908_v51 = vshrl.u32 %v4907_v50, 23  ;;  %v4911_v9 = vand.u32 8388607, %v16425_v7  ;;  %v4888_v30 = vsel %vm14444_vm11, %v13956_v36, %v4885_v43 }
 0x49e   :  { %16736 = vst [vmem:[#allocation61_spill] sm:$0xff] %v14558_v44  ;;  %vm10067_vm10 = vcmp.lt.s32.totalorder %v10066_v8, 0  ;;  %vm5065_vm14 = vc.u32 %v14549_v24, %v14545_v59  ;;  %v16424_v33 = vand.u32 2147483647, %v14175_v28  ;;  %v5219_v23 = vand.u32 2139095040, %v14175_v28 }
 0x49f   :  { %v4767_v27 = vsel %vm10067_vm10, 0, %v10066_v8  ;;  %v5067_v48 = vsel %vm5065_vm14, %v5066_v49, %v14546_v35  ;;  %v10072_v21 = vadd.s32 4294967169, %v4908_v51  ;;  %11261 = vcosq.f32 %v4888_v30 }
 0x4a0   :  { %v4768_v52 = vsub.s32 32, %v4767_v27  ;;  %v4769_v3 = vshll.u32 %v14521_v42, %v4767_v27  ;;  %v4772_v32 = vsub.s32 4294967266, %v4767_v27  ;;  %v5068_v4 = vadd.s32 %v5067_v48, %v5063_v5 }
 0x4a1   :  { %v14571_v57 = vand.u32 3, %v4789_v60  ;;  %vm5010_vm6 = vcmp.lt.s32.totalorder %v14127_v61, 0  ;;  %v4912_v2 = vor.u32 8388608, %v4911_v9  ;;  %v4914_v63 = vadd.s32 1, %v10072_v21 }
 0x4a2   :  { %11263 = vsinq.f32 %v4888_v30  ;;  %v4770_v53 = vshrl.u32 %v4752_v14, %v4768_v52  ;;  %v4773_v54 = vadd.s32 127, %v4772_v32  ;;  %v5069_v25 = vadd.s32 536870912, %v5068_v4 }
 0x4a3   :  { %16737 = vst [vmem:[#allocation62_spill] sm:$0xff] %v14571_v57  ;;  %vm4915_vm5 = vcmp.gt.s32.totalorder %v4914_v63, 0  ;;  %v5220_v35 = vshrl.u32 %v5219_v23, 23  ;;  %v14576_v10 = vand.u32 8388607, %v16424_v33  ;;  %v14579_v43 = vpop.eup %11257  ;;  %v14590_v9 = vadd.s32 %v14545_v59, %v14549_v24 }
 0x4a4   :  { %v16429_v42 = vand.u32 2147483647, %v14185_v39  ;;  %16738 = vst [vmem:[#allocation63_spill] sm:$0xff] %v14579_v43  ;;  %v4771_v50 = vor.u32 %v4770_v53, %v4769_v3  ;;  %v4774_v8 = vshll.u32 %v4773_v54, 23  ;;  %v5070_v60 = vshrl.u32 %v5069_v25, 30  ;;  %v14581_v49 = vpop.eup %11259 }
 0x4a5   :  { %v4916_v5 = vsel %vm4915_vm5, %v4914_v63, 0  ;;  %16739 = vst [vmem:[#allocation64_spill] sm:$0xff] %v14581_v49  ;;  %v16740_v14 = vand.u32 2147483647, %v14127_v61  ;;  %v14592_v27 = vshll.u32 %v4912_v2, 8  ;;  %v10084_v53 = vadd.s32 4294967169, %v5220_v35 }
 0x4a6   :  { %v4918_v30 = vand.u32 31, %v4916_v5  ;;  %v4775_v21 = vor.u32 4788187, %v4774_v8  ;;  %v4778_v23 = vcvt.s32.f32 %v4771_v50  ;;  %v5071_v52 = vshll.u32 %v5070_v60, 30 }
 0x4a7   :  { %vm14585_vm11 = vcmp.le.f32.partialorder %v16740_v14, 0.7853982  ;;  %v5094_v3 = vsub.s32 4, %v5070_v60  ;;  %v4917_v59 = vshrl.u32 %v4916_v5, 5  ;;  %v5226_v57 = vadd.s32 1, %v10084_v53 }
 0x4a8   :  { %v4919_v32 = vsub.s32 32, %v4918_v30  ;;  %v4921_v63 = vshll.u32 %v16505_v15, %v4918_v30  ;;  %v4776_v25 = vand.u32 2147483647, %v4775_v21  ;;  %v14597_v14 = vsub.s32 %v5068_v4, %v5071_v52 }
 0x4a9   :  { %v4924_v24 = vshll.u32 %v16666_v41, %v4918_v30  ;;  %v4927_v50 = vshll.u32 %v16667_v56, %v4918_v30  ;;  %v4930_v8 = vshll.u32 %v16668_v1, %v4918_v30  ;;  %v5095_v35 = vsel %vm5010_vm6, %v5094_v3, %v5070_v60  ;;  %v14611_v5 = vpop.eup %11261 }
 0x4aa   :  { %v4922_v2 = vshrl.u32 %v16666_v41, %v4919_v32  ;;  %v4925_v33 = vshrl.u32 %v16667_v56, %v4919_v32  ;;  %v4779_v7 = vmul.f32 %v4778_v23, %v4776_v25  ;;  %v5074_v48 = vsub.s32 0, %v14597_v14  ;;  %16743 = vst [vmem:[#allocation65_spill] sm:$0xff] %v14611_v5 }
 0x4ab   :  { %v14609_v4 = vand.u32 8388607, %v16429_v42  ;;  %v4920_v21 = vshrl.u32 %v16505_v15, %v4919_v32  ;;  %v4928_v54 = vshrl.u32 %v16668_v1, %v4919_v32  ;;  %v4931_v20 = vshrl.u32 %v16503_v16, %v4919_v32 }
 0x4ac   :  { %v4923_v52 = vor.u32 %v4922_v2, %v4921_v63  ;;  %v14616_v44 = vpop.eup %11263  ;;  %v4780_v23 = vxor.u32 2147483648, %v4779_v7  ;;  %v10077_v25 = vmin.u32 %v5074_v48, %v14597_v14  ;;  %v4926_v58 = vor.u32 %v4925_v33, %v4924_v24 }
 0x4ad   :  { %16744 = vst [vmem:[#allocation66_spill] sm:$0xff] %v14616_v44  ;;  %v4933_v60 = vshll.u32 %v16503_v16, %v4918_v30  ;;  %v4929_v3 = vor.u32 %v4928_v54, %v4927_v50  ;;  %v4932_v42 = vor.u32 %v4931_v20, %v4930_v8  ;;  %v4934_v36 = vshrl.u32 %v16504_v62, %v4919_v32  ;;  %v11075_v32 = vld [vmem:[%s16745_s27] sm:$0xff]  }
 0x4ae   :  { %vm4936_vm9 = vcmp.lt.s32.totalorder %v4917_v59, 1  ;;  %v4781_v63 = vsel %vm4698_vm7, %v4780_v23, %v4779_v7  ;;  %v5076_v2 = vclz %v10077_v25  ;;  %v5097_v5 = vsel %vm14585_vm11, 0, %v5095_v35  ;;  %10574 = vmatprep.subr.bf16.mxu0 %v11075_v32 }
 0x4af   :  { %v4935_v44 = vor.u32 %v4934_v36, %v4933_v60  ;;  %vm4937_vm13 = vcmp.lt.s32.totalorder %v4917_v59, 2  ;;  %vm4938_vm2 = vcmp.lt.s32.totalorder %v4917_v59, 3  ;;  %vm4939_vm4 = vcmp.lt.s32.totalorder %v4917_v59, 4  ;;  %10575 = vmatpush3.bf16.msra.mxu0 %v11075_v32 }
 0x4b0   :  { %v10078_v33 = vadd.s32 4294967294, %v5076_v2  ;;  %v4940_v30 = vsel %vm4936_vm9, %v4920_v21, %v4923_v52  ;;  %v4941_v48 = vsel %vm4939_vm4, %v4929_v3, 2102212464  ;;  %v4944_v20 = vsel %vm4936_vm9, %v4923_v52, %v4926_v58 }
 0x4b1   :  { %v5101_v7 = vadd.s32 3, %v5097_v5  ;;  %v4942_v54 = vsel %vm4938_vm2, %v4926_v58, %v4941_v48  ;;  %v4945_v24 = vsel %vm4939_vm4, %v4932_v42, 920167782  ;;  %v4948_v53 = vsel %vm4936_vm9, %v4926_v58, %v4929_v3  ;;  %v11077_v48 = vld [vmem:[%s16745_s27 + $0x10] sm:$0xff]  }
 0x4b2   :  { %v4784_v36 = vsel %vm14510_vm15, %v14034_v29, %v4781_v63  ;;  %vm10079_vm7 = vcmp.lt.s32.totalorder %v10078_v33, 0  ;;  %v4946_v50 = vsel %vm4938_vm2, %v4929_v3, %v4945_v24  ;;  %v4949_v8 = vsel %vm4939_vm4, %v4935_v44, 1326507024  ;;  %v11076_v3 = vld [vmem:[%s16745_s27 + $0x8] sm:$0xff]  }
 0x4b3   :  { %v5079_v35 = vsel %vm10079_vm7, 0, %v10078_v33  ;;  %v4943_v21 = vsel %vm4937_vm13, %v4940_v30, %v4942_v54  ;;  %v4947_v52 = vsel %vm4937_vm13, %v4944_v20, %v4946_v50  ;;  %v4950_v23 = vsel %vm4938_vm2, %v4932_v42, %v4949_v8  ;;  %10576 = vmatprep.subr.bf16.mxu0 %v11076_v3  ;;  %v11083_v8 = vld [vmem:[%s16750_s29] sm:$0xff]  }
 0x4b4   :  { %v5080_v25 = vsub.s32 32, %v5079_v35  ;;  %v5081_v58 = vshll.u32 %v14597_v14, %v5079_v35  ;;  %v5084_v60 = vsub.s32 4294967266, %v5079_v35  ;;  %v4951_v11 = vsel %vm4937_vm13, %v4948_v53, %v4950_v23  ;;  %10577 = vmatpush3.bf16.msra.mxu0 %v11076_v3  ;;  %10606 = vmatprep.subr.bf16.mxu1 %v11083_v8 }
 0x4b5   :  { %v14645_v44 = vmul.u32.u64.low %v14592_v27, %v4951_v11  ;;  %v14646_v63 = vmul.u32.u64.high %v14592_v27, %v4951_v11, %v14645_v44  ;;  %v14649_v2 = vmul.u32.u64.low %v14592_v27, %v4947_v52  ;;  %v14650_v33 = vmul.u32.u64.high %v14592_v27, %v4947_v52, %v14649_v2  ;;  %10578 = vmatprep.subr.bf16.mxu0 %v11077_v48  ;;  %10607 = vmatpush3.bf16.msra.mxu1 %v11083_v8 }
 0x4b6   :  { %v5082_v42 = vshrl.u32 %v14590_v9, %v5080_v25  ;;  %v5085_v30 = vadd.s32 127, %v5084_v60  ;;  %vm5227_vm15 = vcmp.gt.s32.totalorder %v5226_v57, 0  ;;  %v16746_v14 = vor.u32 8388608, %v14576_v10  ;;  %v11078_v10 = vld [vmem:[%s16745_s27 + $0x18] sm:$0xff]  }
 0x4b7   :  { %11265 = vcosq.f32 %v4784_v36  ;;  %v14661_v20 = vand.u32 3, %v5101_v7  ;;  %v14663_v32 = vand.u32 3, %v5097_v5  ;;  %v5228_v54 = vsel %vm5227_vm15, %v5226_v57, 0 }
 0x4b8   :  { %v14656_v59 = vshll.u32 %v16746_v14, 8  ;;  %v5083_v24 = vor.u32 %v5082_v42, %v5081_v58  ;;  %v5086_v9 = vshll.u32 %v5085_v30, 23  ;;  %v4959_v53 = vmul.u32 %v14592_v27, %v4943_v21  ;;  %10579 = vmatpush3.bf16.msra.mxu0 %v11077_v48 }
 0x4b9   :  { %16747 = vst [vmem:[#allocation67_spill] sm:$0xff] %v14661_v20  ;;  %16748 = vst [vmem:[#allocation68_spill] sm:$0xff] %v14663_v32  ;;  %v5230_v50 = vand.u32 31, %v5228_v54  ;;  %11267 = vsinq.f32 %v4784_v36  ;;  %vm4961_vm12 = vc.u32 %v14646_v63, %v14649_v2  ;;  %v4962_v7 = vadd.s32 1, %v14650_v33  ;;  %v11084_v36 = vld [vmem:[%s16750_s29 + $0x8] sm:$0xff]   ;;  %10580 = vmatprep.subr.bf16.mxu0 %v11078_v10 }
 0x4ba   :  { %v16749_v5 = vand.u32 2139095040, %v14185_v39  ;;  %v5087_v27 = vor.u32 4788187, %v5086_v9  ;;  %v5090_v35 = vcvt.s32.f32 %v5083_v24  ;;  %v14677_v21 = vshrl.u32 %v5228_v54, 5  ;;  %10608 = vmatprep.subr.bf16.mxu1 %v11084_v36 }
 0x4bb   :  { %v5231_v52 = vsub.s32 32, %v5230_v50  ;;  %vm4906_vm1 = vcmp.lt.s32.totalorder %v14156_v45, 0  ;;  %v4963_v23 = vsel %vm4961_vm12, %v4962_v7, %v14650_v33  ;;  %v5233_v25 = vshll.u32 %v16505_v15, %v5230_v50  ;;  %v11079_v33 = vld [vmem:[%s16745_s27 + $0x20] sm:$0xff]   ;;  %10609 = vmatpush3.bf16.msra.mxu1 %v11084_v36 }
 0x4bc   :  { %v5116_v57 = vshrl.u32 %v16749_v5, 23  ;;  %v5236_v58 = vshll.u32 %v16666_v41, %v5230_v50  ;;  %v5242_v60 = vshll.u32 %v16668_v1, %v5230_v50  ;;  %v5088_v11 = vand.u32 2147483647, %v5087_v27  ;;  %10581 = vmatpush3.bf16.msra.mxu0 %v11078_v10 }
 0x4bd   :  { %v16751_v3 = vand.u32 2147483647, %v14156_v45  ;;  %v4964_v42 = vadd.s32 %v4963_v23, %v4959_v53  ;;  %v5234_v30 = vshrl.u32 %v16666_v41, %v5231_v52  ;;  %v5239_v14 = vshll.u32 %v16667_v56, %v5230_v50  ;;  %v11085_v23 = vld [vmem:[%s16750_s29 + $0x10] sm:$0xff]   ;;  %10582 = vmatprep.subr.bf16.mxu0 %v11079_v33 }
 0x4be   :  { %v5237_v48 = vshrl.u32 %v16667_v56, %v5231_v52  ;;  %v5240_v54 = vshrl.u32 %v16668_v1, %v5231_v52  ;;  %v5243_v24 = vshrl.u32 %v16503_v16, %v5231_v52  ;;  %v5245_v9 = vshll.u32 %v16503_v16, %v5230_v50  ;;  %10610 = vmatprep.subr.bf16.mxu1 %v11085_v23 }
 0x4bf   :  { %vm14689_vm0 = vcmp.le.f32.partialorder %v16751_v3, 0.7853982  ;;  %v5091_v53 = vmul.f32 %v5090_v35, %v5088_v11  ;;  %v4965_v7 = vadd.s32 536870912, %v4964_v42  ;;  %v5246_v5 = vshrl.u32 %v16504_v62, %v5231_v52  ;;  %v11080_v35 = vld [vmem:[%s16745_s27 + $0x28] sm:$0xff]   ;;  %10611 = vmatpush3.bf16.msra.mxu1 %v11085_v23 }
 0x4c0   :  { %v5232_v3 = vshrl.u32 %v16505_v15, %v5231_v52  ;;  %v5235_v32 = vor.u32 %v5234_v30, %v5233_v25  ;;  %v5238_v20 = vor.u32 %v5237_v48, %v5236_v58  ;;  %v5244_v29 = vor.u32 %v5243_v24, %v5242_v60  ;;  %v14716_v25 = vpop.f32.mrb[16].mxu1  ;;  %v11086_v48 = vld [vmem:[%s16750_s29 + $0x18] sm:$0xff]   ;;  %10583 = vmatpush3.bf16.msra.mxu0 %v11079_v33 }
 0x4c1   :  { %v5092_v43 = vxor.u32 2147483648, %v5091_v53  ;;  %v4966_v50 = vshrl.u32 %v4965_v7, 30  ;;  %v5241_v8 = vor.u32 %v5240_v54, %v5239_v14  ;;  %vm5248_vm10 = vcmp.lt.s32.totalorder %v14677_v21, 1  ;;  %v14712_v11 = vpop.eup %11265  ;;  %v14722_v14 = vpop.f32.mrb[17].mxu1  ;;  %10584 = vmatprep.subr.bf16.mxu0 %v11080_v35  ;;  %10612 = vmatprep.subr.bf16.mxu1 %v11086_v48 }
 0x4c2   :  { %16754 = vst [vmem:[#allocation69_spill] sm:$0xff] %v14712_v11  ;;  %v5247_v27 = vor.u32 %v5246_v5, %v5245_v9  ;;  %vm5250_vm14 = vcmp.lt.s32.totalorder %v14677_v21, 3  ;;  %vm5251_vm5 = vcmp.lt.s32.totalorder %v14677_v21, 4  ;;  %v10080_v52 = vadd.s32 4294967169, %v5116_v57  ;;  %v14737_v24 = vpop.f32.mrb[18].mxu1  ;;  %v11081_v5 = vld [vmem:[%s16745_s27 + $0x30] sm:$0xff]  }
 0x4c3   :  { %v5093_v10 = vsel %vm5010_vm6, %v5092_v43, %v5091_v53  ;;  %v4967_v58 = vshll.u32 %v4966_v50, 30  ;;  %v4990_v60 = vsub.s32 4, %v4966_v50  ;;  %v5253_v30 = vsel %vm5251_vm5, %v5241_v8, 2102212464  ;;  %v14727_v54 = vpop.eup %11267  ;;  %10613 = vmatpush3.bf16.msra.mxu1 %v11086_v48 }
 0x4c4   :  { %16755 = vst [vmem:[#allocation70_spill] sm:$0xff] %v14727_v54  ;;  %v5096_v57 = vsel %vm14585_vm11, %v14127_v61, %v5093_v10  ;;  %vm5249_vm6 = vcmp.lt.s32.totalorder %v14677_v21, 2  ;;  %v5256_v43 = vsel %vm5248_vm10, %v5235_v32, %v5238_v20  ;;  %v5257_v36 = vsel %vm5251_vm5, %v5244_v29, 920167782  ;;  %v14750_v10 = vpop.f32.mrb[19].mxu1  ;;  %10585 = vmatpush3.bf16.msra.mxu0 %v11080_v35 }
 0x4c5   :  { %v14739_v9 = vsub.s32 %v4964_v42, %v4967_v58  ;;  %v4991_v53 = vsel %vm4906_vm1, %v4990_v60, %v4966_v50  ;;  %v5252_v51 = vsel %vm5248_vm10, %v5232_v3, %v5235_v32  ;;  %v5254_v7 = vsel %vm5250_vm14, %v5238_v20, %v5253_v30  ;;  %v11087_v30 = vld [vmem:[%s16750_s29 + $0x20] sm:$0xff]   ;;  %10586 = vmatprep.subr.bf16.mxu0 %v11081_v5  ;;  %v11082_v60 = vld [vmem:[%s16745_s27 + $0x38] sm:$0xff]  }
 0x4c6   :  { %v4993_v42 = vsel %vm14689_vm0, 0, %v4991_v53  ;;  %v5258_v33 = vsel %vm5250_vm14, %v5241_v8, %v5257_v36  ;;  %v5260_v50 = vsel %vm5248_vm10, %v5238_v20, %v5241_v8  ;;  %v5261_v32 = vsel %vm5251_vm5, %v5247_v27, 1326507024  ;;  %10614 = vmatprep.subr.bf16.mxu1 %v11087_v30 }
 0x4c7   :  { %11269 = vcosq.f32 %v5096_v57  ;;  %v4970_v3 = vsub.s32 0, %v14739_v9  ;;  %v5259_v58 = vsel %vm5249_vm6, %v5256_v43, %v5258_v33  ;;  %v4997_v36 = vadd.s32 3, %v4993_v42  ;;  %10615 = vmatpush3.bf16.msra.mxu1 %v11087_v30 }
 0x4c8   :  { %v5262_v20 = vsel %vm5250_vm14, %v5244_v29, %v5261_v32  ;;  %v14770_v27 = vmul.u32.u64.low %v14656_v59, %v5259_v58  ;;  %v14771_v23 = vmul.u32.u64.high %v14656_v59, %v5259_v58, %v14770_v27  ;;  %v5255_v43 = vsel %vm5249_vm6, %v5252_v51, %v5254_v7  ;;  %10587 = vmatpush3.bf16.msra.mxu0 %v11081_v5 }
 0x4c9   :  { %v10073_v8 = vmin.u32 %v4970_v3, %v14739_v9  ;;  %v5263_v53 = vsel %vm5249_vm6, %v5260_v50, %v5262_v20  ;;  %v5122_v33 = vadd.s32 1, %v10080_v52  ;;  %11271 = vsinq.f32 %v5096_v57  ;;  %v11088_v52 = vld [vmem:[%s16750_s29 + $0x28] sm:$0xff]   ;;  %10588 = vmatprep.subr.bf16.mxu0 %v11082_v60 }
 0x4ca   :  { %v4960_v29 = vadd.s32 %v14649_v2, %v14646_v63  ;;  %v14784_v35 = vmul.u32.u64.low %v14656_v59, %v5263_v53  ;;  %v14785_v32 = vmul.u32.u64.high %v14656_v59, %v5263_v53, %v14784_v35  ;;  %v14787_v51 = vand.u32 3, %v4993_v42  ;;  %10616 = vmatprep.subr.bf16.mxu1 %v11088_v52 }
 0x4cb   :  { %v4972_v3 = vclz %v10073_v8  ;;  %vm5123_vm11 = vcmp.gt.s32.totalorder %v5122_v33, 0  ;;  %v5427_v21 = vand.u32 2139095040, %v14238_v47  ;;  %v14793_v57 = vand.u32 3, %v4997_v36  ;;  %10617 = vmatpush3.bf16.msra.mxu1 %v11088_v52 }
 0x4cc   :  { %16756 = vst [vmem:[#allocation71_spill] sm:$0xff] %v14787_v51  ;;  %v5271_v63 = vmul.u32 %v14656_v59, %v5255_v43  ;;  %v5274_v2 = vadd.s32 1, %v14771_v23  ;;  %v5124_v7 = vsel %vm5123_vm11, %v5122_v33, 0  ;;  %v16758_v42 = vor.u32 8388608, %v14609_v4  ;;  %10589 = vmatpush3.bf16.msra.mxu0 %v11082_v60 }
 0x4cd   :  { %16757 = vst [vmem:[#allocation72_spill] sm:$0xff] %v14793_v57  ;;  %v10074_v48 = vadd.s32 4294967294, %v4972_v3  ;;  %v5126_v50 = vand.u32 31, %v5124_v7  ;;  %v16759_v20 = vand.u32 2147483647, %v14238_v47  ;;  %vm5273_vm9 = vc.u32 %v14785_v32, %v14770_v27 }
 0x4ce   :  { %v14799_v58 = vshll.u32 %v16758_v42, 8  ;;  %v14806_v36 = vshrl.u32 %v5124_v7, 5  ;;  %v14808_v59 = vshrl.u32 %v5427_v21, 23  ;;  %vm5218_vm2 = vcmp.lt.s32.totalorder %v14175_v28, 0 }
 0x4cf   :  { %v14803_v8 = vand.u32 8388607, %v16759_v20  ;;  %vm10075_vm13 = vcmp.lt.s32.totalorder %v10074_v48, 0  ;;  %v14813_v4 = vadd.s32 %v14770_v27, %v14785_v32  ;;  %v5275_v5 = vsel %vm5273_vm9, %v5274_v2, %v14771_v23 }
 0x4d0   :  { %v5127_v53 = vsub.s32 32, %v5126_v50  ;;  %v4975_v33 = vsel %vm10075_vm13, 0, %v10074_v48  ;;  %v16760_v35 = vand.u32 2147483647, %v14175_v28  ;;  %v5276_v21 = vadd.s32 %v5275_v5, %v5271_v63 }
 0x4d1   :  { %v5129_v30 = vshll.u32 %v16505_v15, %v5126_v50  ;;  %v5132_v7 = vshll.u32 %v16666_v41, %v5126_v50  ;;  %v14824_v42 = vpop.eup %11269  ;;  %v4976_v27 = vsub.s32 32, %v4975_v33  ;;  %v4977_v23 = vshll.u32 %v14739_v9, %v4975_v33 }
 0x4d2   :  { %vm14818_vm4 = vcmp.le.f32.partialorder %v16760_v35, 0.7853982  ;;  %16763 = vst [vmem:[#allocation73_spill] sm:$0xff] %v14824_v42  ;;  %v4980_v32 = vsub.s32 4294967266, %v4975_v33  ;;  %v5135_v2 = vshll.u32 %v16667_v56, %v5126_v50  ;;  %v5277_v48 = vadd.s32 536870912, %v5276_v21 }
 0x4d3   :  { %v5130_v20 = vshrl.u32 %v16666_v41, %v5127_v53  ;;  %v5133_v35 = vshrl.u32 %v16667_v56, %v5127_v53  ;;  %v5136_v63 = vshrl.u32 %v16668_v1, %v5127_v53  ;;  %v4978_v5 = vshrl.u32 %v4960_v29, %v4976_v27  ;;  %v14833_v42 = vpop.eup %11271 }
 0x4d4   :  { %v4981_v43 = vadd.s32 127, %v4980_v32  ;;  %v5138_v60 = vshll.u32 %v16668_v1, %v5126_v50  ;;  %v5139_v51 = vshrl.u32 %v16503_v16, %v5127_v53  ;;  %16764 = vst [vmem:[#allocation74_spill] sm:$0xff] %v14833_v42  ;;  %v5278_v9 = vshrl.u32 %v5277_v48, 30 }
 0x4d5   :  { %v5128_v33 = vshrl.u32 %v16505_v15, %v5127_v53  ;;  %v5131_v61 = vor.u32 %v5130_v20, %v5129_v30  ;;  %v5432_v57 = vor.u32 8388608, %v14803_v8  ;;  %v4979_v11 = vor.u32 %v4978_v5, %v4977_v23 }
 0x4d6   :  { %v4982_v54 = vshll.u32 %v4981_v43, 23  ;;  %v5134_v49 = vor.u32 %v5133_v35, %v5132_v7  ;;  %v5141_v22 = vshll.u32 %v16503_v16, %v5126_v50  ;;  %v5279_v52 = vshll.u32 %v5278_v9, 30 }
 0x4d7   :  { %v5302_v29 = vsub.s32 4, %v5278_v9  ;;  %v5137_v27 = vor.u32 %v5136_v63, %v5135_v2  ;;  %v5142_v32 = vshrl.u32 %v16504_v62, %v5127_v53  ;;  %v4986_v31 = vcvt.s32.f32 %v4979_v11 }
 0x4d8   :  { %v4983_v13 = vor.u32 4788187, %v4982_v54  ;;  %v5140_v6 = vor.u32 %v5139_v51, %v5138_v60  ;;  %vm5144_vm7 = vcmp.lt.s32.totalorder %v14806_v36, 1  ;;  %v14840_v48 = vsub.s32 %v5276_v21, %v5279_v52  ;;  %v14856_v21 = vpop.f32.mrb[20].mxu1 }
 0x4d9   :  { %v5303_v8 = vsel %vm5218_vm2, %v5302_v29, %v5278_v9  ;;  %vm5146_vm15 = vcmp.lt.s32.totalorder %v14806_v36, 3  ;;  %vm5147_vm12 = vcmp.lt.s32.totalorder %v14806_v36, 4  ;;  %v5143_v30 = vor.u32 %v5142_v32, %v5141_v22  ;;  %v14862_v2 = vpop.f32.mrb[21].mxu1 }
 0x4da   :  { %v4984_v50 = vand.u32 2147483647, %v4983_v13  ;;  %v5305_v43 = vsel %vm14818_vm4, 0, %v5303_v8  ;;  %v5149_v11 = vsel %vm5147_vm12, %v5137_v27, 2102212464  ;;  %v5282_v54 = vsub.s32 0, %v14840_v48 }
 0x4db   :  { %vm5145_vm10 = vcmp.lt.s32.totalorder %v14806_v36, 2  ;;  %v5148_v51 = vsel %vm5144_vm7, %v5128_v33, %v5131_v61  ;;  %v5150_v53 = vsel %vm5146_vm15, %v5134_v49, %v5149_v11  ;;  %v5309_v7 = vadd.s32 3, %v5305_v43 }
 0x4dc   :  { %v4987_v13 = vmul.f32 %v4986_v31, %v4984_v50  ;;  %v5152_v22 = vsel %vm5144_vm7, %v5131_v61, %v5134_v49  ;;  %v5153_v23 = vsel %vm5147_vm12, %v5140_v6, 920167782  ;;  %v10085_v20 = vmin.u32 %v5282_v54, %v14840_v48  ;;  %v14871_v31 = vpop.f32.mrb[22].mxu1 }
 0x4dd   :  { %v14865_v35 = vand.u32 3, %v5305_v43  ;;  %v5154_v63 = vsel %vm5146_vm15, %v5137_v27, %v5153_v23  ;;  %v5156_v5 = vsel %vm5144_vm7, %v5134_v49, %v5137_v27  ;;  %v5151_v61 = vsel %vm5145_vm10, %v5148_v51, %v5150_v53  ;;  %v14879_v52 = vpop.f32.mrb[23].mxu1 }
 0x4de   :  { %v4988_v60 = vxor.u32 2147483648, %v4987_v13  ;;  %v5155_v9 = vsel %vm5145_vm10, %v5152_v22, %v5154_v63  ;;  %v5157_v33 = vsel %vm5147_vm12, %v5143_v30, 1326507024  ;;  %v5284_v29 = vclz %v10085_v20 }
 0x4df   :  { %16765 = vst [vmem:[#allocation75_spill] sm:$0xff] %v14865_v35  ;;  %v5158_v32 = vsel %vm5146_vm15, %v5140_v6, %v5157_v33  ;;  %v14884_v49 = vmul.u32.u64.low %v14799_v58, %v5155_v9  ;;  %v14885_v27 = vmul.u32.u64.high %v14799_v58, %v5155_v9, %v14884_v49  ;;  %v14889_v50 = vand.u32 3, %v5309_v7 }
 0x4e0   :  { %v4989_v8 = vsel %vm4906_vm1, %v4988_v60, %v4987_v13  ;;  %v5159_v43 = vsel %vm5145_vm10, %v5156_v5, %v5158_v32  ;;  %v10092_v30 = vadd.s32 4294967169, %v14808_v59  ;;  %v10086_v54 = vadd.s32 4294967294, %v5284_v29  ;;  %v14908_v59 = vld [vmem:[%s16768_s4] ss:$0 sm:$0xff] }
 0x4e1   :  { %16766 = vst [vmem:[#allocation76_spill] sm:$0xff] %v14889_v50  ;;  %v4992_v11 = vsel %vm14689_vm0, %v14156_v45, %v4989_v8  ;;  %v14898_v6 = vmul.u32.u64.low %v14799_v58, %v5159_v43  ;;  %v14899_v51 = vmul.u32.u64.high %v14799_v58, %v5159_v43, %v14898_v6  ;;  %v5167_v53 = vmul.u32 %v14799_v58, %v5151_v61 }
 0x4e2   :  { %v5434_v22 = vadd.s32 1, %v10092_v30  ;;  %v5323_v13 = vand.u32 2139095040, %v14316_v38  ;;  %v16767_v7 = vand.u32 2147483647, %v14316_v38  ;;  %11273 = vcosq.f32 %v4992_v11 }
 0x4e3   :  { %vm10087_vm1 = vcmp.lt.s32.totalorder %v10086_v54, 0  ;;  %v5170_v44 = vadd.s32 1, %v14885_v27  ;;  %v14911_v23 = vshll.u32 %v5432_v57, 8  ;;  %v14916_v9 = vadd.f32 %v14716_v25, %v14908_v59 }
 0x4e4   :  { %v5327_v36 = vand.u32 8388607, %v16767_v7  ;;  %v5287_v20 = vsel %vm10087_vm1, 0, %v10086_v54  ;;  %vm5435_vm0 = vcmp.gt.s32.totalorder %v5434_v22, 0  ;;  %v5324_v58 = vshrl.u32 %v5323_v13, 23 }
 0x4e5   :  { %v5288_v5 = vsub.s32 32, %v5287_v20  ;;  %v5289_v60 = vshll.u32 %v14840_v48, %v5287_v20  ;;  %v5292_v61 = vsub.s32 4294967266, %v5287_v20  ;;  %11275 = vsinq.f32 %v4992_v11 }
 0x4e6   :  { %v5328_v63 = vor.u32 8388608, %v5327_v36  ;;  %vm5169_vm14 = vc.u32 %v14899_v51, %v14884_v49  ;;  %v5436_v33 = vsel %vm5435_vm0, %v5434_v22, 0  ;;  %v10088_v29 = vadd.s32 4294967169, %v5324_v58 }
 0x4e7   :  { %v5290_v57 = vshrl.u32 %v14813_v4, %v5288_v5  ;;  %v5293_v32 = vadd.s32 127, %v5292_v61  ;;  %vm5114_vm5 = vcmp.lt.s32.totalorder %v14185_v39, 0  ;;  %v5171_v8 = vsel %vm5169_vm14, %v5170_v44, %v14885_v27 }
 0x4e8   :  { %v14922_v43 = vshrl.u32 %v5436_v33, 5  ;;  %v16769_v48 = vand.u32 2147483647, %v14185_v39  ;;  %v14931_v25 = vadd.s32 %v14884_v49, %v14899_v51  ;;  %v5172_v11 = vadd.s32 %v5171_v8, %v5167_v53  ;;  %v14946_v61 = vpop.f32.mrb[24].mxu1 }
 0x4e9   :  { %v5438_v54 = vand.u32 31, %v5436_v33  ;;  %v14933_v6 = vshll.u32 %v5328_v63, 8  ;;  %v5291_v4 = vor.u32 %v5290_v57, %v5289_v60  ;;  %v5294_v22 = vshll.u32 %v5293_v32, 23 }
 0x4ea   :  { %vm14926_vm6 = vcmp.le.f32.partialorder %v16769_v48, 0.7853982  ;;  %v14935_v13 = vadd.s32 1, %v10088_v29  ;;  %v5173_v7 = vadd.s32 536870912, %v5172_v11  ;;  %vm5456_vm11 = vcmp.lt.s32.totalorder %v14922_v43, 1  ;;  %v14953_v48 = vpop.f32.mrb[25].mxu1 }
 0x4eb   :  { %v5439_v36 = vsub.s32 32, %v5438_v54  ;;  %v5441_v44 = vshll.u32 %v16505_v15, %v5438_v54  ;;  %v5295_v20 = vor.u32 4788187, %v5294_v22  ;;  %v5298_v58 = vcvt.s32.f32 %v5291_v4  ;;  %v14956_v35 = vpop.f32.mrb[26].mxu1 }
 0x4ec   :  { %v5444_v49 = vshll.u32 %v16666_v41, %v5438_v54  ;;  %v5450_v51 = vshll.u32 %v16668_v1, %v5438_v54  ;;  %vm5457_vm9 = vcmp.lt.s32.totalorder %v14922_v43, 2  ;;  %v5174_v53 = vshrl.u32 %v5173_v7, 30  ;;  %v14948_v33 = vpop.eup %11273 }
 0x4ed   :  { %v5442_v63 = vshrl.u32 %v16666_v41, %v5439_v36  ;;  %v5445_v5 = vshrl.u32 %v16667_v56, %v5439_v36  ;;  %v5447_v60 = vshll.u32 %v16667_v56, %v5438_v54  ;;  %16772 = vst [vmem:[#allocation77_spill] sm:$0xff] %v14948_v33  ;;  %v5296_v29 = vand.u32 2147483647, %v5295_v20  ;;  %v14959_v33 = vpop.f32.mrb[27].mxu1 }
 0x4ee   :  { %v5448_v57 = vshrl.u32 %v16668_v1, %v5439_v36  ;;  %v5451_v32 = vshrl.u32 %v16503_v16, %v5439_v36  ;;  %v5453_v8 = vshll.u32 %v16503_v16, %v5438_v54  ;;  %v5175_v4 = vshll.u32 %v5174_v53, 30 }
 0x4ef   :  { %v5198_v22 = vsub.s32 4, %v5174_v53  ;;  %v5440_v7 = vshrl.u32 %v16505_v15, %v5439_v36  ;;  %v5443_v27 = vor.u32 %v5442_v63, %v5441_v44  ;;  %v5299_v50 = vmul.f32 %v5298_v58, %v5296_v29  ;;  %v14961_v19 = vpop.eup %11275 }
 0x4f0   :  { %v5446_v42 = vor.u32 %v5445_v5, %v5444_v49  ;;  %v5452_v45 = vor.u32 %v5451_v32, %v5450_v51  ;;  %v5454_v20 = vshrl.u32 %v16504_v62, %v5439_v36  ;;  %v14963_v37 = vsub.s32 %v5172_v11, %v5175_v4 }
 0x4f1   :  { %v5199_v54 = vsel %vm5114_vm5, %v5198_v22, %v5174_v53  ;;  %v5449_v12 = vor.u32 %v5448_v57, %v5447_v60  ;;  %vm5459_vm13 = vcmp.lt.s32.totalorder %v14922_v43, 4  ;;  %v5300_v44 = vxor.u32 2147483648, %v5299_v50 }
 0x4f2   :  { %v5201_v58 = vsel %vm14926_vm6, 0, %v5199_v54  ;;  %v5455_v49 = vor.u32 %v5454_v20, %v5453_v8  ;;  %vm5458_vm7 = vcmp.lt.s32.totalorder %v14922_v43, 3  ;;  %v5178_v36 = vsub.s32 0, %v14963_v37 }
 0x4f3   :  { %v5205_v51 = vadd.s32 3, %v5201_v58  ;;  %v5460_v11 = vsel %vm5456_vm11, %v5440_v7, %v5443_v27  ;;  %v5461_v63 = vsel %vm5459_vm13, %v5449_v12, 2102212464  ;;  %v5301_v53 = vsel %vm5218_vm2, %v5300_v44, %v5299_v50 }
 0x4f4   :  { %v5462_v5 = vsel %vm5458_vm7, %v5446_v42, %v5461_v63  ;;  %v5464_v60 = vsel %vm5456_vm11, %v5443_v27, %v5446_v42  ;;  %v5465_v29 = vsel %vm5459_vm13, %v5452_v45, 920167782  ;;  %v5304_v57 = vsel %vm14818_vm4, %v14175_v28, %v5301_v53 }
 0x4f5   :  { %v10081_v32 = vmin.u32 %v5178_v36, %v14963_v37  ;;  %v14988_v8 = vand.u32 3, %v5205_v51  ;;  %v14990_v4 = vand.u32 3, %v5201_v58  ;;  %v5463_v50 = vsel %vm5457_vm9, %v5460_v11, %v5462_v5 }
 0x4f6   :  { %v5466_v22 = vsel %vm5458_vm7, %v5449_v12, %v5465_v29  ;;  %v5468_v27 = vsel %vm5456_vm11, %v5446_v42, %v5449_v12  ;;  %v5469_v7 = vsel %vm5459_vm13, %v5455_v49, 1326507024  ;;  %11277 = vcosq.f32 %v5304_v57 }
 0x4f7   :  { %16773 = vst [vmem:[#allocation78_spill] sm:$0xff] %v14990_v4  ;;  %v5180_v3 = vclz %v10081_v32  ;;  %v5467_v20 = vsel %vm5457_vm9, %v5464_v60, %v5466_v22  ;;  %v5470_v54 = vsel %vm5458_vm7, %v5452_v45, %v5469_v7  ;;  %11279 = vsinq.f32 %v5304_v57 }
 0x4f8   :  { %v5471_v44 = vsel %vm5457_vm9, %v5468_v27, %v5470_v54  ;;  %v15007_v58 = vmul.u32.u64.low %v14911_v23, %v5467_v20  ;;  %v15008_v36 = vmul.u32.u64.high %v14911_v23, %v5467_v20, %v15007_v58  ;;  %vm5331_vm2 = vcmp.gt.s32.totalorder %v14935_v13, 0 }
 0x4f9   :  { %v10082_v12 = vadd.s32 4294967294, %v5180_v3  ;;  %v15012_v42 = vmul.u32.u64.low %v14911_v23, %v5471_v44  ;;  %v15013_v49 = vmul.u32.u64.high %v14911_v23, %v5471_v44, %v15012_v42  ;;  %v5479_v51 = vmul.u32 %v14911_v23, %v5463_v50 }
 0x4fa   :  { %v5332_v45 = vsel %vm5331_vm2, %v14935_v13, 0  ;;  %v15020_v43 = vadd.f32 %v14908_v59, %v14722_v14  ;;  %v15024_v11 = vadd.f32 %v14737_v24, %v14908_v59  ;;  %v15030_v5 = vadd.f32 %v14908_v59, %v14750_v10  ;;  %v15044_v27 = vpop.f32.mrb[28].mxu1 }
 0x4fb   :  { %vm10083_vm4 = vcmp.lt.s32.totalorder %v10082_v12, 0  ;;  %v15026_v63 = vshrl.u32 %v5332_v45, 5  ;;  %v5334_v53 = vand.u32 31, %v5332_v45  ;;  %v5482_v23 = vadd.s32 1, %v15008_v36  ;;  %v15050_v20 = vpop.f32.mrb[29].mxu1 }
 0x4fc   :  { %v5183_v60 = vsel %vm10083_vm4, 0, %v10082_v12  ;;  %v15036_v14 = vadd.f32 %v14856_v21, %v14908_v59  ;;  %vm5481_vm15 = vc.u32 %v15013_v49, %v15007_v58  ;;  %vm5426_vm12 = vcmp.lt.s32.totalorder %v14238_v47, 0 }
 0x4fd   :  { %v5184_v29 = vsub.s32 32, %v5183_v60  ;;  %v5185_v24 = vshll.u32 %v14963_v37, %v5183_v60  ;;  %v5188_v57 = vsub.s32 4294967266, %v5183_v60  ;;  %v5335_v10 = vsub.s32 32, %v5334_v53  ;;  %v15061_v60 = vpop.f32.mrb[30].mxu1 }
 0x4fe   :  { %v5337_v50 = vshll.u32 %v16505_v15, %v5334_v53  ;;  %v5340_v22 = vshll.u32 %v16666_v41, %v5334_v53  ;;  %v5483_v37 = vsel %vm5481_vm15, %v5482_v23, %v15008_v36  ;;  %v5343_v3 = vshll.u32 %v16667_v56, %v5334_v53  ;;  %v15067_v13 = vpop.f32.mrb[31].mxu1 }
 0x4ff   :  { %v5186_v7 = vshrl.u32 %v14931_v25, %v5184_v29  ;;  %v5189_v21 = vadd.s32 127, %v5188_v57  ;;  %v16774_v54 = vand.u32 2147483647, %v14238_v47  ;;  %v5484_v12 = vadd.s32 %v5483_v37, %v5479_v51 }
 0x500   :  { %v5336_v42 = vshrl.u32 %v16505_v15, %v5335_v10  ;;  %v5338_v25 = vshrl.u32 %v16666_v41, %v5335_v10  ;;  %v5341_v45 = vshrl.u32 %v16667_v56, %v5335_v10  ;;  %v15063_v36 = vpop.eup %11277  ;;  %v5344_v57 = vshrl.u32 %v16668_v1, %v5335_v10 }
 0x501   :  { %vm15054_vm10 = vcmp.le.f32.partialorder %v16774_v54, 0.7853982  ;;  %16777 = vst [vmem:[#allocation79_spill] sm:$0xff] %v15063_v36  ;;  %v5187_v23 = vor.u32 %v5186_v7, %v5185_v24  ;;  %v5190_v29 = vshll.u32 %v5189_v21, 23  ;;  %v5346_v54 = vshll.u32 %v16668_v1, %v5334_v53  ;;  %v15069_v32 = vpop.eup %11279 }
 0x502   :  { %v5485_v51 = vadd.s32 536870912, %v5484_v12  ;;  %v5339_v15 = vor.u32 %v5338_v25, %v5337_v50  ;;  %v5342_v37 = vor.u32 %v5341_v45, %v5340_v22  ;;  %v5347_v41 = vshrl.u32 %v16503_v16, %v5335_v10 }
 0x503   :  { %v5191_v56 = vor.u32 4788187, %v5190_v29  ;;  %v5194_v4 = vcvt.s32.f32 %v5187_v23  ;;  %v5345_v28 = vor.u32 %v5344_v57, %v5343_v3  ;;  %v5349_v36 = vshll.u32 %v16503_v16, %v5334_v53 }
 0x504   :  { %v5486_v24 = vshrl.u32 %v5485_v51, 30  ;;  %v5348_v7 = vor.u32 %v5347_v41, %v5346_v54  ;;  %v5350_v21 = vshrl.u32 %v16504_v62, %v5335_v10  ;;  %vm5352_vm1 = vcmp.lt.s32.totalorder %v15026_v63, 1 }
 0x505   :  { %v5192_v1 = vand.u32 2147483647, %v5191_v56  ;;  %vm5353_vm0 = vcmp.lt.s32.totalorder %v15026_v63, 2  ;;  %vm5354_vm14 = vcmp.lt.s32.totalorder %v15026_v63, 3  ;;  %vm5355_vm11 = vcmp.lt.s32.totalorder %v15026_v63, 4 }
 0x506   :  { %v5487_v50 = vshll.u32 %v5486_v24, 30  ;;  %v5510_v22 = vsub.s32 4, %v5486_v24  ;;  %v5351_v25 = vor.u32 %v5350_v21, %v5349_v36  ;;  %v5356_v3 = vsel %vm5352_vm1, %v5336_v42, %v5339_v15 }
 0x507   :  { %v5195_v16 = vmul.f32 %v5194_v4, %v5192_v1  ;;  %v5357_v53 = vsel %vm5355_vm11, %v5345_v28, 2102212464  ;;  %v5360_v62 = vsel %vm5352_vm1, %v5339_v15, %v5342_v37  ;;  %v5361_v10 = vsel %vm5355_vm11, %v5348_v7, 920167782 }
 0x508   :  { %v15086_v45 = vsub.s32 %v5484_v12, %v5487_v50  ;;  %v5511_v23 = vsel %vm5426_vm12, %v5510_v22, %v5486_v24  ;;  %v5358_v36 = vsel %vm5354_vm14, %v5342_v37, %v5357_v53  ;;  %v5362_v4 = vsel %vm5354_vm14, %v5345_v28, %v5361_v10 }
 0x509   :  { %v5196_v42 = vxor.u32 2147483648, %v5195_v16  ;;  %v5480_v29 = vadd.s32 %v15007_v58, %v15013_v49  ;;  %v5513_v57 = vsel %vm15054_vm10, 0, %v5511_v23  ;;  %v5363_v12 = vsel %vm5353_vm0, %v5360_v62, %v5362_v4 }
 0x50a   :  { %v5490_v54 = vsub.s32 0, %v15086_v45  ;;  %v5517_v51 = vadd.s32 3, %v5513_v57  ;;  %v5359_v15 = vsel %vm5353_vm0, %v5356_v3, %v5358_v36  ;;  %v5364_v41 = vsel %vm5352_vm1, %v5342_v37, %v5345_v28 }
 0x50b   :  { %v5197_v56 = vsel %vm5114_vm5, %v5196_v42, %v5195_v16  ;;  %v5365_v58 = vsel %vm5355_vm11, %v5351_v25, 1326507024  ;;  %v15110_v49 = vmul.u32.u64.low %v14933_v6, %v5363_v12  ;;  %v15111_v24 = vmul.u32.u64.high %v14933_v6, %v5363_v12, %v15110_v49 }
 0x50c   :  { %v5200_v21 = vsel %vm14926_vm6, %v14185_v39, %v5197_v56  ;;  %v10093_v1 = vmin.u32 %v5490_v54, %v15086_v45  ;;  %v15117_v50 = vand.u32 3, %v5513_v57  ;;  %v5366_v28 = vsel %vm5354_vm14, %v5348_v7, %v5365_v58 }
 0x50d   :  { %11281 = vcosq.f32 %v5200_v21  ;;  %v15121_v37 = vand.u32 3, %v5517_v51  ;;  %v5367_v22 = vsel %vm5353_vm0, %v5364_v41, %v5366_v28  ;;  %v16778_v25 = vmax.f32 %v14916_v9, 0.0 }
 0x50e   :  { %v16779_v3 = vmax.f32 %v15024_v11, 0.0  ;;  %v5492_v30 = vclz %v10093_v1  ;;  %v15130_v53 = vmul.u32.u64.low %v14933_v6, %v5367_v22  ;;  %v15131_v62 = vmul.u32.u64.high %v14933_v6, %v5367_v22, %v15130_v53 }
 0x50f   :  { %v5375_v10 = vmul.u32 %v14933_v6, %v5359_v15  ;;  %11283 = vsinq.f32 %v5200_v21  ;;  %v5378_v7 = vadd.s32 1, %v15111_v24  ;;  %v7622_v23 = vmax.f32 %v15030_v5, 0.0 }
 0x510   :  { %v7638_v16 = vpack.c.bf16 %v16779_v3, %v16778_v25  ;;  %v7575_v63 = vadd.f32 %v14908_v59, %v14862_v2  ;;  %v10094_v36 = vadd.s32 4294967294, %v5492_v30  ;;  %v7627_v9 = vmax.f32 %v15036_v14, 0.0 }
 0x511   :  { %v7586_v11 = vadd.f32 %v14871_v31, %v14908_v59  ;;  %v7578_v4 = vadd.f32 %v14908_v59, %v14879_v52  ;;  %v16780_v42 = vmax.f32 %v15020_v43, 0.0  ;;  %v7599_v12 = vadd.f32 %v14946_v61, %v14908_v59 }
 0x512   :  { %v7625_v57 = vmax.f32 %v7575_v63, 0.0  ;;  %v7602_v5 = vadd.f32 %v14956_v35, %v14908_v59  ;;  %vm10095_vm5 = vcmp.lt.s32.totalorder %v10094_v36, 0  ;;  %vm5377_vm6 = vc.u32 %v15131_v62, %v15110_v49 }
 0x513   :  { %v7637_v6 = vpack.c.bf16 %v7622_v23, %v16780_v42  ;;  %v7628_v2 = vmax.f32 %v7586_v11, 0.0  ;;  %v7591_v31 = vadd.f32 %v14908_v59, %v14953_v48  ;;  %v5495_v14 = vsel %vm10095_vm5, 0, %v10094_v36 }
 0x514   :  { %vm5322_vm9 = vcmp.lt.s32.totalorder %v14316_v38, 0  ;;  %v15154_v52 = vadd.s32 %v15110_v49, %v15131_v62  ;;  %v5379_v43 = vsel %vm5377_vm6, %v5378_v7, %v15111_v24  ;;  %v7626_v61 = vmax.f32 %v7578_v4, 0.0 }
 0x515   :  { %10590 = vmatprep.mubr.bf16.mxu0 %v7637_v6  ;;  %v5496_v54 = vsub.s32 32, %v5495_v14  ;;  %v5497_v35 = vshll.u32 %v15086_v45, %v5495_v14  ;;  %v5500_v51 = vsub.s32 4294967266, %v5495_v14  ;;  %v16781_v15 = vand.u32 2147483647, %v14316_v38 }
 0x516   :  { %v5380_v48 = vadd.s32 %v5379_v43, %v5375_v10  ;;  %10591 = vmatmul.mubr.bf16.vlgmr.msra.gmra.mrb[32].mxu0 %v7638_v16  ;;  %v7640_v56 = vpack.c.bf16 %v7628_v2, %v7627_v9  ;;  %v7639_v58 = vpack.c.bf16 %v7626_v61, %v7625_v57  ;;  %v7631_v49 = vmax.f32 %v7599_v12, 0.0 }
 0x517   :  { %vm15160_vm13 = vcmp.le.f32.partialorder %v16781_v15, 0.7853982  ;;  %v7632_v21 = vmax.f32 %v7602_v5, 0.0  ;;  %v5498_v1 = vshrl.u32 %v5480_v29, %v5496_v54  ;;  %v5501_v24 = vadd.s32 127, %v5500_v51  ;;  %v15166_v45 = vpop.eup %11281 }
 0x518   :  { %v5381_v28 = vadd.s32 536870912, %v5380_v48  ;;  %v7594_v22 = vadd.f32 %v14908_v59, %v14959_v33  ;;  %10594 = vmatprep.mubr.bf16.mxu0 %v7639_v58  ;;  %v7615_v3 = vadd.f32 %v15044_v27, %v14908_v59  ;;  %v7607_v16 = vadd.f32 %v14908_v59, %v15050_v20  ;;  %v16784_v58 = vld [vmem:[#allocation37_spill] sm:$0xff] }
 0x519   :  { %v7642_v25 = vpack.c.bf16 %v7632_v21, %v7631_v49  ;;  %v7618_v30 = vadd.f32 %v15061_v60, %v14908_v59  ;;  %v5499_v53 = vor.u32 %v5498_v1, %v5497_v35  ;;  %v5502_v29 = vshll.u32 %v5501_v24, 23  ;;  %v15174_v7 = vpop.eup %11283 }
 0x51a   :  { %v5382_v62 = vshrl.u32 %v5381_v28, 30  ;;  %v7630_v10 = vmax.f32 %v7594_v22, 0.0  ;;  %v7629_v33 = vmax.f32 %v7591_v31, 0.0  ;;  %v7635_v23 = vmax.f32 %v7615_v3, 0.0 }
 0x51b   :  { %v7636_v63 = vmax.f32 %v7618_v30, 0.0  ;;  %v7610_v36 = vadd.f32 %v14908_v59, %v15067_v13  ;;  %v5503_v9 = vor.u32 4788187, %v5502_v29  ;;  %v5506_v27 = vcvt.s32.f32 %v5499_v53  ;;  %v16785_v29 = vld [vmem:[#allocation28_spill] sm:$0xff] }
 0x51c   :  { %v5383_v11 = vshll.u32 %v5382_v62, 30  ;;  %v5406_v4 = vsub.s32 4, %v5382_v62  ;;  %v7641_v20 = vpack.c.bf16 %v7630_v10, %v7629_v33  ;;  %v7633_v42 = vmax.f32 %v7607_v16, 0.0 }
 0x51d   :  { %v15178_v6 = vpack.c.bf16 %v7636_v63, %v7635_v23  ;;  %v7634_v60 = vmax.f32 %v7610_v36, 0.0  ;;  %v5504_v57 = vand.u32 2147483647, %v5503_v9  ;;  %vm3956_vm7 = vweird.f32 %v13654_v26  ;;  %v16792_v26 = vld [vmem:[#allocation35_spill] sm:$0xff] }
 0x51e   :  { %v15180_v12 = vsub.s32 %v5380_v48, %v5383_v11  ;;  %v5407_v5 = vsel %vm5322_vm9, %v5406_v4, %v5382_v62  ;;  %10595 = vmatmul.mubr.bf16.gmra.mrb[36].mxu0 %v7640_v56  ;;  %vm3960_vm2 = vcmp.eq.s32.totalorder %v13928_v46, 0  ;;  %v3961_v2 = vxor.u32 2147483648, %v14085_v18 }
 0x51f   :  { %v5409_v59 = vsel %vm15160_vm13, 0, %v5407_v5  ;;  %10598 = vmatprep.mubr.bf16.mxu0 %v7641_v20  ;;  %v7643_v13 = vpack.c.bf16 %v7634_v60, %v7633_v42  ;;  %v5507_v31 = vmul.f32 %v5506_v27, %v5504_v57  ;;  %vm3959_vm4 = vcmp.lt.s32.totalorder %v13928_v46, 2 }
 0x520   :  { %v5386_v14 = vsub.s32 0, %v15180_v12  ;;  %v5413_v43 = vadd.s32 3, %v5409_v59  ;;  %v15190_v61 = vand.u32 3, %v5409_v59  ;;  %vm3963_vm15 = vcmp.eq.s32.totalorder %v13928_v46, 2  ;;  %v16790_v59 = vld [vmem:[#allocation23_spill] sm:$0xff]  ;;  %v16791_v46 = vld [vmem:[#allocation29_spill] sm:$0xff] }
 0x521   :  { %v3964_v54 = vxor.u32 2147483648, %v14074_v0  ;;  %vm4060_vm1 = vweird.f32 %v13650_v17  ;;  %vm4063_vm0 = vcmp.lt.s32.totalorder %v13921_v34, 2  ;;  %v5508_v35 = vxor.u32 2147483648, %v5507_v31 }
 0x522   :  { %v10089_v51 = vmin.u32 %v5386_v14, %v15180_v12  ;;  %v15198_v15 = vand.u32 3, %v5413_v43  ;;  %vm4064_vm14 = vcmp.eq.s32.totalorder %v13921_v34, 0  ;;  %v4065_v48 = vxor.u32 2147483648, %v14068_v55  ;;  %v16793_v43 = vld [vmem:[#allocation38_spill] sm:$0xff] }
 0x523   :  { %vm4067_vm11 = vcmp.eq.s32.totalorder %v13921_v34, 2  ;;  %v4068_v56 = vxor.u32 2147483648, %v14061_v40  ;;  %vm5622_vm5 = vcmp.lt.s32.totalorder %v16784_v58, 2  ;;  %v5509_v49 = vsel %vm5426_vm12, %v5508_v35, %v5507_v31  ;;  %v16794_v35 = vld [vmem:[#allocation39_spill] sm:$0xff] }
 0x524   :  { %v5388_v21 = vclz %v10089_v51  ;;  %vm5623_vm6 = vcmp.eq.s32.totalorder %v16784_v58, 0  ;;  %vm5626_vm3 = vcmp.eq.s32.totalorder %v16784_v58, 2  ;;  %v5512_v1 = vsel %vm15054_vm10, %v14238_v47, %v5509_v49 }
 0x525   :  { %v4066_v24 = vsel %vm4064_vm14, %v14061_v40, %v4065_v48  ;;  %v4069_v28 = vsel %vm4067_vm11, %v4068_v56, %v14068_v55  ;;  %v5625_v22 = vsel %vm5623_vm6, %v14074_v0, %v3961_v2  ;;  %11285 = vcosq.f32 %v5512_v1 }
 0x526   :  { %v10090_v3 = vadd.s32 4294967294, %v5388_v21  ;;  %10599 = vmatmul.mubr.bf16.gmra.mrb[40].mxu0 %v7642_v25  ;;  %v4070_v16 = vsel %vm4063_vm0, %v4066_v24, %v4069_v28  ;;  %v5628_v30 = vsel %vm5626_vm3, %v3964_v54, %v14085_v18  ;;  %11287 = vsinq.f32 %v5512_v1 }
 0x527   :  { %10602 = vmatprep.mubr.bf16.mxu0 %v7643_v13  ;;  %v15220_v44 = vsel %vm4060_vm1, nan, %v4070_v16  ;;  %v5629_v53 = vsel %vm5622_vm5, %v5625_v22, %v5628_v30  ;;  %vm5725_vm12 = vcmp.lt.s32.totalorder %v16785_v29, 2  ;;  %vm5726_vm0 = vcmp.eq.s32.totalorder %v16785_v29, 0 }
 0x528   :  { %vm10091_vm10 = vcmp.lt.s32.totalorder %v10090_v3, 0  ;;  %v15227_v25 = vsel %vm3956_vm7, nan, %v5629_v53  ;;  %vm5729_vm3 = vcmp.eq.s32.totalorder %v16785_v29, 2  ;;  %v5728_v62 = vsel %vm5726_vm0, %v14061_v40, %v4065_v48  ;;  %v16786_v40 = vld [vmem:[#allocation12_spill] sm:$0xff] }
 0x529   :  { %v5391_v34 = vsel %vm10091_vm10, 0, %v10090_v3  ;;  %v5731_v10 = vsel %vm5729_vm3, %v4068_v56, %v14068_v55  ;;  %v3962_v33 = vsel %vm3960_vm2, %v14074_v0, %v3961_v2  ;;  %v3965_v11 = vsel %vm3963_vm15, %v3964_v54, %v14085_v18  ;;  %v16787_v55 = vld [vmem:[#allocation34_spill] sm:$0xff]  ;;  %v16788_v18 = vld [vmem:[#allocation48_spill] sm:$0xff] }
 0x52a   :  { %v5392_v23 = vsub.s32 32, %v5391_v34  ;;  %v5393_v63 = vshll.u32 %v15180_v12, %v5391_v34  ;;  %v5396_v36 = vsub.s32 4294967266, %v5391_v34  ;;  %v5732_v9 = vsel %vm5725_vm12, %v5728_v62, %v5731_v10  ;;  %v16795_v48 = vld [vmem:[#allocation16_spill] sm:$0xff]  ;;  %v16796_v34 = vld [vmem:[#allocation41_spill] sm:$0xff] }
 0x52b   :  { %v15239_v27 = vsel %vm4060_vm1, nan, %v5732_v9  ;;  %vm4164_vm14 = vweird.f32 %v16786_v40  ;;  %vm4167_vm11 = vcmp.lt.s32.totalorder %v16787_v55, 2  ;;  %v3966_v42 = vsel %vm3959_vm4, %v3962_v33, %v3965_v11  ;;  %v16798_v9 = vld [vmem:[#allocation55_spill] sm:$0xff] }
 0x52c   :  { %v5394_v4 = vshrl.u32 %v15154_v52, %v5392_v23  ;;  %v5397_v0 = vadd.s32 127, %v5396_v36  ;;  %v10983_v20 = vpack.i.bf16 %v15239_v27, %v15227_v25  ;;  %v15253_v17 = vsel %vm3956_vm7, nan, %v3966_v42  ;;  %v16789_v52 = vld [vmem:[#allocation45_spill] sm:$0xff]  ;;  %v16797_v23 = vld [vmem:[#allocation44_spill] sm:$0xff] }
 0x52d   :  { %vm4168_vm2 = vcmp.eq.s32.totalorder %v16787_v55, 0  ;;  %v4169_v60 = vxor.u32 2147483648, %v16788_v18  ;;  %vm4171_vm15 = vcmp.eq.s32.totalorder %v16787_v55, 2  ;;  %v4172_v5 = vxor.u32 2147483648, %v16789_v52  ;;  %v11111_v25 = vld [vmem:[%s16286_s15] sm:$0xff]   ;;  %v11112_v27 = vld [vmem:[%s16286_s15 + $0x8] sm:$0xff]  }
 0x52e   :  { %v5395_v57 = vor.u32 %v5394_v4, %v5393_v63  ;;  %v5398_v12 = vshll.u32 %v5397_v0, 23  ;;  %10603 = vmatmul.mubr.bf16.gmra.mrb[44].mxu0 %v15178_v6  ;;  %vm4268_vm1 = vweird.f32 %v16790_v59  ;;  %vm4271_vm4 = vcmp.lt.s32.totalorder %v16791_v46, 2  ;;  %v16799_v0 = vld [vmem:[#allocation54_spill] sm:$0xff] }
 0x52f   :  { %vm4272_vm5 = vcmp.eq.s32.totalorder %v16791_v46, 0  ;;  %v4273_v13 = vxor.u32 2147483648, %v16792_v26  ;;  %vm4275_vm7 = vcmp.eq.s32.totalorder %v16791_v46, 2  ;;  %v15265_v2 = vpop.eup %11285  ;;  %v4276_v54 = vxor.u32 2147483648, %v16793_v43  ;;  %v16804_v59 = vld [vmem:[#allocation46_spill] sm:$0xff] }
 0x530   :  { %v5399_v31 = vor.u32 4788187, %v5398_v12  ;;  %v5402_v14 = vcvt.s32.f32 %v5395_v57  ;;  %vm5828_vm6 = vcmp.lt.s32.totalorder %v16794_v35, 2  ;;  %v15269_v6 = vpop.eup %11287  ;;  %vm5829_vm12 = vcmp.eq.s32.totalorder %v16794_v35, 0  ;;  %v16802_v57 = vld [vmem:[#allocation53_spill] sm:$0xff] }
 0x531   :  { %v4274_v51 = vsel %vm4272_vm5, %v16793_v43, %v4273_v13  ;;  %vm5832_vm10 = vcmp.eq.s32.totalorder %v16794_v35, 2  ;;  %vm5931_vm0 = vcmp.lt.s32.totalorder %v16795_v48, 2  ;;  %v4277_v58 = vsel %vm4275_vm7, %v4276_v54, %v16792_v26 }
 0x532   :  { %v5400_v56 = vand.u32 2147483647, %v5399_v31  ;;  %v5831_v49 = vsel %vm5829_vm12, %v16789_v52, %v4169_v60  ;;  %v5834_v21 = vsel %vm5832_vm10, %v4172_v5, %v16788_v18  ;;  %v4278_v1 = vsel %vm4271_vm4, %v4274_v51, %v4277_v58 }
 0x533   :  { %v5835_v24 = vsel %vm5828_vm6, %v5831_v49, %v5834_v21  ;;  %vm5932_vm3 = vcmp.eq.s32.totalorder %v16795_v48, 0  ;;  %vm5935_vm5 = vcmp.eq.s32.totalorder %v16795_v48, 2  ;;  %v15284_v22 = vsel %vm4268_vm1, nan, %v4278_v1  ;;  %v16806_v49 = vld [vmem:[#allocation14_spill] sm:$0xff] }
 0x534   :  { %v5403_v28 = vmul.f32 %v5402_v14, %v5400_v56  ;;  %v15288_v3 = vsel %vm4164_vm14, nan, %v5835_v24  ;;  %v5934_v16 = vsel %vm5932_vm3, %v16793_v43, %v4273_v13  ;;  %v5937_v30 = vsel %vm5935_vm5, %v4276_v54, %v16792_v26  ;;  %v16805_v43 = vld [vmem:[#allocation47_spill] sm:$0xff]  ;;  %v16807_v24 = vld [vmem:[#allocation58_spill] sm:$0xff] }
 0x535   :  { %v4170_v53 = vsel %vm4168_vm2, %v16789_v52, %v4169_v60  ;;  %v4173_v29 = vsel %vm4171_vm15, %v4172_v5, %v16788_v18  ;;  %vm4372_vm4 = vweird.f32 %v16796_v34  ;;  %v5938_v10 = vsel %vm5931_vm0, %v5934_v16, %v5937_v30  ;;  %v16800_v18 = vld [vmem:[#allocation33_spill] sm:$0xff]  ;;  %v16808_v30 = vld [vmem:[#allocation64_spill] sm:$0xff] }
 0x536   :  { %v5404_v62 = vxor.u32 2147483648, %v5403_v28  ;;  %v4174_v33 = vsel %vm4167_vm11, %v4170_v53, %v4173_v29  ;;  %vm4375_vm7 = vcmp.lt.s32.totalorder %v16797_v23, 2  ;;  %v15306_v63 = vsel %vm4268_vm1, nan, %v5938_v10  ;;  %v16801_v60 = vld [vmem:[#allocation17_spill] sm:$0xff]  ;;  %v16813_v34 = vld [vmem:[#allocation56_spill] sm:$0xff] }
 0x537   :  { %v15310_v36 = vsel %vm4164_vm14, nan, %v4174_v33  ;;  %vm4376_vm2 = vcmp.eq.s32.totalorder %v16797_v23, 0  ;;  %v4377_v11 = vxor.u32 2147483648, %v16798_v9  ;;  %v10993_v55 = vpack.i.bf16 %v15306_v63, %v15288_v3  ;;  %v16803_v52 = vld [vmem:[#allocation49_spill] sm:$0xff]  ;;  %v16810_v33 = vld [vmem:[#allocation40_spill] sm:$0xff]  ;;  %v11114_v3 = vld [vmem:[%s16286_s15 + $0x18] sm:$0xff]  }
 0x538   :  { %v5405_v4 = vsel %vm5322_vm9, %v5404_v62, %v5403_v28  ;;  %vm4379_vm11 = vcmp.eq.s32.totalorder %v16797_v23, 2  ;;  %v4380_v42 = vxor.u32 2147483648, %v16799_v0  ;;  %vm4476_vm14 = vweird.f32 %v16800_v18  ;;  %v16809_v62 = vld [vmem:[#allocation63_spill] sm:$0xff] }
 0x539   :  { %v5408_v40 = vsel %vm15160_vm13, %v14316_v38, %v5405_v4  ;;  %vm4479_vm15 = vcmp.lt.s32.totalorder %v16801_v60, 2  ;;  %vm4480_vm1 = vcmp.eq.s32.totalorder %v16801_v60, 0  ;;  %v4481_v12 = vxor.u32 2147483648, %v16802_v57  ;;  %v16811_v23 = vld [vmem:[#allocation51_spill] sm:$0xff] }
 0x53a   :  { %11289 = vcosq.f32 %v5408_v40  ;;  %vm4483_vm9 = vcmp.eq.s32.totalorder %v16801_v60, 2  ;;  %v4484_v5 = vxor.u32 2147483648, %v16803_v52  ;;  %vm6034_vm6 = vcmp.lt.s32.totalorder %v16804_v59, 2 }
 0x53b   :  { %11291 = vsinq.f32 %v5408_v40  ;;  %vm6035_vm12 = vcmp.eq.s32.totalorder %v16804_v59, 0  ;;  %vm6038_vm13 = vcmp.eq.s32.totalorder %v16804_v59, 2  ;;  %v4482_v41 = vsel %vm4480_vm1, %v16803_v52, %v4481_v12  ;;  %v16815_v40 = vld [vmem:[#allocation50_spill] sm:$0xff] }
 0x53c   :  { %v4485_v46 = vsel %vm4483_vm9, %v4484_v5, %v16802_v57  ;;  %v6037_v26 = vsel %vm6035_vm12, %v16799_v0, %v4377_v11  ;;  %v6040_v13 = vsel %vm6038_vm13, %v4380_v42, %v16798_v9  ;;  %vm6137_vm10 = vcmp.lt.s32.totalorder %v16805_v43, 2 }
 0x53d   :  { %v4486_v31 = vsel %vm4479_vm15, %v4482_v41, %v4485_v46  ;;  %v6041_v14 = vsel %vm6034_vm6, %v6037_v26, %v6040_v13  ;;  %vm6138_vm0 = vcmp.eq.s32.totalorder %v16805_v43, 0  ;;  %vm6141_vm3 = vcmp.eq.s32.totalorder %v16805_v43, 2 }
 0x53e   :  { %v15340_v54 = vsel %vm4476_vm14, nan, %v4486_v31  ;;  %v15344_v35 = vsel %vm4372_vm4, nan, %v6041_v14  ;;  %v6140_v51 = vsel %vm6138_vm0, %v16803_v52, %v4481_v12  ;;  %v6143_v48 = vsel %vm6141_vm3, %v4484_v5, %v16802_v57 }
 0x53f   :  { %v4378_v56 = vsel %vm4376_vm2, %v16799_v0, %v4377_v11  ;;  %v4381_v58 = vsel %vm4379_vm11, %v4380_v42, %v16798_v9  ;;  %vm4580_vm5 = vweird.f32 %v16806_v49  ;;  %v6144_v21 = vsel %vm6137_vm10, %v6140_v51, %v6143_v48  ;;  %v16812_v9 = vld [vmem:[#allocation57_spill] sm:$0xff]  ;;  %v16814_v42 = vld [vmem:[#allocation52_spill] sm:$0xff] }
 0x540   :  { %v4382_v1 = vsel %vm4375_vm7, %v4378_v56, %v4381_v58  ;;  %vm4583_vm15 = vcmp.lt.s32.totalorder %v16807_v24, 2  ;;  %vm4584_vm1 = vcmp.eq.s32.totalorder %v16807_v24, 0  ;;  %v15362_v28 = vsel %vm4476_vm14, nan, %v6144_v21  ;;  %v16816_v51 = vld [vmem:[#allocation32_spill] sm:$0xff]  ;;  %v16817_v58 = vld [vmem:[#allocation62_spill] sm:$0xff] }
 0x541   :  { %v15366_v16 = vsel %vm4372_vm4, nan, %v4382_v1  ;;  %v4585_v53 = vxor.u32 2147483648, %v16808_v30  ;;  %vm4587_vm2 = vcmp.eq.s32.totalorder %v16807_v24, 2  ;;  %v11003_v29 = vpack.i.bf16 %v15362_v28, %v15344_v35  ;;  %v16821_v24 = vld [vmem:[#allocation60_spill] sm:$0xff] }
 0x542   :  { %v4588_v10 = vxor.u32 2147483648, %v16809_v62  ;;  %vm4684_vm7 = vweird.f32 %v16810_v33  ;;  %vm4687_vm11 = vcmp.lt.s32.totalorder %v16811_v23, 2  ;;  %vm4688_vm14 = vcmp.eq.s32.totalorder %v16811_v23, 0  ;;  %v16820_v33 = vld [vmem:[#allocation36_spill] sm:$0xff] }
 0x543   :  { %v4689_v11 = vxor.u32 2147483648, %v16812_v9  ;;  %vm4691_vm4 = vcmp.eq.s32.totalorder %v16811_v23, 2  ;;  %v4692_v4 = vxor.u32 2147483648, %v16813_v34  ;;  %vm6240_vm9 = vcmp.lt.s32.totalorder %v16814_v42, 2  ;;  %v16822_v23 = vld [vmem:[#allocation66_spill] sm:$0xff] }
 0x544   :  { %v15379_v0 = vpop.eup %11289  ;;  %vm6241_vm6 = vcmp.eq.s32.totalorder %v16814_v42, 0  ;;  %vm6244_vm12 = vcmp.eq.s32.totalorder %v16814_v42, 2  ;;  %vm6343_vm13 = vcmp.lt.s32.totalorder %v16815_v40, 2  ;;  %vm6344_vm10 = vcmp.eq.s32.totalorder %v16815_v40, 0 }
 0x545   :  { %v15385_v18 = vpop.eup %11291  ;;  %v4690_v60 = vsel %vm4688_vm14, %v16813_v34, %v4689_v11  ;;  %v4693_v57 = vsel %vm4691_vm4, %v4692_v4, %v16812_v9  ;;  %v6243_v12 = vsel %vm6241_vm6, %v16809_v62, %v4585_v53  ;;  %v6246_v52 = vsel %vm6244_vm12, %v4588_v10, %v16808_v30 }
 0x546   :  { %v4694_v5 = vsel %vm4687_vm11, %v4690_v60, %v4693_v57  ;;  %v6247_v59 = vsel %vm6240_vm9, %v6243_v12, %v6246_v52  ;;  %vm6347_vm0 = vcmp.eq.s32.totalorder %v16815_v40, 2  ;;  %v6346_v26 = vsel %vm6344_vm10, %v16813_v34, %v4689_v11  ;;  %v16823_v11 = vld [vmem:[#allocation65_spill] sm:$0xff] }
 0x547   :  { %v15395_v41 = vsel %vm4684_vm7, nan, %v4694_v5  ;;  %v15399_v46 = vsel %vm4580_vm5, nan, %v6247_v59  ;;  %v6349_v13 = vsel %vm6347_vm0, %v4692_v4, %v16812_v9  ;;  %v4586_v14 = vsel %vm4584_vm1, %v16809_v62, %v4585_v53  ;;  %v16819_v62 = vld [vmem:[#allocation69_spill] sm:$0xff]  ;;  %v16825_v4 = vld [vmem:[#allocation59_spill] sm:$0xff] }
 0x548   :  { %v6350_v31 = vsel %vm6343_vm13, %v6346_v26, %v6349_v13  ;;  %v4589_v43 = vsel %vm4587_vm2, %v4588_v10, %v16808_v30  ;;  %vm4788_vm3 = vweird.f32 %v16816_v51  ;;  %vm4791_vm11 = vcmp.lt.s32.totalorder %v16817_v58, 2  ;;  %v16818_v30 = vld [vmem:[#allocation70_spill] sm:$0xff]  ;;  %v16824_v34 = vld [vmem:[#allocation61_spill] sm:$0xff] }
 0x549   :  { %v15412_v48 = vsel %vm4684_vm7, nan, %v6350_v31  ;;  %v4590_v56 = vsel %vm4583_vm15, %v4586_v14, %v4589_v43  ;;  %vm4792_vm14 = vcmp.eq.s32.totalorder %v16817_v58, 0  ;;  %v4793_v53 = vxor.u32 2147483648, %v16818_v30 }
 0x54a   :  { %v11013_v21 = vpack.i.bf16 %v15412_v48, %v15399_v46  ;;  %v15422_v1 = vsel %vm4580_vm5, nan, %v4590_v56  ;;  %vm4795_vm1 = vcmp.eq.s32.totalorder %v16817_v58, 2  ;;  %v4796_v10 = vxor.u32 2147483648, %v16819_v62  ;;  %v16826_v56 = vld [vmem:[#allocation43_spill] sm:$0xff]  ;;  %v16831_v58 = vld [vmem:[#allocation74_spill] sm:$0xff]  ;;  %v16841_v48 = vld [vmem:[#allocation8_spill] sm:$0xff] }
 0x54b   :  { %vm4892_vm2 = vweird.f32 %v16820_v33  ;;  %vm4895_vm15 = vcmp.lt.s32.totalorder %v16821_v24, 2  ;;  %vm4896_vm7 = vcmp.eq.s32.totalorder %v16821_v24, 0  ;;  %v4897_v9 = vxor.u32 2147483648, %v16822_v23 }
 0x54c   :  { %vm4899_vm4 = vcmp.eq.s32.totalorder %v16821_v24, 2  ;;  %v4900_v49 = vxor.u32 2147483648, %v16823_v11  ;;  %vm6446_vm5 = vcmp.lt.s32.totalorder %v16824_v34, 2  ;;  %vm6447_vm9 = vcmp.eq.s32.totalorder %v16824_v34, 0  ;;  %v16827_v24 = vld [vmem:[#allocation72_spill] sm:$0xff] }
 0x54d   :  { %vm6450_vm6 = vcmp.eq.s32.totalorder %v16824_v34, 2  ;;  %vm6549_vm12 = vcmp.lt.s32.totalorder %v16825_v4, 2  ;;  %vm6550_vm13 = vcmp.eq.s32.totalorder %v16825_v4, 0  ;;  %v4898_v42 = vsel %vm4896_vm7, %v16823_v11, %v4897_v9 }
 0x54e   :  { %v4901_v40 = vsel %vm4899_vm4, %v4900_v49, %v16822_v23  ;;  %v6449_v60 = vsel %vm6447_vm9, %v16819_v62, %v4793_v53  ;;  %v6452_v57 = vsel %vm6450_vm6, %v4796_v10, %v16818_v30  ;;  %v6552_v5 = vsel %vm6550_vm13, %v16823_v11, %v4897_v9  ;;  %v16829_v11 = vld [vmem:[#allocation15_spill] sm:$0xff] }
 0x54f   :  { %v4902_v12 = vsel %vm4895_vm15, %v4898_v42, %v4901_v40  ;;  %v6453_v52 = vsel %vm6446_vm5, %v6449_v60, %v6452_v57  ;;  %vm6553_vm10 = vcmp.eq.s32.totalorder %v16825_v4, 2  ;;  %v4794_v31 = vsel %vm4792_vm14, %v16819_v62, %v4793_v53  ;;  %v16832_v4 = vld [vmem:[#allocation73_spill] sm:$0xff]  ;;  %v16833_v40 = vld [vmem:[#allocation71_spill] sm:$0xff]  ;;  %v16834_v57 = vld [vmem:[#allocation68_spill] sm:$0xff] }
 0x550   :  { %v15446_v59 = vsel %vm4892_vm2, nan, %v4902_v12  ;;  %v15450_v26 = vsel %vm4788_vm3, nan, %v6453_v52  ;;  %v6555_v13 = vsel %vm6553_vm10, %v4900_v49, %v16822_v23  ;;  %v4797_v43 = vsel %vm4795_vm1, %v4796_v10, %v16818_v30  ;;  %v16828_v10 = vld [vmem:[#allocation77_spill] sm:$0xff]  ;;  %v16830_v49 = vld [vmem:[#allocation67_spill] sm:$0xff] }
 0x551   :  { %v6556_v14 = vsel %vm6549_vm12, %v6552_v5, %v6555_v13  ;;  %vm4996_vm0 = vweird.f32 %v16826_v56  ;;  %vm4999_vm15 = vcmp.lt.s32.totalorder %v16827_v24, 2  ;;  %v4798_v23 = vsel %vm4791_vm11, %v4794_v31, %v4797_v43 }
 0x552   :  { %v15463_v9 = vsel %vm4892_vm2, nan, %v6556_v14  ;;  %vm5000_vm7 = vcmp.eq.s32.totalorder %v16827_v24, 0  ;;  %v5001_v53 = vxor.u32 2147483648, %v14961_v19  ;;  %v15473_v30 = vsel %vm4788_vm3, nan, %v4798_v23 }
 0x553   :  { %v11023_v62 = vpack.i.bf16 %v15463_v9, %v15450_v26  ;;  %vm5003_vm14 = vcmp.eq.s32.totalorder %v16827_v24, 2  ;;  %v5004_v33 = vxor.u32 2147483648, %v16828_v10  ;;  %vm5100_vm1 = vweird.f32 %v16829_v11  ;;  %v16836_v11 = vld [vmem:[#allocation76_spill] sm:$0xff]  ;;  %v16843_v26 = vld [vmem:[#allocation9_spill] sm:$0xff] }
 0x554   :  { %vm5103_vm2 = vcmp.lt.s32.totalorder %v16830_v49, 2  ;;  %vm5104_vm11 = vcmp.eq.s32.totalorder %v16830_v49, 0  ;;  %v5105_v34 = vxor.u32 2147483648, %v16831_v58  ;;  %vm5107_vm4 = vcmp.eq.s32.totalorder %v16830_v49, 2 }
 0x555   :  { %v5108_v42 = vxor.u32 2147483648, %v16832_v4  ;;  %vm6652_vm5 = vcmp.lt.s32.totalorder %v16833_v40, 2  ;;  %vm6653_vm3 = vcmp.eq.s32.totalorder %v16833_v40, 0  ;;  %vm6656_vm9 = vcmp.eq.s32.totalorder %v16833_v40, 2 }
 0x556   :  { %v5106_v51 = vsel %vm5104_vm11, %v16832_v4, %v5105_v34  ;;  %v6655_v60 = vsel %vm6653_vm3, %v16828_v10, %v5001_v53  ;;  %vm6755_vm6 = vcmp.lt.s32.totalorder %v16834_v57, 2  ;;  %v6658_v52 = vsel %vm6656_vm9, %v5004_v33, %v14961_v19 }
 0x557   :  { %v5109_v12 = vsel %vm5107_vm4, %v5108_v42, %v16831_v58  ;;  %vm6756_vm12 = vcmp.eq.s32.totalorder %v16834_v57, 0  ;;  %vm6759_vm13 = vcmp.eq.s32.totalorder %v16834_v57, 2  ;;  %v6659_v13 = vsel %vm6652_vm5, %v6655_v60, %v6658_v52  ;;  %v16838_v57 = vld [vmem:[#allocation78_spill] sm:$0xff] }
 0x558   :  { %v5110_v5 = vsel %vm5103_vm2, %v5106_v51, %v5109_v12  ;;  %v6758_v31 = vsel %vm6756_vm12, %v16832_v4, %v5105_v34  ;;  %v6761_v14 = vsel %vm6759_vm13, %v5108_v42, %v16831_v58  ;;  %v15501_v23 = vsel %vm4996_vm0, nan, %v6659_v13  ;;  %v16837_v42 = vld [vmem:[#allocation79_spill] sm:$0xff] }
 0x559   :  { %v15497_v43 = vsel %vm5100_vm1, nan, %v5110_v5  ;;  %v6762_v49 = vsel %vm6755_vm6, %v6758_v31, %v6761_v14  ;;  %v5002_v40 = vsel %vm5000_vm7, %v16828_v10, %v5001_v53  ;;  %v5005_v58 = vsel %vm5003_vm14, %v5004_v33, %v14961_v19  ;;  %v16835_v33 = vld [vmem:[#allocation42_spill] sm:$0xff]  ;;  %v16839_v5 = vld [vmem:[#allocation75_spill] sm:$0xff] }
 0x55a   :  { %v15508_v51 = vsel %vm5100_vm1, nan, %v6762_v49  ;;  %vm5204_vm10 = vweird.f32 %v14185_v39  ;;  %vm5207_vm2 = vcmp.lt.s32.totalorder %v14988_v8, 2  ;;  %v5006_v4 = vsel %vm4999_vm15, %v5002_v40, %v5005_v58 }
 0x55b   :  { %v11033_v34 = vpack.i.bf16 %v15508_v51, %v15501_v23  ;;  %vm5208_vm7 = vcmp.eq.s32.totalorder %v14988_v8, 0  ;;  %v5209_v53 = vxor.u32 2147483648, %v15174_v7  ;;  %v15523_v10 = vsel %vm4996_vm0, nan, %v5006_v4 }
 0x55c   :  { %vm5211_vm14 = vcmp.eq.s32.totalorder %v14988_v8, 2  ;;  %v5212_v19 = vxor.u32 2147483648, %v15166_v45  ;;  %vm5308_vm1 = vweird.f32 %v16835_v33  ;;  %vm5311_vm11 = vcmp.lt.s32.totalorder %v16836_v11, 2 }
 0x55d   :  { %vm5312_vm4 = vcmp.eq.s32.totalorder %v16836_v11, 0  ;;  %v5313_v24 = vxor.u32 2147483648, %v15069_v32  ;;  %vm5315_vm15 = vcmp.eq.s32.totalorder %v16836_v11, 2  ;;  %v5316_v60 = vxor.u32 2147483648, %v16837_v42 }
 0x55e   :  { %vm6858_vm5 = vcmp.lt.s32.totalorder %v16838_v57, 2  ;;  %vm6859_vm0 = vcmp.eq.s32.totalorder %v16838_v57, 0  ;;  %vm6862_vm3 = vcmp.eq.s32.totalorder %v16838_v57, 2  ;;  %vm6961_vm9 = vcmp.lt.s32.totalorder %v16839_v5, 2 }
 0x55f   :  { %v5314_v56 = vsel %vm5312_vm4, %v16837_v42, %v5313_v24  ;;  %v6861_v12 = vsel %vm6859_vm0, %v15166_v45, %v5209_v53  ;;  %v6864_v52 = vsel %vm6862_vm3, %v5212_v19, %v15174_v7  ;;  %v5317_v13 = vsel %vm5315_vm15, %v5316_v60, %v15069_v32 }
 0x560   :  { %v6865_v31 = vsel %vm6858_vm5, %v6861_v12, %v6864_v52  ;;  %vm6962_vm6 = vcmp.eq.s32.totalorder %v16839_v5, 0  ;;  %vm6965_vm12 = vcmp.eq.s32.totalorder %v16839_v5, 2  ;;  %v5318_v14 = vsel %vm5311_vm11, %v5314_v56, %v5317_v13 }
 0x561   :  { %v15547_v49 = vsel %vm5204_vm10, nan, %v6865_v31  ;;  %v6964_v40 = vsel %vm6962_vm6, %v16837_v42, %v5313_v24  ;;  %v6967_v58 = vsel %vm6965_vm12, %v5316_v60, %v15069_v32  ;;  %v15553_v4 = vsel %vm5308_vm1, nan, %v5318_v14 }
 0x562   :  { %v6968_v57 = vsel %vm6961_vm9, %v6964_v40, %v6967_v58  ;;  %v5210_v12 = vsel %vm5208_vm7, %v15166_v45, %v5209_v53  ;;  %v5213_v11 = vsel %vm5211_vm14, %v5212_v19, %v15174_v7  ;;  %vm5412_vm13 = vweird.f32 %v14316_v38  ;;  %v11092_v38 = vld [vmem:[%s16282_s11 + $0x8] sm:$0xff]  }
 0x563   :  { %v15563_v56 = vsel %vm5308_vm1, nan, %v6968_v57  ;;  %v5214_v32 = vsel %vm5207_vm2, %v5210_v12, %v5213_v11  ;;  %vm5415_vm11 = vcmp.lt.s32.totalorder %v15198_v15, 2  ;;  %vm5416_vm7 = vcmp.eq.s32.totalorder %v15198_v15, 0  ;;  %v11094_v12 = vld [vmem:[%s16282_s11 + $0x18] sm:$0xff]   ;;  %v11095_v11 = vld [vmem:[%s16282_s11 + $0x20] sm:$0xff]  }
 0x564   :  { %v11043_v24 = vpack.i.bf16 %v15563_v56, %v15547_v49  ;;  %v15573_v45 = vsel %vm5204_vm10, nan, %v5214_v32  ;;  %v5417_v7 = vxor.u32 2147483648, %v15385_v18  ;;  %vm5419_vm14 = vcmp.eq.s32.totalorder %v15198_v15, 2  ;;  %v11091_v15 = vld [vmem:[%s16282_s11] sm:$0xff]   ;;  %v11096_v32 = vld [vmem:[%s16282_s11 + $0x28] sm:$0xff]  }
 0x565   :  { %v5420_v8 = vxor.u32 2147483648, %v15379_v0  ;;  %vm5516_vm2 = vweird.f32 %v14238_v47  ;;  %vm5519_vm1 = vcmp.lt.s32.totalorder %v15121_v37, 2  ;;  %vm5520_vm4 = vcmp.eq.s32.totalorder %v15121_v37, 0  ;;  %v11090_v47 = vld [vmem:[%s16750_s29 + $0x38] sm:$0xff]   ;;  %10638 = vmatprep.subr.bf16.mxu0 %v11091_v15 }
 0x566   :  { %v5521_v53 = vxor.u32 2147483648, %v15269_v6  ;;  %vm5523_vm15 = vcmp.eq.s32.totalorder %v15121_v37, 2  ;;  %v5524_v39 = vxor.u32 2147483648, %v15265_v2  ;;  %vm7064_vm10 = vcmp.lt.s32.totalorder %v15190_v61, 2  ;;  %10639 = vmatpush3.bf16.msra.mxu0 %v11091_v15 }
 0x567   :  { %vm7065_vm5 = vcmp.eq.s32.totalorder %v15190_v61, 0  ;;  %vm7068_vm0 = vcmp.eq.s32.totalorder %v15190_v61, 2  ;;  %vm7167_vm3 = vcmp.lt.s32.totalorder %v15117_v50, 2  ;;  %vm7168_vm9 = vcmp.eq.s32.totalorder %v15117_v50, 0  ;;  %10640 = vmatprep.subr.bf16.mxu0 %v11092_v38 }
 0x568   :  { %v5522_v19 = vsel %vm5520_vm4, %v15265_v2, %v5521_v53  ;;  %v5525_v33 = vsel %vm5523_vm15, %v5524_v39, %v15269_v6  ;;  %v7067_v42 = vsel %vm7065_vm5, %v15379_v0, %v5417_v7  ;;  %v7070_v60 = vsel %vm7068_vm0, %v5420_v8, %v15385_v18 }
 0x569   :  { %v5526_v52 = vsel %vm5519_vm1, %v5522_v19, %v5525_v33  ;;  %v7071_v37 = vsel %vm7064_vm10, %v7067_v42, %v7070_v60  ;;  %vm7171_vm6 = vcmp.eq.s32.totalorder %v15117_v50, 2  ;;  %v7170_v13 = vsel %vm7168_vm9, %v15265_v2, %v5521_v53 }
 0x56a   :  { %v15597_v5 = vsel %vm5516_vm2, nan, %v5526_v52  ;;  %v15601_v61 = vsel %vm5412_vm13, nan, %v7071_v37  ;;  %v7173_v31 = vsel %vm7171_vm6, %v5524_v39, %v15269_v6  ;;  %v5418_v40 = vsel %vm5416_vm7, %v15379_v0, %v5417_v7  ;;  %v11089_v0 = vld [vmem:[%s16750_s29 + $0x30] sm:$0xff]   ;;  %10641 = vmatpush3.bf16.msra.mxu0 %v11092_v38  ;;  %v10182_v7 = vld [vmem:[%s16840_s6] ss:$0 sm:$0xff] }
 0x56b   :  { %v7174_v14 = vsel %vm7167_vm3, %v7170_v13, %v7173_v31  ;;  %v5421_v50 = vsel %vm5419_vm14, %v5420_v8, %v15385_v18  ;;  %10618 = vmatprep.subr.bf16.mxu1 %v11089_v0  ;;  %v11093_v18 = vld [vmem:[%s16282_s11 + $0x10] sm:$0xff]  }
 0x56c   :  { %v15613_v58 = vsel %vm5516_vm2, nan, %v7174_v14  ;;  %v5422_v57 = vsel %vm5415_vm11, %v5418_v40, %v5421_v50  ;;  %10619 = vmatpush3.bf16.msra.mxu1 %v11089_v0  ;;  %10642 = vmatprep.subr.bf16.mxu0 %v11093_v18 }
 0x56d   :  { %v11053_v2 = vpack.i.bf16 %v15613_v58, %v15601_v61  ;;  %v15621_v6 = vsel %vm5412_vm13, nan, %v5422_v57  ;;  %10620 = vmatprep.subr.bf16.mxu1 %v11090_v47  ;;  %v16849_v58 = vld [vmem:[#allocation11_spill] sm:$0xff] }
 0x56e   :  { %10643 = vmatpush3.bf16.msra.mxu0 %v11093_v18 }
 0x56f   :  { %10644 = vmatprep.subr.bf16.mxu0 %v11094_v12 }
 0x570   :  { %10621 = vmatpush3.bf16.msra.mxu1 %v11090_v47 }
 0x572   :  { %10645 = vmatpush3.bf16.msra.mxu0 %v11094_v12 }
 0x573   :  { %10646 = vmatprep.subr.bf16.mxu0 %v11095_v11 }
 0x576   :  { %10647 = vmatpush3.bf16.msra.mxu0 %v11095_v11 }
 0x577   :  { %10648 = vmatprep.subr.bf16.mxu0 %v11096_v32 }
 0x57a   :  { %10649 = vmatpush3.bf16.msra.mxu0 %v11096_v32 }
 0x5e9   :  { %v10592_v8 = vpop.f32.mrb[32].mxu0 }
 0x5ea   :  { %v7759_v53 = vadd.f32 %v10592_v8, %v10182_v7  ;;  %v7750_v39 = vpop.f32.mrb[33].mxu0 }
 0x5eb   :  { %v7751_v19 = vadd.f32 %v10182_v7, %v7750_v39  ;;  %v10593_v33 = vpop.f32.mrb[34].mxu0 }
 0x5ec   :  { %v7762_v42 = vadd.f32 %v10593_v33, %v10182_v7  ;;  %v7753_v60 = vpop.f32.mrb[35].mxu0  ;;  %v7815_v37 = vmax.f32 %v7759_v53, 0.0 }
 0x5ed   :  { %v7754_v52 = vadd.f32 %v10182_v7, %v7753_v60  ;;  %v7813_v31 = vmax.f32 %v7751_v19, 0.0 }
 0x5ee   :  { %v7816_v13 = vmax.f32 %v7762_v42, 0.0 }
 0x5ef   :  { %v7814_v14 = vmax.f32 %v7754_v52, 0.0 }
 0x5f0   :  { %v7830_v40 = vpack.c.bf16 %v7816_v13, %v7815_v37 }
 0x5f1   :  { %v7829_v50 = vpack.c.bf16 %v7814_v14, %v7813_v31  ;;  %v10596_v57 = vpop.f32.mrb[36].mxu0 }
 0x5f2   :  { %v7775_v0 = vadd.f32 %v10596_v57, %v10182_v7  ;;  %v7766_v47 = vpop.f32.mrb[37].mxu0 }
 0x5f3   :  { %v7767_v15 = vadd.f32 %v10182_v7, %v7766_v47  ;;  %v10597_v38 = vpop.f32.mrb[38].mxu0  ;;  %10622 = vmatprep.mubr.bf16.mxu1 %v7829_v50 }
 0x5f4   :  { %v7778_v18 = vadd.f32 %v10597_v38, %v10182_v7  ;;  %v7769_v12 = vpop.f32.mrb[39].mxu0  ;;  %10623 = vmatmul.mubr.bf16.vlgmr.msra.gmra.mrb[32].mxu1 %v7830_v40  ;;  %v7819_v32 = vmax.f32 %v7775_v0, 0.0 }
 0x5f5   :  { %v7770_v11 = vadd.f32 %v10182_v7, %v7769_v12  ;;  %v7817_v39 = vmax.f32 %v7767_v15, 0.0 }
 0x5f6   :  { %v7820_v8 = vmax.f32 %v7778_v18, 0.0 }
 0x5f7   :  { %v7818_v33 = vmax.f32 %v7770_v11, 0.0 }
 0x5f8   :  { %v7832_v53 = vpack.c.bf16 %v7820_v8, %v7819_v32 }
 0x5f9   :  { %v7831_v42 = vpack.c.bf16 %v7818_v33, %v7817_v39  ;;  %v10600_v19 = vpop.f32.mrb[40].mxu0 }
 0x5fa   :  { %v7791_v60 = vadd.f32 %v10600_v19, %v10182_v7  ;;  %v7782_v52 = vpop.f32.mrb[41].mxu0 }
 0x5fb   :  { %v7783_v37 = vadd.f32 %v10182_v7, %v7782_v52  ;;  %v10601_v13 = vpop.f32.mrb[42].mxu0  ;;  %10626 = vmatprep.mubr.bf16.mxu1 %v7831_v42 }
 0x5fc   :  { %v7794_v31 = vadd.f32 %v10601_v13, %v10182_v7  ;;  %v7785_v14 = vpop.f32.mrb[43].mxu0  ;;  %10627 = vmatmul.mubr.bf16.gmra.mrb[36].mxu1 %v7832_v53  ;;  %v7823_v57 = vmax.f32 %v7791_v60, 0.0 }
 0x5fd   :  { %v7786_v50 = vadd.f32 %v10182_v7, %v7785_v14  ;;  %v7821_v40 = vmax.f32 %v7783_v37, 0.0  ;;  %v11097_v37 = vld [vmem:[%s16282_s11 + $0x30] sm:$0xff]   ;;  %v11098_v14 = vld [vmem:[%s16282_s11 + $0x38] sm:$0xff]  }
 0x5fe   :  { %v7824_v47 = vmax.f32 %v7794_v31, 0.0  ;;  %10650 = vmatprep.subr.bf16.mxu0 %v11097_v37 }
 0x5ff   :  { %v7822_v38 = vmax.f32 %v7786_v50, 0.0  ;;  %10651 = vmatpush3.bf16.msra.mxu0 %v11097_v37 }
 0x600   :  { %v7834_v0 = vpack.c.bf16 %v7824_v47, %v7823_v57  ;;  %10652 = vmatprep.subr.bf16.mxu0 %v11098_v14 }
 0x601   :  { %v7833_v18 = vpack.c.bf16 %v7822_v38, %v7821_v40  ;;  %v10604_v15 = vpop.f32.mrb[44].mxu0 }
 0x602   :  { %v7807_v12 = vadd.f32 %v10604_v15, %v10182_v7  ;;  %v7798_v11 = vpop.f32.mrb[45].mxu0 }
 0x603   :  { %v7799_v32 = vadd.f32 %v10182_v7, %v7798_v11  ;;  %v10605_v8 = vpop.f32.mrb[46].mxu0  ;;  %10630 = vmatprep.mubr.bf16.mxu1 %v7833_v18  ;;  %10653 = vmatpush3.bf16.msra.mxu0 %v11098_v14 }
 0x604   :  { %v7810_v39 = vadd.f32 %v10605_v8, %v10182_v7  ;;  %v7801_v33 = vpop.f32.mrb[47].mxu0  ;;  %10631 = vmatmul.mubr.bf16.gmra.mrb[40].mxu1 %v7834_v0  ;;  %v7827_v19 = vmax.f32 %v7807_v12, 0.0  ;;  %10670 = vmatprep.subr.bf16.mxu0 %v11111_v25 }
 0x605   :  { %v7802_v42 = vadd.f32 %v10182_v7, %v7801_v33  ;;  %v7825_v53 = vmax.f32 %v7799_v32, 0.0  ;;  %v10191_v7 = vld [vmem:[%s16281_s10] ss:$0 sm:$0xff] }
 0x606   :  { %v7828_v52 = vmax.f32 %v7810_v39, 0.0 }
 0x607   :  { %v7826_v13 = vmax.f32 %v7802_v42, 0.0 }
 0x608   :  { %v7836_v60 = vpack.c.bf16 %v7828_v52, %v7827_v19 }
 0x609   :  { %v7835_v31 = vpack.c.bf16 %v7826_v13, %v7825_v53 }
 0x60b   :  { %10634 = vmatprep.mubr.bf16.mxu1 %v7835_v31 }
 0x60c   :  { %10635 = vmatmul.mubr.bf16.gmra.mrb[44].mxu1 %v7836_v60 }
 0x6c7   :  { %v10624_v50 = vpop.f32.mrb[32].mxu1 }
 0x6c8   :  { %v7951_v57 = vadd.f32 %v10624_v50, %v10191_v7  ;;  %v7942_v47 = vpop.f32.mrb[33].mxu1 }
 0x6c9   :  { %v7943_v40 = vadd.f32 %v10191_v7, %v7942_v47  ;;  %v10625_v38 = vpop.f32.mrb[34].mxu1 }
 0x6ca   :  { %v7954_v0 = vadd.f32 %v10625_v38, %v10191_v7  ;;  %v7945_v18 = vpop.f32.mrb[35].mxu1  ;;  %v8007_v12 = vmax.f32 %v7951_v57, 0.0 }
 0x6cb   :  { %v7946_v15 = vadd.f32 %v10191_v7, %v7945_v18  ;;  %v8005_v32 = vmax.f32 %v7943_v40, 0.0 }
 0x6cc   :  { %v8008_v11 = vmax.f32 %v7954_v0, 0.0 }
 0x6cd   :  { %v8006_v8 = vmax.f32 %v7946_v15, 0.0 }
 0x6ce   :  { %v8022_v39 = vpack.c.bf16 %v8008_v11, %v8007_v12 }
 0x6cf   :  { %v8021_v33 = vpack.c.bf16 %v8006_v8, %v8005_v32  ;;  %v10628_v42 = vpop.f32.mrb[36].mxu1 }
 0x6d0   :  { %v7967_v19 = vadd.f32 %v10628_v42, %v10191_v7  ;;  %v7958_v52 = vpop.f32.mrb[37].mxu1 }
 0x6d1   :  { %v7959_v53 = vadd.f32 %v10191_v7, %v7958_v52  ;;  %v10629_v13 = vpop.f32.mrb[38].mxu1  ;;  %10654 = vmatprep.mubr.bf16.mxu0 %v8021_v33 }
 0x6d2   :  { %v7970_v60 = vadd.f32 %v10629_v13, %v10191_v7  ;;  %v7961_v31 = vpop.f32.mrb[39].mxu1  ;;  %10655 = vmatmul.mubr.bf16.vlgmr.msra.gmra.mrb[48].mxu0 %v8022_v39  ;;  %v8011_v14 = vmax.f32 %v7967_v19, 0.0 }
 0x6d3   :  { %v7962_v37 = vadd.f32 %v10191_v7, %v7961_v31  ;;  %v8009_v47 = vmax.f32 %v7959_v53, 0.0  ;;  %10671 = vmatpush3.bf16.msra.mxu0 %v11111_v25  ;;  %v16862_v25 = vld [vmem:[#allocation21_spill] sm:$0xff] }
 0x6d4   :  { %v8012_v50 = vmax.f32 %v7970_v60, 0.0  ;;  %10672 = vmatprep.subr.bf16.mxu0 %v11112_v27 }
 0x6d5   :  { %v8010_v38 = vmax.f32 %v7962_v37, 0.0 }
 0x6d6   :  { %v8024_v57 = vpack.c.bf16 %v8012_v50, %v8011_v14 }
 0x6d7   :  { %v8023_v0 = vpack.c.bf16 %v8010_v38, %v8009_v47  ;;  %v10632_v40 = vpop.f32.mrb[40].mxu1  ;;  %10673 = vmatpush3.bf16.msra.mxu0 %v11112_v27 }
 0x6d8   :  { %v7983_v18 = vadd.f32 %v10632_v40, %v10191_v7  ;;  %v7974_v15 = vpop.f32.mrb[41].mxu1 }
 0x6d9   :  { %v7975_v12 = vadd.f32 %v10191_v7, %v7974_v15  ;;  %v10633_v11 = vpop.f32.mrb[42].mxu1  ;;  %10658 = vmatprep.mubr.bf16.mxu0 %v8023_v0 }
 0x6da   :  { %v7986_v32 = vadd.f32 %v10633_v11, %v10191_v7  ;;  %v7977_v8 = vpop.f32.mrb[43].mxu1  ;;  %10659 = vmatmul.mubr.bf16.gmra.mrb[52].mxu0 %v8024_v57  ;;  %v8015_v42 = vmax.f32 %v7983_v18, 0.0 }
 0x6db   :  { %v7978_v33 = vadd.f32 %v10191_v7, %v7977_v8  ;;  %v8013_v39 = vmax.f32 %v7975_v12, 0.0  ;;  %v11099_v12 = vld [vmem:[%s16284_s13] sm:$0xff]   ;;  %v11431_v8 = vmov 0  }
 0x6dc   :  { %v8016_v52 = vmax.f32 %v7986_v32, 0.0  ;;  %8438 = vmatprep.subr.bf16.mxu1 %v11431_v8 }
 0x6dd   :  { %v8014_v13 = vmax.f32 %v7978_v33, 0.0  ;;  %8439 = vmatpush1.bf16.msra.mxu1 %v11099_v12  ;;  %v11101_v33 = vld [vmem:[%s16284_s13 + $0x10] sm:$0xff]  }
 0x6de   :  { %v8026_v19 = vpack.c.bf16 %v8016_v52, %v8015_v42  ;;  %8440 = vmatprep.subr.bf16.mxu1 %v11431_v8  ;;  %v11102_v42 = vld [vmem:[%s16284_s13 + $0x18] sm:$0xff]   ;;  %v11103_v52 = vld [vmem:[%s16284_s13 + $0x20] sm:$0xff]  }
 0x6df   :  { %v8025_v60 = vpack.c.bf16 %v8014_v13, %v8013_v39  ;;  %v10636_v53 = vpop.f32.mrb[44].mxu1  ;;  %v11104_v39 = vld [vmem:[%s16284_s13 + $0x28] sm:$0xff]   ;;  %v11105_v13 = vld [vmem:[%s16284_s13 + $0x30] sm:$0xff]  }
 0x6e0   :  { %v7999_v31 = vadd.f32 %v10636_v53, %v10191_v7  ;;  %v7990_v37 = vpop.f32.mrb[45].mxu1  ;;  %v11108_v53 = vld [vmem:[%s16284_s13 + $0x48] sm:$0xff]  }
 0x6e1   :  { %v7991_v14 = vadd.f32 %v10191_v7, %v7990_v37  ;;  %v10637_v50 = vpop.f32.mrb[46].mxu1  ;;  %10662 = vmatprep.mubr.bf16.mxu0 %v8025_v60  ;;  %v11107_v60 = vld [vmem:[%s16284_s13 + $0x40] sm:$0xff]  }
 0x6e2   :  { %v8002_v47 = vadd.f32 %v10637_v50, %v10191_v7  ;;  %v7993_v38 = vpop.f32.mrb[47].mxu1  ;;  %10663 = vmatmul.mubr.bf16.gmra.mrb[56].mxu0 %v8026_v19  ;;  %v8019_v40 = vmax.f32 %v7999_v31, 0.0  ;;  %v11106_v19 = vld [vmem:[%s16284_s13 + $0x38] sm:$0xff]   ;;  %v11109_v31 = vld [vmem:[%s16284_s13 + $0x50] sm:$0xff]   ;;  %v10200_v37 = vld [vmem:[%s16283_s12] ss:$0 sm:$0xff] }
 0x6e3   :  { %v7994_v0 = vadd.f32 %v10191_v7, %v7993_v38  ;;  %v8017_v57 = vmax.f32 %v7991_v14, 0.0  ;;  %v11100_v7 = vld [vmem:[%s16284_s13 + $0x8] sm:$0xff]   ;;  %v11110_v50 = vld [vmem:[%s16284_s13 + $0x58] sm:$0x3f]   ;;  %s11432_s12 = smov 60   ;;  %s11433_s13 = smov 12  }
 0x6e4   :  { %v8020_v15 = vmax.f32 %v8002_v47, 0.0  ;;  %8441 = vmatpush1.bf16.msra.mxu1 %v11100_v7 }
 0x6e5   :  { %v8018_v11 = vmax.f32 %v7994_v0, 0.0  ;;  %8442 = vmatprep.subr.bf16.mxu1 %v11431_v8 }
 0x6e6   :  { %v8028_v18 = vpack.c.bf16 %v8020_v15, %v8019_v40  ;;  %v8436_v15 = vsel %vm7328_vm8, %v11110_v50, 0  ;;  %vm16842_vm8 = vcmask 490496  }
 0x6e7   :  { %v8027_v32 = vpack.c.bf16 %v8018_v11, %v8017_v57  ;;  %vm16844_vm12 = vmmov %vm16842_vm8 }
 0x6e8   :  { %8443 = vmatpush1.bf16.msra.mxu1 %v11101_v33  ;;  %vm16845_vm13 = vmmov %vm16842_vm8 }
 0x6e9   :  { %10666 = vmatprep.mubr.bf16.mxu0 %v8027_v32  ;;  %8444 = vmatprep.subr.bf16.mxu1 %v11431_v8  ;;  %vm16846_vm11 = vmmov %vm16842_vm8 }
 0x6ea   :  { %10667 = vmatmul.mubr.bf16.gmra.mrb[60].mxu0 %v8028_v18  ;;  %vm16848_vm7 = vmmov %vm16842_vm8 }
 0x6eb   :  { %vm16850_vm14 = vmmov %vm16848_vm7 }
 0x6ec   :  { %8445 = vmatpush1.bf16.msra.mxu1 %v11102_v42  ;;  %vm16851_vm2 = vmmov %vm16848_vm7 }
 0x6ed   :  { %8446 = vmatprep.subr.bf16.mxu1 %v11431_v8  ;;  %vm16853_vm1 = vmmov %vm16851_vm2 }
 0x6ee   :  { %vm16855_vm4 = vmmov %vm16853_vm1 }
 0x6ef   :  { %vm16856_vm15 = vmmov %vm16853_vm1 }
 0x6f0   :  { %8447 = vmatpush1.bf16.msra.mxu1 %v11103_v52  ;;  %vm16858_vm10 = vmmov %vm16853_vm1 }
 0x6f1   :  { %8448 = vmatprep.subr.bf16.mxu1 %v11431_v8  ;;  %vm16860_vm5 = vmmov %vm16853_vm1 }
 0x6f2   :  { %vm16861_vm0 = vmmov %vm16853_vm1 }
 0x6f3   :  { %vm16863_vm3 = vmmov %vm16861_vm0 }
 0x6f4   :  { %8449 = vmatpush1.bf16.msra.mxu1 %v11104_v39  ;;  %vm16865_vm9 = vmmov %vm16861_vm0 }
 0x6f5   :  { %8450 = vmatprep.subr.bf16.mxu1 %v11431_v8  ;;  %vm16866_vm6 = vmmov %vm16861_vm0 }
 0x6f8   :  { %8451 = vmatpush1.bf16.msra.mxu1 %v11105_v13 }
 0x6f9   :  { %8452 = vmatprep.subr.bf16.mxu1 %v11431_v8 }
 0x6fc   :  { %8453 = vmatpush1.bf16.msra.mxu1 %v11106_v19 }
 0x6fd   :  { %8454 = vmatprep.subr.bf16.mxu1 %v11431_v8 }
 0x700   :  { %8455 = vmatpush1.bf16.msra.mxu1 %v11107_v60 }
 0x701   :  { %8456 = vmatprep.subr.bf16.mxu1 %v11431_v8 }
 0x704   :  { %8457 = vmatpush1.bf16.msra.mxu1 %v11108_v53 }
 0x705   :  { %8458 = vmatprep.subr.bf16.mxu1 %v11431_v8 }
 0x708   :  { %8459 = vmatpush1.bf16.msra.mxu1 %v11109_v31 }
 0x709   :  { %8460 = vmatprep.subr.bf16.mxu1 %v11431_v8 }
 0x70c   :  { %8461 = vmatpush1.bf16.msra.mxu1 %v8436_v15 }
 0x7a5   :  { %v10656_v14 = vpop.f32.mrb[48].mxu0 }
 0x7a6   :  { %v8143_v47 = vadd.f32 %v10656_v14, %v10200_v37  ;;  %v8134_v38 = vpop.f32.mrb[49].mxu0 }
 0x7a7   :  { %v8135_v0 = vadd.f32 %v10200_v37, %v8134_v38  ;;  %v10657_v40 = vpop.f32.mrb[50].mxu0 }
 0x7a8   :  { %v8146_v57 = vadd.f32 %v10657_v40, %v10200_v37  ;;  %v8137_v11 = vpop.f32.mrb[51].mxu0  ;;  %v8199_v32 = vmax.f32 %v8143_v47, 0.0 }
 0x7a9   :  { %v8138_v18 = vadd.f32 %v10200_v37, %v8137_v11  ;;  %v8197_v7 = vmax.f32 %v8135_v0, 0.0 }
 0x7aa   :  { %v8200_v12 = vmax.f32 %v8146_v57, 0.0 }
 0x7ab   :  { %v8198_v33 = vmax.f32 %v8138_v18, 0.0 }
 0x7ac   :  { %v10948_v42 = vpack.i.bf16 %v8200_v12, %v8199_v32 }
 0x7ad   :  { %v10943_v52 = vpack.i.bf16 %v8198_v33, %v8197_v7  ;;  %v10660_v39 = vpop.f32.mrb[52].mxu0 }
 0x7ae   :  { %v8159_v13 = vadd.f32 %v10660_v39, %v10200_v37  ;;  %10949 = vrot.lane.b32.xlu1 %v10948_v42, %s11432_s12  ;;  %v8150_v19 = vpop.f32.mrb[53].mxu0 }
 0x7af   :  { %v8151_v60 = vadd.f32 %v10200_v37, %v8150_v19  ;;  %v10661_v53 = vpop.f32.mrb[54].mxu0  ;;  %10944 = vrot.lane.b32.xlu0 %v10943_v52, %s11432_s12 }
 0x7b0   :  { %v8162_v31 = vadd.f32 %v10661_v53, %v10200_v37  ;;  %v8153_v14 = vpop.f32.mrb[55].mxu0  ;;  %v8203_v38 = vmax.f32 %v8159_v13, 0.0 }
 0x7b1   :  { %v8154_v50 = vadd.f32 %v10200_v37, %v8153_v14  ;;  %v8201_v40 = vmax.f32 %v8151_v60, 0.0 }
 0x7b2   :  { %v8204_v47 = vmax.f32 %v8162_v31, 0.0 }
 0x7b3   :  { %v8202_v0 = vmax.f32 %v8154_v50, 0.0 }
 0x7b4   :  { %v10958_v15 = vpack.i.bf16 %v8204_v47, %v8203_v38 }
 0x7b5   :  { %v10953_v57 = vpack.i.bf16 %v8202_v0, %v8201_v40  ;;  %v10664_v11 = vpop.f32.mrb[56].mxu0 }
 0x7b6   :  { %v8175_v18 = vadd.f32 %v10664_v11, %v10200_v37  ;;  %10959 = vrot.lane.b32.xlu1 %v10958_v15, %s11432_s12  ;;  %v8166_v32 = vpop.f32.mrb[57].mxu0 }
 0x7b7   :  { %v8167_v12 = vadd.f32 %v10200_v37, %v8166_v32  ;;  %v10665_v7 = vpop.f32.mrb[58].mxu0  ;;  %10954 = vrot.lane.b32.xlu0 %v10953_v57, %s11432_s12 }
 0x7b8   :  { %v8178_v33 = vadd.f32 %v10665_v7, %v10200_v37  ;;  %v8169_v42 = vpop.f32.mrb[59].mxu0  ;;  %v8207_v39 = vmax.f32 %v8175_v18, 0.0 }
 0x7b9   :  { %v8170_v52 = vadd.f32 %v10200_v37, %v8169_v42  ;;  %v8205_v13 = vmax.f32 %v8167_v12, 0.0 }
 0x7ba   :  { %v8208_v19 = vmax.f32 %v8178_v33, 0.0 }
 0x7bb   :  { %v8206_v53 = vmax.f32 %v8170_v52, 0.0 }
 0x7bc   :  { %v10968_v60 = vpack.i.bf16 %v8208_v19, %v8207_v39 }
 0x7bd   :  { %v10963_v31 = vpack.i.bf16 %v8206_v53, %v8205_v13  ;;  %v10668_v14 = vpop.f32.mrb[60].mxu0  ;;  %v16852_v13 = vld [vmem:[#allocation30_spill] sm:$0xff] }
 0x7be   :  { %v8191_v50 = vadd.f32 %v10668_v14, %v10200_v37  ;;  %10969 = vrot.lane.b32.xlu1 %v10968_v60, %s11432_s12  ;;  %v8182_v38 = vpop.f32.mrb[61].mxu0  ;;  %v16854_v60 = vld [vmem:[#allocation31_spill] sm:$0xff] }
 0x7bf   :  { %v8183_v47 = vadd.f32 %v10200_v37, %v8182_v38  ;;  %10964 = vrot.lane.b32.xlu0 %v10963_v31, %s11432_s12  ;;  %v10669_v40 = vpop.f32.mrb[62].mxu0 }
 0x7c0   :  { %v8194_v0 = vadd.f32 %v10669_v40, %v10200_v37  ;;  %v8185_v15 = vpop.f32.mrb[63].mxu0  ;;  %v8211_v11 = vmax.f32 %v8191_v50, 0.0 }
 0x7c1   :  { %v8186_v57 = vadd.f32 %v10200_v37, %v8185_v15  ;;  %v8209_v18 = vmax.f32 %v8183_v47, 0.0 }
 0x7c2   :  { %v8212_v32 = vmax.f32 %v8194_v0, 0.0  ;;  %v16857_v0 = vld [vmem:[#allocation19_spill] sm:$0xff] }
 0x7c3   :  { %v8210_v7 = vmax.f32 %v8186_v57, 0.0  ;;  %v16859_v57 = vld [vmem:[#allocation10_spill] sm:$0xff] }
 0x7c4   :  { %v10978_v12 = vpack.i.bf16 %v8212_v32, %v8211_v11 }
 0x7c5   :  { %v10973_v33 = vpack.i.bf16 %v8210_v7, %v8209_v18 }
 0x7c6   :  { %10979 = vrot.lane.b32.xlu1 %v10978_v12, %s11432_s12 }
 0x7c7   :  { %10974 = vrot.lane.b32.xlu0 %v10973_v33, %s11432_s12 }
 0x7cb   :  { %10984 = vrot.lane.b32.xlu0 %v10983_v20, %s11433_s13  ;;  %v11113_v20 = vld [vmem:[%s16286_s15 + $0x10] sm:$0xff]  }
 0x7cc   :  { %10674 = vmatprep.subr.bf16.mxu0 %v11113_v20 }
 0x7cd   :  { %10675 = vmatpush3.bf16.msra.mxu0 %v11113_v20  ;;  %v16864_v20 = vld [vmem:[#allocation22_spill] sm:$0xff] }
 0x7ce   :  { %10676 = vmatprep.subr.bf16.mxu0 %v11114_v3 }
 0x7cf   :  { %10994 = vrot.lane.b32.xlu0 %v10993_v55, %s11433_s13 }
 0x7d1   :  { %10677 = vmatpush3.bf16.msra.mxu0 %v11114_v3 }
 0x7d3   :  { %11004 = vrot.lane.b32.xlu0 %v11003_v29, %s11433_s13 }
 0x7d7   :  { %11014 = vrot.lane.b32.xlu0 %v11013_v21, %s11433_s13 }
 0x7db   :  { %11024 = vrot.lane.b32.xlu0 %v11023_v62, %s11433_s13 }
 0x7df   :  { %11034 = vrot.lane.b32.xlu0 %v11033_v34, %s11433_s13 }
 0x7e3   :  { %11044 = vrot.lane.b32.xlu0 %v11043_v24, %s11433_s13  ;;  %v16847_v24 = vld [vmem:[#allocation25_spill] sm:$0xff] }
 0x7e7   :  { %11054 = vrot.lane.b32.xlu0 %v11053_v2, %s11433_s13 }
 0x820   :  { %v10950_v63 = vpop.permute.xlu1 %10949 }
 0x821   :  { %v10945_v55 = vpop.permute.xlu0 %10944  ;;  %v10952_v35 = vunpack.i.h.bf16 %v10950_v63  ;;  %v10951_v28 = vunpack.i.l.bf16 %v10950_v63 }
 0x822   :  { %v10947_v29 = vunpack.i.h.bf16 %v10945_v55  ;;  %v10946_v46 = vunpack.i.l.bf16 %v10945_v55 }
 0x823   :  { %v8296_v51 = vpack.c.bf16 %v10952_v35, %v10951_v28  ;;  %v8279_v61 = vsel %vm16848_vm7, %v16847_v24, %v10951_v28  ;;  %v8280_v2 = vsel %vm16850_vm14, %v16849_v58, %v10952_v35  ;;  %v16874_v24 = vld [vmem:[#allocation27_spill] sm:$0xff]  ;;  %vm16875_vm7 = vmmov %vm16861_vm0 }
 0x824   :  { %v8278_v21 = vsel %vm16842_vm8, %v16841_v48, %v10947_v29  ;;  %v8277_v9 = vsel %vm16844_vm12, %v16843_v26, %v10946_v46  ;;  %v8294_v62 = vpack.c.bf16 %v10947_v29, %v10946_v46  ;;  %v8295_v37 = vpack.c.bf16 %v8280_v2, %v8279_v61  ;;  %v16867_v46 = vld [vmem:[#allocation18_spill] sm:$0xff]  ;;  %vm16868_vm8 = vmmov %vm16861_vm0 }
 0x825   :  { %v8293_v23 = vpack.c.bf16 %v8278_v21, %v8277_v9  ;;  %v16869_v21 = vld [vmem:[#allocation20_spill] sm:$0xff]  ;;  %vm16870_vm12 = vmmov %vm16861_vm0 }
 0x826   :  { %10222 = vmatprep.mubr.msk.bf16.mxu1 %vm16845_vm13, %v8294_v62  ;;  %vm16871_vm13 = vmmov %vm16861_vm0 }
 0x827   :  { %8471 = vmatmul.mubr.bf16.vlgmr.msra.gmra.mrb[48].mxu1 %v8293_v23  ;;  %vm16876_vm14 = vmmov %vm16861_vm0 }
 0x828   :  { %10223 = vmatprep.mubr.msk.bf16.mxu1 %vm16846_vm11, %v8296_v51  ;;  %v10960_v52 = vpop.permute.xlu1 %10959  ;;  %vm16873_vm11 = vmmov %vm16861_vm0 }
 0x829   :  { %v10955_v34 = vpop.permute.xlu0 %10954  ;;  %v10962_v39 = vunpack.i.h.bf16 %v10960_v52  ;;  %v10961_v19 = vunpack.i.l.bf16 %v10960_v52  ;;  %v16879_v52 = vld [vmem:[#allocation13_spill] sm:$0xff] }
 0x82a   :  { %v10957_v49 = vunpack.i.h.bf16 %v10955_v34  ;;  %v10956_v56 = vunpack.i.l.bf16 %v10955_v34 }
 0x82b   :  { %v8300_v50 = vpack.c.bf16 %v10962_v39, %v10961_v19  ;;  %v8283_v15 = vsel %vm16858_vm10, %v16857_v0, %v10961_v19  ;;  %v8284_v11 = vsel %vm16860_vm5, %v16859_v57, %v10962_v39  ;;  %vm9244_vm10 = vcmask 195584  }
 0x82c   :  { %v8298_v42 = vpack.c.bf16 %v10957_v49, %v10956_v56  ;;  %v8281_v53 = vsel %vm16853_vm1, %v16852_v13, %v10956_v56  ;;  %v8282_v31 = vsel %vm16855_vm4, %v16854_v60, %v10957_v49  ;;  %v8299_v32 = vpack.c.bf16 %v8284_v11, %v8283_v15  ;;  %v16872_v49 = vld [vmem:[#allocation24_spill] sm:$0xff]  ;;  %vm16880_vm1 = vmmov %vm16861_vm0  ;;  %v11117_v60 = vld [vmem:[%s16286_s15 + $0x30] sm:$0xff]  }
 0x82d   :  { %v8297_v14 = vpack.c.bf16 %v8282_v31, %v8281_v53  ;;  %v11115_v13 = vld [vmem:[%s16286_s15 + $0x20] sm:$0xff]   ;;  %v11116_v53 = vld [vmem:[%s16286_s15 + $0x28] sm:$0xff]   ;;  %v11118_v31 = vld [vmem:[%s16286_s15 + $0x38] sm:$0xff]   ;;  %vm9384_vm4 = vcmask 1043456   ;;  %vm9548_vm5 = vcmask 523264  }
 0x82e   :  { %10678 = vmatprep.subr.bf16.mxu0 %v11115_v13 }
 0x82f   :  { %8479 = vmatmul.mubr.bf16.gmra.mrb[52].mxu1 %v8295_v37  ;;  %v16877_v37 = vld [vmem:[#allocation26_spill] sm:$0xff]  ;;  %10679 = vmatpush3.bf16.msra.mxu0 %v11115_v13 }
 0x830   :  { %10224 = vmatprep.mubr.msk.bf16.mxu1 %vm16851_vm2, %v8298_v42  ;;  %v10970_v7 = vpop.permute.xlu1 %10969  ;;  %vm16878_vm2 = vmmov %vm16861_vm0  ;;  %10680 = vmatprep.subr.bf16.mxu0 %v11116_v53 }
 0x831   :  { %v10965_v38 = vpop.permute.xlu0 %10964  ;;  %v10972_v12 = vunpack.i.h.bf16 %v10970_v7  ;;  %v10971_v33 = vunpack.i.l.bf16 %v10970_v7 }
 0x832   :  { %v10967_v47 = vunpack.i.h.bf16 %v10965_v38  ;;  %v10966_v40 = vunpack.i.l.bf16 %v10965_v38 }
 0x833   :  { %v8304_v55 = vpack.c.bf16 %v10972_v12, %v10971_v33  ;;  %v8287_v48 = vsel %vm16868_vm8, %v16867_v46, %v10971_v33  ;;  %v8288_v26 = vsel %vm16870_vm12, %v16869_v21, %v10972_v12  ;;  %10681 = vmatpush3.bf16.msra.mxu0 %v11116_v53 }
 0x834   :  { %v8302_v18 = vpack.c.bf16 %v10967_v47, %v10966_v40  ;;  %v8285_v27 = vsel %vm16863_vm3, %v16862_v25, %v10966_v40  ;;  %v8286_v3 = vsel %vm16865_vm9, %v16864_v20, %v10967_v47  ;;  %v8303_v9 = vpack.c.bf16 %v8288_v26, %v8287_v48  ;;  %10682 = vmatprep.subr.bf16.mxu0 %v11117_v60 }
 0x835   :  { %v8301_v63 = vpack.c.bf16 %v8286_v3, %v8285_v27  ;;  %vm9847_vm3 = vcmask 31744  }
 0x837   :  { %8487 = vmatmul.mubr.bf16.gmra.mrb[56].mxu1 %v8297_v14  ;;  %10683 = vmatpush3.bf16.msra.mxu0 %v11117_v60  ;;  %v11119_v14 = vld [vmem:[%s16288_s17] sm:$0xff]  }
 0x838   :  { %10225 = vmatprep.mubr.msk.bf16.mxu1 %vm16856_vm15, %v8300_v50  ;;  %v10980_v23 = vpop.permute.xlu1 %10979  ;;  %10684 = vmatprep.subr.bf16.mxu0 %v11118_v31  ;;  %v15814_v50 = vld [vmem:[%s16285_s14] ss:$0 sm:$0xff]  ;;  %vm7240_vm15 = vcmask 97280  }
 0x839   :  { %v10975_v35 = vpop.permute.xlu0 %10974  ;;  %v10982_v51 = vunpack.i.h.bf16 %v10980_v23  ;;  %v10981_v34 = vunpack.i.l.bf16 %v10980_v23 }
 0x83a   :  { %v10977_v28 = vunpack.i.h.bf16 %v10975_v35  ;;  %v10976_v29 = vunpack.i.l.bf16 %v10975_v35  ;;  %v11120_v35 = vld [vmem:[%s16288_s17 + $0x8] sm:$0xff]  }
 0x83b   :  { %v8308_v2 = vpack.c.bf16 %v10982_v51, %v10981_v34  ;;  %v8291_v42 = vsel %vm16878_vm2, %v16877_v37, %v10981_v34  ;;  %v8292_v39 = vsel %vm16880_vm1, %v16879_v52, %v10982_v51  ;;  %10685 = vmatpush3.bf16.msra.mxu0 %v11118_v31  ;;  %v11122_v34 = vld [vmem:[%s16288_s17 + $0x18] sm:$0xff]   ;;  %v11123_v37 = vld [vmem:[%s16288_s17 + $0x20] sm:$0xff]  }
 0x83c   :  { %v8306_v62 = vpack.c.bf16 %v10977_v28, %v10976_v29  ;;  %v8289_v56 = vsel %vm16873_vm11, %v16872_v49, %v10976_v29  ;;  %v8290_v61 = vsel %vm16875_vm7, %v16874_v24, %v10977_v28  ;;  %v8307_v19 = vpack.c.bf16 %v8292_v39, %v8291_v42  ;;  %10702 = vmatprep.subr.bf16.mxu0 %v11119_v14 }
 0x83d   :  { %v8305_v58 = vpack.c.bf16 %v8290_v61, %v8289_v56 }
 0x83f   :  { %8495 = vmatmul.mubr.bf16.gmra.mrb[60].mxu1 %v8299_v32 }
 0x840   :  { %10226 = vmatprep.mubr.msk.bf16.mxu1 %vm16861_vm0, %v8302_v18  ;;  %vm9830_vm0 = vcmask 7168  }
 0x847   :  { %8503 = vmatmul.mubr.bf16.gmra.mrb[64].mxu1 %v8301_v63 }
 0x848   :  { %10227 = vmatprep.mubr.msk.bf16.mxu1 %vm16866_vm6, %v8304_v55 }
 0x84f   :  { %8511 = vmatmul.mubr.bf16.gmra.mrb[68].mxu1 %v8303_v9  ;;  %v11121_v9 = vld [vmem:[%s16288_s17 + $0x10] sm:$0xff]  }
 0x850   :  { %10228 = vmatprep.mubr.msk.bf16.mxu1 %vm16871_vm13, %v8306_v62 }
 0x857   :  { %8519 = vmatmul.mubr.bf16.gmra.mrb[72].mxu1 %v8305_v58 }
 0x858   :  { %10229 = vmatprep.mubr.msk.bf16.mxu1 %vm16876_vm14, %v8308_v2 }
 0x85f   :  { %8527 = vmatmul.mubr.bf16.gmra.mrb[76].mxu1 %v8307_v19  ;;  %v11124_v19 = vld [vmem:[%s16288_s17 + $0x28] sm:$0xff]  }
 0x860   :  { %9067 = vmatprep.mubr.bf16.mxu1 %v11431_v8 }
 0x8fa   :  { %v8472_v38 = vpop.f32.mrb[48].mxu1 }
 0x8fb   :  { %v8473_v47 = vadd.f32 %v15814_v50, %v8472_v38  ;;  %v8474_v40 = vpop.f32.mrb[49].mxu1 }
 0x8fc   :  { %v8475_v0 = vpop.f32.mrb[50].mxu1 }
 0x8fd   :  { %v8476_v15 = vadd.f32 %v15814_v50, %v8475_v0  ;;  %v8477_v57 = vpop.f32.mrb[51].mxu1  ;;  %v8535_v11 = vmax.f32 %v8473_v47, 0.0 }
 0x8ff   :  { %v8536_v32 = vmax.f32 %v8476_v15, 0.0 }
 0x901   :  { %v8551_v18 = vpack.c.bf16 %v8536_v32, %v8535_v11 }
 0x902   :  { %v8480_v7 = vpop.f32.mrb[52].mxu1 }
 0x903   :  { %v8481_v12 = vadd.f32 %v15814_v50, %v8480_v7  ;;  %v8482_v33 = vpop.f32.mrb[53].mxu1  ;;  %10686 = vmatprep.mubr.bf16.mxu0 %v8551_v18 }
 0x904   :  { %v8483_v25 = vpop.f32.mrb[54].mxu1 }
 0x905   :  { %v8484_v27 = vadd.f32 %v15814_v50, %v8483_v25  ;;  %v8485_v20 = vpop.f32.mrb[55].mxu1  ;;  %v8537_v3 = vmax.f32 %v8481_v12, 0.0 }
 0x907   :  { %v8538_v63 = vmax.f32 %v8484_v27, 0.0 }
 0x909   :  { %v8552_v55 = vpack.c.bf16 %v8538_v63, %v8537_v3 }
 0x90a   :  { %v8488_v28 = vpop.f32.mrb[56].mxu1 }
 0x90b   :  { %v8489_v29 = vadd.f32 %v15814_v50, %v8488_v28  ;;  %v8490_v46 = vpop.f32.mrb[57].mxu1  ;;  %10687 = vmatmul.mubr.bf16.vlgmr.msra.gmra.mrb[64].mxu0 %v8552_v55 }
 0x90c   :  { %v8491_v48 = vpop.f32.mrb[58].mxu1  ;;  %10703 = vmatpush3.bf16.msra.mxu0 %v11119_v14 }
 0x90d   :  { %v8492_v21 = vadd.f32 %v15814_v50, %v8491_v48  ;;  %v8493_v26 = vpop.f32.mrb[59].mxu1  ;;  %10704 = vmatprep.subr.bf16.mxu0 %v11120_v35  ;;  %v8539_v62 = vmax.f32 %v8489_v29, 0.0 }
 0x90f   :  { %v8540_v23 = vmax.f32 %v8492_v21, 0.0 }
 0x910   :  { %10705 = vmatpush3.bf16.msra.mxu0 %v11120_v35 }
 0x911   :  { %v8553_v51 = vpack.c.bf16 %v8540_v23, %v8539_v62  ;;  %10706 = vmatprep.subr.bf16.mxu0 %v11121_v9 }
 0x912   :  { %v8496_v49 = vpop.f32.mrb[60].mxu1 }
 0x913   :  { %v8497_v56 = vadd.f32 %v15814_v50, %v8496_v49  ;;  %v8498_v24 = vpop.f32.mrb[61].mxu1  ;;  %10690 = vmatprep.mubr.bf16.mxu0 %v8553_v51 }
 0x914   :  { %v8499_v61 = vpop.f32.mrb[62].mxu1  ;;  %10707 = vmatpush3.bf16.msra.mxu0 %v11121_v9  ;;  %v11126_v24 = vld [vmem:[%s16288_s17 + $0x38] sm:$0xff]  }
 0x915   :  { %v8500_v58 = vadd.f32 %v15814_v50, %v8499_v61  ;;  %v8501_v2 = vpop.f32.mrb[63].mxu1  ;;  %10708 = vmatprep.subr.bf16.mxu0 %v11122_v34  ;;  %v8541_v42 = vmax.f32 %v8497_v56, 0.0  ;;  %v11125_v56 = vld [vmem:[%s16288_s17 + $0x30] sm:$0xff]   ;;  %v11129_v61 = vld [vmem:[%s16290_s19 + $0x4] ss:$8 sps:$4 sm:$0xff]  }
 0x916   :  { %9035 = vmatprep.subr.bf16.mxu1 %v11129_v61  ;;  %v11130_v2 = vld [vmem:[%s16290_s19 + $0x10] ss:$8 sps:$4 sm:$0xff]  }
 0x917   :  { %v8542_v52 = vmax.f32 %v8500_v58, 0.0  ;;  %v11132_v58 = vld [vmem:[%s16290_s19 + $0x14] ss:$8 sps:$4 sm:$0xff]  }
 0x918   :  { %10709 = vmatpush3.bf16.msra.mxu0 %v11122_v34 }
 0x919   :  { %v8554_v39 = vpack.c.bf16 %v8542_v52, %v8541_v42  ;;  %10710 = vmatprep.subr.bf16.mxu0 %v11123_v37  ;;  %v11133_v42 = vld [vmem:[%s16290_s19 + $0x20] ss:$8 sps:$4 sm:$0xff]   ;;  %v11138_v52 = vld [vmem:[%s16290_s19 + $0x34] ss:$8 sps:$4 sm:$0xff]  }
 0x91a   :  { %v8504_v13 = vpop.f32.mrb[64].mxu1 }
 0x91b   :  { %v8505_v53 = vadd.f32 %v15814_v50, %v8504_v13  ;;  %v8506_v60 = vpop.f32.mrb[65].mxu1  ;;  %10691 = vmatmul.mubr.bf16.gmra.mrb[68].mxu0 %v8554_v39  ;;  %v11136_v39 = vld [vmem:[%s16290_s19 + $0x30] ss:$8 sps:$4 sm:$0xff]   ;;  %v11139_v13 = vld [vmem:[%s16290_s19 + $0x40] ss:$8 sps:$4 sm:$0xff]  }
 0x91c   :  { %v8507_v31 = vpop.f32.mrb[66].mxu1  ;;  %10711 = vmatpush3.bf16.msra.mxu0 %v11123_v37  ;;  %v11135_v37 = vld [vmem:[%s16290_s19 + $0x24] ss:$8 sps:$4 sm:$0xff]   ;;  %v11142_v60 = vld [vmem:[%s16290_s19 + $0x50] ss:$8 sps:$4 sm:$0xff]  }
 0x91d   :  { %v8508_v14 = vadd.f32 %v15814_v50, %v8507_v31  ;;  %v8509_v38 = vpop.f32.mrb[67].mxu1  ;;  %10712 = vmatprep.subr.bf16.mxu0 %v11124_v19  ;;  %v8543_v47 = vmax.f32 %v8505_v53, 0.0  ;;  %v11144_v53 = vld [vmem:[%s16290_s19 + $0x54] ss:$8 sps:$4 sm:$0xff]   ;;  %v11147_v31 = vld [vmem:[%s16290_s19 + $0x64] ss:$8 sps:$4 sm:$0xff]  }
 0x91e   :  { %v11150_v38 = vld [vmem:[%s16290_s19 + $0x74] ss:$8 sps:$4 sm:$0xff]  }
 0x91f   :  { %v8544_v40 = vmax.f32 %v8508_v14, 0.0  ;;  %v11145_v14 = vld [vmem:[%s16290_s19 + $0x60] ss:$8 sps:$4 sm:$0xff]  }
 0x920   :  { %10713 = vmatpush3.bf16.msra.mxu0 %v11124_v19  ;;  %v11141_v19 = vld [vmem:[%s16290_s19 + $0x44] ss:$8 sps:$4 sm:$0xff]  }
 0x921   :  { %v8555_v0 = vpack.c.bf16 %v8544_v40, %v8543_v47  ;;  %10714 = vmatprep.subr.bf16.mxu0 %v11125_v56  ;;  %v11148_v47 = vld [vmem:[%s16290_s19 + $0x70] ss:$8 sps:$4 sm:$0xff]   ;;  %v10230_v40 = vld [vmem:[%s16287_s16] ss:$0 sm:$0xff] }
 0x922   :  { %v8512_v15 = vpop.f32.mrb[68].mxu1 }
 0x923   :  { %v8513_v57 = vadd.f32 %v15814_v50, %v8512_v15  ;;  %v8514_v11 = vpop.f32.mrb[69].mxu1  ;;  %10694 = vmatprep.mubr.bf16.mxu0 %v8555_v0 }
 0x924   :  { %v8515_v32 = vpop.f32.mrb[70].mxu1  ;;  %10715 = vmatpush3.bf16.msra.mxu0 %v11125_v56 }
 0x925   :  { %v8516_v18 = vadd.f32 %v15814_v50, %v8515_v32  ;;  %v8517_v7 = vpop.f32.mrb[71].mxu1  ;;  %v8545_v12 = vmax.f32 %v8513_v57, 0.0  ;;  %10716 = vmatprep.subr.bf16.mxu0 %v11126_v24 }
 0x927   :  { %v8546_v33 = vmax.f32 %v8516_v18, 0.0 }
 0x928   :  { %10717 = vmatpush3.bf16.msra.mxu0 %v11126_v24 }
 0x929   :  { %v8556_v25 = vpack.c.bf16 %v8546_v33, %v8545_v12  ;;  %9388 = vmatprep.subr.bf16.mxu0 %v11431_v8 }
 0x92a   :  { %v8520_v27 = vpop.f32.mrb[72].mxu1 }
 0x92b   :  { %v8521_v20 = vadd.f32 %v15814_v50, %v8520_v27  ;;  %v8522_v3 = vpop.f32.mrb[73].mxu1  ;;  %10695 = vmatmul.mubr.bf16.gmra.mrb[72].mxu0 %v8556_v25 }
 0x92c   :  { %v8523_v63 = vpop.f32.mrb[74].mxu1 }
 0x92d   :  { %v8524_v55 = vadd.f32 %v15814_v50, %v8523_v63  ;;  %v8525_v35 = vpop.f32.mrb[75].mxu1  ;;  %v8547_v28 = vmax.f32 %v8521_v20, 0.0 }
 0x92f   :  { %v8548_v29 = vmax.f32 %v8524_v55, 0.0 }
 0x931   :  { %v8557_v46 = vpack.c.bf16 %v8548_v29, %v8547_v28 }
 0x932   :  { %v8528_v48 = vpop.f32.mrb[76].mxu1 }
 0x933   :  { %v8529_v21 = vadd.f32 %v15814_v50, %v8528_v48  ;;  %v8530_v26 = vpop.f32.mrb[77].mxu1  ;;  %10698 = vmatprep.mubr.bf16.mxu0 %v8557_v46 }
 0x934   :  { %v8531_v9 = vpop.f32.mrb[78].mxu1 }
 0x935   :  { %v8532_v62 = vadd.f32 %v15814_v50, %v8531_v9  ;;  %v8533_v23 = vpop.f32.mrb[79].mxu1  ;;  %v8549_v51 = vmax.f32 %v8529_v21, 0.0  ;;  %v11127_v50 = vld [vmem:[%s16290_s19] ss:$8 sps:$4 sm:$0xff]  }
 0x936   :  { %9036 = vmatpush1.bf16.msra.mxu1 %v11127_v50 }
 0x937   :  { %v8550_v34 = vmax.f32 %v8532_v62, 0.0  ;;  %9037 = vmatprep.subr.bf16.mxu1 %v11132_v58 }
 0x939   :  { %v8558_v49 = vpack.c.bf16 %v8550_v34, %v8549_v51 }
 0x93a   :  { %9038 = vmatpush1.bf16.msra.mxu1 %v11130_v2 }
 0x93b   :  { %10699 = vmatmul.mubr.bf16.gmra.mrb[76].mxu0 %v8558_v49  ;;  %9039 = vmatprep.subr.bf16.mxu1 %v11135_v37 }
 0x93e   :  { %9040 = vmatpush1.bf16.msra.mxu1 %v11133_v42 }
 0x93f   :  { %9041 = vmatprep.subr.bf16.mxu1 %v11138_v52 }
 0x942   :  { %9042 = vmatpush1.bf16.msra.mxu1 %v11136_v39 }
 0x943   :  { %9043 = vmatprep.subr.bf16.mxu1 %v11141_v19 }
 0x946   :  { %9044 = vmatpush1.bf16.msra.mxu1 %v11139_v13 }
 0x947   :  { %9045 = vmatprep.subr.bf16.mxu1 %v11144_v53 }
 0x94a   :  { %9046 = vmatpush1.bf16.msra.mxu1 %v11142_v60 }
 0x94b   :  { %9047 = vmatprep.subr.bf16.mxu1 %v11147_v31 }
 0x94e   :  { %9048 = vmatpush1.bf16.msra.mxu1 %v11145_v14 }
 0x94f   :  { %9049 = vmatprep.subr.bf16.mxu1 %v11150_v38 }
 0x952   :  { %9050 = vmatpush1.bf16.msra.mxu1 %v11148_v47 }
 0x9de   :  { %v10688_v0 = vpop.f32.mrb[64].mxu0 }
 0x9df   :  { %v8673_v15 = vadd.f32 %v10688_v0, %v10230_v40  ;;  %v8664_v57 = vpop.f32.mrb[65].mxu0 }
 0x9e0   :  { %v8665_v11 = vadd.f32 %v10230_v40, %v8664_v57  ;;  %v10689_v32 = vpop.f32.mrb[66].mxu0 }
 0x9e1   :  { %v8676_v18 = vadd.f32 %v10689_v32, %v10230_v40  ;;  %v8667_v7 = vpop.f32.mrb[67].mxu0  ;;  %v8729_v33 = vmax.f32 %v8673_v15, 0.0 }
 0x9e2   :  { %v8668_v12 = vadd.f32 %v10230_v40, %v8667_v7  ;;  %v8727_v27 = vmax.f32 %v8665_v11, 0.0 }
 0x9e3   :  { %v8730_v25 = vmax.f32 %v8676_v18, 0.0 }
 0x9e4   :  { %v8728_v20 = vmax.f32 %v8668_v12, 0.0 }
 0x9e5   :  { %v8744_v3 = vpack.c.bf16 %v8730_v25, %v8729_v33 }
 0x9e6   :  { %v8743_v63 = vpack.c.bf16 %v8728_v20, %v8727_v27  ;;  %v10239_v20 = vld [vmem:[%s16289_s18] ss:$0 sm:$0xff] }
 0x9e8   :  { %10718 = vmatprep.mubr.bf16.mxu0 %v8743_v63 }
 0x9e9   :  { %10719 = vmatmul.mubr.bf16.vlgmr.msra.gmra.mrb[80].mxu0 %v8744_v3 }
 0x9ee   :  { %v10692_v55 = vpop.f32.mrb[68].mxu0 }
 0x9ef   :  { %v8689_v35 = vadd.f32 %v10692_v55, %v10230_v40  ;;  %v8680_v28 = vpop.f32.mrb[69].mxu0 }
 0x9f0   :  { %v8681_v29 = vadd.f32 %v10230_v40, %v8680_v28  ;;  %v10693_v46 = vpop.f32.mrb[70].mxu0 }
 0x9f1   :  { %v8692_v48 = vadd.f32 %v10693_v46, %v10230_v40  ;;  %v8683_v21 = vpop.f32.mrb[71].mxu0  ;;  %v8733_v9 = vmax.f32 %v8689_v35, 0.0 }
 0x9f2   :  { %v8684_v26 = vadd.f32 %v10230_v40, %v8683_v21  ;;  %v8731_v23 = vmax.f32 %v8681_v29, 0.0 }
 0x9f3   :  { %v8734_v62 = vmax.f32 %v8692_v48, 0.0 }
 0x9f4   :  { %v8732_v51 = vmax.f32 %v8684_v26, 0.0 }
 0x9f5   :  { %v8746_v34 = vpack.c.bf16 %v8734_v62, %v8733_v9 }
 0x9f6   :  { %v8745_v49 = vpack.c.bf16 %v8732_v51, %v8731_v23 }
 0x9f8   :  { %10722 = vmatprep.mubr.bf16.mxu0 %v8745_v49 }
 0x9f9   :  { %10723 = vmatmul.mubr.bf16.gmra.mrb[84].mxu0 %v8746_v34 }
 0x9fe   :  { %v10696_v56 = vpop.f32.mrb[72].mxu0 }
 0x9ff   :  { %v8705_v24 = vadd.f32 %v10696_v56, %v10230_v40  ;;  %v8696_v50 = vpop.f32.mrb[73].mxu0 }
 0xa00   :  { %v8697_v61 = vadd.f32 %v10230_v40, %v8696_v50  ;;  %v10697_v58 = vpop.f32.mrb[74].mxu0 }
 0xa01   :  { %v8708_v2 = vadd.f32 %v10697_v58, %v10230_v40  ;;  %v8699_v37 = vpop.f32.mrb[75].mxu0  ;;  %v8737_v52 = vmax.f32 %v8705_v24, 0.0 }
 0xa02   :  { %v8700_v42 = vadd.f32 %v10230_v40, %v8699_v37  ;;  %v8735_v19 = vmax.f32 %v8697_v61, 0.0 }
 0xa03   :  { %v8738_v39 = vmax.f32 %v8708_v2, 0.0 }
 0xa04   :  { %v8736_v13 = vmax.f32 %v8700_v42, 0.0 }
 0xa05   :  { %v8748_v53 = vpack.c.bf16 %v8738_v39, %v8737_v52 }
 0xa06   :  { %v8747_v60 = vpack.c.bf16 %v8736_v13, %v8735_v19 }
 0xa08   :  { %10726 = vmatprep.mubr.bf16.mxu0 %v8747_v60 }
 0xa09   :  { %10727 = vmatmul.mubr.bf16.gmra.mrb[88].mxu0 %v8748_v53 }
 0xa0e   :  { %v10700_v31 = vpop.f32.mrb[76].mxu0 }
 0xa0f   :  { %v8721_v14 = vadd.f32 %v10700_v31, %v10230_v40  ;;  %v8712_v38 = vpop.f32.mrb[77].mxu0 }
 0xa10   :  { %v8713_v47 = vadd.f32 %v10230_v40, %v8712_v38  ;;  %v10701_v0 = vpop.f32.mrb[78].mxu0 }
 0xa11   :  { %v8724_v15 = vadd.f32 %v10701_v0, %v10230_v40  ;;  %v8715_v57 = vpop.f32.mrb[79].mxu0  ;;  %v8741_v32 = vmax.f32 %v8721_v14, 0.0 }
 0xa12   :  { %v8716_v11 = vadd.f32 %v10230_v40, %v8715_v57  ;;  %v8739_v7 = vmax.f32 %v8713_v47, 0.0 }
 0xa13   :  { %v8742_v18 = vmax.f32 %v8724_v15, 0.0 }
 0xa14   :  { %v8740_v12 = vmax.f32 %v8716_v11, 0.0 }
 0xa15   :  { %v8750_v33 = vpack.c.bf16 %v8742_v18, %v8741_v32  ;;  %v11151_v32 = vld [vmem:[%s16292_s21] sm:$0xff]   ;;  %v11152_v18 = vld [vmem:[%s16292_s21 + $0x8] sm:$0xff]  }
 0xa16   :  { %v8749_v25 = vpack.c.bf16 %v8740_v12, %v8739_v7  ;;  %9389 = vmatpush1.bf16.msra.mxu0 %v11151_v32  ;;  %v11153_v7 = vld [vmem:[%s16292_s21 + $0x10] sm:$0xff]   ;;  %v11154_v12 = vld [vmem:[%s16292_s21 + $0x18] sm:$0xff]  }
 0xa17   :  { %9390 = vmatprep.subr.bf16.mxu0 %v11431_v8 }
 0xa18   :  { %10730 = vmatprep.mubr.bf16.mxu0 %v8749_v25  ;;  %v11156_v25 = vld [vmem:[%s16292_s21 + $0x28] sm:$0xff]  }
 0xa19   :  { %10731 = vmatmul.mubr.bf16.gmra.mrb[92].mxu0 %v8750_v33  ;;  %v11155_v33 = vld [vmem:[%s16292_s21 + $0x20] sm:$0xff]  }
 0xa1a   :  { %9391 = vmatpush1.bf16.msra.mxu0 %v11152_v18 }
 0xa1b   :  { %9392 = vmatprep.subr.bf16.mxu0 %v11431_v8 }
 0xa1e   :  { %9393 = vmatpush1.bf16.msra.mxu0 %v11153_v7 }
 0xa1f   :  { %9394 = vmatprep.subr.bf16.mxu0 %v11431_v8 }
 0xa22   :  { %9395 = vmatpush1.bf16.msra.mxu0 %v11154_v12 }
 0xa23   :  { %9396 = vmatprep.subr.bf16.mxu0 %v11431_v8 }
 0xa26   :  { %9397 = vmatpush1.bf16.msra.mxu0 %v11155_v33 }
 0xa27   :  { %9398 = vmatprep.subr.bf16.mxu0 %v11431_v8 }
 0xa2a   :  { %9399 = vmatpush1.bf16.msra.mxu0 %v11156_v25 }
 0xa2b   :  { %9400 = vmatprep.subr.bf16.mxu0 %v11431_v8 }
 0xabc   :  { %v10720_v27 = vpop.f32.mrb[80].mxu0 }
 0xabd   :  { %v8856_v3 = vpop.f32.mrb[81].mxu0  ;;  %v8865_v55 = vadd.f32 %v10720_v27, %v10239_v20  ;;  %v11157_v27 = vld [vmem:[%s16292_s21 + $0x30] sm:$0xff]  }
 0xabe   :  { %v10721_v63 = vpop.f32.mrb[82].mxu0  ;;  %v8857_v29 = vadd.f32 %v10239_v20, %v8856_v3  ;;  %9401 = vmatpush1.bf16.msra.mxu0 %v11157_v27  ;;  %v11159_v3 = vld [vmem:[%s16292_s21 + $0x40] sm:$0xff]  }
 0xabf   :  { %v8868_v35 = vadd.f32 %v10721_v63, %v10239_v20  ;;  %v8859_v28 = vpop.f32.mrb[83].mxu0  ;;  %9402 = vmatprep.subr.bf16.mxu0 %v11431_v8  ;;  %v8945_v63 = vlaneseq }
 0xac0   :  { %v8860_v40 = vadd.f32 %v10239_v20, %v8859_v28  ;;  %v15957_v28 = vld [vmem:[%s16291_s20] sm:$0x3]  ;;  %s11434_s20 = smov 24  }
 0xac1   :  { %v8920_v46 = vpack.c.bf16 %v8868_v35, %v8865_v55  ;;  %v15951_v55 = vshrl.u32 %v8945_v63, 7 }
 0xac2   :  { %v8919_v48 = vpack.c.bf16 %v8860_v40, %v8857_v29  ;;  %v11160_v40 = vld [vmem:[%s16292_s21 + $0x48] ss:$0 sps:$4 sm:$0xff]  }
 0xac3   :  { %v8947_v35 = vsub.s32 0, %v15951_v55 }
 0xac4   :  { %9068 = vmatmul.mubr.bf16.vlgmr.msra.gmra.mrb[80].mxu1 %v8919_v48 }
 0xac5   :  { %9077 = vmatprep.mubr.bf16.mxu1 %v11431_v8  ;;  %v15960_v29 = vrot.slane %v15957_v28, %v8947_v35 }
 0xacc   :  { %v10724_v21 = vpop.f32.mrb[84].mxu0  ;;  %9078 = vmatmul.mubr.bf16.gmra.mrb[84].mxu1 %v8920_v46 }
 0xacd   :  { %v8872_v26 = vpop.f32.mrb[85].mxu0  ;;  %9087 = vmatprep.mubr.bf16.mxu1 %v11431_v8  ;;  %v8881_v62 = vadd.f32 %v10724_v21, %v10239_v20  ;;  %v9386_v21 = vsel %vm9384_vm4, %v11160_v40, 0 }
 0xace   :  { %v10725_v9 = vpop.f32.mrb[86].mxu0  ;;  %v8873_v34 = vadd.f32 %v10239_v20, %v8872_v26 }
 0xacf   :  { %v8884_v23 = vadd.f32 %v10725_v9, %v10239_v20  ;;  %v8875_v51 = vpop.f32.mrb[87].mxu0 }
 0xad0   :  { %v8876_v49 = vadd.f32 %v10239_v20, %v8875_v51 }
 0xad1   :  { %v8922_v56 = vpack.c.bf16 %v8884_v23, %v8881_v62 }
 0xad2   :  { %v8921_v24 = vpack.c.bf16 %v8876_v49, %v8873_v34 }
 0xad4   :  { %9088 = vmatmul.mubr.bf16.gmra.mrb[88].mxu1 %v8921_v24 }
 0xad5   :  { %9097 = vmatprep.mubr.bf16.mxu1 %v11431_v8 }
 0xadc   :  { %v10728_v50 = vpop.f32.mrb[88].mxu0  ;;  %9098 = vmatmul.mubr.bf16.gmra.mrb[92].mxu1 %v8922_v56 }
 0xadd   :  { %v8888_v61 = vpop.f32.mrb[89].mxu0  ;;  %9107 = vmatprep.mubr.bf16.mxu1 %v11431_v8  ;;  %v8897_v2 = vadd.f32 %v10728_v50, %v10239_v20 }
 0xade   :  { %v10729_v58 = vpop.f32.mrb[90].mxu0  ;;  %v8889_v52 = vadd.f32 %v10239_v20, %v8888_v61 }
 0xadf   :  { %v8900_v37 = vadd.f32 %v10729_v58, %v10239_v20  ;;  %v8891_v42 = vpop.f32.mrb[91].mxu0 }
 0xae0   :  { %v8892_v39 = vadd.f32 %v10239_v20, %v8891_v42 }
 0xae1   :  { %v8924_v19 = vpack.c.bf16 %v8900_v37, %v8897_v2 }
 0xae2   :  { %v8923_v13 = vpack.c.bf16 %v8892_v39, %v8889_v52 }
 0xae4   :  { %9108 = vmatmul.mubr.bf16.gmra.mrb[96].mxu1 %v8923_v13 }
 0xae5   :  { %9117 = vmatprep.mubr.bf16.mxu1 %v11431_v8 }
 0xaec   :  { %v10732_v53 = vpop.f32.mrb[92].mxu0  ;;  %9118 = vmatmul.mubr.bf16.gmra.mrb[100].mxu1 %v8924_v19 }
 0xaed   :  { %v8904_v60 = vpop.f32.mrb[93].mxu0  ;;  %9127 = vmatprep.mubr.bf16.mxu1 %v11431_v8  ;;  %v8913_v14 = vadd.f32 %v10732_v53, %v10239_v20 }
 0xaee   :  { %v10733_v31 = vpop.f32.mrb[94].mxu0  ;;  %v8905_v0 = vadd.f32 %v10239_v20, %v8904_v60 }
 0xaef   :  { %v8916_v38 = vadd.f32 %v10733_v31, %v10239_v20  ;;  %v8907_v47 = vpop.f32.mrb[95].mxu0 }
 0xaf0   :  { %v8908_v15 = vadd.f32 %v10239_v20, %v8907_v47  ;;  %v11158_v20 = vld [vmem:[%s16292_s21 + $0x38] sm:$0xff]  }
 0xaf1   :  { %v8926_v57 = vpack.c.bf16 %v8916_v38, %v8913_v14  ;;  %9403 = vmatpush1.bf16.msra.mxu0 %v11158_v20 }
 0xaf2   :  { %v8925_v11 = vpack.c.bf16 %v8908_v15, %v8905_v0  ;;  %9404 = vmatprep.subr.bf16.mxu0 %v11431_v8 }
 0xaf4   :  { %9128 = vmatmul.mubr.bf16.gmra.mrb[104].mxu1 %v8925_v11 }
 0xaf5   :  { %9137 = vmatprep.mubr.bf16.mxu1 %v11431_v8  ;;  %9405 = vmatpush1.bf16.msra.mxu0 %v11159_v3 }
 0xaf6   :  { %9406 = vmatprep.subr.bf16.mxu0 %v11431_v8 }
 0xaf9   :  { %9407 = vmatpush1.bf16.msra.mxu0 %v9386_v21 }
 0xafc   :  { %9138 = vmatmul.mubr.bf16.gmra.mrb[108].mxu1 %v8926_v57 }
 0xb97   :  { %v9069_v46 = vpop.f32.mrb[80].mxu1 }
 0xb98   :  { %v9070_v8 = vadd.f32 %v9069_v46, %v15960_v29  ;;  %v15966_v48 = vpop.f32.mrb[81].mxu1 }
 0xb99   :  { %v9073_v26 = vpop.f32.mrb[82].mxu1 }
 0xb9a   :  { %v9074_v9 = vadd.f32 %v9073_v26, %v15960_v29  ;;  %v15969_v62 = vpop.f32.mrb[83].mxu1  ;;  %v9148_v23 = vmax.f32 %v9070_v8, 0.0 }
 0xb9c   :  { %v9150_v51 = vmax.f32 %v9074_v9, 0.0 }
 0xb9e   :  { %v10988_v34 = vpack.i.bf16 %v9150_v51, %v9148_v23 }
 0xb9f   :  { %v9079_v49 = vpop.f32.mrb[84].mxu1 }
 0xba0   :  { %v9080_v56 = vadd.f32 %v9079_v49, %v15960_v29  ;;  %v15972_v24 = vpop.f32.mrb[85].mxu1  ;;  %10989 = vrot.lane.b32.xlu1 %v10988_v34, %s11434_s20 }
 0xba1   :  { %v9083_v50 = vpop.f32.mrb[86].mxu1 }
 0xba2   :  { %v9084_v61 = vadd.f32 %v9083_v50, %v15960_v29  ;;  %v15976_v58 = vpop.f32.mrb[87].mxu1  ;;  %v9152_v2 = vmax.f32 %v9080_v56, 0.0 }
 0xba4   :  { %v9154_v37 = vmax.f32 %v9084_v61, 0.0 }
 0xba6   :  { %v10998_v42 = vpack.i.bf16 %v9154_v37, %v9152_v2 }
 0xba7   :  { %v9089_v52 = vpop.f32.mrb[88].mxu1 }
 0xba8   :  { %v9090_v39 = vadd.f32 %v9089_v52, %v15960_v29  ;;  %v15979_v19 = vpop.f32.mrb[89].mxu1  ;;  %10999 = vrot.lane.b32.xlu1 %v10998_v42, %s11434_s20 }
 0xba9   :  { %v9093_v13 = vpop.f32.mrb[90].mxu1 }
 0xbaa   :  { %v9094_v53 = vadd.f32 %v9093_v13, %v15960_v29  ;;  %v15983_v60 = vpop.f32.mrb[91].mxu1  ;;  %v9156_v31 = vmax.f32 %v9090_v39, 0.0 }
 0xbac   :  { %v9158_v14 = vmax.f32 %v9094_v53, 0.0 }
 0xbae   :  { %v11008_v38 = vpack.i.bf16 %v9158_v14, %v9156_v31 }
 0xbaf   :  { %v9099_v47 = vpop.f32.mrb[92].mxu1 }
 0xbb0   :  { %v9100_v0 = vadd.f32 %v9099_v47, %v15960_v29  ;;  %v15986_v15 = vpop.f32.mrb[93].mxu1  ;;  %11009 = vrot.lane.b32.xlu1 %v11008_v38, %s11434_s20  ;;  %v11161_v47 = vld [vmem:[%s16294_s23] sm:$0xff]  }
 0xbb1   :  { %v9103_v57 = vpop.f32.mrb[94].mxu1  ;;  %10734 = vmatprep.subr.bf16.mxu1 %v11161_v47 }
 0xbb2   :  { %v9104_v11 = vadd.f32 %v9103_v57, %v15960_v29  ;;  %v15990_v32 = vpop.f32.mrb[95].mxu1  ;;  %v9160_v18 = vmax.f32 %v9100_v0, 0.0  ;;  %v11162_v0 = vld [vmem:[%s16294_s23 + $0x8] sm:$0xff]   ;;  %10735 = vmatpush3.bf16.msra.mxu1 %v11161_v47 }
 0xbb3   :  { %10736 = vmatprep.subr.bf16.mxu1 %v11162_v0 }
 0xbb4   :  { %v9162_v7 = vmax.f32 %v9104_v11, 0.0 }
 0xbb6   :  { %v11018_v12 = vpack.i.bf16 %v9162_v7, %v9160_v18  ;;  %10737 = vmatpush3.bf16.msra.mxu1 %v11162_v0 }
 0xbb7   :  { %v9109_v33 = vpop.f32.mrb[96].mxu1 }
 0xbb8   :  { %v9110_v25 = vadd.f32 %v9109_v33, %v15960_v29  ;;  %v15993_v27 = vpop.f32.mrb[97].mxu1  ;;  %11019 = vrot.lane.b32.xlu1 %v11018_v12, %s11434_s20 }
 0xbb9   :  { %v9113_v20 = vpop.f32.mrb[98].mxu1 }
 0xbba   :  { %v9114_v3 = vadd.f32 %v9113_v20, %v15960_v29  ;;  %v15997_v63 = vpop.f32.mrb[99].mxu1  ;;  %v9164_v35 = vmax.f32 %v9110_v25, 0.0  ;;  %v10985_v25 = vpop.permute.xlu0 %10984 }
 0xbbb   :  { %v10987_v20 = vunpack.i.h.bf16 %v10985_v25 }
 0xbbc   :  { %v9166_v40 = vmax.f32 %v9114_v3, 0.0  ;;  %v10986_v3 = vunpack.i.l.bf16 %v10985_v25 }
 0xbbe   :  { %v11028_v46 = vpack.i.bf16 %v9166_v40, %v9164_v35 }
 0xbbf   :  { %v9119_v8 = vpop.f32.mrb[100].mxu1 }
 0xbc0   :  { %v9120_v21 = vadd.f32 %v9119_v8, %v15960_v29  ;;  %v16000_v26 = vpop.f32.mrb[101].mxu1  ;;  %11029 = vrot.lane.b32.xlu1 %v11028_v46, %s11434_s20  ;;  %v7241_v8 = vsel %vm7240_vm15, %v15253_v17, %v10986_v3 }
 0xbc1   :  { %v9123_v9 = vpop.f32.mrb[102].mxu1 }
 0xbc2   :  { %v9124_v23 = vadd.f32 %v9123_v9, %v15960_v29  ;;  %v16004_v51 = vpop.f32.mrb[103].mxu1  ;;  %v9168_v34 = vmax.f32 %v9120_v21, 0.0  ;;  %v10995_v21 = vpop.permute.xlu0 %10994 }
 0xbc4   :  { %v9170_v49 = vmax.f32 %v9124_v23, 0.0 }
 0xbc6   :  { %v11038_v56 = vpack.i.bf16 %v9170_v49, %v9168_v34 }
 0xbc7   :  { %v9129_v50 = vpop.f32.mrb[104].mxu1 }
 0xbc8   :  { %v9130_v61 = vadd.f32 %v9129_v50, %v15960_v29  ;;  %11039 = vrot.lane.b32.xlu1 %v11038_v56, %s11434_s20  ;;  %v16008_v2 = vpop.f32.mrb[105].mxu1  ;;  %v10997_v56 = vunpack.i.h.bf16 %v10995_v21  ;;  %v10996_v50 = vunpack.i.l.bf16 %v10995_v21 }
 0xbc9   :  { %v9133_v37 = vpop.f32.mrb[106].mxu1 }
 0xbca   :  { %v9134_v42 = vadd.f32 %v9133_v37, %v15960_v29  ;;  %v16011_v52 = vpop.f32.mrb[107].mxu1  ;;  %v9172_v39 = vmax.f32 %v9130_v61, 0.0  ;;  %v7243_v17 = vsel %vm7240_vm15, %v15310_v36, %v10996_v50 }
 0xbcc   :  { %v9174_v13 = vmax.f32 %v9134_v42, 0.0 }
 0xbce   :  { %v11048_v53 = vpack.i.bf16 %v9174_v13, %v9172_v39  ;;  %v11005_v39 = vpop.permute.xlu0 %11004 }
 0xbcf   :  { %v9139_v31 = vpop.f32.mrb[108].mxu1  ;;  %v11007_v47 = vunpack.i.h.bf16 %v11005_v39  ;;  %v11006_v0 = vunpack.i.l.bf16 %v11005_v39 }
 0xbd0   :  { %v9140_v14 = vadd.f32 %v9139_v31, %v15960_v29  ;;  %v16014_v38 = vpop.f32.mrb[109].mxu1  ;;  %11049 = vrot.lane.b32.xlu1 %v11048_v53, %s11434_s20 }
 0xbd1   :  { %v9143_v57 = vpop.f32.mrb[110].mxu1  ;;  %v7245_v36 = vsel %vm7240_vm15, %v15366_v16, %v11006_v0 }
 0xbd2   :  { %v9144_v11 = vadd.f32 %v9143_v57, %v15960_v29  ;;  %v16024_v18 = vpop.f32.mrb[111].mxu1  ;;  %v9176_v7 = vmax.f32 %v9140_v14, 0.0  ;;  %v7242_v29 = vsel %vm7240_vm15, %v15220_v44, %v10987_v20  ;;  %v7244_v44 = vsel %vm7240_vm15, %v15284_v22, %v10997_v56 }
 0xbd3   :  { %v7246_v22 = vsel %vm7240_vm15, %v15340_v54, %v11007_v47 }
 0xbd4   :  { %v9178_v12 = vmax.f32 %v9144_v11, 0.0 }
 0xbd6   :  { %v11058_v33 = vpack.i.bf16 %v9178_v12, %v9176_v7  ;;  %v11015_v12 = vpop.permute.xlu0 %11014 }
 0xbd8   :  { %11059 = vrot.lane.b32.xlu1 %v11058_v33, %s11434_s20 }
 0xbda   :  { %v11025_v21 = vpop.permute.xlu0 %11024 }
 0xbdb   :  { %v11027_v56 = vunpack.i.h.bf16 %v11025_v21  ;;  %v11026_v50 = vunpack.i.l.bf16 %v11025_v21 }
 0xc12   :  { %v10990_v35 = vpop.permute.xlu1 %10989 }
 0xc13   :  { %v10992_v40 = vunpack.i.h.bf16 %v10990_v35  ;;  %v10991_v46 = vunpack.i.l.bf16 %v10990_v35  ;;  %v11017_v35 = vunpack.i.h.bf16 %v11015_v12 }
 0xc15   :  { %v9246_v9 = vsel %vm9244_vm10, %v7242_v29, %v10992_v40  ;;  %v9245_v23 = vsel %vm9244_vm10, %v7241_v8, %v10991_v46  ;;  %v9262_v34 = vpack.c.bf16 %v10992_v40, %v10991_v46  ;;  %v11016_v40 = vunpack.i.l.bf16 %v11015_v12 }
 0xc16   :  { %v9261_v49 = vpack.c.bf16 %v9246_v9, %v9245_v23  ;;  %v7248_v54 = vsel %vm7240_vm15, %v15395_v41, %v11017_v35  ;;  %v7250_v41 = vsel %vm7240_vm15, %v15446_v59, %v11027_v56 }
 0xc17   :  { %10275 = vmatprep.mubr.msk.bf16.mxu0 %vm9244_vm10, %v9262_v34  ;;  %v7247_v16 = vsel %vm7240_vm15, %v15422_v1, %v11016_v40  ;;  %v7249_v1 = vsel %vm7240_vm15, %v15473_v30, %v11026_v50 }
 0xc18   :  { %9421 = vmatmul.mubr.bf16.vlgmr.msra.gmra.mrb[96].mxu0 %v9261_v49 }
 0xc1a   :  { %v11000_v61 = vpop.permute.xlu1 %10999 }
 0xc1b   :  { %v11002_v37 = vunpack.i.h.bf16 %v11000_v61  ;;  %v11001_v42 = vunpack.i.l.bf16 %v11000_v61 }
 0xc1d   :  { %v9264_v13 = vpack.c.bf16 %v11002_v37, %v11001_v42  ;;  %v9247_v53 = vsel %vm9244_vm10, %v7243_v17, %v11001_v42  ;;  %v9248_v31 = vsel %vm9244_vm10, %v7244_v44, %v11002_v37  ;;  %v11035_v44 = vpop.permute.xlu0 %11034 }
 0xc1e   :  { %v9263_v14 = vpack.c.bf16 %v9248_v31, %v9247_v53  ;;  %v11037_v31 = vunpack.i.h.bf16 %v11035_v44 }
 0xc1f   :  { %10276 = vmatprep.mubr.msk.bf16.mxu0 %vm9244_vm10, %v9264_v13 }
 0xc20   :  { %9429 = vmatmul.mubr.bf16.gmra.mrb[100].mxu0 %v9263_v14  ;;  %v11036_v14 = vunpack.i.l.bf16 %v11035_v44  ;;  %v7252_v59 = vsel %vm7240_vm15, %v15497_v43, %v11037_v31 }
 0xc22   :  { %v11010_v57 = vpop.permute.xlu1 %11009  ;;  %v7251_v30 = vsel %vm7240_vm15, %v15523_v10, %v11036_v14 }
 0xc23   :  { %v11012_v11 = vunpack.i.h.bf16 %v11010_v57  ;;  %v11011_v7 = vunpack.i.l.bf16 %v11010_v57 }
 0xc25   :  { %v9266_v33 = vpack.c.bf16 %v11012_v11, %v11011_v7  ;;  %v9249_v25 = vsel %vm9244_vm10, %v7245_v36, %v11011_v7  ;;  %v9250_v20 = vsel %vm9244_vm10, %v7246_v22, %v11012_v11  ;;  %v11045_v11 = vpop.permute.xlu0 %11044 }
 0xc26   :  { %v9265_v3 = vpack.c.bf16 %v9250_v20, %v9249_v25  ;;  %v11046_v25 = vunpack.i.l.bf16 %v11045_v11 }
 0xc27   :  { %10277 = vmatprep.mubr.msk.bf16.mxu0 %vm9244_vm10, %v9266_v33  ;;  %v11047_v33 = vunpack.i.h.bf16 %v11045_v11 }
 0xc28   :  { %9437 = vmatmul.mubr.bf16.gmra.mrb[104].mxu0 %v9265_v3  ;;  %v7253_v10 = vsel %vm7240_vm15, %v15573_v45, %v11046_v25 }
 0xc29   :  { %v7254_v43 = vsel %vm7240_vm15, %v15553_v4, %v11047_v33  ;;  %v11055_v40 = vpop.permute.xlu0 %11054 }
 0xc2a   :  { %v11020_v46 = vpop.permute.xlu1 %11019  ;;  %v11056_v21 = vunpack.i.l.bf16 %v11055_v40 }
 0xc2b   :  { %v11022_v29 = vunpack.i.h.bf16 %v11020_v46  ;;  %v11021_v8 = vunpack.i.l.bf16 %v11020_v46 }
 0xc2c   :  { %v7255_v45 = vsel %vm7240_vm15, %v15621_v6, %v11056_v21  ;;  %v16092_v6 = vld [vmem:[%s16293_s22] ss:$0 sm:$0xff] }
 0xc2d   :  { %v9268_v9 = vpack.c.bf16 %v11022_v29, %v11021_v8  ;;  %v9251_v23 = vsel %vm9244_vm10, %v7247_v16, %v11021_v8  ;;  %v9252_v34 = vsel %vm9244_vm10, %v7248_v54, %v11022_v29  ;;  %v11057_v16 = vunpack.i.h.bf16 %v11055_v40 }
 0xc2e   :  { %v9267_v49 = vpack.c.bf16 %v9252_v34, %v9251_v23 }
 0xc2f   :  { %10278 = vmatprep.mubr.msk.bf16.mxu0 %vm9244_vm10, %v9268_v9  ;;  %v7256_v4 = vsel %vm7240_vm15, %v15597_v5, %v11057_v16  ;;  %v11164_v5 = vld [vmem:[%s16294_s23 + $0x18] sm:$0xff]  }
 0xc30   :  { %9445 = vmatmul.mubr.bf16.gmra.mrb[108].mxu0 %v9267_v49 }
 0xc32   :  { %v11030_v61 = vpop.permute.xlu1 %11029 }
 0xc33   :  { %v11032_v37 = vunpack.i.h.bf16 %v11030_v61  ;;  %v11031_v42 = vunpack.i.l.bf16 %v11030_v61 }
 0xc35   :  { %v9270_v17 = vpack.c.bf16 %v11032_v37, %v11031_v42  ;;  %v9253_v39 = vsel %vm9244_vm10, %v7249_v1, %v11031_v42  ;;  %v9254_v13 = vsel %vm9244_vm10, %v7250_v41, %v11032_v37  ;;  %v11163_v37 = vld [vmem:[%s16294_s23 + $0x10] sm:$0xff]  }
 0xc36   :  { %v9269_v53 = vpack.c.bf16 %v9254_v13, %v9253_v39  ;;  %10738 = vmatprep.subr.bf16.mxu1 %v11163_v37 }
 0xc37   :  { %10279 = vmatprep.mubr.msk.bf16.mxu0 %vm9244_vm10, %v9270_v17  ;;  %10739 = vmatpush3.bf16.msra.mxu1 %v11163_v37 }
 0xc38   :  { %9453 = vmatmul.mubr.bf16.gmra.mrb[112].mxu0 %v9269_v53  ;;  %10740 = vmatprep.subr.bf16.mxu1 %v11164_v5 }
 0xc3a   :  { %v11040_v47 = vpop.permute.xlu1 %11039 }
 0xc3b   :  { %v11042_v0 = vunpack.i.h.bf16 %v11040_v47  ;;  %v11041_v57 = vunpack.i.l.bf16 %v11040_v47  ;;  %10741 = vmatpush3.bf16.msra.mxu1 %v11164_v5 }
 0xc3d   :  { %v9272_v7 = vpack.c.bf16 %v11042_v0, %v11041_v57  ;;  %v9255_v22 = vsel %vm9244_vm10, %v7251_v30, %v11041_v57  ;;  %v9256_v36 = vsel %vm9244_vm10, %v7252_v59, %v11042_v0 }
 0xc3e   :  { %v9271_v12 = vpack.c.bf16 %v9256_v36, %v9255_v22 }
 0xc3f   :  { %10280 = vmatprep.mubr.msk.bf16.mxu0 %vm9244_vm10, %v9272_v7 }
 0xc40   :  { %9461 = vmatmul.mubr.bf16.gmra.mrb[116].mxu0 %v9271_v12 }
 0xc42   :  { %v11050_v20 = vpop.permute.xlu1 %11049 }
 0xc43   :  { %v11052_v3 = vunpack.i.h.bf16 %v11050_v20  ;;  %v11051_v35 = vunpack.i.l.bf16 %v11050_v20 }
 0xc45   :  { %v9274_v46 = vpack.c.bf16 %v11052_v3, %v11051_v35  ;;  %v9257_v29 = vsel %vm9244_vm10, %v7253_v10, %v11051_v35  ;;  %v9258_v8 = vsel %vm9244_vm10, %v7254_v43, %v11052_v3 }
 0xc46   :  { %v9273_v54 = vpack.c.bf16 %v9258_v8, %v9257_v29 }
 0xc47   :  { %10281 = vmatprep.mubr.msk.bf16.mxu0 %vm9244_vm10, %v9274_v46 }
 0xc48   :  { %9469 = vmatmul.mubr.bf16.gmra.mrb[120].mxu0 %v9273_v54 }
 0xc4a   :  { %v11060_v9 = vpop.permute.xlu1 %11059 }
 0xc4b   :  { %v11062_v23 = vunpack.i.h.bf16 %v11060_v9  ;;  %v11061_v34 = vunpack.i.l.bf16 %v11060_v9 }
 0xc4d   :  { %v9276_v49 = vpack.c.bf16 %v11062_v23, %v11061_v34  ;;  %v9259_v56 = vsel %vm9244_vm10, %v7255_v45, %v11061_v34  ;;  %v9260_v50 = vsel %vm9244_vm10, %v7256_v4, %v11062_v23 }
 0xc4e   :  { %v9275_v61 = vpack.c.bf16 %v9260_v50, %v9259_v56 }
 0xc4f   :  { %10282 = vmatprep.mubr.msk.bf16.mxu0 %vm9244_vm10, %v9276_v49 }
 0xc50   :  { %9477 = vmatmul.mubr.bf16.gmra.mrb[124].mxu0 %v9275_v61 }
 0xceb   :  { %v9422_v42 = vpop.f32.mrb[96].mxu0 }
 0xcec   :  { %v9423_v41 = vadd.f32 %v16092_v6, %v9422_v42  ;;  %v9424_v1 = vpop.f32.mrb[97].mxu0 }
 0xced   :  { %v9425_v44 = vpop.f32.mrb[98].mxu0 }
 0xcee   :  { %v9426_v17 = vadd.f32 %v16092_v6, %v9425_v44  ;;  %v9427_v39 = vpop.f32.mrb[99].mxu0  ;;  %v9485_v13 = vmax.f32 %v9423_v41, 0.0 }
 0xcf0   :  { %v9486_v53 = vmax.f32 %v9426_v17, 0.0 }
 0xcf2   :  { %v9501_v31 = vpack.c.bf16 %v9486_v53, %v9485_v13 }
 0xcf3   :  { %v9430_v14 = vpop.f32.mrb[100].mxu0 }
 0xcf4   :  { %v9431_v47 = vadd.f32 %v16092_v6, %v9430_v14  ;;  %v9432_v0 = vpop.f32.mrb[101].mxu0  ;;  %10742 = vmatprep.mubr.msk.bf16.mxu1 %vm9548_vm5, %v9501_v31 }
 0xcf5   :  { %v9433_v57 = vpop.f32.mrb[102].mxu0 }
 0xcf6   :  { %v9434_v59 = vadd.f32 %v16092_v6, %v9433_v57  ;;  %v9435_v30 = vpop.f32.mrb[103].mxu0  ;;  %v9487_v11 = vmax.f32 %v9431_v47, 0.0 }
 0xcf8   :  { %v9488_v7 = vmax.f32 %v9434_v59, 0.0 }
 0xcfa   :  { %v9502_v22 = vpack.c.bf16 %v9488_v7, %v9487_v11 }
 0xcfb   :  { %v9438_v36 = vpop.f32.mrb[104].mxu0 }
 0xcfc   :  { %v9439_v12 = vadd.f32 %v16092_v6, %v9438_v36  ;;  %v9440_v33 = vpop.f32.mrb[105].mxu0  ;;  %10743 = vmatmul.mubr.msk.bf16.vlgmr.msra.gmra.mrb[112].mxu1 %vm9548_vm5, %v9502_v22 }
 0xcfd   :  { %v9441_v25 = vpop.f32.mrb[106].mxu0 }
 0xcfe   :  { %v9442_v20 = vadd.f32 %v16092_v6, %v9441_v25  ;;  %v9443_v3 = vpop.f32.mrb[107].mxu0  ;;  %v9489_v35 = vmax.f32 %v9439_v12, 0.0 }
 0xd00   :  { %v9490_v43 = vmax.f32 %v9442_v20, 0.0 }
 0xd02   :  { %v9503_v10 = vpack.c.bf16 %v9490_v43, %v9489_v35 }
 0xd03   :  { %v9446_v40 = vpop.f32.mrb[108].mxu0 }
 0xd04   :  { %v9447_v46 = vadd.f32 %v16092_v6, %v9446_v40  ;;  %v9448_v29 = vpop.f32.mrb[109].mxu0  ;;  %10746 = vmatprep.mubr.msk.bf16.mxu1 %vm9548_vm5, %v9503_v10  ;;  %v16121_v40 = vld [vmem:[%s16295_s24] ss:$0 sm:$0xff]  ;;  %s11435_s24 = smov 1  }
 0xd05   :  { %v9449_v8 = vpop.f32.mrb[110].mxu0 }
 0xd06   :  { %v9450_v54 = vadd.f32 %v16092_v6, %v9449_v8  ;;  %v9451_v16 = vpop.f32.mrb[111].mxu0  ;;  %v9491_v21 = vmax.f32 %v9447_v46, 0.0 }
 0xd08   :  { %v9492_v9 = vmax.f32 %v9450_v54, 0.0 }
 0xd0a   :  { %v9504_v23 = vpack.c.bf16 %v9492_v9, %v9491_v21 }
 0xd0b   :  { %v9454_v34 = vpop.f32.mrb[112].mxu0 }
 0xd0c   :  { %v9455_v4 = vadd.f32 %v16092_v6, %v9454_v34  ;;  %v9456_v45 = vpop.f32.mrb[113].mxu0  ;;  %10747 = vmatmul.mubr.msk.bf16.gmra.mrb[116].mxu1 %vm9548_vm5, %v9504_v23 }
 0xd0d   :  { %v9457_v49 = vpop.f32.mrb[114].mxu0 }
 0xd0e   :  { %v9458_v56 = vadd.f32 %v16092_v6, %v9457_v49  ;;  %v9459_v50 = vpop.f32.mrb[115].mxu0  ;;  %v9493_v61 = vmax.f32 %v9455_v4, 0.0 }
 0xd10   :  { %v9494_v37 = vmax.f32 %v9458_v56, 0.0 }
 0xd12   :  { %v9505_v5 = vpack.c.bf16 %v9494_v37, %v9493_v61 }
 0xd13   :  { %v9462_v42 = vpop.f32.mrb[116].mxu0 }
 0xd14   :  { %v9463_v41 = vadd.f32 %v16092_v6, %v9462_v42  ;;  %v9464_v1 = vpop.f32.mrb[117].mxu0  ;;  %10750 = vmatprep.mubr.msk.bf16.mxu1 %vm9548_vm5, %v9505_v5 }
 0xd15   :  { %v9465_v44 = vpop.f32.mrb[118].mxu0 }
 0xd16   :  { %v9466_v17 = vadd.f32 %v16092_v6, %v9465_v44  ;;  %v9467_v39 = vpop.f32.mrb[119].mxu0  ;;  %v9495_v13 = vmax.f32 %v9463_v41, 0.0 }
 0xd18   :  { %v9496_v53 = vmax.f32 %v9466_v17, 0.0 }
 0xd1a   :  { %v9506_v31 = vpack.c.bf16 %v9496_v53, %v9495_v13 }
 0xd1b   :  { %v9470_v14 = vpop.f32.mrb[120].mxu0 }
 0xd1c   :  { %v9471_v47 = vadd.f32 %v16092_v6, %v9470_v14  ;;  %v9472_v0 = vpop.f32.mrb[121].mxu0  ;;  %10751 = vmatmul.mubr.msk.bf16.gmra.mrb[120].mxu1 %vm9548_vm5, %v9506_v31 }
 0xd1d   :  { %v9473_v57 = vpop.f32.mrb[122].mxu0 }
 0xd1e   :  { %v9474_v59 = vadd.f32 %v16092_v6, %v9473_v57  ;;  %v9475_v30 = vpop.f32.mrb[123].mxu0  ;;  %v9497_v11 = vmax.f32 %v9471_v47, 0.0 }
 0xd20   :  { %v9498_v7 = vmax.f32 %v9474_v59, 0.0 }
 0xd22   :  { %v9507_v22 = vpack.c.bf16 %v9498_v7, %v9497_v11 }
 0xd23   :  { %v9478_v36 = vpop.f32.mrb[124].mxu0 }
 0xd24   :  { %v9479_v12 = vadd.f32 %v16092_v6, %v9478_v36  ;;  %v9480_v33 = vpop.f32.mrb[125].mxu0  ;;  %10754 = vmatprep.mubr.msk.bf16.mxu1 %vm9548_vm5, %v9507_v22 }
 0xd25   :  { %v9481_v25 = vpop.f32.mrb[126].mxu0 }
 0xd26   :  { %v9482_v20 = vadd.f32 %v16092_v6, %v9481_v25  ;;  %v9483_v3 = vpop.f32.mrb[127].mxu0  ;;  %v9499_v35 = vmax.f32 %v9479_v12, 0.0 }
 0xd28   :  { %v9500_v43 = vmax.f32 %v9482_v20, 0.0 }
 0xd2a   :  { %v9508_v10 = vpack.c.bf16 %v9500_v43, %v9499_v35 }
 0xd2c   :  { %10755 = vmatmul.mubr.msk.bf16.gmra.mrb[124].mxu1 %vm9548_vm5, %v9508_v10 }
 0xdcf   :  { %v10744_v46 = vpop.f32.mrb[112].mxu1 }
 0xdd0   :  { %v9616_v29 = vadd.f32 %v10744_v46, %v16121_v40  ;;  %v9607_v8 = vpop.f32.mrb[113].mxu1 }
 0xdd1   :  { %v9608_v54 = vadd.f32 %v16121_v40, %v9607_v8  ;;  %v10745_v16 = vpop.f32.mrb[114].mxu1 }
 0xdd2   :  { %v10298_v21 = vmul.f32 -1.442695, %v9616_v29  ;;  %v9619_v6 = vadd.f32 %v10745_v16, %v16121_v40  ;;  %v9610_v9 = vpop.f32.mrb[115].mxu1 }
 0xdd3   :  { %v10296_v23 = vmul.f32 -1.442695, %v9608_v54  ;;  %v9611_v34 = vadd.f32 %v16121_v40, %v9610_v9 }
 0xdd4   :  { %11293 = vpow2.f32 %v10298_v21  ;;  %v10299_v4 = vmul.f32 -1.442695, %v9619_v6 }
 0xdd5   :  { %11295 = vpow2.f32 %v10296_v23  ;;  %v10297_v45 = vmul.f32 -1.442695, %v9611_v34 }
 0xdd6   :  { %11297 = vpow2.f32 %v10299_v4 }
 0xdd7   :  { %11299 = vpow2.f32 %v10297_v45 }
 0xdde   :  { %v11294_v49 = vpop.eup %11293 }
 0xddf   :  { %v11296_v56 = vpop.eup %11295  ;;  %v9720_v50 = vadd.f32 1.0, %v11294_v49  ;;  %v10748_v61 = vpop.f32.mrb[116].mxu1 }
 0xde0   :  { %v11298_v37 = vpop.eup %11297  ;;  %v9718_v5 = vadd.f32 1.0, %v11296_v56  ;;  %v9632_v42 = vadd.f32 %v10748_v61, %v16121_v40  ;;  %v9623_v41 = vpop.f32.mrb[117].mxu1 }
 0xde1   :  { %v11300_v1 = vpop.eup %11299  ;;  %11301 = vrcp.f32 %v9720_v50  ;;  %v9721_v44 = vadd.f32 1.0, %v11298_v37  ;;  %v9624_v17 = vadd.f32 %v16121_v40, %v9623_v41  ;;  %v10749_v39 = vpop.f32.mrb[118].mxu1 }
 0xde2   :  { %11303 = vrcp.f32 %v9718_v5  ;;  %v9719_v13 = vadd.f32 1.0, %v11300_v1  ;;  %v10302_v53 = vmul.f32 -1.442695, %v9632_v42  ;;  %v9635_v31 = vadd.f32 %v10749_v39, %v16121_v40  ;;  %v9626_v14 = vpop.f32.mrb[119].mxu1 }
 0xde3   :  { %11305 = vrcp.f32 %v9721_v44  ;;  %v10300_v47 = vmul.f32 -1.442695, %v9624_v17  ;;  %v9627_v0 = vadd.f32 %v16121_v40, %v9626_v14 }
 0xde4   :  { %11307 = vrcp.f32 %v9719_v13  ;;  %v10303_v57 = vmul.f32 -1.442695, %v9635_v31 }
 0xde5   :  { %11309 = vpow2.f32 %v10302_v53  ;;  %v10301_v59 = vmul.f32 -1.442695, %v9627_v0 }
 0xde6   :  { %11311 = vpow2.f32 %v10300_v47 }
 0xde7   :  { %11313 = vpow2.f32 %v10303_v57 }
 0xde8   :  { %11315 = vpow2.f32 %v10301_v59 }
 0xdeb   :  { %v11302_v30 = vpop.eup %11301 }
 0xdec   :  { %v11304_v11 = vpop.eup %11303  ;;  %9786 = vrot.lane.b32.xlu0 %v11302_v30, %s11435_s24 }
 0xded   :  { %v11306_v7 = vpop.eup %11305 }
 0xdee   :  { %v11308_v22 = vpop.eup %11307  ;;  %9788 = vrot.lane.b32.xlu1 %v11306_v7, %s11435_s24 }
 0xdef   :  { %v11310_v36 = vpop.eup %11309  ;;  %v10752_v12 = vpop.f32.mrb[120].mxu1 }
 0xdf0   :  { %v11312_v33 = vpop.eup %11311  ;;  %v9724_v25 = vadd.f32 1.0, %v11310_v36  ;;  %v9648_v20 = vadd.f32 %v10752_v12, %v16121_v40  ;;  %v9639_v3 = vpop.f32.mrb[121].mxu1  ;;  %9782 = vrot.lane.b32.xlu0 %v11304_v11, %s11435_s24 }
 0xdf1   :  { %v11314_v35 = vpop.eup %11313  ;;  %v9722_v43 = vadd.f32 1.0, %v11312_v33  ;;  %v9640_v10 = vadd.f32 %v16121_v40, %v9639_v3  ;;  %v10753_v46 = vpop.f32.mrb[122].mxu1 }
 0xdf2   :  { %v11316_v29 = vpop.eup %11315  ;;  %11317 = vrcp.f32 %v9724_v25  ;;  %v9725_v8 = vadd.f32 1.0, %v11314_v35  ;;  %v10306_v54 = vmul.f32 -1.442695, %v9648_v20  ;;  %v9651_v16 = vadd.f32 %v10753_v46, %v16121_v40  ;;  %v9642_v21 = vpop.f32.mrb[123].mxu1  ;;  %9784 = vrot.lane.b32.xlu1 %v11308_v22, %s11435_s24 }
 0xdf3   :  { %11319 = vrcp.f32 %v9722_v43  ;;  %v9723_v6 = vadd.f32 1.0, %v11316_v29  ;;  %v10304_v9 = vmul.f32 -1.442695, %v9640_v10  ;;  %v9643_v23 = vadd.f32 %v16121_v40, %v9642_v21 }
 0xdf4   :  { %11321 = vrcp.f32 %v9725_v8  ;;  %v10307_v34 = vmul.f32 -1.442695, %v9651_v16  ;;  %v8951_v21 = vsub.s32 1, %v15951_v55 }
 0xdf5   :  { %11323 = vrcp.f32 %v9723_v6  ;;  %v10305_v4 = vmul.f32 -1.442695, %v9643_v23 }
 0xdf6   :  { %11325 = vpow2.f32 %v10306_v54  ;;  %v16157_v6 = vrot.slane %v15957_v28, %v8951_v21 }
 0xdf7   :  { %11327 = vpow2.f32 %v10304_v9 }
 0xdf8   :  { %11329 = vpow2.f32 %v10307_v34  ;;  %v9082_v9 = vadd.f32 %v15972_v24, %v16157_v6  ;;  %v9086_v23 = vadd.f32 %v15976_v58, %v16157_v6  ;;  %v9072_v34 = vadd.f32 %v15966_v48, %v16157_v6 }
 0xdf9   :  { %11331 = vpow2.f32 %v10305_v4 }
 0xdfa   :  { %v9153_v4 = vmax.f32 %v9082_v9, 0.0  ;;  %v9155_v55 = vmax.f32 %v9086_v23, 0.0  ;;  %v9149_v58 = vmax.f32 %v9072_v34, 0.0 }
 0xdfc   :  { %v11318_v45 = vpop.eup %11317 }
 0xdfd   :  { %v11320_v49 = vpop.eup %11319  ;;  %9794 = vrot.lane.b32.xlu0 %v11318_v45, %s11435_s24 }
 0xdfe   :  { %v11322_v56 = vpop.eup %11321 }
 0xdff   :  { %v11324_v50 = vpop.eup %11323  ;;  %9796 = vrot.lane.b32.xlu1 %v11322_v56, %s11435_s24  ;;  %v10756_v61 = vpop.f32.mrb[124].mxu1 }
 0xe00   :  { %v11326_v37 = vpop.eup %11325  ;;  %v9664_v5 = vadd.f32 %v10756_v61, %v16121_v40  ;;  %v9655_v42 = vpop.f32.mrb[125].mxu1 }
 0xe01   :  { %v11328_v41 = vpop.eup %11327  ;;  %v9728_v1 = vadd.f32 1.0, %v11326_v37  ;;  %9790 = vrot.lane.b32.xlu0 %v11320_v49, %s11435_s24  ;;  %v9656_v44 = vadd.f32 %v16121_v40, %v9655_v42  ;;  %v10757_v17 = vpop.f32.mrb[126].mxu1  ;;  %v9076_v49 = vadd.f32 %v15969_v62, %v16157_v6  ;;  %v9106_v42 = vadd.f32 %v15990_v32, %v16157_v6 }
 0xe02   :  { %v11330_v39 = vpop.eup %11329  ;;  %v9726_v13 = vadd.f32 1.0, %v11328_v41  ;;  %v9667_v53 = vadd.f32 %v10757_v17, %v16121_v40  ;;  %v9658_v31 = vpop.f32.mrb[127].mxu1  ;;  %v10310_v0 = vmul.f32 -1.442695, %v9664_v5  ;;  %v9102_v5 = vadd.f32 %v15986_v15, %v16157_v6 }
 0xe03   :  { %v11332_v14 = vpop.eup %11331  ;;  %11333 = vrcp.f32 %v9728_v1  ;;  %v9729_v47 = vadd.f32 1.0, %v11330_v39  ;;  %9792 = vrot.lane.b32.xlu1 %v11324_v50, %s11435_s24  ;;  %v9659_v57 = vadd.f32 %v16121_v40, %v9658_v31  ;;  %v10308_v30 = vmul.f32 -1.442695, %v9656_v44 }
 0xe04   :  { %11335 = vrcp.f32 %v9726_v13  ;;  %v9727_v59 = vadd.f32 1.0, %v11332_v14  ;;  %v10311_v11 = vmul.f32 -1.442695, %v9667_v53  ;;  %v9151_v50 = vmax.f32 %v9076_v49, 0.0 }
 0xe05   :  { %11337 = vrcp.f32 %v9729_v47  ;;  %v10309_v7 = vmul.f32 -1.442695, %v9659_v57  ;;  %v9092_v41 = vadd.f32 %v15979_v19, %v16157_v6  ;;  %v9161_v1 = vmax.f32 %v9102_v5, 0.0 }
 0xe06   :  { %11339 = vrcp.f32 %v9727_v59  ;;  %v9096_v17 = vadd.f32 %v15983_v60, %v16157_v6  ;;  %v9163_v39 = vmax.f32 %v9106_v42, 0.0  ;;  %v9126_v57 = vadd.f32 %v16004_v51, %v16157_v6 }
 0xe07   :  { %11341 = vpow2.f32 %v10310_v0  ;;  %v9157_v53 = vmax.f32 %v9092_v41, 0.0  ;;  %v9122_v0 = vadd.f32 %v16000_v26, %v16157_v6  ;;  %v9112_v59 = vadd.f32 %v15993_v27, %v16157_v6 }
 0xe08   :  { %11343 = vpow2.f32 %v10308_v30  ;;  %v9159_v31 = vmax.f32 %v9096_v17, 0.0 }
 0xe09   :  { %11345 = vpow2.f32 %v10311_v11  ;;  %v9169_v30 = vmax.f32 %v9122_v0, 0.0 }
 0xe0a   :  { %11347 = vpow2.f32 %v10309_v7  ;;  %v9116_v7 = vadd.f32 %v15997_v63, %v16157_v6 }
 0xe0d   :  { %v11334_v22 = vpop.eup %11333 }
 0xe0e   :  { %v11336_v36 = vpop.eup %11335  ;;  %9802 = vrot.lane.b32.xlu0 %v11334_v22, %s11435_s24  ;;  %v9171_v22 = vmax.f32 %v9126_v57, 0.0 }
 0xe0f   :  { %v11338_v12 = vpop.eup %11337 }
 0xe10   :  { %v11340_v33 = vpop.eup %11339  ;;  %9804 = vrot.lane.b32.xlu1 %v11338_v12, %s11435_s24  ;;  %v9165_v12 = vmax.f32 %v9112_v59, 0.0 }
 0xe11   :  { %v11342_v40 = vpop.eup %11341 }
 0xe12   :  { %v11344_v25 = vpop.eup %11343  ;;  %9798 = vrot.lane.b32.xlu0 %v11336_v36, %s11435_s24  ;;  %v9732_v43 = vadd.f32 1.0, %v11342_v40 }
 0xe13   :  { %v11346_v20 = vpop.eup %11345  ;;  %v9730_v3 = vadd.f32 1.0, %v11344_v25 }
 0xe14   :  { %v11348_v35 = vpop.eup %11347  ;;  %9800 = vrot.lane.b32.xlu1 %v11340_v33, %s11435_s24  ;;  %v9733_v46 = vadd.f32 1.0, %v11346_v20  ;;  %v9167_v33 = vmax.f32 %v9116_v7, 0.0  ;;  %v9132_v20 = vadd.f32 %v16008_v2, %v16157_v6 }
 0xe15   :  { %11349 = vrcp.f32 %v9730_v3  ;;  %v9731_v10 = vadd.f32 1.0, %v11348_v35  ;;  %v9136_v3 = vadd.f32 %v16011_v52, %v16157_v6 }
 0xe16   :  { %v9173_v35 = vmax.f32 %v9132_v20, 0.0 }
 0xe17   :  { %11351 = vrcp.f32 %v9731_v10 }
 0xe18   :  { %11353 = vrcp.f32 %v9732_v43  ;;  %v9142_v43 = vadd.f32 %v16014_v38, %v16157_v6 }
 0xe19   :  { %11355 = vrcp.f32 %v9733_v46  ;;  %v9175_v46 = vmax.f32 %v9136_v3, 0.0 }
 0xe1f   :  { %v11350_v29 = vpop.eup %11349 }
 0xe20   :  { %9806 = vrot.lane.b32.xlu0 %v11350_v29, %s11435_s24  ;;  %v9146_v29 = vadd.f32 %v16024_v18, %v16157_v6 }
 0xe21   :  { %v11352_v8 = vpop.eup %11351 }
 0xe22   :  { %9808 = vrot.lane.b32.xlu1 %v11352_v8, %s11435_s24  ;;  %v11354_v54 = vpop.eup %11353 }
 0xe23   :  { %v11356_v16 = vpop.eup %11355 }
 0xe24   :  { %9810 = vrot.lane.b32.xlu0 %v11354_v54, %s11435_s24  ;;  %v9177_v54 = vmax.f32 %v9142_v43, 0.0 }
 0xe26   :  { %9812 = vrot.lane.b32.xlu1 %v11356_v16, %s11435_s24  ;;  %v9179_v16 = vmax.f32 %v9146_v29, 0.0 }
 0xe5e   :  { %v9787_v45 = vpop.permute.xlu0 %9786 }
 0xe5f   :  { %v9833_v28 = vsel %vm9830_vm0, %v9153_v4, %v9787_v45 }
 0xe60   :  { %9850 = vst.msk [vmem:[%s16296_s25 + $0x10] sm:$0xff] %vm9847_vm3, %v9833_v28  ;;  %v9789_v24 = vpop.permute.xlu1 %9788 }
 0xe61   :  { %v9834_v56 = vsel %vm9830_vm0, %v9155_v55, %v9789_v24 }
 0xe62   :  { %9851 = vst.msk [vmem:[%s16296_s25 + $0x18] sm:$0xff] %vm9847_vm3, %v9834_v56  ;;  %v9783_v48 = vpop.permute.xlu0 %9782 }
 0xe63   :  { %v9831_v62 = vsel %vm9830_vm0, %v9149_v58, %v9783_v48 }
 0xe64   :  { %9848 = vst.msk [vmem:[%s16296_s25] sm:$0xff] %vm9847_vm3, %v9831_v62  ;;  %v9785_v61 = vpop.permute.xlu1 %9784 }
 0xe65   :  { %v9832_v37 = vsel %vm9830_vm0, %v9151_v50, %v9785_v61 }
 0xe66   :  { %9849 = vst.msk [vmem:[%s16296_s25 + $0x8] sm:$0xff] %vm9847_vm3, %v9832_v37 }
 0xe6f   :  { %v9795_v44 = vpop.permute.xlu0 %9794 }
 0xe70   :  { %v9837_v13 = vsel %vm9830_vm0, %v9161_v1, %v9795_v44 }
 0xe71   :  { %9854 = vst.msk [vmem:[%s16296_s25 + $0x30] sm:$0xff] %vm9847_vm3, %v9837_v13  ;;  %v9797_v15 = vpop.permute.xlu1 %9796 }
 0xe72   :  { %v9838_v32 = vsel %vm9830_vm0, %v9163_v39, %v9797_v15 }
 0xe73   :  { %9855 = vst.msk [vmem:[%s16296_s25 + $0x38] sm:$0xff] %vm9847_vm3, %v9838_v32  ;;  %v9791_v19 = vpop.permute.xlu0 %9790 }
 0xe74   :  { %v9835_v60 = vsel %vm9830_vm0, %v9157_v53, %v9791_v19 }
 0xe75   :  { %9852 = vst.msk [vmem:[%s16296_s25 + $0x20] sm:$0xff] %vm9847_vm3, %v9835_v60  ;;  %v9793_v14 = vpop.permute.xlu1 %9792 }
 0xe76   :  { %v9836_v47 = vsel %vm9830_vm0, %v9159_v31, %v9793_v14 }
 0xe77   :  { %9853 = vst.msk [vmem:[%s16296_s25 + $0x28] sm:$0xff] %vm9847_vm3, %v9836_v47 }
 0xe80   :  { %v9803_v11 = vpop.permute.xlu0 %9802 }
 0xe81   :  { %v9841_v36 = vsel %vm9830_vm0, %v9169_v30, %v9803_v11 }
 0xe82   :  { %9858 = vst.msk [vmem:[%s16296_s25 + $0x50] sm:$0xff] %vm9847_vm3, %v9841_v36  ;;  %v9805_v26 = vpop.permute.xlu1 %9804 }
 0xe83   :  { %v9842_v51 = vsel %vm9830_vm0, %v9171_v22, %v9805_v26 }
 0xe84   :  { %9859 = vst.msk [vmem:[%s16296_s25 + $0x58] sm:$0xff] %vm9847_vm3, %v9842_v51  ;;  %v9799_v27 = vpop.permute.xlu0 %9798 }
 0xe85   :  { %v9839_v63 = vsel %vm9830_vm0, %v9165_v12, %v9799_v27 }
 0xe86   :  { %9856 = vst.msk [vmem:[%s16296_s25 + $0x40] sm:$0xff] %vm9847_vm3, %v9839_v63  ;;  %v9801_v40 = vpop.permute.xlu1 %9800 }
 0xe87   :  { %v9840_v25 = vsel %vm9830_vm0, %v9167_v33, %v9801_v40 }
 0xe88   :  { %9857 = vst.msk [vmem:[%s16296_s25 + $0x48] sm:$0xff] %vm9847_vm3, %v9840_v25 }
 0xe92   :  { %v9807_v10 = vpop.permute.xlu0 %9806 }
 0xe93   :  { %v9843_v8 = vsel %vm9830_vm0, %v9173_v35, %v9807_v10 }
 0xe94   :  { %9860 = vst.msk [vmem:[%s16296_s25 + $0x60] sm:$0xff] %vm9847_vm3, %v9843_v8  ;;  %v9809_v2 = vpop.permute.xlu1 %9808 }
 0xe95   :  { %v9844_v52 = vsel %vm9830_vm0, %v9175_v46, %v9809_v2 }
 0xe96   :  { %9861 = vst.msk [vmem:[%s16296_s25 + $0x68] sm:$0xff] %vm9847_vm3, %v9844_v52  ;;  %v9811_v38 = vpop.permute.xlu0 %9810 }
 0xe97   :  { %v9845_v18 = vsel %vm9830_vm0, %v9177_v54, %v9811_v38 }
 0xe98   :  { %9862 = vst.msk [vmem:[%s16296_s25 + $0x70] sm:$0xff] %vm9847_vm3, %v9845_v18  ;;  %v9813_v21 = vpop.permute.xlu1 %9812 }
 0xe99   :  { %v9846_v6 = vsel %vm9830_vm0, %v9179_v16, %v9813_v21 }
 0xe9a   :  { %9863 = vst.msk [vmem:[%s16296_s25 + $0x78] sm:$0xff] %vm9847_vm3, %v9846_v6 }
 0xe9b   :  { %9868 = vsyncpa [#allocation3], 1 }
 0xe9c   :  { %9869 = vsyncpa [#allocation5], 1 }

</bundles_post_ra>
